<compile_context>
chip_gen: v7x
topology: tpu7x:2x2x1
jax: 0.10.0
libtpu: 0.0.40
codegen_flags: <defaults>
</compile_context>

<pallas_src>
import math
from functools import partial

import jax
import jax.numpy as jnp
from jax import lax
from jax.experimental import pallas as pl
from jax.experimental.pallas import tpu as pltpu

F32 = jnp.float32
BF16 = jnp.bfloat16

# ----------------------- hyper-parameters (small, consistent with __init__) ---
TEXT_DIM = 48          # input_dim[0]
FEAT_DIM = 24          # input_dim[1]
OUT_EMBED_D = 32       # out_embed_d == hidden_dim == d_model (required by forward)
D_MODEL = OUT_EMBED_D
ATTN_HEADS = 2         # transformer nhead
SELF_ATTN_HEADS = 1    # self_attn_heads for the content MHAs
DFF = 512              # hard-coded dim_feedforward in nn.Transformer(...)
ENC_LAYERS = 2         # num encoder layers
DEC_LAYERS = 2         # num decoder layers
OUTEMB_D = 1
LN_EPS = 1e-5


# ========================= in-kernel building blocks ===========================

def _bdot(x, w):
    """MXU matmul: bf16 operands, f32 accumulation."""
    return jnp.dot(x.astype(BF16), w.astype(BF16), preferred_element_type=F32)


def _layer_norm(x, g, b, eps=LN_EPS):
    mu = jnp.mean(x, axis=-1, keepdims=True)
    var = jnp.mean((x - mu) ** 2, axis=-1, keepdims=True)
    return (x - mu) * lax.rsqrt(var + eps) * g + b


def _softmax_attn(q, k, v, scale):
    s = lax.dot_general(q * scale, k, (((1,), (1,)), ((), ())),
                        preferred_element_type=F32)                 # (Lq, Lk)
    s = s - jnp.max(s, axis=-1, keepdims=True)
    p = jnp.exp(s)
    p = p * pl.reciprocal(jnp.sum(p, axis=-1, keepdims=True), approx=True)
    return jnp.dot(p, v, preferred_element_type=F32)                # (Lq, dh)


def _mha_core(q, k, v, wo, bo, num_heads, e):
    dh = e // num_heads
    scale = 1.0 / math.sqrt(dh)
    ctxs = [_softmax_attn(q[:, h * dh:(h + 1) * dh], k[:, h * dh:(h + 1) * dh],
                          v[:, h * dh:(h + 1) * dh], scale)
            for h in range(num_heads)]                              # static unroll
    ctx = ctxs[0] if num_heads == 1 else jnp.concatenate(ctxs, axis=-1)
    return _bdot(ctx, wo) + bo        # single lane-dense out-projection


def _mha_self(x, w, b, num_heads, e):
    """torch nn.MultiheadAttention (eval, batch 1), self-attention.
    w: (e,4e) = [Wq^T|Wk^T|Wv^T|Wo^T] (bf16);  b: (1,4e) = [bq|bk|bv|bo] (f32)."""
    qkv = _bdot(x, w[:, :3 * e]) + b[:, :3 * e]          # one lane-dense QKV matmul
    return _mha_core(qkv[:, :e], qkv[:, e:2 * e], qkv[:, 2 * e:3 * e],
                     w[:, 3 * e:], b[:, 3 * e:], num_heads, e)


def _mha_cross(xq, xkv, w, b, num_heads, e):
    q = _bdot(xq, w[:, :e]) + b[:, :e]
    kv = _bdot(xkv, w[:, e:3 * e]) + b[:, e:3 * e]       # merged K|V matmul
    return _mha_core(q, kv[:, :e], kv[:, e:2 * e],
                     w[:, 3 * e:], b[:, 3 * e:], num_heads, e)


def _text_ce(x, wt, bt, aw, ab, ln, e):
    """Bi_RNN text branch: Linear -> self-MHA(1 head) -> LayerNorm."""
    lin = _bdot(x, wt) + bt
    att = _mha_self(lin, aw, ab, 1, e)
    return _layer_norm(att, ln[0:1, :], ln[1:2, :])


# =============================== fused kernel ==================================

def _het_fused_kernel(
        # SMEM int32 gather / type tables
        enc_rows, enc_types, dec_rows, dec_types,
        # gathered node features (VMEM)
        xc, xn, xuf, xut, xp,
        # positional / type-embedding tables
        pe, te,
        # node-stage weights
        wtext, btext, wfeat, bfeat, naw, nab, nln,
        # transformer encoder stacks
        eaw, eab, ew1, eb1, ew2, eb2, enrm,
        # transformer decoder stacks
        dsw, dsb, dcw, dcb, dw1, db1, dw2, db2, dnrm,
        # final norms + output head
        fnrm, ow, ob,
        # output
        o_ref,
        *, e, n_enc, n_dec, nheads,
        n_news, n_user, n_post, l_enc, l_dec,
        center_attn_idx, center_ln_idx):
    wt = wtext[...]
    bt = btext[...]

    # ---- node stage: Bi_RNN content embeddings (the SameType_Agg tail of the
    # reference is never consumed by forward() and is intentionally removed). ----
    parts = [_text_ce(xc[...], wt, bt, naw[center_attn_idx], nab[center_attn_idx],
                      nln[center_ln_idx], e)]                   # row 0 = center node
    if n_news:
        parts.append(_text_ce(xn[...], wt, bt, naw[0], nab[0], nln[0], e))
    if n_user:
        lo = _bdot(xuf[...], wfeat[...]) + bfeat[...]
        lc = _bdot(xut[...], wt) + bt
        ln2 = nln[1]
        ln3 = nln[2]
        ao = _layer_norm(_mha_self(lo, naw[3], nab[3], 1, e), ln2[0:1, :], ln2[1:2, :])
        ac = _layer_norm(_mha_self(lc, naw[2], nab[2], 1, e), ln3[0:1, :], ln3[1:2, :])
        parts.append(0.5 * (ac + ao))   # torch.cat((content, other), 1).mean(dim=1)
    if n_post:
        parts.append(_text_ce(xp[...], wt, bt, naw[1], nab[1], nln[3], e))
    pool = parts[0] if len(parts) == 1 else jnp.concatenate(parts, axis=0)

    # ---- encoder / decoder input prep: one-hot gather of the VMEM-resident pool
    # driven by the SMEM index tables (no HBM round trip, static shapes only). ----
    def onehot(idx_ref, n, depth):
        rows = [jnp.where(
            lax.broadcasted_iota(jnp.int32, (1, depth), 1) == idx_ref[i], 1.0, 0.0
        ).astype(F32) for i in range(n)]                         # static unroll
        return rows[0] if n == 1 else jnp.concatenate(rows, axis=0)

    te_v = te[...]           # (8, e): rows 0..2 real type embeddings, rest zero pad
    pe_v = pe[...]           # (l_enc, e)
    npool = pool.shape[0]
    enc_x = jnp.dot(onehot(enc_rows, l_enc, npool), pool, preferred_element_type=F32)
    dec_x = jnp.dot(onehot(dec_rows, l_dec, npool), pool, preferred_element_type=F32)
    enc_te = jnp.dot(onehot(enc_types, l_enc, te_v.shape[0]), te_v,
                     preferred_element_type=F32)
    dec_te = jnp.dot(onehot(dec_types, l_dec, te_v.shape[0]), te_v,
                     preferred_element_type=F32)
    # Reference ordering quirks (eval-mode dropout == identity):
    #   enc: x += type_emb ; x += pos_encoder(x)  ->  2*(x + te) + pe
    #   dec: x += pos_encoder(x) ; x += type_emb  ->  2*x + pe + te
    src = 2.0 * (enc_x + enc_te) + pe_v[:l_enc, :]
    tgt = 2.0 * dec_x + pe_v[:l_dec, :] + dec_te

    # ---- nn.Transformer (post-norm, no masks), final enc/dec LayerNorms ----
    for l in range(n_enc):                                       # static unroll
        nrm = enrm[l]                                            # (4, e)
        a = _mha_self(src, eaw[l], eab[l], nheads, e)
        src = _layer_norm(src + a, nrm[0:1, :], nrm[1:2, :])
        h = jnp.maximum(_bdot(src, ew1[l]) + eb1[l], 0.0)
        f = _bdot(h, ew2[l]) + eb2[l]
        src = _layer_norm(src + f, nrm[2:3, :], nrm[3:4, :])
    fn = fnrm[...]                                               # (4, e)
    mem = _layer_norm(src, fn[0:1, :], fn[1:2, :])               # encoder norm

    for l in range(n_dec):
        nrm = dnrm[l]                                            # (6, e)
        a = _mha_self(tgt, dsw[l], dsb[l], nheads, e)
        tgt = _layer_norm(tgt + a, nrm[0:1, :], nrm[1:2, :])
        a = _mha_cross(tgt, mem, dcw[l], dcb[l], nheads, e)
        tgt = _layer_norm(tgt + a, nrm[2:3, :], nrm[3:4, :])
        h = jnp.maximum(_bdot(tgt, dw1[l]) + db1[l], 0.0)
        f = _bdot(h, dw2[l]) + db2[l]
        tgt = _layer_norm(tgt + f, nrm[4:5, :], nrm[5:6, :])
    out = _layer_norm(tgt, fn[2:3, :], fn[3:4, :])               # decoder norm

    # output head fused into the epilogue: sigmoid(Linear(final[0, 0, :]))
    y = jnp.dot(out[0:1, :], ow[...], preferred_element_type=F32) + ob[...]
    o_ref[...] = 1.0 / (1.0 + jnp.exp(-y))


# ============================ jitted device wrapper ============================

@partial(jax.jit, static_argnames=("n_news", "n_user", "n_post",
                                   "center_attn_idx", "center_ln_idx"))
def het_forward_device(params, c_arr, news_arr, post_arr, user_feat_arr, user_text_arr,
                       c_row, news_rows, user_rows, post_rows,
                       enc_rows, enc_types, dec_rows, dec_types,
                       *, n_news, n_user, n_post, center_attn_idx, center_ln_idx):
    # device-side gathers from the pre-stacked embedding tables
    xc = jnp.take(c_arr, c_row, axis=0)
    xn = jnp.take(news_arr, news_rows, axis=0)
    xuf = jnp.take(user_feat_arr, user_rows, axis=0)
    xut = jnp.take(user_text_arr, user_rows, axis=0)
    xp = jnp.take(post_arr, post_rows, axis=0)

    l_enc = enc_rows.shape[0]
    l_dec = dec_rows.shape[0]
    pe_slab = params["pe"][:l_enc]
    te_pad = jnp.zeros((8, D_MODEL), F32).at[:3].set(params["type_encoder"])

    bf = lambda a: a.astype(BF16)
    tp = params["transformer"]

    kernel = partial(_het_fused_kernel,
                     e=D_MODEL, n_enc=ENC_LAYERS, n_dec=DEC_LAYERS, nheads=ATTN_HEADS,
                     n_news=n_news, n_user=n_user, n_post=n_post,
                     l_enc=l_enc, l_dec=l_dec,
                     center_attn_idx=center_attn_idx, center_ln_idx=center_ln_idx)

    args = (enc_rows, enc_types, dec_rows, dec_types,
            xc, xn, xuf, xut, xp, pe_slab, te_pad,
            bf(params["init_linear_text"]["w"]), params["init_linear_text"]["b"],
            bf(params["init_linear_feature"]["w"]), params["init_linear_feature"]["b"],
            bf(params["node_attn_w"]), params["node_attn_b"], params["node_ln"],
            bf(tp["e_attn_w"]), tp["e_attn_b"],
            bf(tp["e_ffn_w1"]), tp["e_ffn_b1"], bf(tp["e_ffn_w2"]), tp["e_ffn_b2"],
            tp["e_norm"],
            bf(tp["d_sattn_w"]), tp["d_sattn_b"], bf(tp["d_cattn_w"]), tp["d_cattn_b"],
            bf(tp["d_ffn_w1"]), tp["d_ffn_b1"], bf(tp["d_ffn_w2"]), tp["d_ffn_b2"],
            tp["d_norm"],
            tp["final_norm"], params["out_linear"]["w"], params["out_linear"]["b"])

    smem = pl.BlockSpec(memory_space=pltpu.MemorySpace.SMEM)
    vmem = pl.BlockSpec(memory_space=pltpu.MemorySpace.VMEM)
    return pl.pallas_call(
        kernel,
        out_shape=jax.ShapeDtypeStruct((1, OUTEMB_D), F32),
        in_specs=[smem] * 4 + [vmem] * (len(args) - 4),
        out_specs=vmem,
    )(*args)


# =============================== parameter setup ===============================

class KeyGen:
    def __init__(self, key):
        self.key = key

    def __call__(self):
        self.key, sub = jax.random.split(self.key)
        return sub


def lin_params(kg, in_dim, out_dim, std=0.05):
    return {"w": jax.random.normal(kg(), (in_dim, out_dim), F32) * std,
            "b": jax.random.normal(kg(), (1, out_dim), F32) * 0.01}


def ln_pack(e):
    """(2, e) = [gamma; beta]."""
    return jnp.concatenate([jnp.ones((1, e), F32), jnp.zeros((1, e), F32)], axis=0)


def make_pe(max_len, d_model):
    position = jnp.arange(max_len, dtype=F32)[:, None]
    div_term = jnp.exp(jnp.arange(0, d_model, 2, dtype=F32) *
                       (-math.log(10000.0) / d_model))
    pe = jnp.zeros((max_len, d_model), F32)
    pe = pe.at[:, 0::2].set(jnp.sin(position * div_term))
    pe = pe.at[:, 1::2].set(jnp.cos(position * div_term))
    return pe


def build_params(kg):
    E = D_MODEL
    type_enc = jax.random.normal(kg(), (3, E), F32) * 0.05
    type_enc = type_enc.at[0].set(0.0)            # nn.Embedding padding_idx=0

    def mha_stack(n, e):
        """Packed per layer: w = [Wq^T|Wk^T|Wv^T|Wo^T] (e,4e), b = [bq|bk|bv|bo]."""
        return (jax.random.normal(kg(), (n, e, 4 * e), F32) * 0.05,
                jax.random.normal(kg(), (n, 1, 4 * e), F32) * 0.01)

    def lin_stack(n, i, o):
        return (jax.random.normal(kg(), (n, i, o), F32) * 0.05,
                jax.random.normal(kg(), (n, 1, o), F32) * 0.01)

    naw, nab = mha_stack(4, E)        # [news, post, user_content, other_user]
    eaw, eab = mha_stack(ENC_LAYERS, E)
    ew1, eb1 = lin_stack(ENC_LAYERS, E, DFF)
    ew2, eb2 = lin_stack(ENC_LAYERS, DFF, E)
    dsw, dsb = mha_stack(DEC_LAYERS, E)
    dcw, dcb = mha_stack(DEC_LAYERS, E)
    dw1, db1 = lin_stack(DEC_LAYERS, E, DFF)
    dw2, db2 = lin_stack(DEC_LAYERS, DFF, E)

    # TODO(synk): GCN_W*/bias*, *_neigh_att and the SameType_Agg heads
    # (n/u/p_init_linear, n/u/p_attention, n/u/p_linear) exist in __init__ but are
    # never consumed by forward(); omitted (dead code per perf review).
    return {
        "init_linear_text": lin_params(kg, TEXT_DIM, E),
        "init_linear_feature": lin_params(kg, FEAT_DIM, E),
        "node_attn_w": naw, "node_attn_b": nab,
        # order: [layernorm1 (news), layernorm2 (user-other),
        #         layernorm3 (user-content), layernorm4 (post)]
        "node_ln": jnp.tile(ln_pack(E)[None], (4, 1, 1)),
        "type_encoder": type_enc,
        "pe": make_pe(201, E),
        "transformer": {
            "e_attn_w": eaw, "e_attn_b": eab,
            "e_ffn_w1": ew1, "e_ffn_b1": eb1, "e_ffn_w2": ew2, "e_ffn_b2": eb2,
            "e_norm": jnp.tile(jnp.concatenate([ln_pack(E)] * 2, axis=0)[None],
                               (ENC_LAYERS, 1, 1)),
            "d_sattn_w": dsw, "d_sattn_b": dsb, "d_cattn_w": dcw, "d_cattn_b": dcb,
            "d_ffn_w1": dw1, "d_ffn_b1": db1, "d_ffn_w2": dw2, "d_ffn_b2": db2,
            "d_norm": jnp.tile(jnp.concatenate([ln_pack(E)] * 3, axis=0)[None],
                               (DEC_LAYERS, 1, 1)),
            "final_norm": jnp.concatenate([ln_pack(E)] * 2, axis=0),
        },
        "out_linear": lin_params(kg, E, OUTEMB_D),
    }


# =============================== model (host glue) =============================

def het_transformer_forward(center_id, center_type, neighbor_order_n_p_u,
                            neighbor_order_n, params, stacked, npu=15):
    """forward(x, neighbor_order_n_p_u, neighbor_order_n) with everything fused
    into a single jitted Pallas call.  neighbor_order_n is unused by the
    reference forward as well."""
    (news_arr, news_row, post_arr, post_row,
     user_feat_arr, user_text_arr, user_row) = stacked
    # TODO(synk): self.content_dict filtering assumed empty (the __init__ default).
    neigh = neighbor_order_n_p_u[:npu]
    post_neighbor = [i for (t, i) in neigh if t == "p"]
    user_neighbor = [i for (t, i) in neigh if t == "u"]
    news_neighbor = [i for (t, i) in neigh if t == "n"]
    n_news, n_user, n_post = len(news_neighbor), len(user_neighbor), len(post_neighbor)

    # pool row layout inside the kernel: [center, news..., user..., post...]
    row_of = {}
    off = 1
    for i in news_neighbor:
        row_of[("n", i)] = off
        off += 1
    for i in user_neighbor:
        row_of[("u", i)] = off
        off += 1
    for i in post_neighbor:
        row_of[("p", i)] = off
        off += 1

    type_of = {"n": 0, "p": 1, "u": 2}
    enc_rows = [0] + [row_of[(t, i)] for (t, i) in neigh]
    enc_types = [0] + [type_of[t] for (t, i) in neigh]
    dec_rows = [0] + [row_of[("n", i)] for i in news_neighbor]
    dec_types = [0] * (1 + n_news)

    if center_type == "news":
        c_arr, c_row_map, c_attn_idx, c_ln_idx = news_arr, news_row, 0, 0
    elif center_type == "post":
        c_arr, c_row_map, c_attn_idx, c_ln_idx = post_arr, post_row, 1, 3
    else:
        # TODO(synk): 'user' center nodes need the two-input user pipeline for the
        # center row; only text-type ('news'/'post') centers are wired here.
        raise NotImplementedError("user center node not wired")

    to_i32 = lambda xs: jnp.asarray(xs, jnp.int32)
    pred = het_forward_device(
        params, c_arr, news_arr, post_arr, user_feat_arr, user_text_arr,
        to_i32([c_row_map[center_id]]),
        to_i32([news_row[i] for i in news_neighbor] or [0]),
        to_i32([user_row[i] for i in user_neighbor] or [0]),
        to_i32([post_row[i] for i in post_neighbor] or [0]),
        to_i32(enc_rows), to_i32(enc_types), to_i32(dec_rows), to_i32(dec_types),
        n_news=n_news, n_user=n_user, n_post=n_post,
        center_attn_idx=c_attn_idx, center_ln_idx=c_ln_idx)
    return pred.reshape(1, 1, OUTEMB_D)                    # matches torch (1, 1, 1)


# ==================================== main =====================================

if __name__ == "__main__":
    kg = KeyGen(jax.random.PRNGKey(0))
    params = build_params(kg)

    # pre-stacked heterogeneous-graph embedding tables (per perf review: no
    # per-id host dict stacking on the critical path)
    news_ids = [99, 0, 1]
    post_ids = [0, 1, 2]
    user_ids = [0, 1, 2]
    news_arr = jax.random.normal(kg(), (len(news_ids), TEXT_DIM), F32)
    post_arr = jax.random.normal(kg(), (len(post_ids), TEXT_DIM), F32)
    user_feat_arr = jax.random.normal(kg(), (len(user_ids), FEAT_DIM), F32)
    user_text_arr = jax.random.normal(kg(), (len(user_ids), TEXT_DIM), F32)
    news_row = {nid: r for r, nid in enumerate(news_ids)}
    post_row = {pid: r for r, pid in enumerate(post_ids)}
    user_row = {uid: r for r, uid in enumerate(user_ids)}
    stacked = (news_arr, news_row, post_arr, post_row,
               user_feat_arr, user_text_arr, user_row)

    # central news node 99 with 8 ordered heterogeneous neighbors
    neighbor_order_n_p_u = [("p", 0), ("u", 0), ("n", 0), ("p", 1),
                            ("u", 1), ("n", 1), ("p", 2), ("u", 2)]
    neighbor_order_n = [0, 1]

    pred = het_transformer_forward(99, "news", neighbor_order_n_p_u,
                                   neighbor_order_n, params, stacked)
    pred = jax.block_until_ready(pred)
    assert pred.shape == (1, 1, 1) and pred.dtype == jnp.float32
    assert bool(jnp.all(jnp.isfinite(pred)))
    print("KERNEL_OK")
</pallas_src>

<mosaic_0001>
module attributes {stable_mosaic.version = 11 : i64} {
  func.func @_het_fused_kernel(%arg0: memref<9xi32, #tpu.memory_space<smem>>, %arg1: memref<9xi32, #tpu.memory_space<smem>>, %arg2: memref<3xi32, #tpu.memory_space<smem>>, %arg3: memref<3xi32, #tpu.memory_space<smem>>, %arg4: memref<1x48xf32, #tpu.memory_space<vmem>>, %arg5: memref<2x48xf32, #tpu.memory_space<vmem>>, %arg6: memref<3x24xf32, #tpu.memory_space<vmem>>, %arg7: memref<3x48xf32, #tpu.memory_space<vmem>>, %arg8: memref<3x48xf32, #tpu.memory_space<vmem>>, %arg9: memref<9x32xf32, #tpu.memory_space<vmem>>, %arg10: memref<8x32xf32, #tpu.memory_space<vmem>>, %arg11: memref<48x32xbf16, #tpu.memory_space<vmem>>, %arg12: memref<1x32xf32, #tpu.memory_space<vmem>>, %arg13: memref<24x32xbf16, #tpu.memory_space<vmem>>, %arg14: memref<1x32xf32, #tpu.memory_space<vmem>>, %arg15: memref<4x32x128xbf16, #tpu.memory_space<vmem>>, %arg16: memref<4x1x128xf32, #tpu.memory_space<vmem>>, %arg17: memref<4x2x32xf32, #tpu.memory_space<vmem>>, %arg18: memref<2x32x128xbf16, #tpu.memory_space<vmem>>, %arg19: memref<2x1x128xf32, #tpu.memory_space<vmem>>, %arg20: memref<2x32x512xbf16, #tpu.memory_space<vmem>>, %arg21: memref<2x1x512xf32, #tpu.memory_space<vmem>>, %arg22: memref<2x512x32xbf16, #tpu.memory_space<vmem>>, %arg23: memref<2x1x32xf32, #tpu.memory_space<vmem>>, %arg24: memref<2x4x32xf32, #tpu.memory_space<vmem>>, %arg25: memref<2x32x128xbf16, #tpu.memory_space<vmem>>, %arg26: memref<2x1x128xf32, #tpu.memory_space<vmem>>, %arg27: memref<2x32x128xbf16, #tpu.memory_space<vmem>>, %arg28: memref<2x1x128xf32, #tpu.memory_space<vmem>>, %arg29: memref<2x32x512xbf16, #tpu.memory_space<vmem>>, %arg30: memref<2x1x512xf32, #tpu.memory_space<vmem>>, %arg31: memref<2x512x32xbf16, #tpu.memory_space<vmem>>, %arg32: memref<2x1x32xf32, #tpu.memory_space<vmem>>, %arg33: memref<2x6x32xf32, #tpu.memory_space<vmem>>, %arg34: memref<4x32xf32, #tpu.memory_space<vmem>>, %arg35: memref<32x1xf32, #tpu.memory_space<vmem>>, %arg36: memref<1x1xf32, #tpu.memory_space<vmem>>, %arg37: memref<1x1xf32, #tpu.memory_space<vmem>>) attributes {dimension_semantics = [], scalar_prefetch = 0 : i64, scratch_operands = 0 : i64, tpu.core_type = #tpu.core_type<tc>} {
    %c0 = arith.constant 0 : index
    %c0_0 = arith.constant 0 : index
    %0 = vector.load %arg11[%c0, %c0_0] : memref<48x32xbf16, #tpu.memory_space<vmem>>, vector<48x32xbf16>
    %c0_1 = arith.constant 0 : index
    %c0_2 = arith.constant 0 : index
    %1 = vector.load %arg12[%c0_1, %c0_2] : memref<1x32xf32, #tpu.memory_space<vmem>>, vector<1x32xf32>
    %c0_3 = arith.constant 0 : index
    %c0_4 = arith.constant 0 : index
    %2 = vector.load %arg4[%c0_3, %c0_4] : memref<1x48xf32, #tpu.memory_space<vmem>>, vector<1x48xf32>
    %c0_5 = arith.constant 0 : index
    %c0_6 = arith.constant 0 : index
    %c0_7 = arith.constant 0 : index
    %3 = vector.load %arg15[%c0_5, %c0_6, %c0_7] : memref<4x32x128xbf16, #tpu.memory_space<vmem>>, vector<1x32x128xbf16>
    %4 = vector.shape_cast %3 : vector<1x32x128xbf16> to vector<32x128xbf16>
    %c0_8 = arith.constant 0 : index
    %c0_9 = arith.constant 0 : index
    %c0_10 = arith.constant 0 : index
    %5 = vector.load %arg16[%c0_8, %c0_9, %c0_10] : memref<4x1x128xf32, #tpu.memory_space<vmem>>, vector<1x1x128xf32>
    %6 = vector.shape_cast %5 : vector<1x1x128xf32> to vector<1x128xf32>
    %c0_11 = arith.constant 0 : index
    %c0_12 = arith.constant 0 : index
    %c0_13 = arith.constant 0 : index
    %7 = vector.load %arg17[%c0_11, %c0_12, %c0_13] : memref<4x2x32xf32, #tpu.memory_space<vmem>>, vector<1x2x32xf32>
    %8 = vector.shape_cast %7 : vector<1x2x32xf32> to vector<2x32xf32>
    %9 = arith.truncf %2 : vector<1x48xf32> to vector<1x48xbf16>
    %cst = arith.constant dense<0.000000e+00> : vector<1x32xf32>
    %10 = tpu.matmul %9, %0, %cst {dimension_numbers = #tpu.dot_dimension_numbers<[1], [0], [0], [1], [0, 0, 1, 1], [], []>} : vector<1x48xbf16>, vector<48x32xbf16>, vector<1x32xf32> -> vector<1x32xf32>
    %11 = arith.addf %10, %1 : vector<1x32xf32>
    %12 = vector.extract_strided_slice %4 {offsets = [0, 0], sizes = [32, 96], strides = [1, 1]} : vector<32x128xbf16> to vector<32x96xbf16>
    %13 = arith.truncf %11 : vector<1x32xf32> to vector<1x32xbf16>
    %cst_14 = arith.constant dense<0.000000e+00> : vector<1x96xf32>
    %14 = tpu.matmul %13, %12, %cst_14 {dimension_numbers = #tpu.dot_dimension_numbers<[1], [0], [0], [1], [0, 0, 1, 1], [], []>} : vector<1x32xbf16>, vector<32x96xbf16>, vector<1x96xf32> -> vector<1x96xf32>
    %15 = vector.extract_strided_slice %6 {offsets = [0, 0], sizes = [1, 96], strides = [1, 1]} : vector<1x128xf32> to vector<1x96xf32>
    %16 = arith.addf %14, %15 : vector<1x96xf32>
    %17 = vector.extract_strided_slice %16 {offsets = [0, 0], sizes = [1, 32], strides = [1, 1]} : vector<1x96xf32> to vector<1x32xf32>
    %18 = vector.extract_strided_slice %16 {offsets = [0, 32], sizes = [1, 32], strides = [1, 1]} : vector<1x96xf32> to vector<1x32xf32>
    %19 = vector.extract_strided_slice %16 {offsets = [0, 64], sizes = [1, 32], strides = [1, 1]} : vector<1x96xf32> to vector<1x32xf32>
    %20 = vector.extract_strided_slice %4 {offsets = [0, 96], sizes = [32, 32], strides = [1, 1]} : vector<32x128xbf16> to vector<32x32xbf16>
    %21 = vector.extract_strided_slice %6 {offsets = [0, 96], sizes = [1, 32], strides = [1, 1]} : vector<1x128xf32> to vector<1x32xf32>
    %cst_15 = arith.constant 0.176776692 : f32
    %22 = vector.broadcast %cst_15 : f32 to vector<1x32xf32>
    %23 = arith.mulf %17, %22 : vector<1x32xf32>
    %cst_16 = arith.constant dense<0.000000e+00> : vector<1x1xf32>
    %24 = tpu.matmul %23, %18, %cst_16 {dimension_numbers = #tpu.dot_dimension_numbers<[1], [1], [0], [0], [0, 0, 1, 0], [], []>} : vector<1x32xf32>, vector<1x32xf32>, vector<1x1xf32> -> vector<1x1xf32>
    %cst_17 = arith.constant dense<0xFF800000> : vector<1xf32>
    %25 = vector.multi_reduction <maximumf>, %24, %cst_17 [1] : vector<1x1xf32> to vector<1xf32>
    %26 = vector.shape_cast %25 : vector<1xf32> to vector<1x1xf32>
    %27 = arith.subf %24, %26 : vector<1x1xf32>
    %28 = math.exp %27 : vector<1x1xf32>
    %cst_18 = arith.constant dense<0.000000e+00> : vector<1xf32>
    %29 = vector.multi_reduction <add>, %28, %cst_18 [1] : vector<1x1xf32> to vector<1xf32>
    %30 = vector.shape_cast %29 : vector<1xf32> to vector<1x1xf32>
    %31 = tpu.reciprocal %30 {approx = true} : vector<1x1xf32> -> vector<1x1xf32>
    %32 = arith.mulf %28, %31 : vector<1x1xf32>
    %cst_19 = arith.constant dense<0.000000e+00> : vector<1x32xf32>
    %33 = tpu.matmul %32, %19, %cst_19 {dimension_numbers = #tpu.dot_dimension_numbers<[1], [0], [0], [1], [0, 0, 1, 1], [], []>} : vector<1x1xf32>, vector<1x32xf32>, vector<1x32xf32> -> vector<1x32xf32>
    %34 = arith.truncf %33 : vector<1x32xf32> to vector<1x32xbf16>
    %cst_20 = arith.constant dense<0.000000e+00> : vector<1x32xf32>
    %35 = tpu.matmul %34, %20, %cst_20 {dimension_numbers = #tpu.dot_dimension_numbers<[1], [0], [0], [1], [0, 0, 1, 1], [], []>} : vector<1x32xbf16>, vector<32x32xbf16>, vector<1x32xf32> -> vector<1x32xf32>
    %36 = arith.addf %35, %21 : vector<1x32xf32>
    %37 = vector.extract_strided_slice %8 {offsets = [0, 0], sizes = [1, 32], strides = [1, 1]} : vector<2x32xf32> to vector<1x32xf32>
    %38 = vector.extract_strided_slice %8 {offsets = [1, 0], sizes = [1, 32], strides = [1, 1]} : vector<2x32xf32> to vector<1x32xf32>
    %cst_21 = arith.constant dense<0.000000e+00> : vector<1xf32>
    %39 = vector.multi_reduction <add>, %36, %cst_21 [1] : vector<1x32xf32> to vector<1xf32>
    %40 = vector.shape_cast %39 : vector<1xf32> to vector<1x1xf32>
    %cst_22 = arith.constant 3.200000e+01 : f32
    %41 = vector.broadcast %cst_22 : f32 to vector<1x1xf32>
    %42 = arith.divf %40, %41 : vector<1x1xf32>
    %43 = vector.broadcast %42 : vector<1x1xf32> to vector<1x32xf32>
    %44 = arith.subf %36, %43 : vector<1x32xf32>
    %45 = arith.mulf %44, %44 : vector<1x32xf32>
    %cst_23 = arith.constant dense<0.000000e+00> : vector<1xf32>
    %46 = vector.multi_reduction <add>, %45, %cst_23 [1] : vector<1x32xf32> to vector<1xf32>
    %47 = vector.shape_cast %46 : vector<1xf32> to vector<1x1xf32>
    %cst_24 = arith.constant 3.200000e+01 : f32
    %48 = vector.broadcast %cst_24 : f32 to vector<1x1xf32>
    %49 = arith.divf %47, %48 : vector<1x1xf32>
    %50 = vector.broadcast %42 : vector<1x1xf32> to vector<1x32xf32>
    %51 = arith.subf %36, %50 : vector<1x32xf32>
    %cst_25 = arith.constant 9.99999974E-6 : f32
    %52 = vector.broadcast %cst_25 : f32 to vector<1x1xf32>
    %53 = arith.addf %49, %52 : vector<1x1xf32>
    %54 = math.rsqrt %53 : vector<1x1xf32>
    %55 = vector.broadcast %54 : vector<1x1xf32> to vector<1x32xf32>
    %56 = arith.mulf %51, %55 : vector<1x32xf32>
    %57 = arith.mulf %56, %37 : vector<1x32xf32>
    %58 = arith.addf %57, %38 : vector<1x32xf32>
    %c0_26 = arith.constant 0 : index
    %c0_27 = arith.constant 0 : index
    %59 = vector.load %arg5[%c0_26, %c0_27] : memref<2x48xf32, #tpu.memory_space<vmem>>, vector<2x48xf32>
    %c0_28 = arith.constant 0 : index
    %c0_29 = arith.constant 0 : index
    %c0_30 = arith.constant 0 : index
    %60 = vector.load %arg15[%c0_28, %c0_29, %c0_30] : memref<4x32x128xbf16, #tpu.memory_space<vmem>>, vector<1x32x128xbf16>
    %61 = vector.shape_cast %60 : vector<1x32x128xbf16> to vector<32x128xbf16>
    %c0_31 = arith.constant 0 : index
    %c0_32 = arith.constant 0 : index
    %c0_33 = arith.constant 0 : index
    %62 = vector.load %arg16[%c0_31, %c0_32, %c0_33] : memref<4x1x128xf32, #tpu.memory_space<vmem>>, vector<1x1x128xf32>
    %63 = vector.shape_cast %62 : vector<1x1x128xf32> to vector<1x128xf32>
    %c0_34 = arith.constant 0 : index
    %c0_35 = arith.constant 0 : index
    %c0_36 = arith.constant 0 : index
    %64 = vector.load %arg17[%c0_34, %c0_35, %c0_36] : memref<4x2x32xf32, #tpu.memory_space<vmem>>, vector<1x2x32xf32>
    %65 = vector.shape_cast %64 : vector<1x2x32xf32> to vector<2x32xf32>
    %66 = arith.truncf %59 : vector<2x48xf32> to vector<2x48xbf16>
    %cst_37 = arith.constant dense<0.000000e+00> : vector<2x32xf32>
    %67 = tpu.matmul %66, %0, %cst_37 {dimension_numbers = #tpu.dot_dimension_numbers<[1], [0], [0], [1], [0, 0, 1, 1], [], []>} : vector<2x48xbf16>, vector<48x32xbf16>, vector<2x32xf32> -> vector<2x32xf32>
    %68 = vector.broadcast %1 : vector<1x32xf32> to vector<2x32xf32>
    %69 = arith.addf %67, %68 : vector<2x32xf32>
    %70 = vector.extract_strided_slice %61 {offsets = [0, 0], sizes = [32, 96], strides = [1, 1]} : vector<32x128xbf16> to vector<32x96xbf16>
    %71 = arith.truncf %69 : vector<2x32xf32> to vector<2x32xbf16>
    %cst_38 = arith.constant dense<0.000000e+00> : vector<2x96xf32>
    %72 = tpu.matmul %71, %70, %cst_38 {dimension_numbers = #tpu.dot_dimension_numbers<[1], [0], [0], [1], [0, 0, 1, 1], [], []>} : vector<2x32xbf16>, vector<32x96xbf16>, vector<2x96xf32> -> vector<2x96xf32>
    %73 = vector.extract_strided_slice %63 {offsets = [0, 0], sizes = [1, 96], strides = [1, 1]} : vector<1x128xf32> to vector<1x96xf32>
    %74 = vector.broadcast %73 : vector<1x96xf32> to vector<2x96xf32>
    %75 = arith.addf %72, %74 : vector<2x96xf32>
    %76 = vector.extract_strided_slice %75 {offsets = [0, 0], sizes = [2, 32], strides = [1, 1]} : vector<2x96xf32> to vector<2x32xf32>
    %77 = vector.extract_strided_slice %75 {offsets = [0, 32], sizes = [2, 32], strides = [1, 1]} : vector<2x96xf32> to vector<2x32xf32>
    %78 = vector.extract_strided_slice %75 {offsets = [0, 64], sizes = [2, 32], strides = [1, 1]} : vector<2x96xf32> to vector<2x32xf32>
    %79 = vector.extract_strided_slice %61 {offsets = [0, 96], sizes = [32, 32], strides = [1, 1]} : vector<32x128xbf16> to vector<32x32xbf16>
    %80 = vector.extract_strided_slice %63 {offsets = [0, 96], sizes = [1, 32], strides = [1, 1]} : vector<1x128xf32> to vector<1x32xf32>
    %cst_39 = arith.constant 0.176776692 : f32
    %81 = vector.broadcast %cst_39 : f32 to vector<2x32xf32>
    %82 = arith.mulf %76, %81 : vector<2x32xf32>
    %cst_40 = arith.constant dense<0.000000e+00> : vector<2x2xf32>
    %83 = tpu.matmul %82, %77, %cst_40 {dimension_numbers = #tpu.dot_dimension_numbers<[1], [1], [0], [0], [0, 0, 1, 0], [], []>} : vector<2x32xf32>, vector<2x32xf32>, vector<2x2xf32> -> vector<2x2xf32>
    %cst_41 = arith.constant dense<0xFF800000> : vector<2xf32>
    %84 = vector.multi_reduction <maximumf>, %83, %cst_41 [1] : vector<2x2xf32> to vector<2xf32>
    %85 = vector.shape_cast %84 : vector<2xf32> to vector<2x1xf32>
    %86 = vector.broadcast %85 : vector<2x1xf32> to vector<2x2xf32>
    %87 = arith.subf %83, %86 : vector<2x2xf32>
    %88 = math.exp %87 : vector<2x2xf32>
    %cst_42 = arith.constant dense<0.000000e+00> : vector<2xf32>
    %89 = vector.multi_reduction <add>, %88, %cst_42 [1] : vector<2x2xf32> to vector<2xf32>
    %90 = vector.shape_cast %89 : vector<2xf32> to vector<2x1xf32>
    %91 = tpu.reciprocal %90 {approx = true} : vector<2x1xf32> -> vector<2x1xf32>
    %92 = vector.broadcast %91 : vector<2x1xf32> to vector<2x2xf32>
    %93 = arith.mulf %88, %92 : vector<2x2xf32>
    %cst_43 = arith.constant dense<0.000000e+00> : vector<2x32xf32>
    %94 = tpu.matmul %93, %78, %cst_43 {dimension_numbers = #tpu.dot_dimension_numbers<[1], [0], [0], [1], [0, 0, 1, 1], [], []>} : vector<2x2xf32>, vector<2x32xf32>, vector<2x32xf32> -> vector<2x32xf32>
    %95 = arith.truncf %94 : vector<2x32xf32> to vector<2x32xbf16>
    %cst_44 = arith.constant dense<0.000000e+00> : vector<2x32xf32>
    %96 = tpu.matmul %95, %79, %cst_44 {dimension_numbers = #tpu.dot_dimension_numbers<[1], [0], [0], [1], [0, 0, 1, 1], [], []>} : vector<2x32xbf16>, vector<32x32xbf16>, vector<2x32xf32> -> vector<2x32xf32>
    %97 = vector.broadcast %80 : vector<1x32xf32> to vector<2x32xf32>
    %98 = arith.addf %96, %97 : vector<2x32xf32>
    %99 = vector.extract_strided_slice %65 {offsets = [0, 0], sizes = [1, 32], strides = [1, 1]} : vector<2x32xf32> to vector<1x32xf32>
    %100 = vector.extract_strided_slice %65 {offsets = [1, 0], sizes = [1, 32], strides = [1, 1]} : vector<2x32xf32> to vector<1x32xf32>
    %cst_45 = arith.constant dense<0.000000e+00> : vector<2xf32>
    %101 = vector.multi_reduction <add>, %98, %cst_45 [1] : vector<2x32xf32> to vector<2xf32>
    %102 = vector.shape_cast %101 : vector<2xf32> to vector<2x1xf32>
    %cst_46 = arith.constant 3.200000e+01 : f32
    %103 = vector.broadcast %cst_46 : f32 to vector<2x1xf32>
    %104 = arith.divf %102, %103 : vector<2x1xf32>
    %105 = vector.broadcast %104 : vector<2x1xf32> to vector<2x32xf32>
    %106 = arith.subf %98, %105 : vector<2x32xf32>
    %107 = arith.mulf %106, %106 : vector<2x32xf32>
    %cst_47 = arith.constant dense<0.000000e+00> : vector<2xf32>
    %108 = vector.multi_reduction <add>, %107, %cst_47 [1] : vector<2x32xf32> to vector<2xf32>
    %109 = vector.shape_cast %108 : vector<2xf32> to vector<2x1xf32>
    %cst_48 = arith.constant 3.200000e+01 : f32
    %110 = vector.broadcast %cst_48 : f32 to vector<2x1xf32>
    %111 = arith.divf %109, %110 : vector<2x1xf32>
    %112 = vector.broadcast %104 : vector<2x1xf32> to vector<2x32xf32>
    %113 = arith.subf %98, %112 : vector<2x32xf32>
    %cst_49 = arith.constant 9.99999974E-6 : f32
    %114 = vector.broadcast %cst_49 : f32 to vector<2x1xf32>
    %115 = arith.addf %111, %114 : vector<2x1xf32>
    %116 = math.rsqrt %115 : vector<2x1xf32>
    %117 = vector.broadcast %116 : vector<2x1xf32> to vector<2x32xf32>
    %118 = arith.mulf %113, %117 : vector<2x32xf32>
    %119 = vector.broadcast %99 : vector<1x32xf32> to vector<2x32xf32>
    %120 = arith.mulf %118, %119 : vector<2x32xf32>
    %121 = vector.broadcast %100 : vector<1x32xf32> to vector<2x32xf32>
    %122 = arith.addf %120, %121 : vector<2x32xf32>
    %c0_50 = arith.constant 0 : index
    %c0_51 = arith.constant 0 : index
    %123 = vector.load %arg6[%c0_50, %c0_51] : memref<3x24xf32, #tpu.memory_space<vmem>>, vector<3x24xf32>
    %c0_52 = arith.constant 0 : index
    %c0_53 = arith.constant 0 : index
    %124 = vector.load %arg13[%c0_52, %c0_53] : memref<24x32xbf16, #tpu.memory_space<vmem>>, vector<24x32xbf16>
    %125 = arith.truncf %123 : vector<3x24xf32> to vector<3x24xbf16>
    %cst_54 = arith.constant dense<0.000000e+00> : vector<3x32xf32>
    %126 = tpu.matmul %125, %124, %cst_54 {dimension_numbers = #tpu.dot_dimension_numbers<[1], [0], [0], [1], [0, 0, 1, 1], [], []>} : vector<3x24xbf16>, vector<24x32xbf16>, vector<3x32xf32> -> vector<3x32xf32>
    %c0_55 = arith.constant 0 : index
    %c0_56 = arith.constant 0 : index
    %127 = vector.load %arg14[%c0_55, %c0_56] : memref<1x32xf32, #tpu.memory_space<vmem>>, vector<1x32xf32>
    %128 = vector.broadcast %127 : vector<1x32xf32> to vector<3x32xf32>
    %129 = arith.addf %126, %128 : vector<3x32xf32>
    %c0_57 = arith.constant 0 : index
    %c0_58 = arith.constant 0 : index
    %130 = vector.load %arg7[%c0_57, %c0_58] : memref<3x48xf32, #tpu.memory_space<vmem>>, vector<3x48xf32>
    %131 = arith.truncf %130 : vector<3x48xf32> to vector<3x48xbf16>
    %cst_59 = arith.constant dense<0.000000e+00> : vector<3x32xf32>
    %132 = tpu.matmul %131, %0, %cst_59 {dimension_numbers = #tpu.dot_dimension_numbers<[1], [0], [0], [1], [0, 0, 1, 1], [], []>} : vector<3x48xbf16>, vector<48x32xbf16>, vector<3x32xf32> -> vector<3x32xf32>
    %133 = vector.broadcast %1 : vector<1x32xf32> to vector<3x32xf32>
    %134 = arith.addf %132, %133 : vector<3x32xf32>
    %c1 = arith.constant 1 : index
    %c0_60 = arith.constant 0 : index
    %c0_61 = arith.constant 0 : index
    %135 = vector.load %arg17[%c1, %c0_60, %c0_61] : memref<4x2x32xf32, #tpu.memory_space<vmem>>, vector<1x2x32xf32>
    %136 = vector.shape_cast %135 : vector<1x2x32xf32> to vector<2x32xf32>
    %c2 = arith.constant 2 : index
    %c0_62 = arith.constant 0 : index
    %c0_63 = arith.constant 0 : index
    %137 = vector.load %arg17[%c2, %c0_62, %c0_63] : memref<4x2x32xf32, #tpu.memory_space<vmem>>, vector<1x2x32xf32>
    %138 = vector.shape_cast %137 : vector<1x2x32xf32> to vector<2x32xf32>
    %c3 = arith.constant 3 : index
    %c0_64 = arith.constant 0 : index
    %c0_65 = arith.constant 0 : index
    %139 = vector.load %arg15[%c3, %c0_64, %c0_65] : memref<4x32x128xbf16, #tpu.memory_space<vmem>>, vector<1x32x128xbf16>
    %140 = vector.shape_cast %139 : vector<1x32x128xbf16> to vector<32x128xbf16>
    %c3_66 = arith.constant 3 : index
    %c0_67 = arith.constant 0 : index
    %c0_68 = arith.constant 0 : index
    %141 = vector.load %arg16[%c3_66, %c0_67, %c0_68] : memref<4x1x128xf32, #tpu.memory_space<vmem>>, vector<1x1x128xf32>
    %142 = vector.shape_cast %141 : vector<1x1x128xf32> to vector<1x128xf32>
    %143 = vector.extract_strided_slice %140 {offsets = [0, 0], sizes = [32, 96], strides = [1, 1]} : vector<32x128xbf16> to vector<32x96xbf16>
    %144 = arith.truncf %129 : vector<3x32xf32> to vector<3x32xbf16>
    %cst_69 = arith.constant dense<0.000000e+00> : vector<3x96xf32>
    %145 = tpu.matmul %144, %143, %cst_69 {dimension_numbers = #tpu.dot_dimension_numbers<[1], [0], [0], [1], [0, 0, 1, 1], [], []>} : vector<3x32xbf16>, vector<32x96xbf16>, vector<3x96xf32> -> vector<3x96xf32>
    %146 = vector.extract_strided_slice %142 {offsets = [0, 0], sizes = [1, 96], strides = [1, 1]} : vector<1x128xf32> to vector<1x96xf32>
    %147 = vector.broadcast %146 : vector<1x96xf32> to vector<3x96xf32>
    %148 = arith.addf %145, %147 : vector<3x96xf32>
    %149 = vector.extract_strided_slice %148 {offsets = [0, 0], sizes = [3, 32], strides = [1, 1]} : vector<3x96xf32> to vector<3x32xf32>
    %150 = vector.extract_strided_slice %148 {offsets = [0, 32], sizes = [3, 32], strides = [1, 1]} : vector<3x96xf32> to vector<3x32xf32>
    %151 = vector.extract_strided_slice %148 {offsets = [0, 64], sizes = [3, 32], strides = [1, 1]} : vector<3x96xf32> to vector<3x32xf32>
    %152 = vector.extract_strided_slice %140 {offsets = [0, 96], sizes = [32, 32], strides = [1, 1]} : vector<32x128xbf16> to vector<32x32xbf16>
    %153 = vector.extract_strided_slice %142 {offsets = [0, 96], sizes = [1, 32], strides = [1, 1]} : vector<1x128xf32> to vector<1x32xf32>
    %cst_70 = arith.constant 0.176776692 : f32
    %154 = vector.broadcast %cst_70 : f32 to vector<3x32xf32>
    %155 = arith.mulf %149, %154 : vector<3x32xf32>
    %cst_71 = arith.constant dense<0.000000e+00> : vector<3x3xf32>
    %156 = tpu.matmul %155, %150, %cst_71 {dimension_numbers = #tpu.dot_dimension_numbers<[1], [1], [0], [0], [0, 0, 1, 0], [], []>} : vector<3x32xf32>, vector<3x32xf32>, vector<3x3xf32> -> vector<3x3xf32>
    %cst_72 = arith.constant dense<0xFF800000> : vector<3xf32>
    %157 = vector.multi_reduction <maximumf>, %156, %cst_72 [1] : vector<3x3xf32> to vector<3xf32>
    %158 = vector.shape_cast %157 : vector<3xf32> to vector<3x1xf32>
    %159 = vector.broadcast %158 : vector<3x1xf32> to vector<3x3xf32>
    %160 = arith.subf %156, %159 : vector<3x3xf32>
    %161 = math.exp %160 : vector<3x3xf32>
    %cst_73 = arith.constant dense<0.000000e+00> : vector<3xf32>
    %162 = vector.multi_reduction <add>, %161, %cst_73 [1] : vector<3x3xf32> to vector<3xf32>
    %163 = vector.shape_cast %162 : vector<3xf32> to vector<3x1xf32>
    %164 = tpu.reciprocal %163 {approx = true} : vector<3x1xf32> -> vector<3x1xf32>
    %165 = vector.broadcast %164 : vector<3x1xf32> to vector<3x3xf32>
    %166 = arith.mulf %161, %165 : vector<3x3xf32>
    %cst_74 = arith.constant dense<0.000000e+00> : vector<3x32xf32>
    %167 = tpu.matmul %166, %151, %cst_74 {dimension_numbers = #tpu.dot_dimension_numbers<[1], [0], [0], [1], [0, 0, 1, 1], [], []>} : vector<3x3xf32>, vector<3x32xf32>, vector<3x32xf32> -> vector<3x32xf32>
    %168 = arith.truncf %167 : vector<3x32xf32> to vector<3x32xbf16>
    %cst_75 = arith.constant dense<0.000000e+00> : vector<3x32xf32>
    %169 = tpu.matmul %168, %152, %cst_75 {dimension_numbers = #tpu.dot_dimension_numbers<[1], [0], [0], [1], [0, 0, 1, 1], [], []>} : vector<3x32xbf16>, vector<32x32xbf16>, vector<3x32xf32> -> vector<3x32xf32>
    %170 = vector.broadcast %153 : vector<1x32xf32> to vector<3x32xf32>
    %171 = arith.addf %169, %170 : vector<3x32xf32>
    %172 = vector.extract_strided_slice %136 {offsets = [0, 0], sizes = [1, 32], strides = [1, 1]} : vector<2x32xf32> to vector<1x32xf32>
    %173 = vector.extract_strided_slice %136 {offsets = [1, 0], sizes = [1, 32], strides = [1, 1]} : vector<2x32xf32> to vector<1x32xf32>
    %cst_76 = arith.constant dense<0.000000e+00> : vector<3xf32>
    %174 = vector.multi_reduction <add>, %171, %cst_76 [1] : vector<3x32xf32> to vector<3xf32>
    %175 = vector.shape_cast %174 : vector<3xf32> to vector<3x1xf32>
    %cst_77 = arith.constant 3.200000e+01 : f32
    %176 = vector.broadcast %cst_77 : f32 to vector<3x1xf32>
    %177 = arith.divf %175, %176 : vector<3x1xf32>
    %178 = vector.broadcast %177 : vector<3x1xf32> to vector<3x32xf32>
    %179 = arith.subf %171, %178 : vector<3x32xf32>
    %180 = arith.mulf %179, %179 : vector<3x32xf32>
    %cst_78 = arith.constant dense<0.000000e+00> : vector<3xf32>
    %181 = vector.multi_reduction <add>, %180, %cst_78 [1] : vector<3x32xf32> to vector<3xf32>
    %182 = vector.shape_cast %181 : vector<3xf32> to vector<3x1xf32>
    %cst_79 = arith.constant 3.200000e+01 : f32
    %183 = vector.broadcast %cst_79 : f32 to vector<3x1xf32>
    %184 = arith.divf %182, %183 : vector<3x1xf32>
    %185 = vector.broadcast %177 : vector<3x1xf32> to vector<3x32xf32>
    %186 = arith.subf %171, %185 : vector<3x32xf32>
    %cst_80 = arith.constant 9.99999974E-6 : f32
    %187 = vector.broadcast %cst_80 : f32 to vector<3x1xf32>
    %188 = arith.addf %184, %187 : vector<3x1xf32>
    %189 = math.rsqrt %188 : vector<3x1xf32>
    %190 = vector.broadcast %189 : vector<3x1xf32> to vector<3x32xf32>
    %191 = arith.mulf %186, %190 : vector<3x32xf32>
    %192 = vector.broadcast %172 : vector<1x32xf32> to vector<3x32xf32>
    %193 = arith.mulf %191, %192 : vector<3x32xf32>
    %194 = vector.broadcast %173 : vector<1x32xf32> to vector<3x32xf32>
    %195 = arith.addf %193, %194 : vector<3x32xf32>
    %c2_81 = arith.constant 2 : index
    %c0_82 = arith.constant 0 : index
    %c0_83 = arith.constant 0 : index
    %196 = vector.load %arg15[%c2_81, %c0_82, %c0_83] : memref<4x32x128xbf16, #tpu.memory_space<vmem>>, vector<1x32x128xbf16>
    %197 = vector.shape_cast %196 : vector<1x32x128xbf16> to vector<32x128xbf16>
    %c2_84 = arith.constant 2 : index
    %c0_85 = arith.constant 0 : index
    %c0_86 = arith.constant 0 : index
    %198 = vector.load %arg16[%c2_84, %c0_85, %c0_86] : memref<4x1x128xf32, #tpu.memory_space<vmem>>, vector<1x1x128xf32>
    %199 = vector.shape_cast %198 : vector<1x1x128xf32> to vector<1x128xf32>
    %200 = vector.extract_strided_slice %197 {offsets = [0, 0], sizes = [32, 96], strides = [1, 1]} : vector<32x128xbf16> to vector<32x96xbf16>
    %201 = arith.truncf %134 : vector<3x32xf32> to vector<3x32xbf16>
    %cst_87 = arith.constant dense<0.000000e+00> : vector<3x96xf32>
    %202 = tpu.matmul %201, %200, %cst_87 {dimension_numbers = #tpu.dot_dimension_numbers<[1], [0], [0], [1], [0, 0, 1, 1], [], []>} : vector<3x32xbf16>, vector<32x96xbf16>, vector<3x96xf32> -> vector<3x96xf32>
    %203 = vector.extract_strided_slice %199 {offsets = [0, 0], sizes = [1, 96], strides = [1, 1]} : vector<1x128xf32> to vector<1x96xf32>
    %204 = vector.broadcast %203 : vector<1x96xf32> to vector<3x96xf32>
    %205 = arith.addf %202, %204 : vector<3x96xf32>
    %206 = vector.extract_strided_slice %205 {offsets = [0, 0], sizes = [3, 32], strides = [1, 1]} : vector<3x96xf32> to vector<3x32xf32>
    %207 = vector.extract_strided_slice %205 {offsets = [0, 32], sizes = [3, 32], strides = [1, 1]} : vector<3x96xf32> to vector<3x32xf32>
    %208 = vector.extract_strided_slice %205 {offsets = [0, 64], sizes = [3, 32], strides = [1, 1]} : vector<3x96xf32> to vector<3x32xf32>
    %209 = vector.extract_strided_slice %197 {offsets = [0, 96], sizes = [32, 32], strides = [1, 1]} : vector<32x128xbf16> to vector<32x32xbf16>
    %210 = vector.extract_strided_slice %199 {offsets = [0, 96], sizes = [1, 32], strides = [1, 1]} : vector<1x128xf32> to vector<1x32xf32>
    %cst_88 = arith.constant 0.176776692 : f32
    %211 = vector.broadcast %cst_88 : f32 to vector<3x32xf32>
    %212 = arith.mulf %206, %211 : vector<3x32xf32>
    %cst_89 = arith.constant dense<0.000000e+00> : vector<3x3xf32>
    %213 = tpu.matmul %212, %207, %cst_89 {dimension_numbers = #tpu.dot_dimension_numbers<[1], [1], [0], [0], [0, 0, 1, 0], [], []>} : vector<3x32xf32>, vector<3x32xf32>, vector<3x3xf32> -> vector<3x3xf32>
    %cst_90 = arith.constant dense<0xFF800000> : vector<3xf32>
    %214 = vector.multi_reduction <maximumf>, %213, %cst_90 [1] : vector<3x3xf32> to vector<3xf32>
    %215 = vector.shape_cast %214 : vector<3xf32> to vector<3x1xf32>
    %216 = vector.broadcast %215 : vector<3x1xf32> to vector<3x3xf32>
    %217 = arith.subf %213, %216 : vector<3x3xf32>
    %218 = math.exp %217 : vector<3x3xf32>
    %cst_91 = arith.constant dense<0.000000e+00> : vector<3xf32>
    %219 = vector.multi_reduction <add>, %218, %cst_91 [1] : vector<3x3xf32> to vector<3xf32>
    %220 = vector.shape_cast %219 : vector<3xf32> to vector<3x1xf32>
    %221 = tpu.reciprocal %220 {approx = true} : vector<3x1xf32> -> vector<3x1xf32>
    %222 = vector.broadcast %221 : vector<3x1xf32> to vector<3x3xf32>
    %223 = arith.mulf %218, %222 : vector<3x3xf32>
    %cst_92 = arith.constant dense<0.000000e+00> : vector<3x32xf32>
    %224 = tpu.matmul %223, %208, %cst_92 {dimension_numbers = #tpu.dot_dimension_numbers<[1], [0], [0], [1], [0, 0, 1, 1], [], []>} : vector<3x3xf32>, vector<3x32xf32>, vector<3x32xf32> -> vector<3x32xf32>
    %225 = arith.truncf %224 : vector<3x32xf32> to vector<3x32xbf16>
    %cst_93 = arith.constant dense<0.000000e+00> : vector<3x32xf32>
    %226 = tpu.matmul %225, %209, %cst_93 {dimension_numbers = #tpu.dot_dimension_numbers<[1], [0], [0], [1], [0, 0, 1, 1], [], []>} : vector<3x32xbf16>, vector<32x32xbf16>, vector<3x32xf32> -> vector<3x32xf32>
    %227 = vector.broadcast %210 : vector<1x32xf32> to vector<3x32xf32>
    %228 = arith.addf %226, %227 : vector<3x32xf32>
    %229 = vector.extract_strided_slice %138 {offsets = [0, 0], sizes = [1, 32], strides = [1, 1]} : vector<2x32xf32> to vector<1x32xf32>
    %230 = vector.extract_strided_slice %138 {offsets = [1, 0], sizes = [1, 32], strides = [1, 1]} : vector<2x32xf32> to vector<1x32xf32>
    %cst_94 = arith.constant dense<0.000000e+00> : vector<3xf32>
    %231 = vector.multi_reduction <add>, %228, %cst_94 [1] : vector<3x32xf32> to vector<3xf32>
    %232 = vector.shape_cast %231 : vector<3xf32> to vector<3x1xf32>
    %cst_95 = arith.constant 3.200000e+01 : f32
    %233 = vector.broadcast %cst_95 : f32 to vector<3x1xf32>
    %234 = arith.divf %232, %233 : vector<3x1xf32>
    %235 = vector.broadcast %234 : vector<3x1xf32> to vector<3x32xf32>
    %236 = arith.subf %228, %235 : vector<3x32xf32>
    %237 = arith.mulf %236, %236 : vector<3x32xf32>
    %cst_96 = arith.constant dense<0.000000e+00> : vector<3xf32>
    %238 = vector.multi_reduction <add>, %237, %cst_96 [1] : vector<3x32xf32> to vector<3xf32>
    %239 = vector.shape_cast %238 : vector<3xf32> to vector<3x1xf32>
    %cst_97 = arith.constant 3.200000e+01 : f32
    %240 = vector.broadcast %cst_97 : f32 to vector<3x1xf32>
    %241 = arith.divf %239, %240 : vector<3x1xf32>
    %242 = vector.broadcast %234 : vector<3x1xf32> to vector<3x32xf32>
    %243 = arith.subf %228, %242 : vector<3x32xf32>
    %cst_98 = arith.constant 9.99999974E-6 : f32
    %244 = vector.broadcast %cst_98 : f32 to vector<3x1xf32>
    %245 = arith.addf %241, %244 : vector<3x1xf32>
    %246 = math.rsqrt %245 : vector<3x1xf32>
    %247 = vector.broadcast %246 : vector<3x1xf32> to vector<3x32xf32>
    %248 = arith.mulf %243, %247 : vector<3x32xf32>
    %249 = vector.broadcast %229 : vector<1x32xf32> to vector<3x32xf32>
    %250 = arith.mulf %248, %249 : vector<3x32xf32>
    %251 = vector.broadcast %230 : vector<1x32xf32> to vector<3x32xf32>
    %252 = arith.addf %250, %251 : vector<3x32xf32>
    %253 = arith.addf %252, %195 : vector<3x32xf32>
    %cst_99 = arith.constant 5.000000e-01 : f32
    %254 = vector.broadcast %cst_99 : f32 to vector<3x32xf32>
    %255 = arith.mulf %254, %253 : vector<3x32xf32>
    %c0_100 = arith.constant 0 : index
    %c0_101 = arith.constant 0 : index
    %256 = vector.load %arg8[%c0_100, %c0_101] : memref<3x48xf32, #tpu.memory_space<vmem>>, vector<3x48xf32>
    %c1_102 = arith.constant 1 : index
    %c0_103 = arith.constant 0 : index
    %c0_104 = arith.constant 0 : index
    %257 = vector.load %arg15[%c1_102, %c0_103, %c0_104] : memref<4x32x128xbf16, #tpu.memory_space<vmem>>, vector<1x32x128xbf16>
    %258 = vector.shape_cast %257 : vector<1x32x128xbf16> to vector<32x128xbf16>
    %c1_105 = arith.constant 1 : index
    %c0_106 = arith.constant 0 : index
    %c0_107 = arith.constant 0 : index
    %259 = vector.load %arg16[%c1_105, %c0_106, %c0_107] : memref<4x1x128xf32, #tpu.memory_space<vmem>>, vector<1x1x128xf32>
    %260 = vector.shape_cast %259 : vector<1x1x128xf32> to vector<1x128xf32>
    %c3_108 = arith.constant 3 : index
    %c0_109 = arith.constant 0 : index
    %c0_110 = arith.constant 0 : index
    %261 = vector.load %arg17[%c3_108, %c0_109, %c0_110] : memref<4x2x32xf32, #tpu.memory_space<vmem>>, vector<1x2x32xf32>
    %262 = vector.shape_cast %261 : vector<1x2x32xf32> to vector<2x32xf32>
    %263 = arith.truncf %256 : vector<3x48xf32> to vector<3x48xbf16>
    %cst_111 = arith.constant dense<0.000000e+00> : vector<3x32xf32>
    %264 = tpu.matmul %263, %0, %cst_111 {dimension_numbers = #tpu.dot_dimension_numbers<[1], [0], [0], [1], [0, 0, 1, 1], [], []>} : vector<3x48xbf16>, vector<48x32xbf16>, vector<3x32xf32> -> vector<3x32xf32>
    %265 = vector.broadcast %1 : vector<1x32xf32> to vector<3x32xf32>
    %266 = arith.addf %264, %265 : vector<3x32xf32>
    %267 = vector.extract_strided_slice %258 {offsets = [0, 0], sizes = [32, 96], strides = [1, 1]} : vector<32x128xbf16> to vector<32x96xbf16>
    %268 = arith.truncf %266 : vector<3x32xf32> to vector<3x32xbf16>
    %cst_112 = arith.constant dense<0.000000e+00> : vector<3x96xf32>
    %269 = tpu.matmul %268, %267, %cst_112 {dimension_numbers = #tpu.dot_dimension_numbers<[1], [0], [0], [1], [0, 0, 1, 1], [], []>} : vector<3x32xbf16>, vector<32x96xbf16>, vector<3x96xf32> -> vector<3x96xf32>
    %270 = vector.extract_strided_slice %260 {offsets = [0, 0], sizes = [1, 96], strides = [1, 1]} : vector<1x128xf32> to vector<1x96xf32>
    %271 = vector.broadcast %270 : vector<1x96xf32> to vector<3x96xf32>
    %272 = arith.addf %269, %271 : vector<3x96xf32>
    %273 = vector.extract_strided_slice %272 {offsets = [0, 0], sizes = [3, 32], strides = [1, 1]} : vector<3x96xf32> to vector<3x32xf32>
    %274 = vector.extract_strided_slice %272 {offsets = [0, 32], sizes = [3, 32], strides = [1, 1]} : vector<3x96xf32> to vector<3x32xf32>
    %275 = vector.extract_strided_slice %272 {offsets = [0, 64], sizes = [3, 32], strides = [1, 1]} : vector<3x96xf32> to vector<3x32xf32>
    %276 = vector.extract_strided_slice %258 {offsets = [0, 96], sizes = [32, 32], strides = [1, 1]} : vector<32x128xbf16> to vector<32x32xbf16>
    %277 = vector.extract_strided_slice %260 {offsets = [0, 96], sizes = [1, 32], strides = [1, 1]} : vector<1x128xf32> to vector<1x32xf32>
    %cst_113 = arith.constant 0.176776692 : f32
    %278 = vector.broadcast %cst_113 : f32 to vector<3x32xf32>
    %279 = arith.mulf %273, %278 : vector<3x32xf32>
    %cst_114 = arith.constant dense<0.000000e+00> : vector<3x3xf32>
    %280 = tpu.matmul %279, %274, %cst_114 {dimension_numbers = #tpu.dot_dimension_numbers<[1], [1], [0], [0], [0, 0, 1, 0], [], []>} : vector<3x32xf32>, vector<3x32xf32>, vector<3x3xf32> -> vector<3x3xf32>
    %cst_115 = arith.constant dense<0xFF800000> : vector<3xf32>
    %281 = vector.multi_reduction <maximumf>, %280, %cst_115 [1] : vector<3x3xf32> to vector<3xf32>
    %282 = vector.shape_cast %281 : vector<3xf32> to vector<3x1xf32>
    %283 = vector.broadcast %282 : vector<3x1xf32> to vector<3x3xf32>
    %284 = arith.subf %280, %283 : vector<3x3xf32>
    %285 = math.exp %284 : vector<3x3xf32>
    %cst_116 = arith.constant dense<0.000000e+00> : vector<3xf32>
    %286 = vector.multi_reduction <add>, %285, %cst_116 [1] : vector<3x3xf32> to vector<3xf32>
    %287 = vector.shape_cast %286 : vector<3xf32> to vector<3x1xf32>
    %288 = tpu.reciprocal %287 {approx = true} : vector<3x1xf32> -> vector<3x1xf32>
    %289 = vector.broadcast %288 : vector<3x1xf32> to vector<3x3xf32>
    %290 = arith.mulf %285, %289 : vector<3x3xf32>
    %cst_117 = arith.constant dense<0.000000e+00> : vector<3x32xf32>
    %291 = tpu.matmul %290, %275, %cst_117 {dimension_numbers = #tpu.dot_dimension_numbers<[1], [0], [0], [1], [0, 0, 1, 1], [], []>} : vector<3x3xf32>, vector<3x32xf32>, vector<3x32xf32> -> vector<3x32xf32>
    %292 = arith.truncf %291 : vector<3x32xf32> to vector<3x32xbf16>
    %cst_118 = arith.constant dense<0.000000e+00> : vector<3x32xf32>
    %293 = tpu.matmul %292, %276, %cst_118 {dimension_numbers = #tpu.dot_dimension_numbers<[1], [0], [0], [1], [0, 0, 1, 1], [], []>} : vector<3x32xbf16>, vector<32x32xbf16>, vector<3x32xf32> -> vector<3x32xf32>
    %294 = vector.broadcast %277 : vector<1x32xf32> to vector<3x32xf32>
    %295 = arith.addf %293, %294 : vector<3x32xf32>
    %296 = vector.extract_strided_slice %262 {offsets = [0, 0], sizes = [1, 32], strides = [1, 1]} : vector<2x32xf32> to vector<1x32xf32>
    %297 = vector.extract_strided_slice %262 {offsets = [1, 0], sizes = [1, 32], strides = [1, 1]} : vector<2x32xf32> to vector<1x32xf32>
    %cst_119 = arith.constant dense<0.000000e+00> : vector<3xf32>
    %298 = vector.multi_reduction <add>, %295, %cst_119 [1] : vector<3x32xf32> to vector<3xf32>
    %299 = vector.shape_cast %298 : vector<3xf32> to vector<3x1xf32>
    %cst_120 = arith.constant 3.200000e+01 : f32
    %300 = vector.broadcast %cst_120 : f32 to vector<3x1xf32>
    %301 = arith.divf %299, %300 : vector<3x1xf32>
    %302 = vector.broadcast %301 : vector<3x1xf32> to vector<3x32xf32>
    %303 = arith.subf %295, %302 : vector<3x32xf32>
    %304 = arith.mulf %303, %303 : vector<3x32xf32>
    %cst_121 = arith.constant dense<0.000000e+00> : vector<3xf32>
    %305 = vector.multi_reduction <add>, %304, %cst_121 [1] : vector<3x32xf32> to vector<3xf32>
    %306 = vector.shape_cast %305 : vector<3xf32> to vector<3x1xf32>
    %cst_122 = arith.constant 3.200000e+01 : f32
    %307 = vector.broadcast %cst_122 : f32 to vector<3x1xf32>
    %308 = arith.divf %306, %307 : vector<3x1xf32>
    %309 = vector.broadcast %301 : vector<3x1xf32> to vector<3x32xf32>
    %310 = arith.subf %295, %309 : vector<3x32xf32>
    %cst_123 = arith.constant 9.99999974E-6 : f32
    %311 = vector.broadcast %cst_123 : f32 to vector<3x1xf32>
    %312 = arith.addf %308, %311 : vector<3x1xf32>
    %313 = math.rsqrt %312 : vector<3x1xf32>
    %314 = vector.broadcast %313 : vector<3x1xf32> to vector<3x32xf32>
    %315 = arith.mulf %310, %314 : vector<3x32xf32>
    %316 = vector.broadcast %296 : vector<1x32xf32> to vector<3x32xf32>
    %317 = arith.mulf %315, %316 : vector<3x32xf32>
    %318 = vector.broadcast %297 : vector<1x32xf32> to vector<3x32xf32>
    %319 = arith.addf %317, %318 : vector<3x32xf32>
    %320 = tpu.concatenate %58, %122, %255, %319 in 0 : vector<1x32xf32>, vector<2x32xf32>, vector<3x32xf32>, vector<3x32xf32> -> vector<9x32xf32>
    %c0_124 = arith.constant 0 : index
    %c0_125 = arith.constant 0 : index
    %321 = vector.load %arg10[%c0_124, %c0_125] : memref<8x32xf32, #tpu.memory_space<vmem>>, vector<8x32xf32>
    %c0_126 = arith.constant 0 : index
    %c0_127 = arith.constant 0 : index
    %322 = vector.load %arg9[%c0_126, %c0_127] : memref<9x32xf32, #tpu.memory_space<vmem>>, vector<9x32xf32>
    %323 = tpu.iota {dimensions = array<i32: 1>} : vector<1x9xi32>
    %c0_128 = arith.constant 0 : index
    %324 = memref.load %arg0[%c0_128] : memref<9xi32, #tpu.memory_space<smem>>
    %325 = vector.broadcast %324 : i32 to vector<1x9xi32>
    %326 = arith.cmpi eq, %323, %325 : vector<1x9xi32>
    %cst_129 = arith.constant 1.000000e+00 : f32
    %cst_130 = arith.constant 0.000000e+00 : f32
    %327 = vector.broadcast %cst_129 : f32 to vector<1x9xf32>
    %328 = vector.broadcast %cst_130 : f32 to vector<1x9xf32>
    %329 = arith.select %326, %327, %328 : vector<1x9xi1>, vector<1x9xf32>
    %330 = tpu.iota {dimensions = array<i32: 1>} : vector<1x9xi32>
    %c1_131 = arith.constant 1 : index
    %331 = memref.load %arg0[%c1_131] : memref<9xi32, #tpu.memory_space<smem>>
    %332 = vector.broadcast %331 : i32 to vector<1x9xi32>
    %333 = arith.cmpi eq, %330, %332 : vector<1x9xi32>
    %cst_132 = arith.constant 1.000000e+00 : f32
    %cst_133 = arith.constant 0.000000e+00 : f32
    %334 = vector.broadcast %cst_132 : f32 to vector<1x9xf32>
    %335 = vector.broadcast %cst_133 : f32 to vector<1x9xf32>
    %336 = arith.select %333, %334, %335 : vector<1x9xi1>, vector<1x9xf32>
    %337 = tpu.iota {dimensions = array<i32: 1>} : vector<1x9xi32>
    %c2_134 = arith.constant 2 : index
    %338 = memref.load %arg0[%c2_134] : memref<9xi32, #tpu.memory_space<smem>>
    %339 = vector.broadcast %338 : i32 to vector<1x9xi32>
    %340 = arith.cmpi eq, %337, %339 : vector<1x9xi32>
    %cst_135 = arith.constant 1.000000e+00 : f32
    %cst_136 = arith.constant 0.000000e+00 : f32
    %341 = vector.broadcast %cst_135 : f32 to vector<1x9xf32>
    %342 = vector.broadcast %cst_136 : f32 to vector<1x9xf32>
    %343 = arith.select %340, %341, %342 : vector<1x9xi1>, vector<1x9xf32>
    %344 = tpu.iota {dimensions = array<i32: 1>} : vector<1x9xi32>
    %c3_137 = arith.constant 3 : index
    %345 = memref.load %arg0[%c3_137] : memref<9xi32, #tpu.memory_space<smem>>
    %346 = vector.broadcast %345 : i32 to vector<1x9xi32>
    %347 = arith.cmpi eq, %344, %346 : vector<1x9xi32>
    %cst_138 = arith.constant 1.000000e+00 : f32
    %cst_139 = arith.constant 0.000000e+00 : f32
    %348 = vector.broadcast %cst_138 : f32 to vector<1x9xf32>
    %349 = vector.broadcast %cst_139 : f32 to vector<1x9xf32>
    %350 = arith.select %347, %348, %349 : vector<1x9xi1>, vector<1x9xf32>
    %351 = tpu.iota {dimensions = array<i32: 1>} : vector<1x9xi32>
    %c4 = arith.constant 4 : index
    %352 = memref.load %arg0[%c4] : memref<9xi32, #tpu.memory_space<smem>>
    %353 = vector.broadcast %352 : i32 to vector<1x9xi32>
    %354 = arith.cmpi eq, %351, %353 : vector<1x9xi32>
    %cst_140 = arith.constant 1.000000e+00 : f32
    %cst_141 = arith.constant 0.000000e+00 : f32
    %355 = vector.broadcast %cst_140 : f32 to vector<1x9xf32>
    %356 = vector.broadcast %cst_141 : f32 to vector<1x9xf32>
    %357 = arith.select %354, %355, %356 : vector<1x9xi1>, vector<1x9xf32>
    %358 = tpu.iota {dimensions = array<i32: 1>} : vector<1x9xi32>
    %c5 = arith.constant 5 : index
    %359 = memref.load %arg0[%c5] : memref<9xi32, #tpu.memory_space<smem>>
    %360 = vector.broadcast %359 : i32 to vector<1x9xi32>
    %361 = arith.cmpi eq, %358, %360 : vector<1x9xi32>
    %cst_142 = arith.constant 1.000000e+00 : f32
    %cst_143 = arith.constant 0.000000e+00 : f32
    %362 = vector.broadcast %cst_142 : f32 to vector<1x9xf32>
    %363 = vector.broadcast %cst_143 : f32 to vector<1x9xf32>
    %364 = arith.select %361, %362, %363 : vector<1x9xi1>, vector<1x9xf32>
    %365 = tpu.iota {dimensions = array<i32: 1>} : vector<1x9xi32>
    %c6 = arith.constant 6 : index
    %366 = memref.load %arg0[%c6] : memref<9xi32, #tpu.memory_space<smem>>
    %367 = vector.broadcast %366 : i32 to vector<1x9xi32>
    %368 = arith.cmpi eq, %365, %367 : vector<1x9xi32>
    %cst_144 = arith.constant 1.000000e+00 : f32
    %cst_145 = arith.constant 0.000000e+00 : f32
    %369 = vector.broadcast %cst_144 : f32 to vector<1x9xf32>
    %370 = vector.broadcast %cst_145 : f32 to vector<1x9xf32>
    %371 = arith.select %368, %369, %370 : vector<1x9xi1>, vector<1x9xf32>
    %372 = tpu.iota {dimensions = array<i32: 1>} : vector<1x9xi32>
    %c7 = arith.constant 7 : index
    %373 = memref.load %arg0[%c7] : memref<9xi32, #tpu.memory_space<smem>>
    %374 = vector.broadcast %373 : i32 to vector<1x9xi32>
    %375 = arith.cmpi eq, %372, %374 : vector<1x9xi32>
    %cst_146 = arith.constant 1.000000e+00 : f32
    %cst_147 = arith.constant 0.000000e+00 : f32
    %376 = vector.broadcast %cst_146 : f32 to vector<1x9xf32>
    %377 = vector.broadcast %cst_147 : f32 to vector<1x9xf32>
    %378 = arith.select %375, %376, %377 : vector<1x9xi1>, vector<1x9xf32>
    %379 = tpu.iota {dimensions = array<i32: 1>} : vector<1x9xi32>
    %c8 = arith.constant 8 : index
    %380 = memref.load %arg0[%c8] : memref<9xi32, #tpu.memory_space<smem>>
    %381 = vector.broadcast %380 : i32 to vector<1x9xi32>
    %382 = arith.cmpi eq, %379, %381 : vector<1x9xi32>
    %cst_148 = arith.constant 1.000000e+00 : f32
    %cst_149 = arith.constant 0.000000e+00 : f32
    %383 = vector.broadcast %cst_148 : f32 to vector<1x9xf32>
    %384 = vector.broadcast %cst_149 : f32 to vector<1x9xf32>
    %385 = arith.select %382, %383, %384 : vector<1x9xi1>, vector<1x9xf32>
    %386 = tpu.concatenate %329, %336, %343, %350, %357, %364, %371, %378, %385 in 0 : vector<1x9xf32>, vector<1x9xf32>, vector<1x9xf32>, vector<1x9xf32>, vector<1x9xf32>, vector<1x9xf32>, vector<1x9xf32>, vector<1x9xf32>, vector<1x9xf32> -> vector<9x9xf32>
    %cst_150 = arith.constant dense<0.000000e+00> : vector<9x32xf32>
    %387 = tpu.matmul %386, %320, %cst_150 {dimension_numbers = #tpu.dot_dimension_numbers<[1], [0], [0], [1], [0, 0, 1, 1], [], []>} : vector<9x9xf32>, vector<9x32xf32>, vector<9x32xf32> -> vector<9x32xf32>
    %388 = tpu.iota {dimensions = array<i32: 1>} : vector<1x9xi32>
    %c0_151 = arith.constant 0 : index
    %389 = memref.load %arg2[%c0_151] : memref<3xi32, #tpu.memory_space<smem>>
    %390 = vector.broadcast %389 : i32 to vector<1x9xi32>
    %391 = arith.cmpi eq, %388, %390 : vector<1x9xi32>
    %cst_152 = arith.constant 1.000000e+00 : f32
    %cst_153 = arith.constant 0.000000e+00 : f32
    %392 = vector.broadcast %cst_152 : f32 to vector<1x9xf32>
    %393 = vector.broadcast %cst_153 : f32 to vector<1x9xf32>
    %394 = arith.select %391, %392, %393 : vector<1x9xi1>, vector<1x9xf32>
    %395 = tpu.iota {dimensions = array<i32: 1>} : vector<1x9xi32>
    %c1_154 = arith.constant 1 : index
    %396 = memref.load %arg2[%c1_154] : memref<3xi32, #tpu.memory_space<smem>>
    %397 = vector.broadcast %396 : i32 to vector<1x9xi32>
    %398 = arith.cmpi eq, %395, %397 : vector<1x9xi32>
    %cst_155 = arith.constant 1.000000e+00 : f32
    %cst_156 = arith.constant 0.000000e+00 : f32
    %399 = vector.broadcast %cst_155 : f32 to vector<1x9xf32>
    %400 = vector.broadcast %cst_156 : f32 to vector<1x9xf32>
    %401 = arith.select %398, %399, %400 : vector<1x9xi1>, vector<1x9xf32>
    %402 = tpu.iota {dimensions = array<i32: 1>} : vector<1x9xi32>
    %c2_157 = arith.constant 2 : index
    %403 = memref.load %arg2[%c2_157] : memref<3xi32, #tpu.memory_space<smem>>
    %404 = vector.broadcast %403 : i32 to vector<1x9xi32>
    %405 = arith.cmpi eq, %402, %404 : vector<1x9xi32>
    %cst_158 = arith.constant 1.000000e+00 : f32
    %cst_159 = arith.constant 0.000000e+00 : f32
    %406 = vector.broadcast %cst_158 : f32 to vector<1x9xf32>
    %407 = vector.broadcast %cst_159 : f32 to vector<1x9xf32>
    %408 = arith.select %405, %406, %407 : vector<1x9xi1>, vector<1x9xf32>
    %409 = tpu.concatenate %394, %401, %408 in 0 : vector<1x9xf32>, vector<1x9xf32>, vector<1x9xf32> -> vector<3x9xf32>
    %cst_160 = arith.constant dense<0.000000e+00> : vector<3x32xf32>
    %410 = tpu.matmul %409, %320, %cst_160 {dimension_numbers = #tpu.dot_dimension_numbers<[1], [0], [0], [1], [0, 0, 1, 1], [], []>} : vector<3x9xf32>, vector<9x32xf32>, vector<3x32xf32> -> vector<3x32xf32>
    %411 = tpu.iota {dimensions = array<i32: 1>} : vector<1x8xi32>
    %c0_161 = arith.constant 0 : index
    %412 = memref.load %arg1[%c0_161] : memref<9xi32, #tpu.memory_space<smem>>
    %413 = vector.broadcast %412 : i32 to vector<1x8xi32>
    %414 = arith.cmpi eq, %411, %413 : vector<1x8xi32>
    %cst_162 = arith.constant 1.000000e+00 : f32
    %cst_163 = arith.constant 0.000000e+00 : f32
    %415 = vector.broadcast %cst_162 : f32 to vector<1x8xf32>
    %416 = vector.broadcast %cst_163 : f32 to vector<1x8xf32>
    %417 = arith.select %414, %415, %416 : vector<1x8xi1>, vector<1x8xf32>
    %418 = tpu.iota {dimensions = array<i32: 1>} : vector<1x8xi32>
    %c1_164 = arith.constant 1 : index
    %419 = memref.load %arg1[%c1_164] : memref<9xi32, #tpu.memory_space<smem>>
    %420 = vector.broadcast %419 : i32 to vector<1x8xi32>
    %421 = arith.cmpi eq, %418, %420 : vector<1x8xi32>
    %cst_165 = arith.constant 1.000000e+00 : f32
    %cst_166 = arith.constant 0.000000e+00 : f32
    %422 = vector.broadcast %cst_165 : f32 to vector<1x8xf32>
    %423 = vector.broadcast %cst_166 : f32 to vector<1x8xf32>
    %424 = arith.select %421, %422, %423 : vector<1x8xi1>, vector<1x8xf32>
    %425 = tpu.iota {dimensions = array<i32: 1>} : vector<1x8xi32>
    %c2_167 = arith.constant 2 : index
    %426 = memref.load %arg1[%c2_167] : memref<9xi32, #tpu.memory_space<smem>>
    %427 = vector.broadcast %426 : i32 to vector<1x8xi32>
    %428 = arith.cmpi eq, %425, %427 : vector<1x8xi32>
    %cst_168 = arith.constant 1.000000e+00 : f32
    %cst_169 = arith.constant 0.000000e+00 : f32
    %429 = vector.broadcast %cst_168 : f32 to vector<1x8xf32>
    %430 = vector.broadcast %cst_169 : f32 to vector<1x8xf32>
    %431 = arith.select %428, %429, %430 : vector<1x8xi1>, vector<1x8xf32>
    %432 = tpu.iota {dimensions = array<i32: 1>} : vector<1x8xi32>
    %c3_170 = arith.constant 3 : index
    %433 = memref.load %arg1[%c3_170] : memref<9xi32, #tpu.memory_space<smem>>
    %434 = vector.broadcast %433 : i32 to vector<1x8xi32>
    %435 = arith.cmpi eq, %432, %434 : vector<1x8xi32>
    %cst_171 = arith.constant 1.000000e+00 : f32
    %cst_172 = arith.constant 0.000000e+00 : f32
    %436 = vector.broadcast %cst_171 : f32 to vector<1x8xf32>
    %437 = vector.broadcast %cst_172 : f32 to vector<1x8xf32>
    %438 = arith.select %435, %436, %437 : vector<1x8xi1>, vector<1x8xf32>
    %439 = tpu.iota {dimensions = array<i32: 1>} : vector<1x8xi32>
    %c4_173 = arith.constant 4 : index
    %440 = memref.load %arg1[%c4_173] : memref<9xi32, #tpu.memory_space<smem>>
    %441 = vector.broadcast %440 : i32 to vector<1x8xi32>
    %442 = arith.cmpi eq, %439, %441 : vector<1x8xi32>
    %cst_174 = arith.constant 1.000000e+00 : f32
    %cst_175 = arith.constant 0.000000e+00 : f32
    %443 = vector.broadcast %cst_174 : f32 to vector<1x8xf32>
    %444 = vector.broadcast %cst_175 : f32 to vector<1x8xf32>
    %445 = arith.select %442, %443, %444 : vector<1x8xi1>, vector<1x8xf32>
    %446 = tpu.iota {dimensions = array<i32: 1>} : vector<1x8xi32>
    %c5_176 = arith.constant 5 : index
    %447 = memref.load %arg1[%c5_176] : memref<9xi32, #tpu.memory_space<smem>>
    %448 = vector.broadcast %447 : i32 to vector<1x8xi32>
    %449 = arith.cmpi eq, %446, %448 : vector<1x8xi32>
    %cst_177 = arith.constant 1.000000e+00 : f32
    %cst_178 = arith.constant 0.000000e+00 : f32
    %450 = vector.broadcast %cst_177 : f32 to vector<1x8xf32>
    %451 = vector.broadcast %cst_178 : f32 to vector<1x8xf32>
    %452 = arith.select %449, %450, %451 : vector<1x8xi1>, vector<1x8xf32>
    %453 = tpu.iota {dimensions = array<i32: 1>} : vector<1x8xi32>
    %c6_179 = arith.constant 6 : index
    %454 = memref.load %arg1[%c6_179] : memref<9xi32, #tpu.memory_space<smem>>
    %455 = vector.broadcast %454 : i32 to vector<1x8xi32>
    %456 = arith.cmpi eq, %453, %455 : vector<1x8xi32>
    %cst_180 = arith.constant 1.000000e+00 : f32
    %cst_181 = arith.constant 0.000000e+00 : f32
    %457 = vector.broadcast %cst_180 : f32 to vector<1x8xf32>
    %458 = vector.broadcast %cst_181 : f32 to vector<1x8xf32>
    %459 = arith.select %456, %457, %458 : vector<1x8xi1>, vector<1x8xf32>
    %460 = tpu.iota {dimensions = array<i32: 1>} : vector<1x8xi32>
    %c7_182 = arith.constant 7 : index
    %461 = memref.load %arg1[%c7_182] : memref<9xi32, #tpu.memory_space<smem>>
    %462 = vector.broadcast %461 : i32 to vector<1x8xi32>
    %463 = arith.cmpi eq, %460, %462 : vector<1x8xi32>
    %cst_183 = arith.constant 1.000000e+00 : f32
    %cst_184 = arith.constant 0.000000e+00 : f32
    %464 = vector.broadcast %cst_183 : f32 to vector<1x8xf32>
    %465 = vector.broadcast %cst_184 : f32 to vector<1x8xf32>
    %466 = arith.select %463, %464, %465 : vector<1x8xi1>, vector<1x8xf32>
    %467 = tpu.iota {dimensions = array<i32: 1>} : vector<1x8xi32>
    %c8_185 = arith.constant 8 : index
    %468 = memref.load %arg1[%c8_185] : memref<9xi32, #tpu.memory_space<smem>>
    %469 = vector.broadcast %468 : i32 to vector<1x8xi32>
    %470 = arith.cmpi eq, %467, %469 : vector<1x8xi32>
    %cst_186 = arith.constant 1.000000e+00 : f32
    %cst_187 = arith.constant 0.000000e+00 : f32
    %471 = vector.broadcast %cst_186 : f32 to vector<1x8xf32>
    %472 = vector.broadcast %cst_187 : f32 to vector<1x8xf32>
    %473 = arith.select %470, %471, %472 : vector<1x8xi1>, vector<1x8xf32>
    %474 = tpu.concatenate %417, %424, %431, %438, %445, %452, %459, %466, %473 in 0 : vector<1x8xf32>, vector<1x8xf32>, vector<1x8xf32>, vector<1x8xf32>, vector<1x8xf32>, vector<1x8xf32>, vector<1x8xf32>, vector<1x8xf32>, vector<1x8xf32> -> vector<9x8xf32>
    %cst_188 = arith.constant dense<0.000000e+00> : vector<9x32xf32>
    %475 = tpu.matmul %474, %321, %cst_188 {dimension_numbers = #tpu.dot_dimension_numbers<[1], [0], [0], [1], [0, 0, 1, 1], [], []>} : vector<9x8xf32>, vector<8x32xf32>, vector<9x32xf32> -> vector<9x32xf32>
    %476 = tpu.iota {dimensions = array<i32: 1>} : vector<1x8xi32>
    %c0_189 = arith.constant 0 : index
    %477 = memref.load %arg3[%c0_189] : memref<3xi32, #tpu.memory_space<smem>>
    %478 = vector.broadcast %477 : i32 to vector<1x8xi32>
    %479 = arith.cmpi eq, %476, %478 : vector<1x8xi32>
    %cst_190 = arith.constant 1.000000e+00 : f32
    %cst_191 = arith.constant 0.000000e+00 : f32
    %480 = vector.broadcast %cst_190 : f32 to vector<1x8xf32>
    %481 = vector.broadcast %cst_191 : f32 to vector<1x8xf32>
    %482 = arith.select %479, %480, %481 : vector<1x8xi1>, vector<1x8xf32>
    %483 = tpu.iota {dimensions = array<i32: 1>} : vector<1x8xi32>
    %c1_192 = arith.constant 1 : index
    %484 = memref.load %arg3[%c1_192] : memref<3xi32, #tpu.memory_space<smem>>
    %485 = vector.broadcast %484 : i32 to vector<1x8xi32>
    %486 = arith.cmpi eq, %483, %485 : vector<1x8xi32>
    %cst_193 = arith.constant 1.000000e+00 : f32
    %cst_194 = arith.constant 0.000000e+00 : f32
    %487 = vector.broadcast %cst_193 : f32 to vector<1x8xf32>
    %488 = vector.broadcast %cst_194 : f32 to vector<1x8xf32>
    %489 = arith.select %486, %487, %488 : vector<1x8xi1>, vector<1x8xf32>
    %490 = tpu.iota {dimensions = array<i32: 1>} : vector<1x8xi32>
    %c2_195 = arith.constant 2 : index
    %491 = memref.load %arg3[%c2_195] : memref<3xi32, #tpu.memory_space<smem>>
    %492 = vector.broadcast %491 : i32 to vector<1x8xi32>
    %493 = arith.cmpi eq, %490, %492 : vector<1x8xi32>
    %cst_196 = arith.constant 1.000000e+00 : f32
    %cst_197 = arith.constant 0.000000e+00 : f32
    %494 = vector.broadcast %cst_196 : f32 to vector<1x8xf32>
    %495 = vector.broadcast %cst_197 : f32 to vector<1x8xf32>
    %496 = arith.select %493, %494, %495 : vector<1x8xi1>, vector<1x8xf32>
    %497 = tpu.concatenate %482, %489, %496 in 0 : vector<1x8xf32>, vector<1x8xf32>, vector<1x8xf32> -> vector<3x8xf32>
    %cst_198 = arith.constant dense<0.000000e+00> : vector<3x32xf32>
    %498 = tpu.matmul %497, %321, %cst_198 {dimension_numbers = #tpu.dot_dimension_numbers<[1], [0], [0], [1], [0, 0, 1, 1], [], []>} : vector<3x8xf32>, vector<8x32xf32>, vector<3x32xf32> -> vector<3x32xf32>
    %499 = arith.addf %387, %475 : vector<9x32xf32>
    %cst_199 = arith.constant 2.000000e+00 : f32
    %500 = vector.broadcast %cst_199 : f32 to vector<9x32xf32>
    %501 = arith.mulf %500, %499 : vector<9x32xf32>
    %502 = arith.addf %501, %322 : vector<9x32xf32>
    %cst_200 = arith.constant 2.000000e+00 : f32
    %503 = vector.broadcast %cst_200 : f32 to vector<3x32xf32>
    %504 = arith.mulf %503, %410 : vector<3x32xf32>
    %505 = vector.extract_strided_slice %322 {offsets = [0, 0], sizes = [3, 32], strides = [1, 1]} : vector<9x32xf32> to vector<3x32xf32>
    %506 = arith.addf %504, %505 : vector<3x32xf32>
    %507 = arith.addf %506, %498 : vector<3x32xf32>
    %c0_201 = arith.constant 0 : index
    %c0_202 = arith.constant 0 : index
    %c0_203 = arith.constant 0 : index
    %508 = vector.load %arg24[%c0_201, %c0_202, %c0_203] : memref<2x4x32xf32, #tpu.memory_space<vmem>>, vector<1x4x32xf32>
    %509 = vector.shape_cast %508 : vector<1x4x32xf32> to vector<4x32xf32>
    %c0_204 = arith.constant 0 : index
    %c0_205 = arith.constant 0 : index
    %c0_206 = arith.constant 0 : index
    %510 = vector.load %arg18[%c0_204, %c0_205, %c0_206] : memref<2x32x128xbf16, #tpu.memory_space<vmem>>, vector<1x32x128xbf16>
    %511 = vector.shape_cast %510 : vector<1x32x128xbf16> to vector<32x128xbf16>
    %c0_207 = arith.constant 0 : index
    %c0_208 = arith.constant 0 : index
    %c0_209 = arith.constant 0 : index
    %512 = vector.load %arg19[%c0_207, %c0_208, %c0_209] : memref<2x1x128xf32, #tpu.memory_space<vmem>>, vector<1x1x128xf32>
    %513 = vector.shape_cast %512 : vector<1x1x128xf32> to vector<1x128xf32>
    %514 = vector.extract_strided_slice %511 {offsets = [0, 0], sizes = [32, 96], strides = [1, 1]} : vector<32x128xbf16> to vector<32x96xbf16>
    %515 = arith.truncf %502 : vector<9x32xf32> to vector<9x32xbf16>
    %cst_210 = arith.constant dense<0.000000e+00> : vector<9x96xf32>
    %516 = tpu.matmul %515, %514, %cst_210 {dimension_numbers = #tpu.dot_dimension_numbers<[1], [0], [0], [1], [0, 0, 1, 1], [], []>} : vector<9x32xbf16>, vector<32x96xbf16>, vector<9x96xf32> -> vector<9x96xf32>
    %517 = vector.extract_strided_slice %513 {offsets = [0, 0], sizes = [1, 96], strides = [1, 1]} : vector<1x128xf32> to vector<1x96xf32>
    %518 = vector.broadcast %517 : vector<1x96xf32> to vector<9x96xf32>
    %519 = arith.addf %516, %518 : vector<9x96xf32>
    %520 = vector.extract_strided_slice %519 {offsets = [0, 0], sizes = [9, 32], strides = [1, 1]} : vector<9x96xf32> to vector<9x32xf32>
    %521 = vector.extract_strided_slice %519 {offsets = [0, 32], sizes = [9, 32], strides = [1, 1]} : vector<9x96xf32> to vector<9x32xf32>
    %522 = vector.extract_strided_slice %519 {offsets = [0, 64], sizes = [9, 32], strides = [1, 1]} : vector<9x96xf32> to vector<9x32xf32>
    %523 = vector.extract_strided_slice %511 {offsets = [0, 96], sizes = [32, 32], strides = [1, 1]} : vector<32x128xbf16> to vector<32x32xbf16>
    %524 = vector.extract_strided_slice %513 {offsets = [0, 96], sizes = [1, 32], strides = [1, 1]} : vector<1x128xf32> to vector<1x32xf32>
    %525 = vector.extract_strided_slice %520 {offsets = [0, 0], sizes = [9, 16], strides = [1, 1]} : vector<9x32xf32> to vector<9x16xf32>
    %526 = vector.extract_strided_slice %521 {offsets = [0, 0], sizes = [9, 16], strides = [1, 1]} : vector<9x32xf32> to vector<9x16xf32>
    %527 = vector.extract_strided_slice %522 {offsets = [0, 0], sizes = [9, 16], strides = [1, 1]} : vector<9x32xf32> to vector<9x16xf32>
    %cst_211 = arith.constant 2.500000e-01 : f32
    %528 = vector.broadcast %cst_211 : f32 to vector<9x16xf32>
    %529 = arith.mulf %525, %528 : vector<9x16xf32>
    %cst_212 = arith.constant dense<0.000000e+00> : vector<9x9xf32>
    %530 = tpu.matmul %529, %526, %cst_212 {dimension_numbers = #tpu.dot_dimension_numbers<[1], [1], [0], [0], [0, 0, 1, 0], [], []>} : vector<9x16xf32>, vector<9x16xf32>, vector<9x9xf32> -> vector<9x9xf32>
    %cst_213 = arith.constant dense<0xFF800000> : vector<9xf32>
    %531 = vector.multi_reduction <maximumf>, %530, %cst_213 [1] : vector<9x9xf32> to vector<9xf32>
    %532 = vector.shape_cast %531 : vector<9xf32> to vector<9x1xf32>
    %533 = vector.broadcast %532 : vector<9x1xf32> to vector<9x9xf32>
    %534 = arith.subf %530, %533 : vector<9x9xf32>
    %535 = math.exp %534 : vector<9x9xf32>
    %cst_214 = arith.constant dense<0.000000e+00> : vector<9xf32>
    %536 = vector.multi_reduction <add>, %535, %cst_214 [1] : vector<9x9xf32> to vector<9xf32>
    %537 = vector.shape_cast %536 : vector<9xf32> to vector<9x1xf32>
    %538 = tpu.reciprocal %537 {approx = true} : vector<9x1xf32> -> vector<9x1xf32>
    %539 = vector.broadcast %538 : vector<9x1xf32> to vector<9x9xf32>
    %540 = arith.mulf %535, %539 : vector<9x9xf32>
    %cst_215 = arith.constant dense<0.000000e+00> : vector<9x16xf32>
    %541 = tpu.matmul %540, %527, %cst_215 {dimension_numbers = #tpu.dot_dimension_numbers<[1], [0], [0], [1], [0, 0, 1, 1], [], []>} : vector<9x9xf32>, vector<9x16xf32>, vector<9x16xf32> -> vector<9x16xf32>
    %542 = vector.extract_strided_slice %520 {offsets = [0, 16], sizes = [9, 16], strides = [1, 1]} : vector<9x32xf32> to vector<9x16xf32>
    %543 = vector.extract_strided_slice %521 {offsets = [0, 16], sizes = [9, 16], strides = [1, 1]} : vector<9x32xf32> to vector<9x16xf32>
    %544 = vector.extract_strided_slice %522 {offsets = [0, 16], sizes = [9, 16], strides = [1, 1]} : vector<9x32xf32> to vector<9x16xf32>
    %cst_216 = arith.constant 2.500000e-01 : f32
    %545 = vector.broadcast %cst_216 : f32 to vector<9x16xf32>
    %546 = arith.mulf %542, %545 : vector<9x16xf32>
    %cst_217 = arith.constant dense<0.000000e+00> : vector<9x9xf32>
    %547 = tpu.matmul %546, %543, %cst_217 {dimension_numbers = #tpu.dot_dimension_numbers<[1], [1], [0], [0], [0, 0, 1, 0], [], []>} : vector<9x16xf32>, vector<9x16xf32>, vector<9x9xf32> -> vector<9x9xf32>
    %cst_218 = arith.constant dense<0xFF800000> : vector<9xf32>
    %548 = vector.multi_reduction <maximumf>, %547, %cst_218 [1] : vector<9x9xf32> to vector<9xf32>
    %549 = vector.shape_cast %548 : vector<9xf32> to vector<9x1xf32>
    %550 = vector.broadcast %549 : vector<9x1xf32> to vector<9x9xf32>
    %551 = arith.subf %547, %550 : vector<9x9xf32>
    %552 = math.exp %551 : vector<9x9xf32>
    %cst_219 = arith.constant dense<0.000000e+00> : vector<9xf32>
    %553 = vector.multi_reduction <add>, %552, %cst_219 [1] : vector<9x9xf32> to vector<9xf32>
    %554 = vector.shape_cast %553 : vector<9xf32> to vector<9x1xf32>
    %555 = tpu.reciprocal %554 {approx = true} : vector<9x1xf32> -> vector<9x1xf32>
    %556 = vector.broadcast %555 : vector<9x1xf32> to vector<9x9xf32>
    %557 = arith.mulf %552, %556 : vector<9x9xf32>
    %cst_220 = arith.constant dense<0.000000e+00> : vector<9x16xf32>
    %558 = tpu.matmul %557, %544, %cst_220 {dimension_numbers = #tpu.dot_dimension_numbers<[1], [0], [0], [1], [0, 0, 1, 1], [], []>} : vector<9x9xf32>, vector<9x16xf32>, vector<9x16xf32> -> vector<9x16xf32>
    %559 = tpu.concatenate %541, %558 in 1 : vector<9x16xf32>, vector<9x16xf32> -> vector<9x32xf32>
    %560 = arith.truncf %559 : vector<9x32xf32> to vector<9x32xbf16>
    %cst_221 = arith.constant dense<0.000000e+00> : vector<9x32xf32>
    %561 = tpu.matmul %560, %523, %cst_221 {dimension_numbers = #tpu.dot_dimension_numbers<[1], [0], [0], [1], [0, 0, 1, 1], [], []>} : vector<9x32xbf16>, vector<32x32xbf16>, vector<9x32xf32> -> vector<9x32xf32>
    %562 = vector.broadcast %524 : vector<1x32xf32> to vector<9x32xf32>
    %563 = arith.addf %561, %562 : vector<9x32xf32>
    %564 = arith.addf %502, %563 : vector<9x32xf32>
    %565 = vector.extract_strided_slice %509 {offsets = [0, 0], sizes = [1, 32], strides = [1, 1]} : vector<4x32xf32> to vector<1x32xf32>
    %566 = vector.extract_strided_slice %509 {offsets = [1, 0], sizes = [1, 32], strides = [1, 1]} : vector<4x32xf32> to vector<1x32xf32>
    %cst_222 = arith.constant dense<0.000000e+00> : vector<9xf32>
    %567 = vector.multi_reduction <add>, %564, %cst_222 [1] : vector<9x32xf32> to vector<9xf32>
    %568 = vector.shape_cast %567 : vector<9xf32> to vector<9x1xf32>
    %cst_223 = arith.constant 3.200000e+01 : f32
    %569 = vector.broadcast %cst_223 : f32 to vector<9x1xf32>
    %570 = arith.divf %568, %569 : vector<9x1xf32>
    %571 = vector.broadcast %570 : vector<9x1xf32> to vector<9x32xf32>
    %572 = arith.subf %564, %571 : vector<9x32xf32>
    %573 = arith.mulf %572, %572 : vector<9x32xf32>
    %cst_224 = arith.constant dense<0.000000e+00> : vector<9xf32>
    %574 = vector.multi_reduction <add>, %573, %cst_224 [1] : vector<9x32xf32> to vector<9xf32>
    %575 = vector.shape_cast %574 : vector<9xf32> to vector<9x1xf32>
    %cst_225 = arith.constant 3.200000e+01 : f32
    %576 = vector.broadcast %cst_225 : f32 to vector<9x1xf32>
    %577 = arith.divf %575, %576 : vector<9x1xf32>
    %578 = vector.broadcast %570 : vector<9x1xf32> to vector<9x32xf32>
    %579 = arith.subf %564, %578 : vector<9x32xf32>
    %cst_226 = arith.constant 9.99999974E-6 : f32
    %580 = vector.broadcast %cst_226 : f32 to vector<9x1xf32>
    %581 = arith.addf %577, %580 : vector<9x1xf32>
    %582 = math.rsqrt %581 : vector<9x1xf32>
    %583 = vector.broadcast %582 : vector<9x1xf32> to vector<9x32xf32>
    %584 = arith.mulf %579, %583 : vector<9x32xf32>
    %585 = vector.broadcast %565 : vector<1x32xf32> to vector<9x32xf32>
    %586 = arith.mulf %584, %585 : vector<9x32xf32>
    %587 = vector.broadcast %566 : vector<1x32xf32> to vector<9x32xf32>
    %588 = arith.addf %586, %587 : vector<9x32xf32>
    %c0_227 = arith.constant 0 : index
    %c0_228 = arith.constant 0 : index
    %c0_229 = arith.constant 0 : index
    %589 = vector.load %arg20[%c0_227, %c0_228, %c0_229] : memref<2x32x512xbf16, #tpu.memory_space<vmem>>, vector<1x32x512xbf16>
    %590 = vector.shape_cast %589 : vector<1x32x512xbf16> to vector<32x512xbf16>
    %591 = arith.truncf %588 : vector<9x32xf32> to vector<9x32xbf16>
    %cst_230 = arith.constant dense<0.000000e+00> : vector<9x512xf32>
    %592 = tpu.matmul %591, %590, %cst_230 {dimension_numbers = #tpu.dot_dimension_numbers<[1], [0], [0], [1], [0, 0, 1, 1], [], []>} : vector<9x32xbf16>, vector<32x512xbf16>, vector<9x512xf32> -> vector<9x512xf32>
    %c0_231 = arith.constant 0 : index
    %c0_232 = arith.constant 0 : index
    %c0_233 = arith.constant 0 : index
    %593 = vector.load %arg21[%c0_231, %c0_232, %c0_233] : memref<2x1x512xf32, #tpu.memory_space<vmem>>, vector<1x1x512xf32>
    %594 = vector.shape_cast %593 : vector<1x1x512xf32> to vector<1x512xf32>
    %595 = vector.broadcast %594 : vector<1x512xf32> to vector<9x512xf32>
    %596 = arith.addf %592, %595 : vector<9x512xf32>
    %cst_234 = arith.constant 0.000000e+00 : f32
    %597 = vector.broadcast %cst_234 : f32 to vector<9x512xf32>
    %598 = arith.maximumf %596, %597 : vector<9x512xf32>
    %c0_235 = arith.constant 0 : index
    %c0_236 = arith.constant 0 : index
    %c0_237 = arith.constant 0 : index
    %599 = vector.load %arg22[%c0_235, %c0_236, %c0_237] : memref<2x512x32xbf16, #tpu.memory_space<vmem>>, vector<1x512x32xbf16>
    %600 = vector.shape_cast %599 : vector<1x512x32xbf16> to vector<512x32xbf16>
    %601 = arith.truncf %598 : vector<9x512xf32> to vector<9x512xbf16>
    %cst_238 = arith.constant dense<0.000000e+00> : vector<9x32xf32>
    %602 = tpu.matmul %601, %600, %cst_238 {dimension_numbers = #tpu.dot_dimension_numbers<[1], [0], [0], [1], [0, 0, 1, 1], [], []>} : vector<9x512xbf16>, vector<512x32xbf16>, vector<9x32xf32> -> vector<9x32xf32>
    %c0_239 = arith.constant 0 : index
    %c0_240 = arith.constant 0 : index
    %c0_241 = arith.constant 0 : index
    %603 = vector.load %arg23[%c0_239, %c0_240, %c0_241] : memref<2x1x32xf32, #tpu.memory_space<vmem>>, vector<1x1x32xf32>
    %604 = vector.shape_cast %603 : vector<1x1x32xf32> to vector<1x32xf32>
    %605 = vector.broadcast %604 : vector<1x32xf32> to vector<9x32xf32>
    %606 = arith.addf %602, %605 : vector<9x32xf32>
    %607 = arith.addf %588, %606 : vector<9x32xf32>
    %608 = vector.extract_strided_slice %509 {offsets = [2, 0], sizes = [1, 32], strides = [1, 1]} : vector<4x32xf32> to vector<1x32xf32>
    %609 = vector.extract_strided_slice %509 {offsets = [3, 0], sizes = [1, 32], strides = [1, 1]} : vector<4x32xf32> to vector<1x32xf32>
    %cst_242 = arith.constant dense<0.000000e+00> : vector<9xf32>
    %610 = vector.multi_reduction <add>, %607, %cst_242 [1] : vector<9x32xf32> to vector<9xf32>
    %611 = vector.shape_cast %610 : vector<9xf32> to vector<9x1xf32>
    %cst_243 = arith.constant 3.200000e+01 : f32
    %612 = vector.broadcast %cst_243 : f32 to vector<9x1xf32>
    %613 = arith.divf %611, %612 : vector<9x1xf32>
    %614 = vector.broadcast %613 : vector<9x1xf32> to vector<9x32xf32>
    %615 = arith.subf %607, %614 : vector<9x32xf32>
    %616 = arith.mulf %615, %615 : vector<9x32xf32>
    %cst_244 = arith.constant dense<0.000000e+00> : vector<9xf32>
    %617 = vector.multi_reduction <add>, %616, %cst_244 [1] : vector<9x32xf32> to vector<9xf32>
    %618 = vector.shape_cast %617 : vector<9xf32> to vector<9x1xf32>
    %cst_245 = arith.constant 3.200000e+01 : f32
    %619 = vector.broadcast %cst_245 : f32 to vector<9x1xf32>
    %620 = arith.divf %618, %619 : vector<9x1xf32>
    %621 = vector.broadcast %613 : vector<9x1xf32> to vector<9x32xf32>
    %622 = arith.subf %607, %621 : vector<9x32xf32>
    %cst_246 = arith.constant 9.99999974E-6 : f32
    %623 = vector.broadcast %cst_246 : f32 to vector<9x1xf32>
    %624 = arith.addf %620, %623 : vector<9x1xf32>
    %625 = math.rsqrt %624 : vector<9x1xf32>
    %626 = vector.broadcast %625 : vector<9x1xf32> to vector<9x32xf32>
    %627 = arith.mulf %622, %626 : vector<9x32xf32>
    %628 = vector.broadcast %608 : vector<1x32xf32> to vector<9x32xf32>
    %629 = arith.mulf %627, %628 : vector<9x32xf32>
    %630 = vector.broadcast %609 : vector<1x32xf32> to vector<9x32xf32>
    %631 = arith.addf %629, %630 : vector<9x32xf32>
    %c1_247 = arith.constant 1 : index
    %c0_248 = arith.constant 0 : index
    %c0_249 = arith.constant 0 : index
    %632 = vector.load %arg24[%c1_247, %c0_248, %c0_249] : memref<2x4x32xf32, #tpu.memory_space<vmem>>, vector<1x4x32xf32>
    %633 = vector.shape_cast %632 : vector<1x4x32xf32> to vector<4x32xf32>
    %c1_250 = arith.constant 1 : index
    %c0_251 = arith.constant 0 : index
    %c0_252 = arith.constant 0 : index
    %634 = vector.load %arg18[%c1_250, %c0_251, %c0_252] : memref<2x32x128xbf16, #tpu.memory_space<vmem>>, vector<1x32x128xbf16>
    %635 = vector.shape_cast %634 : vector<1x32x128xbf16> to vector<32x128xbf16>
    %c1_253 = arith.constant 1 : index
    %c0_254 = arith.constant 0 : index
    %c0_255 = arith.constant 0 : index
    %636 = vector.load %arg19[%c1_253, %c0_254, %c0_255] : memref<2x1x128xf32, #tpu.memory_space<vmem>>, vector<1x1x128xf32>
    %637 = vector.shape_cast %636 : vector<1x1x128xf32> to vector<1x128xf32>
    %638 = vector.extract_strided_slice %635 {offsets = [0, 0], sizes = [32, 96], strides = [1, 1]} : vector<32x128xbf16> to vector<32x96xbf16>
    %639 = arith.truncf %631 : vector<9x32xf32> to vector<9x32xbf16>
    %cst_256 = arith.constant dense<0.000000e+00> : vector<9x96xf32>
    %640 = tpu.matmul %639, %638, %cst_256 {dimension_numbers = #tpu.dot_dimension_numbers<[1], [0], [0], [1], [0, 0, 1, 1], [], []>} : vector<9x32xbf16>, vector<32x96xbf16>, vector<9x96xf32> -> vector<9x96xf32>
    %641 = vector.extract_strided_slice %637 {offsets = [0, 0], sizes = [1, 96], strides = [1, 1]} : vector<1x128xf32> to vector<1x96xf32>
    %642 = vector.broadcast %641 : vector<1x96xf32> to vector<9x96xf32>
    %643 = arith.addf %640, %642 : vector<9x96xf32>
    %644 = vector.extract_strided_slice %643 {offsets = [0, 0], sizes = [9, 32], strides = [1, 1]} : vector<9x96xf32> to vector<9x32xf32>
    %645 = vector.extract_strided_slice %643 {offsets = [0, 32], sizes = [9, 32], strides = [1, 1]} : vector<9x96xf32> to vector<9x32xf32>
    %646 = vector.extract_strided_slice %643 {offsets = [0, 64], sizes = [9, 32], strides = [1, 1]} : vector<9x96xf32> to vector<9x32xf32>
    %647 = vector.extract_strided_slice %635 {offsets = [0, 96], sizes = [32, 32], strides = [1, 1]} : vector<32x128xbf16> to vector<32x32xbf16>
    %648 = vector.extract_strided_slice %637 {offsets = [0, 96], sizes = [1, 32], strides = [1, 1]} : vector<1x128xf32> to vector<1x32xf32>
    %649 = vector.extract_strided_slice %644 {offsets = [0, 0], sizes = [9, 16], strides = [1, 1]} : vector<9x32xf32> to vector<9x16xf32>
    %650 = vector.extract_strided_slice %645 {offsets = [0, 0], sizes = [9, 16], strides = [1, 1]} : vector<9x32xf32> to vector<9x16xf32>
    %651 = vector.extract_strided_slice %646 {offsets = [0, 0], sizes = [9, 16], strides = [1, 1]} : vector<9x32xf32> to vector<9x16xf32>
    %cst_257 = arith.constant 2.500000e-01 : f32
    %652 = vector.broadcast %cst_257 : f32 to vector<9x16xf32>
    %653 = arith.mulf %649, %652 : vector<9x16xf32>
    %cst_258 = arith.constant dense<0.000000e+00> : vector<9x9xf32>
    %654 = tpu.matmul %653, %650, %cst_258 {dimension_numbers = #tpu.dot_dimension_numbers<[1], [1], [0], [0], [0, 0, 1, 0], [], []>} : vector<9x16xf32>, vector<9x16xf32>, vector<9x9xf32> -> vector<9x9xf32>
    %cst_259 = arith.constant dense<0xFF800000> : vector<9xf32>
    %655 = vector.multi_reduction <maximumf>, %654, %cst_259 [1] : vector<9x9xf32> to vector<9xf32>
    %656 = vector.shape_cast %655 : vector<9xf32> to vector<9x1xf32>
    %657 = vector.broadcast %656 : vector<9x1xf32> to vector<9x9xf32>
    %658 = arith.subf %654, %657 : vector<9x9xf32>
    %659 = math.exp %658 : vector<9x9xf32>
    %cst_260 = arith.constant dense<0.000000e+00> : vector<9xf32>
    %660 = vector.multi_reduction <add>, %659, %cst_260 [1] : vector<9x9xf32> to vector<9xf32>
    %661 = vector.shape_cast %660 : vector<9xf32> to vector<9x1xf32>
    %662 = tpu.reciprocal %661 {approx = true} : vector<9x1xf32> -> vector<9x1xf32>
    %663 = vector.broadcast %662 : vector<9x1xf32> to vector<9x9xf32>
    %664 = arith.mulf %659, %663 : vector<9x9xf32>
    %cst_261 = arith.constant dense<0.000000e+00> : vector<9x16xf32>
    %665 = tpu.matmul %664, %651, %cst_261 {dimension_numbers = #tpu.dot_dimension_numbers<[1], [0], [0], [1], [0, 0, 1, 1], [], []>} : vector<9x9xf32>, vector<9x16xf32>, vector<9x16xf32> -> vector<9x16xf32>
    %666 = vector.extract_strided_slice %644 {offsets = [0, 16], sizes = [9, 16], strides = [1, 1]} : vector<9x32xf32> to vector<9x16xf32>
    %667 = vector.extract_strided_slice %645 {offsets = [0, 16], sizes = [9, 16], strides = [1, 1]} : vector<9x32xf32> to vector<9x16xf32>
    %668 = vector.extract_strided_slice %646 {offsets = [0, 16], sizes = [9, 16], strides = [1, 1]} : vector<9x32xf32> to vector<9x16xf32>
    %cst_262 = arith.constant 2.500000e-01 : f32
    %669 = vector.broadcast %cst_262 : f32 to vector<9x16xf32>
    %670 = arith.mulf %666, %669 : vector<9x16xf32>
    %cst_263 = arith.constant dense<0.000000e+00> : vector<9x9xf32>
    %671 = tpu.matmul %670, %667, %cst_263 {dimension_numbers = #tpu.dot_dimension_numbers<[1], [1], [0], [0], [0, 0, 1, 0], [], []>} : vector<9x16xf32>, vector<9x16xf32>, vector<9x9xf32> -> vector<9x9xf32>
    %cst_264 = arith.constant dense<0xFF800000> : vector<9xf32>
    %672 = vector.multi_reduction <maximumf>, %671, %cst_264 [1] : vector<9x9xf32> to vector<9xf32>
    %673 = vector.shape_cast %672 : vector<9xf32> to vector<9x1xf32>
    %674 = vector.broadcast %673 : vector<9x1xf32> to vector<9x9xf32>
    %675 = arith.subf %671, %674 : vector<9x9xf32>
    %676 = math.exp %675 : vector<9x9xf32>
    %cst_265 = arith.constant dense<0.000000e+00> : vector<9xf32>
    %677 = vector.multi_reduction <add>, %676, %cst_265 [1] : vector<9x9xf32> to vector<9xf32>
    %678 = vector.shape_cast %677 : vector<9xf32> to vector<9x1xf32>
    %679 = tpu.reciprocal %678 {approx = true} : vector<9x1xf32> -> vector<9x1xf32>
    %680 = vector.broadcast %679 : vector<9x1xf32> to vector<9x9xf32>
    %681 = arith.mulf %676, %680 : vector<9x9xf32>
    %cst_266 = arith.constant dense<0.000000e+00> : vector<9x16xf32>
    %682 = tpu.matmul %681, %668, %cst_266 {dimension_numbers = #tpu.dot_dimension_numbers<[1], [0], [0], [1], [0, 0, 1, 1], [], []>} : vector<9x9xf32>, vector<9x16xf32>, vector<9x16xf32> -> vector<9x16xf32>
    %683 = tpu.concatenate %665, %682 in 1 : vector<9x16xf32>, vector<9x16xf32> -> vector<9x32xf32>
    %684 = arith.truncf %683 : vector<9x32xf32> to vector<9x32xbf16>
    %cst_267 = arith.constant dense<0.000000e+00> : vector<9x32xf32>
    %685 = tpu.matmul %684, %647, %cst_267 {dimension_numbers = #tpu.dot_dimension_numbers<[1], [0], [0], [1], [0, 0, 1, 1], [], []>} : vector<9x32xbf16>, vector<32x32xbf16>, vector<9x32xf32> -> vector<9x32xf32>
    %686 = vector.broadcast %648 : vector<1x32xf32> to vector<9x32xf32>
    %687 = arith.addf %685, %686 : vector<9x32xf32>
    %688 = arith.addf %631, %687 : vector<9x32xf32>
    %689 = vector.extract_strided_slice %633 {offsets = [0, 0], sizes = [1, 32], strides = [1, 1]} : vector<4x32xf32> to vector<1x32xf32>
    %690 = vector.extract_strided_slice %633 {offsets = [1, 0], sizes = [1, 32], strides = [1, 1]} : vector<4x32xf32> to vector<1x32xf32>
    %cst_268 = arith.constant dense<0.000000e+00> : vector<9xf32>
    %691 = vector.multi_reduction <add>, %688, %cst_268 [1] : vector<9x32xf32> to vector<9xf32>
    %692 = vector.shape_cast %691 : vector<9xf32> to vector<9x1xf32>
    %cst_269 = arith.constant 3.200000e+01 : f32
    %693 = vector.broadcast %cst_269 : f32 to vector<9x1xf32>
    %694 = arith.divf %692, %693 : vector<9x1xf32>
    %695 = vector.broadcast %694 : vector<9x1xf32> to vector<9x32xf32>
    %696 = arith.subf %688, %695 : vector<9x32xf32>
    %697 = arith.mulf %696, %696 : vector<9x32xf32>
    %cst_270 = arith.constant dense<0.000000e+00> : vector<9xf32>
    %698 = vector.multi_reduction <add>, %697, %cst_270 [1] : vector<9x32xf32> to vector<9xf32>
    %699 = vector.shape_cast %698 : vector<9xf32> to vector<9x1xf32>
    %cst_271 = arith.constant 3.200000e+01 : f32
    %700 = vector.broadcast %cst_271 : f32 to vector<9x1xf32>
    %701 = arith.divf %699, %700 : vector<9x1xf32>
    %702 = vector.broadcast %694 : vector<9x1xf32> to vector<9x32xf32>
    %703 = arith.subf %688, %702 : vector<9x32xf32>
    %cst_272 = arith.constant 9.99999974E-6 : f32
    %704 = vector.broadcast %cst_272 : f32 to vector<9x1xf32>
    %705 = arith.addf %701, %704 : vector<9x1xf32>
    %706 = math.rsqrt %705 : vector<9x1xf32>
    %707 = vector.broadcast %706 : vector<9x1xf32> to vector<9x32xf32>
    %708 = arith.mulf %703, %707 : vector<9x32xf32>
    %709 = vector.broadcast %689 : vector<1x32xf32> to vector<9x32xf32>
    %710 = arith.mulf %708, %709 : vector<9x32xf32>
    %711 = vector.broadcast %690 : vector<1x32xf32> to vector<9x32xf32>
    %712 = arith.addf %710, %711 : vector<9x32xf32>
    %c1_273 = arith.constant 1 : index
    %c0_274 = arith.constant 0 : index
    %c0_275 = arith.constant 0 : index
    %713 = vector.load %arg20[%c1_273, %c0_274, %c0_275] : memref<2x32x512xbf16, #tpu.memory_space<vmem>>, vector<1x32x512xbf16>
    %714 = vector.shape_cast %713 : vector<1x32x512xbf16> to vector<32x512xbf16>
    %715 = arith.truncf %712 : vector<9x32xf32> to vector<9x32xbf16>
    %cst_276 = arith.constant dense<0.000000e+00> : vector<9x512xf32>
    %716 = tpu.matmul %715, %714, %cst_276 {dimension_numbers = #tpu.dot_dimension_numbers<[1], [0], [0], [1], [0, 0, 1, 1], [], []>} : vector<9x32xbf16>, vector<32x512xbf16>, vector<9x512xf32> -> vector<9x512xf32>
    %c1_277 = arith.constant 1 : index
    %c0_278 = arith.constant 0 : index
    %c0_279 = arith.constant 0 : index
    %717 = vector.load %arg21[%c1_277, %c0_278, %c0_279] : memref<2x1x512xf32, #tpu.memory_space<vmem>>, vector<1x1x512xf32>
    %718 = vector.shape_cast %717 : vector<1x1x512xf32> to vector<1x512xf32>
    %719 = vector.broadcast %718 : vector<1x512xf32> to vector<9x512xf32>
    %720 = arith.addf %716, %719 : vector<9x512xf32>
    %cst_280 = arith.constant 0.000000e+00 : f32
    %721 = vector.broadcast %cst_280 : f32 to vector<9x512xf32>
    %722 = arith.maximumf %720, %721 : vector<9x512xf32>
    %c1_281 = arith.constant 1 : index
    %c0_282 = arith.constant 0 : index
    %c0_283 = arith.constant 0 : index
    %723 = vector.load %arg22[%c1_281, %c0_282, %c0_283] : memref<2x512x32xbf16, #tpu.memory_space<vmem>>, vector<1x512x32xbf16>
    %724 = vector.shape_cast %723 : vector<1x512x32xbf16> to vector<512x32xbf16>
    %725 = arith.truncf %722 : vector<9x512xf32> to vector<9x512xbf16>
    %cst_284 = arith.constant dense<0.000000e+00> : vector<9x32xf32>
    %726 = tpu.matmul %725, %724, %cst_284 {dimension_numbers = #tpu.dot_dimension_numbers<[1], [0], [0], [1], [0, 0, 1, 1], [], []>} : vector<9x512xbf16>, vector<512x32xbf16>, vector<9x32xf32> -> vector<9x32xf32>
    %c1_285 = arith.constant 1 : index
    %c0_286 = arith.constant 0 : index
    %c0_287 = arith.constant 0 : index
    %727 = vector.load %arg23[%c1_285, %c0_286, %c0_287] : memref<2x1x32xf32, #tpu.memory_space<vmem>>, vector<1x1x32xf32>
    %728 = vector.shape_cast %727 : vector<1x1x32xf32> to vector<1x32xf32>
    %729 = vector.broadcast %728 : vector<1x32xf32> to vector<9x32xf32>
    %730 = arith.addf %726, %729 : vector<9x32xf32>
    %731 = arith.addf %712, %730 : vector<9x32xf32>
    %732 = vector.extract_strided_slice %633 {offsets = [2, 0], sizes = [1, 32], strides = [1, 1]} : vector<4x32xf32> to vector<1x32xf32>
    %733 = vector.extract_strided_slice %633 {offsets = [3, 0], sizes = [1, 32], strides = [1, 1]} : vector<4x32xf32> to vector<1x32xf32>
    %cst_288 = arith.constant dense<0.000000e+00> : vector<9xf32>
    %734 = vector.multi_reduction <add>, %731, %cst_288 [1] : vector<9x32xf32> to vector<9xf32>
    %735 = vector.shape_cast %734 : vector<9xf32> to vector<9x1xf32>
    %cst_289 = arith.constant 3.200000e+01 : f32
    %736 = vector.broadcast %cst_289 : f32 to vector<9x1xf32>
    %737 = arith.divf %735, %736 : vector<9x1xf32>
    %738 = vector.broadcast %737 : vector<9x1xf32> to vector<9x32xf32>
    %739 = arith.subf %731, %738 : vector<9x32xf32>
    %740 = arith.mulf %739, %739 : vector<9x32xf32>
    %cst_290 = arith.constant dense<0.000000e+00> : vector<9xf32>
    %741 = vector.multi_reduction <add>, %740, %cst_290 [1] : vector<9x32xf32> to vector<9xf32>
    %742 = vector.shape_cast %741 : vector<9xf32> to vector<9x1xf32>
    %cst_291 = arith.constant 3.200000e+01 : f32
    %743 = vector.broadcast %cst_291 : f32 to vector<9x1xf32>
    %744 = arith.divf %742, %743 : vector<9x1xf32>
    %745 = vector.broadcast %737 : vector<9x1xf32> to vector<9x32xf32>
    %746 = arith.subf %731, %745 : vector<9x32xf32>
    %cst_292 = arith.constant 9.99999974E-6 : f32
    %747 = vector.broadcast %cst_292 : f32 to vector<9x1xf32>
    %748 = arith.addf %744, %747 : vector<9x1xf32>
    %749 = math.rsqrt %748 : vector<9x1xf32>
    %750 = vector.broadcast %749 : vector<9x1xf32> to vector<9x32xf32>
    %751 = arith.mulf %746, %750 : vector<9x32xf32>
    %752 = vector.broadcast %732 : vector<1x32xf32> to vector<9x32xf32>
    %753 = arith.mulf %751, %752 : vector<9x32xf32>
    %754 = vector.broadcast %733 : vector<1x32xf32> to vector<9x32xf32>
    %755 = arith.addf %753, %754 : vector<9x32xf32>
    %c0_293 = arith.constant 0 : index
    %c0_294 = arith.constant 0 : index
    %756 = vector.load %arg34[%c0_293, %c0_294] : memref<4x32xf32, #tpu.memory_space<vmem>>, vector<4x32xf32>
    %757 = vector.extract_strided_slice %756 {offsets = [0, 0], sizes = [1, 32], strides = [1, 1]} : vector<4x32xf32> to vector<1x32xf32>
    %758 = vector.extract_strided_slice %756 {offsets = [1, 0], sizes = [1, 32], strides = [1, 1]} : vector<4x32xf32> to vector<1x32xf32>
    %cst_295 = arith.constant dense<0.000000e+00> : vector<9xf32>
    %759 = vector.multi_reduction <add>, %755, %cst_295 [1] : vector<9x32xf32> to vector<9xf32>
    %760 = vector.shape_cast %759 : vector<9xf32> to vector<9x1xf32>
    %cst_296 = arith.constant 3.200000e+01 : f32
    %761 = vector.broadcast %cst_296 : f32 to vector<9x1xf32>
    %762 = arith.divf %760, %761 : vector<9x1xf32>
    %763 = vector.broadcast %762 : vector<9x1xf32> to vector<9x32xf32>
    %764 = arith.subf %755, %763 : vector<9x32xf32>
    %765 = arith.mulf %764, %764 : vector<9x32xf32>
    %cst_297 = arith.constant dense<0.000000e+00> : vector<9xf32>
    %766 = vector.multi_reduction <add>, %765, %cst_297 [1] : vector<9x32xf32> to vector<9xf32>
    %767 = vector.shape_cast %766 : vector<9xf32> to vector<9x1xf32>
    %cst_298 = arith.constant 3.200000e+01 : f32
    %768 = vector.broadcast %cst_298 : f32 to vector<9x1xf32>
    %769 = arith.divf %767, %768 : vector<9x1xf32>
    %770 = vector.broadcast %762 : vector<9x1xf32> to vector<9x32xf32>
    %771 = arith.subf %755, %770 : vector<9x32xf32>
    %cst_299 = arith.constant 9.99999974E-6 : f32
    %772 = vector.broadcast %cst_299 : f32 to vector<9x1xf32>
    %773 = arith.addf %769, %772 : vector<9x1xf32>
    %774 = math.rsqrt %773 : vector<9x1xf32>
    %775 = vector.broadcast %774 : vector<9x1xf32> to vector<9x32xf32>
    %776 = arith.mulf %771, %775 : vector<9x32xf32>
    %777 = vector.broadcast %757 : vector<1x32xf32> to vector<9x32xf32>
    %778 = arith.mulf %776, %777 : vector<9x32xf32>
    %779 = vector.broadcast %758 : vector<1x32xf32> to vector<9x32xf32>
    %780 = arith.addf %778, %779 : vector<9x32xf32>
    %c0_300 = arith.constant 0 : index
    %c0_301 = arith.constant 0 : index
    %c0_302 = arith.constant 0 : index
    %781 = vector.load %arg33[%c0_300, %c0_301, %c0_302] : memref<2x6x32xf32, #tpu.memory_space<vmem>>, vector<1x6x32xf32>
    %782 = vector.shape_cast %781 : vector<1x6x32xf32> to vector<6x32xf32>
    %c0_303 = arith.constant 0 : index
    %c0_304 = arith.constant 0 : index
    %c0_305 = arith.constant 0 : index
    %783 = vector.load %arg25[%c0_303, %c0_304, %c0_305] : memref<2x32x128xbf16, #tpu.memory_space<vmem>>, vector<1x32x128xbf16>
    %784 = vector.shape_cast %783 : vector<1x32x128xbf16> to vector<32x128xbf16>
    %c0_306 = arith.constant 0 : index
    %c0_307 = arith.constant 0 : index
    %c0_308 = arith.constant 0 : index
    %785 = vector.load %arg26[%c0_306, %c0_307, %c0_308] : memref<2x1x128xf32, #tpu.memory_space<vmem>>, vector<1x1x128xf32>
    %786 = vector.shape_cast %785 : vector<1x1x128xf32> to vector<1x128xf32>
    %787 = vector.extract_strided_slice %784 {offsets = [0, 0], sizes = [32, 96], strides = [1, 1]} : vector<32x128xbf16> to vector<32x96xbf16>
    %788 = arith.truncf %507 : vector<3x32xf32> to vector<3x32xbf16>
    %cst_309 = arith.constant dense<0.000000e+00> : vector<3x96xf32>
    %789 = tpu.matmul %788, %787, %cst_309 {dimension_numbers = #tpu.dot_dimension_numbers<[1], [0], [0], [1], [0, 0, 1, 1], [], []>} : vector<3x32xbf16>, vector<32x96xbf16>, vector<3x96xf32> -> vector<3x96xf32>
    %790 = vector.extract_strided_slice %786 {offsets = [0, 0], sizes = [1, 96], strides = [1, 1]} : vector<1x128xf32> to vector<1x96xf32>
    %791 = vector.broadcast %790 : vector<1x96xf32> to vector<3x96xf32>
    %792 = arith.addf %789, %791 : vector<3x96xf32>
    %793 = vector.extract_strided_slice %792 {offsets = [0, 0], sizes = [3, 32], strides = [1, 1]} : vector<3x96xf32> to vector<3x32xf32>
    %794 = vector.extract_strided_slice %792 {offsets = [0, 32], sizes = [3, 32], strides = [1, 1]} : vector<3x96xf32> to vector<3x32xf32>
    %795 = vector.extract_strided_slice %792 {offsets = [0, 64], sizes = [3, 32], strides = [1, 1]} : vector<3x96xf32> to vector<3x32xf32>
    %796 = vector.extract_strided_slice %784 {offsets = [0, 96], sizes = [32, 32], strides = [1, 1]} : vector<32x128xbf16> to vector<32x32xbf16>
    %797 = vector.extract_strided_slice %786 {offsets = [0, 96], sizes = [1, 32], strides = [1, 1]} : vector<1x128xf32> to vector<1x32xf32>
    %798 = vector.extract_strided_slice %793 {offsets = [0, 0], sizes = [3, 16], strides = [1, 1]} : vector<3x32xf32> to vector<3x16xf32>
    %799 = vector.extract_strided_slice %794 {offsets = [0, 0], sizes = [3, 16], strides = [1, 1]} : vector<3x32xf32> to vector<3x16xf32>
    %800 = vector.extract_strided_slice %795 {offsets = [0, 0], sizes = [3, 16], strides = [1, 1]} : vector<3x32xf32> to vector<3x16xf32>
    %cst_310 = arith.constant 2.500000e-01 : f32
    %801 = vector.broadcast %cst_310 : f32 to vector<3x16xf32>
    %802 = arith.mulf %798, %801 : vector<3x16xf32>
    %cst_311 = arith.constant dense<0.000000e+00> : vector<3x3xf32>
    %803 = tpu.matmul %802, %799, %cst_311 {dimension_numbers = #tpu.dot_dimension_numbers<[1], [1], [0], [0], [0, 0, 1, 0], [], []>} : vector<3x16xf32>, vector<3x16xf32>, vector<3x3xf32> -> vector<3x3xf32>
    %cst_312 = arith.constant dense<0xFF800000> : vector<3xf32>
    %804 = vector.multi_reduction <maximumf>, %803, %cst_312 [1] : vector<3x3xf32> to vector<3xf32>
    %805 = vector.shape_cast %804 : vector<3xf32> to vector<3x1xf32>
    %806 = vector.broadcast %805 : vector<3x1xf32> to vector<3x3xf32>
    %807 = arith.subf %803, %806 : vector<3x3xf32>
    %808 = math.exp %807 : vector<3x3xf32>
    %cst_313 = arith.constant dense<0.000000e+00> : vector<3xf32>
    %809 = vector.multi_reduction <add>, %808, %cst_313 [1] : vector<3x3xf32> to vector<3xf32>
    %810 = vector.shape_cast %809 : vector<3xf32> to vector<3x1xf32>
    %811 = tpu.reciprocal %810 {approx = true} : vector<3x1xf32> -> vector<3x1xf32>
    %812 = vector.broadcast %811 : vector<3x1xf32> to vector<3x3xf32>
    %813 = arith.mulf %808, %812 : vector<3x3xf32>
    %cst_314 = arith.constant dense<0.000000e+00> : vector<3x16xf32>
    %814 = tpu.matmul %813, %800, %cst_314 {dimension_numbers = #tpu.dot_dimension_numbers<[1], [0], [0], [1], [0, 0, 1, 1], [], []>} : vector<3x3xf32>, vector<3x16xf32>, vector<3x16xf32> -> vector<3x16xf32>
    %815 = vector.extract_strided_slice %793 {offsets = [0, 16], sizes = [3, 16], strides = [1, 1]} : vector<3x32xf32> to vector<3x16xf32>
    %816 = vector.extract_strided_slice %794 {offsets = [0, 16], sizes = [3, 16], strides = [1, 1]} : vector<3x32xf32> to vector<3x16xf32>
    %817 = vector.extract_strided_slice %795 {offsets = [0, 16], sizes = [3, 16], strides = [1, 1]} : vector<3x32xf32> to vector<3x16xf32>
    %cst_315 = arith.constant 2.500000e-01 : f32
    %818 = vector.broadcast %cst_315 : f32 to vector<3x16xf32>
    %819 = arith.mulf %815, %818 : vector<3x16xf32>
    %cst_316 = arith.constant dense<0.000000e+00> : vector<3x3xf32>
    %820 = tpu.matmul %819, %816, %cst_316 {dimension_numbers = #tpu.dot_dimension_numbers<[1], [1], [0], [0], [0, 0, 1, 0], [], []>} : vector<3x16xf32>, vector<3x16xf32>, vector<3x3xf32> -> vector<3x3xf32>
    %cst_317 = arith.constant dense<0xFF800000> : vector<3xf32>
    %821 = vector.multi_reduction <maximumf>, %820, %cst_317 [1] : vector<3x3xf32> to vector<3xf32>
    %822 = vector.shape_cast %821 : vector<3xf32> to vector<3x1xf32>
    %823 = vector.broadcast %822 : vector<3x1xf32> to vector<3x3xf32>
    %824 = arith.subf %820, %823 : vector<3x3xf32>
    %825 = math.exp %824 : vector<3x3xf32>
    %cst_318 = arith.constant dense<0.000000e+00> : vector<3xf32>
    %826 = vector.multi_reduction <add>, %825, %cst_318 [1] : vector<3x3xf32> to vector<3xf32>
    %827 = vector.shape_cast %826 : vector<3xf32> to vector<3x1xf32>
    %828 = tpu.reciprocal %827 {approx = true} : vector<3x1xf32> -> vector<3x1xf32>
    %829 = vector.broadcast %828 : vector<3x1xf32> to vector<3x3xf32>
    %830 = arith.mulf %825, %829 : vector<3x3xf32>
    %cst_319 = arith.constant dense<0.000000e+00> : vector<3x16xf32>
    %831 = tpu.matmul %830, %817, %cst_319 {dimension_numbers = #tpu.dot_dimension_numbers<[1], [0], [0], [1], [0, 0, 1, 1], [], []>} : vector<3x3xf32>, vector<3x16xf32>, vector<3x16xf32> -> vector<3x16xf32>
    %832 = tpu.concatenate %814, %831 in 1 : vector<3x16xf32>, vector<3x16xf32> -> vector<3x32xf32>
    %833 = arith.truncf %832 : vector<3x32xf32> to vector<3x32xbf16>
    %cst_320 = arith.constant dense<0.000000e+00> : vector<3x32xf32>
    %834 = tpu.matmul %833, %796, %cst_320 {dimension_numbers = #tpu.dot_dimension_numbers<[1], [0], [0], [1], [0, 0, 1, 1], [], []>} : vector<3x32xbf16>, vector<32x32xbf16>, vector<3x32xf32> -> vector<3x32xf32>
    %835 = vector.broadcast %797 : vector<1x32xf32> to vector<3x32xf32>
    %836 = arith.addf %834, %835 : vector<3x32xf32>
    %837 = arith.addf %507, %836 : vector<3x32xf32>
    %838 = vector.extract_strided_slice %782 {offsets = [0, 0], sizes = [1, 32], strides = [1, 1]} : vector<6x32xf32> to vector<1x32xf32>
    %839 = vector.extract_strided_slice %782 {offsets = [1, 0], sizes = [1, 32], strides = [1, 1]} : vector<6x32xf32> to vector<1x32xf32>
    %cst_321 = arith.constant dense<0.000000e+00> : vector<3xf32>
    %840 = vector.multi_reduction <add>, %837, %cst_321 [1] : vector<3x32xf32> to vector<3xf32>
    %841 = vector.shape_cast %840 : vector<3xf32> to vector<3x1xf32>
    %cst_322 = arith.constant 3.200000e+01 : f32
    %842 = vector.broadcast %cst_322 : f32 to vector<3x1xf32>
    %843 = arith.divf %841, %842 : vector<3x1xf32>
    %844 = vector.broadcast %843 : vector<3x1xf32> to vector<3x32xf32>
    %845 = arith.subf %837, %844 : vector<3x32xf32>
    %846 = arith.mulf %845, %845 : vector<3x32xf32>
    %cst_323 = arith.constant dense<0.000000e+00> : vector<3xf32>
    %847 = vector.multi_reduction <add>, %846, %cst_323 [1] : vector<3x32xf32> to vector<3xf32>
    %848 = vector.shape_cast %847 : vector<3xf32> to vector<3x1xf32>
    %cst_324 = arith.constant 3.200000e+01 : f32
    %849 = vector.broadcast %cst_324 : f32 to vector<3x1xf32>
    %850 = arith.divf %848, %849 : vector<3x1xf32>
    %851 = vector.broadcast %843 : vector<3x1xf32> to vector<3x32xf32>
    %852 = arith.subf %837, %851 : vector<3x32xf32>
    %cst_325 = arith.constant 9.99999974E-6 : f32
    %853 = vector.broadcast %cst_325 : f32 to vector<3x1xf32>
    %854 = arith.addf %850, %853 : vector<3x1xf32>
    %855 = math.rsqrt %854 : vector<3x1xf32>
    %856 = vector.broadcast %855 : vector<3x1xf32> to vector<3x32xf32>
    %857 = arith.mulf %852, %856 : vector<3x32xf32>
    %858 = vector.broadcast %838 : vector<1x32xf32> to vector<3x32xf32>
    %859 = arith.mulf %857, %858 : vector<3x32xf32>
    %860 = vector.broadcast %839 : vector<1x32xf32> to vector<3x32xf32>
    %861 = arith.addf %859, %860 : vector<3x32xf32>
    %c0_326 = arith.constant 0 : index
    %c0_327 = arith.constant 0 : index
    %c0_328 = arith.constant 0 : index
    %862 = vector.load %arg27[%c0_326, %c0_327, %c0_328] : memref<2x32x128xbf16, #tpu.memory_space<vmem>>, vector<1x32x128xbf16>
    %863 = vector.shape_cast %862 : vector<1x32x128xbf16> to vector<32x128xbf16>
    %c0_329 = arith.constant 0 : index
    %c0_330 = arith.constant 0 : index
    %c0_331 = arith.constant 0 : index
    %864 = vector.load %arg28[%c0_329, %c0_330, %c0_331] : memref<2x1x128xf32, #tpu.memory_space<vmem>>, vector<1x1x128xf32>
    %865 = vector.shape_cast %864 : vector<1x1x128xf32> to vector<1x128xf32>
    %866 = vector.extract_strided_slice %863 {offsets = [0, 0], sizes = [32, 32], strides = [1, 1]} : vector<32x128xbf16> to vector<32x32xbf16>
    %867 = arith.truncf %861 : vector<3x32xf32> to vector<3x32xbf16>
    %cst_332 = arith.constant dense<0.000000e+00> : vector<3x32xf32>
    %868 = tpu.matmul %867, %866, %cst_332 {dimension_numbers = #tpu.dot_dimension_numbers<[1], [0], [0], [1], [0, 0, 1, 1], [], []>} : vector<3x32xbf16>, vector<32x32xbf16>, vector<3x32xf32> -> vector<3x32xf32>
    %869 = vector.extract_strided_slice %865 {offsets = [0, 0], sizes = [1, 32], strides = [1, 1]} : vector<1x128xf32> to vector<1x32xf32>
    %870 = vector.broadcast %869 : vector<1x32xf32> to vector<3x32xf32>
    %871 = arith.addf %868, %870 : vector<3x32xf32>
    %872 = vector.extract_strided_slice %863 {offsets = [0, 32], sizes = [32, 64], strides = [1, 1]} : vector<32x128xbf16> to vector<32x64xbf16>
    %873 = arith.truncf %780 : vector<9x32xf32> to vector<9x32xbf16>
    %cst_333 = arith.constant dense<0.000000e+00> : vector<9x64xf32>
    %874 = tpu.matmul %873, %872, %cst_333 {dimension_numbers = #tpu.dot_dimension_numbers<[1], [0], [0], [1], [0, 0, 1, 1], [], []>} : vector<9x32xbf16>, vector<32x64xbf16>, vector<9x64xf32> -> vector<9x64xf32>
    %875 = vector.extract_strided_slice %865 {offsets = [0, 32], sizes = [1, 64], strides = [1, 1]} : vector<1x128xf32> to vector<1x64xf32>
    %876 = vector.broadcast %875 : vector<1x64xf32> to vector<9x64xf32>
    %877 = arith.addf %874, %876 : vector<9x64xf32>
    %878 = vector.extract_strided_slice %877 {offsets = [0, 0], sizes = [9, 32], strides = [1, 1]} : vector<9x64xf32> to vector<9x32xf32>
    %879 = vector.extract_strided_slice %877 {offsets = [0, 32], sizes = [9, 32], strides = [1, 1]} : vector<9x64xf32> to vector<9x32xf32>
    %880 = vector.extract_strided_slice %863 {offsets = [0, 96], sizes = [32, 32], strides = [1, 1]} : vector<32x128xbf16> to vector<32x32xbf16>
    %881 = vector.extract_strided_slice %865 {offsets = [0, 96], sizes = [1, 32], strides = [1, 1]} : vector<1x128xf32> to vector<1x32xf32>
    %882 = vector.extract_strided_slice %871 {offsets = [0, 0], sizes = [3, 16], strides = [1, 1]} : vector<3x32xf32> to vector<3x16xf32>
    %883 = vector.extract_strided_slice %878 {offsets = [0, 0], sizes = [9, 16], strides = [1, 1]} : vector<9x32xf32> to vector<9x16xf32>
    %884 = vector.extract_strided_slice %879 {offsets = [0, 0], sizes = [9, 16], strides = [1, 1]} : vector<9x32xf32> to vector<9x16xf32>
    %cst_334 = arith.constant 2.500000e-01 : f32
    %885 = vector.broadcast %cst_334 : f32 to vector<3x16xf32>
    %886 = arith.mulf %882, %885 : vector<3x16xf32>
    %cst_335 = arith.constant dense<0.000000e+00> : vector<3x9xf32>
    %887 = tpu.matmul %886, %883, %cst_335 {dimension_numbers = #tpu.dot_dimension_numbers<[1], [1], [0], [0], [0, 0, 1, 0], [], []>} : vector<3x16xf32>, vector<9x16xf32>, vector<3x9xf32> -> vector<3x9xf32>
    %cst_336 = arith.constant dense<0xFF800000> : vector<3xf32>
    %888 = vector.multi_reduction <maximumf>, %887, %cst_336 [1] : vector<3x9xf32> to vector<3xf32>
    %889 = vector.shape_cast %888 : vector<3xf32> to vector<3x1xf32>
    %890 = vector.broadcast %889 : vector<3x1xf32> to vector<3x9xf32>
    %891 = arith.subf %887, %890 : vector<3x9xf32>
    %892 = math.exp %891 : vector<3x9xf32>
    %cst_337 = arith.constant dense<0.000000e+00> : vector<3xf32>
    %893 = vector.multi_reduction <add>, %892, %cst_337 [1] : vector<3x9xf32> to vector<3xf32>
    %894 = vector.shape_cast %893 : vector<3xf32> to vector<3x1xf32>
    %895 = tpu.reciprocal %894 {approx = true} : vector<3x1xf32> -> vector<3x1xf32>
    %896 = vector.broadcast %895 : vector<3x1xf32> to vector<3x9xf32>
    %897 = arith.mulf %892, %896 : vector<3x9xf32>
    %cst_338 = arith.constant dense<0.000000e+00> : vector<3x16xf32>
    %898 = tpu.matmul %897, %884, %cst_338 {dimension_numbers = #tpu.dot_dimension_numbers<[1], [0], [0], [1], [0, 0, 1, 1], [], []>} : vector<3x9xf32>, vector<9x16xf32>, vector<3x16xf32> -> vector<3x16xf32>
    %899 = vector.extract_strided_slice %871 {offsets = [0, 16], sizes = [3, 16], strides = [1, 1]} : vector<3x32xf32> to vector<3x16xf32>
    %900 = vector.extract_strided_slice %878 {offsets = [0, 16], sizes = [9, 16], strides = [1, 1]} : vector<9x32xf32> to vector<9x16xf32>
    %901 = vector.extract_strided_slice %879 {offsets = [0, 16], sizes = [9, 16], strides = [1, 1]} : vector<9x32xf32> to vector<9x16xf32>
    %cst_339 = arith.constant 2.500000e-01 : f32
    %902 = vector.broadcast %cst_339 : f32 to vector<3x16xf32>
    %903 = arith.mulf %899, %902 : vector<3x16xf32>
    %cst_340 = arith.constant dense<0.000000e+00> : vector<3x9xf32>
    %904 = tpu.matmul %903, %900, %cst_340 {dimension_numbers = #tpu.dot_dimension_numbers<[1], [1], [0], [0], [0, 0, 1, 0], [], []>} : vector<3x16xf32>, vector<9x16xf32>, vector<3x9xf32> -> vector<3x9xf32>
    %cst_341 = arith.constant dense<0xFF800000> : vector<3xf32>
    %905 = vector.multi_reduction <maximumf>, %904, %cst_341 [1] : vector<3x9xf32> to vector<3xf32>
    %906 = vector.shape_cast %905 : vector<3xf32> to vector<3x1xf32>
    %907 = vector.broadcast %906 : vector<3x1xf32> to vector<3x9xf32>
    %908 = arith.subf %904, %907 : vector<3x9xf32>
    %909 = math.exp %908 : vector<3x9xf32>
    %cst_342 = arith.constant dense<0.000000e+00> : vector<3xf32>
    %910 = vector.multi_reduction <add>, %909, %cst_342 [1] : vector<3x9xf32> to vector<3xf32>
    %911 = vector.shape_cast %910 : vector<3xf32> to vector<3x1xf32>
    %912 = tpu.reciprocal %911 {approx = true} : vector<3x1xf32> -> vector<3x1xf32>
    %913 = vector.broadcast %912 : vector<3x1xf32> to vector<3x9xf32>
    %914 = arith.mulf %909, %913 : vector<3x9xf32>
    %cst_343 = arith.constant dense<0.000000e+00> : vector<3x16xf32>
    %915 = tpu.matmul %914, %901, %cst_343 {dimension_numbers = #tpu.dot_dimension_numbers<[1], [0], [0], [1], [0, 0, 1, 1], [], []>} : vector<3x9xf32>, vector<9x16xf32>, vector<3x16xf32> -> vector<3x16xf32>
    %916 = tpu.concatenate %898, %915 in 1 : vector<3x16xf32>, vector<3x16xf32> -> vector<3x32xf32>
    %917 = arith.truncf %916 : vector<3x32xf32> to vector<3x32xbf16>
    %cst_344 = arith.constant dense<0.000000e+00> : vector<3x32xf32>
    %918 = tpu.matmul %917, %880, %cst_344 {dimension_numbers = #tpu.dot_dimension_numbers<[1], [0], [0], [1], [0, 0, 1, 1], [], []>} : vector<3x32xbf16>, vector<32x32xbf16>, vector<3x32xf32> -> vector<3x32xf32>
    %919 = vector.broadcast %881 : vector<1x32xf32> to vector<3x32xf32>
    %920 = arith.addf %918, %919 : vector<3x32xf32>
    %921 = arith.addf %861, %920 : vector<3x32xf32>
    %922 = vector.extract_strided_slice %782 {offsets = [2, 0], sizes = [1, 32], strides = [1, 1]} : vector<6x32xf32> to vector<1x32xf32>
    %923 = vector.extract_strided_slice %782 {offsets = [3, 0], sizes = [1, 32], strides = [1, 1]} : vector<6x32xf32> to vector<1x32xf32>
    %cst_345 = arith.constant dense<0.000000e+00> : vector<3xf32>
    %924 = vector.multi_reduction <add>, %921, %cst_345 [1] : vector<3x32xf32> to vector<3xf32>
    %925 = vector.shape_cast %924 : vector<3xf32> to vector<3x1xf32>
    %cst_346 = arith.constant 3.200000e+01 : f32
    %926 = vector.broadcast %cst_346 : f32 to vector<3x1xf32>
    %927 = arith.divf %925, %926 : vector<3x1xf32>
    %928 = vector.broadcast %927 : vector<3x1xf32> to vector<3x32xf32>
    %929 = arith.subf %921, %928 : vector<3x32xf32>
    %930 = arith.mulf %929, %929 : vector<3x32xf32>
    %cst_347 = arith.constant dense<0.000000e+00> : vector<3xf32>
    %931 = vector.multi_reduction <add>, %930, %cst_347 [1] : vector<3x32xf32> to vector<3xf32>
    %932 = vector.shape_cast %931 : vector<3xf32> to vector<3x1xf32>
    %cst_348 = arith.constant 3.200000e+01 : f32
    %933 = vector.broadcast %cst_348 : f32 to vector<3x1xf32>
    %934 = arith.divf %932, %933 : vector<3x1xf32>
    %935 = vector.broadcast %927 : vector<3x1xf32> to vector<3x32xf32>
    %936 = arith.subf %921, %935 : vector<3x32xf32>
    %cst_349 = arith.constant 9.99999974E-6 : f32
    %937 = vector.broadcast %cst_349 : f32 to vector<3x1xf32>
    %938 = arith.addf %934, %937 : vector<3x1xf32>
    %939 = math.rsqrt %938 : vector<3x1xf32>
    %940 = vector.broadcast %939 : vector<3x1xf32> to vector<3x32xf32>
    %941 = arith.mulf %936, %940 : vector<3x32xf32>
    %942 = vector.broadcast %922 : vector<1x32xf32> to vector<3x32xf32>
    %943 = arith.mulf %941, %942 : vector<3x32xf32>
    %944 = vector.broadcast %923 : vector<1x32xf32> to vector<3x32xf32>
    %945 = arith.addf %943, %944 : vector<3x32xf32>
    %c0_350 = arith.constant 0 : index
    %c0_351 = arith.constant 0 : index
    %c0_352 = arith.constant 0 : index
    %946 = vector.load %arg29[%c0_350, %c0_351, %c0_352] : memref<2x32x512xbf16, #tpu.memory_space<vmem>>, vector<1x32x512xbf16>
    %947 = vector.shape_cast %946 : vector<1x32x512xbf16> to vector<32x512xbf16>
    %948 = arith.truncf %945 : vector<3x32xf32> to vector<3x32xbf16>
    %cst_353 = arith.constant dense<0.000000e+00> : vector<3x512xf32>
    %949 = tpu.matmul %948, %947, %cst_353 {dimension_numbers = #tpu.dot_dimension_numbers<[1], [0], [0], [1], [0, 0, 1, 1], [], []>} : vector<3x32xbf16>, vector<32x512xbf16>, vector<3x512xf32> -> vector<3x512xf32>
    %c0_354 = arith.constant 0 : index
    %c0_355 = arith.constant 0 : index
    %c0_356 = arith.constant 0 : index
    %950 = vector.load %arg30[%c0_354, %c0_355, %c0_356] : memref<2x1x512xf32, #tpu.memory_space<vmem>>, vector<1x1x512xf32>
    %951 = vector.shape_cast %950 : vector<1x1x512xf32> to vector<1x512xf32>
    %952 = vector.broadcast %951 : vector<1x512xf32> to vector<3x512xf32>
    %953 = arith.addf %949, %952 : vector<3x512xf32>
    %cst_357 = arith.constant 0.000000e+00 : f32
    %954 = vector.broadcast %cst_357 : f32 to vector<3x512xf32>
    %955 = arith.maximumf %953, %954 : vector<3x512xf32>
    %c0_358 = arith.constant 0 : index
    %c0_359 = arith.constant 0 : index
    %c0_360 = arith.constant 0 : index
    %956 = vector.load %arg31[%c0_358, %c0_359, %c0_360] : memref<2x512x32xbf16, #tpu.memory_space<vmem>>, vector<1x512x32xbf16>
    %957 = vector.shape_cast %956 : vector<1x512x32xbf16> to vector<512x32xbf16>
    %958 = arith.truncf %955 : vector<3x512xf32> to vector<3x512xbf16>
    %cst_361 = arith.constant dense<0.000000e+00> : vector<3x32xf32>
    %959 = tpu.matmul %958, %957, %cst_361 {dimension_numbers = #tpu.dot_dimension_numbers<[1], [0], [0], [1], [0, 0, 1, 1], [], []>} : vector<3x512xbf16>, vector<512x32xbf16>, vector<3x32xf32> -> vector<3x32xf32>
    %c0_362 = arith.constant 0 : index
    %c0_363 = arith.constant 0 : index
    %c0_364 = arith.constant 0 : index
    %960 = vector.load %arg32[%c0_362, %c0_363, %c0_364] : memref<2x1x32xf32, #tpu.memory_space<vmem>>, vector<1x1x32xf32>
    %961 = vector.shape_cast %960 : vector<1x1x32xf32> to vector<1x32xf32>
    %962 = vector.broadcast %961 : vector<1x32xf32> to vector<3x32xf32>
    %963 = arith.addf %959, %962 : vector<3x32xf32>
    %964 = arith.addf %945, %963 : vector<3x32xf32>
    %965 = vector.extract_strided_slice %782 {offsets = [4, 0], sizes = [1, 32], strides = [1, 1]} : vector<6x32xf32> to vector<1x32xf32>
    %966 = vector.extract_strided_slice %782 {offsets = [5, 0], sizes = [1, 32], strides = [1, 1]} : vector<6x32xf32> to vector<1x32xf32>
    %cst_365 = arith.constant dense<0.000000e+00> : vector<3xf32>
    %967 = vector.multi_reduction <add>, %964, %cst_365 [1] : vector<3x32xf32> to vector<3xf32>
    %968 = vector.shape_cast %967 : vector<3xf32> to vector<3x1xf32>
    %cst_366 = arith.constant 3.200000e+01 : f32
    %969 = vector.broadcast %cst_366 : f32 to vector<3x1xf32>
    %970 = arith.divf %968, %969 : vector<3x1xf32>
    %971 = vector.broadcast %970 : vector<3x1xf32> to vector<3x32xf32>
    %972 = arith.subf %964, %971 : vector<3x32xf32>
    %973 = arith.mulf %972, %972 : vector<3x32xf32>
    %cst_367 = arith.constant dense<0.000000e+00> : vector<3xf32>
    %974 = vector.multi_reduction <add>, %973, %cst_367 [1] : vector<3x32xf32> to vector<3xf32>
    %975 = vector.shape_cast %974 : vector<3xf32> to vector<3x1xf32>
    %cst_368 = arith.constant 3.200000e+01 : f32
    %976 = vector.broadcast %cst_368 : f32 to vector<3x1xf32>
    %977 = arith.divf %975, %976 : vector<3x1xf32>
    %978 = vector.broadcast %970 : vector<3x1xf32> to vector<3x32xf32>
    %979 = arith.subf %964, %978 : vector<3x32xf32>
    %cst_369 = arith.constant 9.99999974E-6 : f32
    %980 = vector.broadcast %cst_369 : f32 to vector<3x1xf32>
    %981 = arith.addf %977, %980 : vector<3x1xf32>
    %982 = math.rsqrt %981 : vector<3x1xf32>
    %983 = vector.broadcast %982 : vector<3x1xf32> to vector<3x32xf32>
    %984 = arith.mulf %979, %983 : vector<3x32xf32>
    %985 = vector.broadcast %965 : vector<1x32xf32> to vector<3x32xf32>
    %986 = arith.mulf %984, %985 : vector<3x32xf32>
    %987 = vector.broadcast %966 : vector<1x32xf32> to vector<3x32xf32>
    %988 = arith.addf %986, %987 : vector<3x32xf32>
    %c1_370 = arith.constant 1 : index
    %c0_371 = arith.constant 0 : index
    %c0_372 = arith.constant 0 : index
    %989 = vector.load %arg33[%c1_370, %c0_371, %c0_372] : memref<2x6x32xf32, #tpu.memory_space<vmem>>, vector<1x6x32xf32>
    %990 = vector.shape_cast %989 : vector<1x6x32xf32> to vector<6x32xf32>
    %c1_373 = arith.constant 1 : index
    %c0_374 = arith.constant 0 : index
    %c0_375 = arith.constant 0 : index
    %991 = vector.load %arg25[%c1_373, %c0_374, %c0_375] : memref<2x32x128xbf16, #tpu.memory_space<vmem>>, vector<1x32x128xbf16>
    %992 = vector.shape_cast %991 : vector<1x32x128xbf16> to vector<32x128xbf16>
    %c1_376 = arith.constant 1 : index
    %c0_377 = arith.constant 0 : index
    %c0_378 = arith.constant 0 : index
    %993 = vector.load %arg26[%c1_376, %c0_377, %c0_378] : memref<2x1x128xf32, #tpu.memory_space<vmem>>, vector<1x1x128xf32>
    %994 = vector.shape_cast %993 : vector<1x1x128xf32> to vector<1x128xf32>
    %995 = vector.extract_strided_slice %992 {offsets = [0, 0], sizes = [32, 96], strides = [1, 1]} : vector<32x128xbf16> to vector<32x96xbf16>
    %996 = arith.truncf %988 : vector<3x32xf32> to vector<3x32xbf16>
    %cst_379 = arith.constant dense<0.000000e+00> : vector<3x96xf32>
    %997 = tpu.matmul %996, %995, %cst_379 {dimension_numbers = #tpu.dot_dimension_numbers<[1], [0], [0], [1], [0, 0, 1, 1], [], []>} : vector<3x32xbf16>, vector<32x96xbf16>, vector<3x96xf32> -> vector<3x96xf32>
    %998 = vector.extract_strided_slice %994 {offsets = [0, 0], sizes = [1, 96], strides = [1, 1]} : vector<1x128xf32> to vector<1x96xf32>
    %999 = vector.broadcast %998 : vector<1x96xf32> to vector<3x96xf32>
    %1000 = arith.addf %997, %999 : vector<3x96xf32>
    %1001 = vector.extract_strided_slice %1000 {offsets = [0, 0], sizes = [3, 32], strides = [1, 1]} : vector<3x96xf32> to vector<3x32xf32>
    %1002 = vector.extract_strided_slice %1000 {offsets = [0, 32], sizes = [3, 32], strides = [1, 1]} : vector<3x96xf32> to vector<3x32xf32>
    %1003 = vector.extract_strided_slice %1000 {offsets = [0, 64], sizes = [3, 32], strides = [1, 1]} : vector<3x96xf32> to vector<3x32xf32>
    %1004 = vector.extract_strided_slice %992 {offsets = [0, 96], sizes = [32, 32], strides = [1, 1]} : vector<32x128xbf16> to vector<32x32xbf16>
    %1005 = vector.extract_strided_slice %994 {offsets = [0, 96], sizes = [1, 32], strides = [1, 1]} : vector<1x128xf32> to vector<1x32xf32>
    %1006 = vector.extract_strided_slice %1001 {offsets = [0, 0], sizes = [3, 16], strides = [1, 1]} : vector<3x32xf32> to vector<3x16xf32>
    %1007 = vector.extract_strided_slice %1002 {offsets = [0, 0], sizes = [3, 16], strides = [1, 1]} : vector<3x32xf32> to vector<3x16xf32>
    %1008 = vector.extract_strided_slice %1003 {offsets = [0, 0], sizes = [3, 16], strides = [1, 1]} : vector<3x32xf32> to vector<3x16xf32>
    %cst_380 = arith.constant 2.500000e-01 : f32
    %1009 = vector.broadcast %cst_380 : f32 to vector<3x16xf32>
    %1010 = arith.mulf %1006, %1009 : vector<3x16xf32>
    %cst_381 = arith.constant dense<0.000000e+00> : vector<3x3xf32>
    %1011 = tpu.matmul %1010, %1007, %cst_381 {dimension_numbers = #tpu.dot_dimension_numbers<[1], [1], [0], [0], [0, 0, 1, 0], [], []>} : vector<3x16xf32>, vector<3x16xf32>, vector<3x3xf32> -> vector<3x3xf32>
    %cst_382 = arith.constant dense<0xFF800000> : vector<3xf32>
    %1012 = vector.multi_reduction <maximumf>, %1011, %cst_382 [1] : vector<3x3xf32> to vector<3xf32>
    %1013 = vector.shape_cast %1012 : vector<3xf32> to vector<3x1xf32>
    %1014 = vector.broadcast %1013 : vector<3x1xf32> to vector<3x3xf32>
    %1015 = arith.subf %1011, %1014 : vector<3x3xf32>
    %1016 = math.exp %1015 : vector<3x3xf32>
    %cst_383 = arith.constant dense<0.000000e+00> : vector<3xf32>
    %1017 = vector.multi_reduction <add>, %1016, %cst_383 [1] : vector<3x3xf32> to vector<3xf32>
    %1018 = vector.shape_cast %1017 : vector<3xf32> to vector<3x1xf32>
    %1019 = tpu.reciprocal %1018 {approx = true} : vector<3x1xf32> -> vector<3x1xf32>
    %1020 = vector.broadcast %1019 : vector<3x1xf32> to vector<3x3xf32>
    %1021 = arith.mulf %1016, %1020 : vector<3x3xf32>
    %cst_384 = arith.constant dense<0.000000e+00> : vector<3x16xf32>
    %1022 = tpu.matmul %1021, %1008, %cst_384 {dimension_numbers = #tpu.dot_dimension_numbers<[1], [0], [0], [1], [0, 0, 1, 1], [], []>} : vector<3x3xf32>, vector<3x16xf32>, vector<3x16xf32> -> vector<3x16xf32>
    %1023 = vector.extract_strided_slice %1001 {offsets = [0, 16], sizes = [3, 16], strides = [1, 1]} : vector<3x32xf32> to vector<3x16xf32>
    %1024 = vector.extract_strided_slice %1002 {offsets = [0, 16], sizes = [3, 16], strides = [1, 1]} : vector<3x32xf32> to vector<3x16xf32>
    %1025 = vector.extract_strided_slice %1003 {offsets = [0, 16], sizes = [3, 16], strides = [1, 1]} : vector<3x32xf32> to vector<3x16xf32>
    %cst_385 = arith.constant 2.500000e-01 : f32
    %1026 = vector.broadcast %cst_385 : f32 to vector<3x16xf32>
    %1027 = arith.mulf %1023, %1026 : vector<3x16xf32>
    %cst_386 = arith.constant dense<0.000000e+00> : vector<3x3xf32>
    %1028 = tpu.matmul %1027, %1024, %cst_386 {dimension_numbers = #tpu.dot_dimension_numbers<[1], [1], [0], [0], [0, 0, 1, 0], [], []>} : vector<3x16xf32>, vector<3x16xf32>, vector<3x3xf32> -> vector<3x3xf32>
    %cst_387 = arith.constant dense<0xFF800000> : vector<3xf32>
    %1029 = vector.multi_reduction <maximumf>, %1028, %cst_387 [1] : vector<3x3xf32> to vector<3xf32>
    %1030 = vector.shape_cast %1029 : vector<3xf32> to vector<3x1xf32>
    %1031 = vector.broadcast %1030 : vector<3x1xf32> to vector<3x3xf32>
    %1032 = arith.subf %1028, %1031 : vector<3x3xf32>
    %1033 = math.exp %1032 : vector<3x3xf32>
    %cst_388 = arith.constant dense<0.000000e+00> : vector<3xf32>
    %1034 = vector.multi_reduction <add>, %1033, %cst_388 [1] : vector<3x3xf32> to vector<3xf32>
    %1035 = vector.shape_cast %1034 : vector<3xf32> to vector<3x1xf32>
    %1036 = tpu.reciprocal %1035 {approx = true} : vector<3x1xf32> -> vector<3x1xf32>
    %1037 = vector.broadcast %1036 : vector<3x1xf32> to vector<3x3xf32>
    %1038 = arith.mulf %1033, %1037 : vector<3x3xf32>
    %cst_389 = arith.constant dense<0.000000e+00> : vector<3x16xf32>
    %1039 = tpu.matmul %1038, %1025, %cst_389 {dimension_numbers = #tpu.dot_dimension_numbers<[1], [0], [0], [1], [0, 0, 1, 1], [], []>} : vector<3x3xf32>, vector<3x16xf32>, vector<3x16xf32> -> vector<3x16xf32>
    %1040 = tpu.concatenate %1022, %1039 in 1 : vector<3x16xf32>, vector<3x16xf32> -> vector<3x32xf32>
    %1041 = arith.truncf %1040 : vector<3x32xf32> to vector<3x32xbf16>
    %cst_390 = arith.constant dense<0.000000e+00> : vector<3x32xf32>
    %1042 = tpu.matmul %1041, %1004, %cst_390 {dimension_numbers = #tpu.dot_dimension_numbers<[1], [0], [0], [1], [0, 0, 1, 1], [], []>} : vector<3x32xbf16>, vector<32x32xbf16>, vector<3x32xf32> -> vector<3x32xf32>
    %1043 = vector.broadcast %1005 : vector<1x32xf32> to vector<3x32xf32>
    %1044 = arith.addf %1042, %1043 : vector<3x32xf32>
    %1045 = arith.addf %988, %1044 : vector<3x32xf32>
    %1046 = vector.extract_strided_slice %990 {offsets = [0, 0], sizes = [1, 32], strides = [1, 1]} : vector<6x32xf32> to vector<1x32xf32>
    %1047 = vector.extract_strided_slice %990 {offsets = [1, 0], sizes = [1, 32], strides = [1, 1]} : vector<6x32xf32> to vector<1x32xf32>
    %cst_391 = arith.constant dense<0.000000e+00> : vector<3xf32>
    %1048 = vector.multi_reduction <add>, %1045, %cst_391 [1] : vector<3x32xf32> to vector<3xf32>
    %1049 = vector.shape_cast %1048 : vector<3xf32> to vector<3x1xf32>
    %cst_392 = arith.constant 3.200000e+01 : f32
    %1050 = vector.broadcast %cst_392 : f32 to vector<3x1xf32>
    %1051 = arith.divf %1049, %1050 : vector<3x1xf32>
    %1052 = vector.broadcast %1051 : vector<3x1xf32> to vector<3x32xf32>
    %1053 = arith.subf %1045, %1052 : vector<3x32xf32>
    %1054 = arith.mulf %1053, %1053 : vector<3x32xf32>
    %cst_393 = arith.constant dense<0.000000e+00> : vector<3xf32>
    %1055 = vector.multi_reduction <add>, %1054, %cst_393 [1] : vector<3x32xf32> to vector<3xf32>
    %1056 = vector.shape_cast %1055 : vector<3xf32> to vector<3x1xf32>
    %cst_394 = arith.constant 3.200000e+01 : f32
    %1057 = vector.broadcast %cst_394 : f32 to vector<3x1xf32>
    %1058 = arith.divf %1056, %1057 : vector<3x1xf32>
    %1059 = vector.broadcast %1051 : vector<3x1xf32> to vector<3x32xf32>
    %1060 = arith.subf %1045, %1059 : vector<3x32xf32>
    %cst_395 = arith.constant 9.99999974E-6 : f32
    %1061 = vector.broadcast %cst_395 : f32 to vector<3x1xf32>
    %1062 = arith.addf %1058, %1061 : vector<3x1xf32>
    %1063 = math.rsqrt %1062 : vector<3x1xf32>
    %1064 = vector.broadcast %1063 : vector<3x1xf32> to vector<3x32xf32>
    %1065 = arith.mulf %1060, %1064 : vector<3x32xf32>
    %1066 = vector.broadcast %1046 : vector<1x32xf32> to vector<3x32xf32>
    %1067 = arith.mulf %1065, %1066 : vector<3x32xf32>
    %1068 = vector.broadcast %1047 : vector<1x32xf32> to vector<3x32xf32>
    %1069 = arith.addf %1067, %1068 : vector<3x32xf32>
    %c1_396 = arith.constant 1 : index
    %c0_397 = arith.constant 0 : index
    %c0_398 = arith.constant 0 : index
    %1070 = vector.load %arg27[%c1_396, %c0_397, %c0_398] : memref<2x32x128xbf16, #tpu.memory_space<vmem>>, vector<1x32x128xbf16>
    %1071 = vector.shape_cast %1070 : vector<1x32x128xbf16> to vector<32x128xbf16>
    %c1_399 = arith.constant 1 : index
    %c0_400 = arith.constant 0 : index
    %c0_401 = arith.constant 0 : index
    %1072 = vector.load %arg28[%c1_399, %c0_400, %c0_401] : memref<2x1x128xf32, #tpu.memory_space<vmem>>, vector<1x1x128xf32>
    %1073 = vector.shape_cast %1072 : vector<1x1x128xf32> to vector<1x128xf32>
    %1074 = vector.extract_strided_slice %1071 {offsets = [0, 0], sizes = [32, 32], strides = [1, 1]} : vector<32x128xbf16> to vector<32x32xbf16>
    %1075 = arith.truncf %1069 : vector<3x32xf32> to vector<3x32xbf16>
    %cst_402 = arith.constant dense<0.000000e+00> : vector<3x32xf32>
    %1076 = tpu.matmul %1075, %1074, %cst_402 {dimension_numbers = #tpu.dot_dimension_numbers<[1], [0], [0], [1], [0, 0, 1, 1], [], []>} : vector<3x32xbf16>, vector<32x32xbf16>, vector<3x32xf32> -> vector<3x32xf32>
    %1077 = vector.extract_strided_slice %1073 {offsets = [0, 0], sizes = [1, 32], strides = [1, 1]} : vector<1x128xf32> to vector<1x32xf32>
    %1078 = vector.broadcast %1077 : vector<1x32xf32> to vector<3x32xf32>
    %1079 = arith.addf %1076, %1078 : vector<3x32xf32>
    %1080 = vector.extract_strided_slice %1071 {offsets = [0, 32], sizes = [32, 64], strides = [1, 1]} : vector<32x128xbf16> to vector<32x64xbf16>
    %1081 = arith.truncf %780 : vector<9x32xf32> to vector<9x32xbf16>
    %cst_403 = arith.constant dense<0.000000e+00> : vector<9x64xf32>
    %1082 = tpu.matmul %1081, %1080, %cst_403 {dimension_numbers = #tpu.dot_dimension_numbers<[1], [0], [0], [1], [0, 0, 1, 1], [], []>} : vector<9x32xbf16>, vector<32x64xbf16>, vector<9x64xf32> -> vector<9x64xf32>
    %1083 = vector.extract_strided_slice %1073 {offsets = [0, 32], sizes = [1, 64], strides = [1, 1]} : vector<1x128xf32> to vector<1x64xf32>
    %1084 = vector.broadcast %1083 : vector<1x64xf32> to vector<9x64xf32>
    %1085 = arith.addf %1082, %1084 : vector<9x64xf32>
    %1086 = vector.extract_strided_slice %1085 {offsets = [0, 0], sizes = [9, 32], strides = [1, 1]} : vector<9x64xf32> to vector<9x32xf32>
    %1087 = vector.extract_strided_slice %1085 {offsets = [0, 32], sizes = [9, 32], strides = [1, 1]} : vector<9x64xf32> to vector<9x32xf32>
    %1088 = vector.extract_strided_slice %1071 {offsets = [0, 96], sizes = [32, 32], strides = [1, 1]} : vector<32x128xbf16> to vector<32x32xbf16>
    %1089 = vector.extract_strided_slice %1073 {offsets = [0, 96], sizes = [1, 32], strides = [1, 1]} : vector<1x128xf32> to vector<1x32xf32>
    %1090 = vector.extract_strided_slice %1079 {offsets = [0, 0], sizes = [3, 16], strides = [1, 1]} : vector<3x32xf32> to vector<3x16xf32>
    %1091 = vector.extract_strided_slice %1086 {offsets = [0, 0], sizes = [9, 16], strides = [1, 1]} : vector<9x32xf32> to vector<9x16xf32>
    %1092 = vector.extract_strided_slice %1087 {offsets = [0, 0], sizes = [9, 16], strides = [1, 1]} : vector<9x32xf32> to vector<9x16xf32>
    %cst_404 = arith.constant 2.500000e-01 : f32
    %1093 = vector.broadcast %cst_404 : f32 to vector<3x16xf32>
    %1094 = arith.mulf %1090, %1093 : vector<3x16xf32>
    %cst_405 = arith.constant dense<0.000000e+00> : vector<3x9xf32>
    %1095 = tpu.matmul %1094, %1091, %cst_405 {dimension_numbers = #tpu.dot_dimension_numbers<[1], [1], [0], [0], [0, 0, 1, 0], [], []>} : vector<3x16xf32>, vector<9x16xf32>, vector<3x9xf32> -> vector<3x9xf32>
    %cst_406 = arith.constant dense<0xFF800000> : vector<3xf32>
    %1096 = vector.multi_reduction <maximumf>, %1095, %cst_406 [1] : vector<3x9xf32> to vector<3xf32>
    %1097 = vector.shape_cast %1096 : vector<3xf32> to vector<3x1xf32>
    %1098 = vector.broadcast %1097 : vector<3x1xf32> to vector<3x9xf32>
    %1099 = arith.subf %1095, %1098 : vector<3x9xf32>
    %1100 = math.exp %1099 : vector<3x9xf32>
    %cst_407 = arith.constant dense<0.000000e+00> : vector<3xf32>
    %1101 = vector.multi_reduction <add>, %1100, %cst_407 [1] : vector<3x9xf32> to vector<3xf32>
    %1102 = vector.shape_cast %1101 : vector<3xf32> to vector<3x1xf32>
    %1103 = tpu.reciprocal %1102 {approx = true} : vector<3x1xf32> -> vector<3x1xf32>
    %1104 = vector.broadcast %1103 : vector<3x1xf32> to vector<3x9xf32>
    %1105 = arith.mulf %1100, %1104 : vector<3x9xf32>
    %cst_408 = arith.constant dense<0.000000e+00> : vector<3x16xf32>
    %1106 = tpu.matmul %1105, %1092, %cst_408 {dimension_numbers = #tpu.dot_dimension_numbers<[1], [0], [0], [1], [0, 0, 1, 1], [], []>} : vector<3x9xf32>, vector<9x16xf32>, vector<3x16xf32> -> vector<3x16xf32>
    %1107 = vector.extract_strided_slice %1079 {offsets = [0, 16], sizes = [3, 16], strides = [1, 1]} : vector<3x32xf32> to vector<3x16xf32>
    %1108 = vector.extract_strided_slice %1086 {offsets = [0, 16], sizes = [9, 16], strides = [1, 1]} : vector<9x32xf32> to vector<9x16xf32>
    %1109 = vector.extract_strided_slice %1087 {offsets = [0, 16], sizes = [9, 16], strides = [1, 1]} : vector<9x32xf32> to vector<9x16xf32>
    %cst_409 = arith.constant 2.500000e-01 : f32
    %1110 = vector.broadcast %cst_409 : f32 to vector<3x16xf32>
    %1111 = arith.mulf %1107, %1110 : vector<3x16xf32>
    %cst_410 = arith.constant dense<0.000000e+00> : vector<3x9xf32>
    %1112 = tpu.matmul %1111, %1108, %cst_410 {dimension_numbers = #tpu.dot_dimension_numbers<[1], [1], [0], [0], [0, 0, 1, 0], [], []>} : vector<3x16xf32>, vector<9x16xf32>, vector<3x9xf32> -> vector<3x9xf32>
    %cst_411 = arith.constant dense<0xFF800000> : vector<3xf32>
    %1113 = vector.multi_reduction <maximumf>, %1112, %cst_411 [1] : vector<3x9xf32> to vector<3xf32>
    %1114 = vector.shape_cast %1113 : vector<3xf32> to vector<3x1xf32>
    %1115 = vector.broadcast %1114 : vector<3x1xf32> to vector<3x9xf32>
    %1116 = arith.subf %1112, %1115 : vector<3x9xf32>
    %1117 = math.exp %1116 : vector<3x9xf32>
    %cst_412 = arith.constant dense<0.000000e+00> : vector<3xf32>
    %1118 = vector.multi_reduction <add>, %1117, %cst_412 [1] : vector<3x9xf32> to vector<3xf32>
    %1119 = vector.shape_cast %1118 : vector<3xf32> to vector<3x1xf32>
    %1120 = tpu.reciprocal %1119 {approx = true} : vector<3x1xf32> -> vector<3x1xf32>
    %1121 = vector.broadcast %1120 : vector<3x1xf32> to vector<3x9xf32>
    %1122 = arith.mulf %1117, %1121 : vector<3x9xf32>
    %cst_413 = arith.constant dense<0.000000e+00> : vector<3x16xf32>
    %1123 = tpu.matmul %1122, %1109, %cst_413 {dimension_numbers = #tpu.dot_dimension_numbers<[1], [0], [0], [1], [0, 0, 1, 1], [], []>} : vector<3x9xf32>, vector<9x16xf32>, vector<3x16xf32> -> vector<3x16xf32>
    %1124 = tpu.concatenate %1106, %1123 in 1 : vector<3x16xf32>, vector<3x16xf32> -> vector<3x32xf32>
    %1125 = arith.truncf %1124 : vector<3x32xf32> to vector<3x32xbf16>
    %cst_414 = arith.constant dense<0.000000e+00> : vector<3x32xf32>
    %1126 = tpu.matmul %1125, %1088, %cst_414 {dimension_numbers = #tpu.dot_dimension_numbers<[1], [0], [0], [1], [0, 0, 1, 1], [], []>} : vector<3x32xbf16>, vector<32x32xbf16>, vector<3x32xf32> -> vector<3x32xf32>
    %1127 = vector.broadcast %1089 : vector<1x32xf32> to vector<3x32xf32>
    %1128 = arith.addf %1126, %1127 : vector<3x32xf32>
    %1129 = arith.addf %1069, %1128 : vector<3x32xf32>
    %1130 = vector.extract_strided_slice %990 {offsets = [2, 0], sizes = [1, 32], strides = [1, 1]} : vector<6x32xf32> to vector<1x32xf32>
    %1131 = vector.extract_strided_slice %990 {offsets = [3, 0], sizes = [1, 32], strides = [1, 1]} : vector<6x32xf32> to vector<1x32xf32>
    %cst_415 = arith.constant dense<0.000000e+00> : vector<3xf32>
    %1132 = vector.multi_reduction <add>, %1129, %cst_415 [1] : vector<3x32xf32> to vector<3xf32>
    %1133 = vector.shape_cast %1132 : vector<3xf32> to vector<3x1xf32>
    %cst_416 = arith.constant 3.200000e+01 : f32
    %1134 = vector.broadcast %cst_416 : f32 to vector<3x1xf32>
    %1135 = arith.divf %1133, %1134 : vector<3x1xf32>
    %1136 = vector.broadcast %1135 : vector<3x1xf32> to vector<3x32xf32>
    %1137 = arith.subf %1129, %1136 : vector<3x32xf32>
    %1138 = arith.mulf %1137, %1137 : vector<3x32xf32>
    %cst_417 = arith.constant dense<0.000000e+00> : vector<3xf32>
    %1139 = vector.multi_reduction <add>, %1138, %cst_417 [1] : vector<3x32xf32> to vector<3xf32>
    %1140 = vector.shape_cast %1139 : vector<3xf32> to vector<3x1xf32>
    %cst_418 = arith.constant 3.200000e+01 : f32
    %1141 = vector.broadcast %cst_418 : f32 to vector<3x1xf32>
    %1142 = arith.divf %1140, %1141 : vector<3x1xf32>
    %1143 = vector.broadcast %1135 : vector<3x1xf32> to vector<3x32xf32>
    %1144 = arith.subf %1129, %1143 : vector<3x32xf32>
    %cst_419 = arith.constant 9.99999974E-6 : f32
    %1145 = vector.broadcast %cst_419 : f32 to vector<3x1xf32>
    %1146 = arith.addf %1142, %1145 : vector<3x1xf32>
    %1147 = math.rsqrt %1146 : vector<3x1xf32>
    %1148 = vector.broadcast %1147 : vector<3x1xf32> to vector<3x32xf32>
    %1149 = arith.mulf %1144, %1148 : vector<3x32xf32>
    %1150 = vector.broadcast %1130 : vector<1x32xf32> to vector<3x32xf32>
    %1151 = arith.mulf %1149, %1150 : vector<3x32xf32>
    %1152 = vector.broadcast %1131 : vector<1x32xf32> to vector<3x32xf32>
    %1153 = arith.addf %1151, %1152 : vector<3x32xf32>
    %c1_420 = arith.constant 1 : index
    %c0_421 = arith.constant 0 : index
    %c0_422 = arith.constant 0 : index
    %1154 = vector.load %arg29[%c1_420, %c0_421, %c0_422] : memref<2x32x512xbf16, #tpu.memory_space<vmem>>, vector<1x32x512xbf16>
    %1155 = vector.shape_cast %1154 : vector<1x32x512xbf16> to vector<32x512xbf16>
    %1156 = arith.truncf %1153 : vector<3x32xf32> to vector<3x32xbf16>
    %cst_423 = arith.constant dense<0.000000e+00> : vector<3x512xf32>
    %1157 = tpu.matmul %1156, %1155, %cst_423 {dimension_numbers = #tpu.dot_dimension_numbers<[1], [0], [0], [1], [0, 0, 1, 1], [], []>} : vector<3x32xbf16>, vector<32x512xbf16>, vector<3x512xf32> -> vector<3x512xf32>
    %c1_424 = arith.constant 1 : index
    %c0_425 = arith.constant 0 : index
    %c0_426 = arith.constant 0 : index
    %1158 = vector.load %arg30[%c1_424, %c0_425, %c0_426] : memref<2x1x512xf32, #tpu.memory_space<vmem>>, vector<1x1x512xf32>
    %1159 = vector.shape_cast %1158 : vector<1x1x512xf32> to vector<1x512xf32>
    %1160 = vector.broadcast %1159 : vector<1x512xf32> to vector<3x512xf32>
    %1161 = arith.addf %1157, %1160 : vector<3x512xf32>
    %cst_427 = arith.constant 0.000000e+00 : f32
    %1162 = vector.broadcast %cst_427 : f32 to vector<3x512xf32>
    %1163 = arith.maximumf %1161, %1162 : vector<3x512xf32>
    %c1_428 = arith.constant 1 : index
    %c0_429 = arith.constant 0 : index
    %c0_430 = arith.constant 0 : index
    %1164 = vector.load %arg31[%c1_428, %c0_429, %c0_430] : memref<2x512x32xbf16, #tpu.memory_space<vmem>>, vector<1x512x32xbf16>
    %1165 = vector.shape_cast %1164 : vector<1x512x32xbf16> to vector<512x32xbf16>
    %1166 = arith.truncf %1163 : vector<3x512xf32> to vector<3x512xbf16>
    %cst_431 = arith.constant dense<0.000000e+00> : vector<3x32xf32>
    %1167 = tpu.matmul %1166, %1165, %cst_431 {dimension_numbers = #tpu.dot_dimension_numbers<[1], [0], [0], [1], [0, 0, 1, 1], [], []>} : vector<3x512xbf16>, vector<512x32xbf16>, vector<3x32xf32> -> vector<3x32xf32>
    %c1_432 = arith.constant 1 : index
    %c0_433 = arith.constant 0 : index
    %c0_434 = arith.constant 0 : index
    %1168 = vector.load %arg32[%c1_432, %c0_433, %c0_434] : memref<2x1x32xf32, #tpu.memory_space<vmem>>, vector<1x1x32xf32>
    %1169 = vector.shape_cast %1168 : vector<1x1x32xf32> to vector<1x32xf32>
    %1170 = vector.broadcast %1169 : vector<1x32xf32> to vector<3x32xf32>
    %1171 = arith.addf %1167, %1170 : vector<3x32xf32>
    %1172 = arith.addf %1153, %1171 : vector<3x32xf32>
    %1173 = vector.extract_strided_slice %990 {offsets = [4, 0], sizes = [1, 32], strides = [1, 1]} : vector<6x32xf32> to vector<1x32xf32>
    %1174 = vector.extract_strided_slice %990 {offsets = [5, 0], sizes = [1, 32], strides = [1, 1]} : vector<6x32xf32> to vector<1x32xf32>
    %cst_435 = arith.constant dense<0.000000e+00> : vector<3xf32>
    %1175 = vector.multi_reduction <add>, %1172, %cst_435 [1] : vector<3x32xf32> to vector<3xf32>
    %1176 = vector.shape_cast %1175 : vector<3xf32> to vector<3x1xf32>
    %cst_436 = arith.constant 3.200000e+01 : f32
    %1177 = vector.broadcast %cst_436 : f32 to vector<3x1xf32>
    %1178 = arith.divf %1176, %1177 : vector<3x1xf32>
    %1179 = vector.broadcast %1178 : vector<3x1xf32> to vector<3x32xf32>
    %1180 = arith.subf %1172, %1179 : vector<3x32xf32>
    %1181 = arith.mulf %1180, %1180 : vector<3x32xf32>
    %cst_437 = arith.constant dense<0.000000e+00> : vector<3xf32>
    %1182 = vector.multi_reduction <add>, %1181, %cst_437 [1] : vector<3x32xf32> to vector<3xf32>
    %1183 = vector.shape_cast %1182 : vector<3xf32> to vector<3x1xf32>
    %cst_438 = arith.constant 3.200000e+01 : f32
    %1184 = vector.broadcast %cst_438 : f32 to vector<3x1xf32>
    %1185 = arith.divf %1183, %1184 : vector<3x1xf32>
    %1186 = vector.broadcast %1178 : vector<3x1xf32> to vector<3x32xf32>
    %1187 = arith.subf %1172, %1186 : vector<3x32xf32>
    %cst_439 = arith.constant 9.99999974E-6 : f32
    %1188 = vector.broadcast %cst_439 : f32 to vector<3x1xf32>
    %1189 = arith.addf %1185, %1188 : vector<3x1xf32>
    %1190 = math.rsqrt %1189 : vector<3x1xf32>
    %1191 = vector.broadcast %1190 : vector<3x1xf32> to vector<3x32xf32>
    %1192 = arith.mulf %1187, %1191 : vector<3x32xf32>
    %1193 = vector.broadcast %1173 : vector<1x32xf32> to vector<3x32xf32>
    %1194 = arith.mulf %1192, %1193 : vector<3x32xf32>
    %1195 = vector.broadcast %1174 : vector<1x32xf32> to vector<3x32xf32>
    %1196 = arith.addf %1194, %1195 : vector<3x32xf32>
    %1197 = vector.extract_strided_slice %756 {offsets = [2, 0], sizes = [1, 32], strides = [1, 1]} : vector<4x32xf32> to vector<1x32xf32>
    %1198 = vector.extract_strided_slice %756 {offsets = [3, 0], sizes = [1, 32], strides = [1, 1]} : vector<4x32xf32> to vector<1x32xf32>
    %cst_440 = arith.constant dense<0.000000e+00> : vector<3xf32>
    %1199 = vector.multi_reduction <add>, %1196, %cst_440 [1] : vector<3x32xf32> to vector<3xf32>
    %1200 = vector.shape_cast %1199 : vector<3xf32> to vector<3x1xf32>
    %cst_441 = arith.constant 3.200000e+01 : f32
    %1201 = vector.broadcast %cst_441 : f32 to vector<3x1xf32>
    %1202 = arith.divf %1200, %1201 : vector<3x1xf32>
    %1203 = vector.broadcast %1202 : vector<3x1xf32> to vector<3x32xf32>
    %1204 = arith.subf %1196, %1203 : vector<3x32xf32>
    %1205 = arith.mulf %1204, %1204 : vector<3x32xf32>
    %cst_442 = arith.constant dense<0.000000e+00> : vector<3xf32>
    %1206 = vector.multi_reduction <add>, %1205, %cst_442 [1] : vector<3x32xf32> to vector<3xf32>
    %1207 = vector.shape_cast %1206 : vector<3xf32> to vector<3x1xf32>
    %cst_443 = arith.constant 3.200000e+01 : f32
    %1208 = vector.broadcast %cst_443 : f32 to vector<3x1xf32>
    %1209 = arith.divf %1207, %1208 : vector<3x1xf32>
    %1210 = vector.broadcast %1202 : vector<3x1xf32> to vector<3x32xf32>
    %1211 = arith.subf %1196, %1210 : vector<3x32xf32>
    %cst_444 = arith.constant 9.99999974E-6 : f32
    %1212 = vector.broadcast %cst_444 : f32 to vector<3x1xf32>
    %1213 = arith.addf %1209, %1212 : vector<3x1xf32>
    %1214 = math.rsqrt %1213 : vector<3x1xf32>
    %1215 = vector.broadcast %1214 : vector<3x1xf32> to vector<3x32xf32>
    %1216 = arith.mulf %1211, %1215 : vector<3x32xf32>
    %1217 = vector.broadcast %1197 : vector<1x32xf32> to vector<3x32xf32>
    %1218 = arith.mulf %1216, %1217 : vector<3x32xf32>
    %1219 = vector.broadcast %1198 : vector<1x32xf32> to vector<3x32xf32>
    %1220 = arith.addf %1218, %1219 : vector<3x32xf32>
    %1221 = vector.extract_strided_slice %1220 {offsets = [0, 0], sizes = [1, 32], strides = [1, 1]} : vector<3x32xf32> to vector<1x32xf32>
    %c0_445 = arith.constant 0 : index
    %c0_446 = arith.constant 0 : index
    %1222 = vector.load %arg35[%c0_445, %c0_446] : memref<32x1xf32, #tpu.memory_space<vmem>>, vector<32x1xf32>
    %cst_447 = arith.constant dense<0.000000e+00> : vector<1x1xf32>
    %1223 = tpu.matmul %1221, %1222, %cst_447 {dimension_numbers = #tpu.dot_dimension_numbers<[1], [0], [0], [1], [0, 0, 1, 1], [], []>} : vector<1x32xf32>, vector<32x1xf32>, vector<1x1xf32> -> vector<1x1xf32>
    %c0_448 = arith.constant 0 : index
    %c0_449 = arith.constant 0 : index
    %1224 = vector.load %arg36[%c0_448, %c0_449] : memref<1x1xf32, #tpu.memory_space<vmem>>, vector<1x1xf32>
    %1225 = arith.addf %1223, %1224 : vector<1x1xf32>
    %cst_450 = arith.constant 0.000000e+00 : f32
    %1226 = vector.broadcast %cst_450 : f32 to vector<1x1xf32>
    %1227 = arith.subf %1226, %1225 : vector<1x1xf32>
    %1228 = math.exp %1227 : vector<1x1xf32>
    %cst_451 = arith.constant 1.000000e+00 : f32
    %1229 = vector.broadcast %cst_451 : f32 to vector<1x1xf32>
    %1230 = arith.addf %1229, %1228 : vector<1x1xf32>
    %cst_452 = arith.constant 1.000000e+00 : f32
    %1231 = vector.broadcast %cst_452 : f32 to vector<1x1xf32>
    %1232 = arith.divf %1231, %1230 : vector<1x1xf32>
    %c0_453 = arith.constant 0 : index
    %c0_454 = arith.constant 0 : index
    %1233 = vector.load %arg37[%c0_453, %c0_454] : memref<1x1xf32, #tpu.memory_space<vmem>>, vector<1x1xf32>
    tpu.vector_store %arg37[%c0_453, %c0_454], %1232 {strides = array<i32>} : memref<1x1xf32, #tpu.memory_space<vmem>>, vector<1x1xf32>,
    return
  }
}

</mosaic_0001>

<bundles_post_ra>
// kernel: het_forward_device.1
= control target key start
LH: loop header
LB: loop body
LE: loop exit
PB: predicated region body
PF: predicated region fallthrough
CT: control target
= control target key end

     0   :  { %s10036_s6 = smov 1   ;;  %s10037_s10 = smov 2   ;;  %s11519_s0 = inlined_call_operand.smem [shape: u32[38], index: -1, kind: input, shape index: {}] }
   0x1   :  { %s10098_s5 = sld [smem:[%s11519_s0]]   ;;  %s10038_s14 = smov 3  }
   0x2   :  { %s10103_s9 = sld [smem:[%s11519_s0 + %s10036_s6]]   ;;  %s10039_s18 = smov 4  }
   0x3   :  { %s10108_s13 = sld [smem:[%s11519_s0 + %s10037_s10]]   ;;  %s10040_s22 = smov 5  }
   0x4   :  { %s10113_s17 = sld [smem:[%s11519_s0 + %s10038_s14]]   ;;  %s10041_s26 = smov 6  }
   0x5   :  { %s10118_s21 = sld [smem:[%s11519_s0 + %s10039_s18]]   ;;  %s10042_s30 = smov 7  }
   0x6   :  { %s10123_s25 = sld [smem:[%s11519_s0 + %s10040_s22]]   ;;  %s10043_s4 = smov 8  }
   0x7   :  { %s10128_s29 = sld [smem:[%s11519_s0 + %s10041_s26]]   ;;  %s10044_s10 = smov 9  }
   0x8   :  { %s10133_s3 = sld [smem:[%s11519_s0 + %s10042_s30]]   ;;  %s10045_s15 = smov 10  }
   0x9   :  { %s10138_s8 = sld [smem:[%s11519_s0 + %s10043_s4]]   ;;  %s10046_s20 = smov 11  }
   0xa   :  { %s10143_s14 = sld [smem:[%s11519_s0 + %s10044_s10]]   ;;  %s10047_s26 = smov 12  }
   0xb   :  { %s10148_s19 = sld [smem:[%s11519_s0 + %s10045_s15]]   ;;  %s10048_s1 = smov 13  }
   0xc   :  { %s10153_s24 = sld [smem:[%s11519_s0 + %s10046_s20]]   ;;  %s10049_s7 = smov 14  }
   0xd   :  { %s10158_s30 = sld [smem:[%s11519_s0 + %s10047_s26]]   ;;  %s10050_s15 = smov 15  }
   0xe   :  { %s10163_s6 = sld [smem:[%s11519_s0 + %s10048_s1]]   ;;  %s10051_s22 = smov 16  }
   0xf   :  { %11538 = sst [smem:[#allocation16_spill]] %s10138_s8  ;;  %s10052_s28 = smov 17  }
  0x10   :  { %11539 = sst [smem:[#allocation17_spill]] %s10143_s14  ;;  %s10072_s1 = smov 37  }
  0x11   :  { %11540 = sst [smem:[#allocation18_spill]] %s10148_s19 }
  0x12   :  { %s10168_s12 = sld [smem:[%s11519_s0 + %s10049_s7]]   ;;  %s10053_s7 = smov 18  }
  0x13   :  { %s10173_s20 = sld [smem:[%s11519_s0 + %s10050_s15]]   ;;  %s10054_s15 = smov 19  }
  0x14   :  { %s10178_s27 = sld [smem:[%s11519_s0 + %s10051_s22]]   ;;  %s10055_s22 = smov 20  }
  0x15   :  { %s10183_s4 = sld [smem:[%s11519_s0 + %s10052_s28]]   ;;  %s10056_s28 = smov 21  }
  0x16   :  { %s10188_s14 = sld [smem:[%s11519_s0 + %s10053_s7]]   ;;  %s10057_s7 = smov 22  }
  0x17   :  { %s10193_s19 = sld [smem:[%s11519_s0 + %s10054_s15]]   ;;  %s10058_s15 = smov 23  }
  0x18   :  { %s10198_s8 = sld [smem:[%s11519_s0 + %s10055_s22]]   ;;  %s10059_s22 = smov 24  }
  0x1b   :  { %11541 = sst [smem:[#allocation19_spill]] %s10183_s4 }
  0x1c   :  { %11542 = sst [smem:[#allocation20_spill]] %s10188_s14 }
  0x1d   :  { %11543 = sst [smem:[#allocation21_spill]] %s10193_s19 }
  0x1e   :  { %11544 = sst [smem:[#allocation22_spill]] %s10198_s8 }
  0x1f   :  { %s10203_s4 = sld [smem:[%s11519_s0 + %s10056_s28]]   ;;  %s10060_s28 = smov 25  }
  0x20   :  { %s10208_s14 = sld [smem:[%s11519_s0 + %s10057_s7]]   ;;  %s10061_s7 = smov 26  }
  0x21   :  { %s10213_s19 = sld [smem:[%s11519_s0 + %s10058_s15]]   ;;  %s10062_s15 = smov 27  }
  0x22   :  { %s10218_s8 = sld [smem:[%s11519_s0 + %s10059_s22]]   ;;  %s10063_s22 = smov 28  }
  0x25   :  { %11545 = sst [smem:[#allocation23_spill]] %s10203_s4 }
  0x26   :  { %11546 = sst [smem:[#allocation24_spill]] %s10208_s14 }
  0x27   :  { %11547 = sst [smem:[#allocation25_spill]] %s10213_s19 }
  0x28   :  { %11548 = sst [smem:[#allocation26_spill]] %s10218_s8 }
  0x29   :  { %s10223_s4 = sld [smem:[%s11519_s0 + %s10060_s28]]   ;;  %s10064_s28 = smov 29  }
  0x2a   :  { %s10228_s14 = sld [smem:[%s11519_s0 + %s10061_s7]]   ;;  %s10065_s7 = smov 30  }
  0x2b   :  { %s10233_s19 = sld [smem:[%s11519_s0 + %s10062_s15]]   ;;  %s10066_s15 = smov 31  }
  0x2c   :  { %s10238_s8 = sld [smem:[%s11519_s0 + %s10063_s22]]   ;;  %s10067_s22 = smov 32  }
  0x2f   :  { %11549 = sst [smem:[#allocation27_spill]] %s10223_s4 }
  0x30   :  { %11550 = sst [smem:[#allocation28_spill]] %s10228_s14 }
  0x31   :  { %11551 = sst [smem:[#allocation29_spill]] %s10233_s19 }
  0x32   :  { %11552 = sst [smem:[#allocation30_spill]] %s10238_s8 }
  0x33   :  { %s10243_s4 = sld [smem:[%s11519_s0 + %s10064_s28]]   ;;  %s10068_s28 = smov 33  }
  0x34   :  { %s10248_s14 = sld [smem:[%s11519_s0 + %s10065_s7]]   ;;  %s10069_s7 = smov 34  }
  0x35   :  { %s10253_s19 = sld [smem:[%s11519_s0 + %s10066_s15]]   ;;  %s10070_s15 = smov 35  }
  0x36   :  { %s10258_s8 = sld [smem:[%s11519_s0 + %s10067_s22]]   ;;  %s10071_s22 = smov 36  }
  0x39   :  { %11553 = sst [smem:[#allocation31_spill]] %s10243_s4 }
  0x3a   :  { %11554 = sst [smem:[#allocation32_spill]] %s10248_s14 }
  0x3b   :  { %11555 = sst [smem:[#allocation33_spill]] %s10253_s19 }
  0x3c   :  { %11556 = sst [smem:[#allocation34_spill]] %s10258_s8 }
  0x3d   :  { %s10263_s4 = sld [smem:[%s11519_s0 + %s10068_s28]]  }
  0x3e   :  { %s10268_s14 = sld [smem:[%s11519_s0 + %s10069_s7]]  }
  0x3f   :  { %s10273_s19 = sld [smem:[%s11519_s0 + %s10070_s15]]  }
  0x40   :  { %s8011_s8 = sld [smem:[%s11519_s0 + %s10071_s22]]  }
  0x43   :  { %11557 = sst [smem:[#allocation35_spill]] %s10263_s4 }
  0x44   :  { %s10281_s4 = sld [smem:[%s11519_s0 + %s10072_s1]]  }
  0x46   :  { %v80_v0 = vstv %s8011_s8 }
  0x47   :  { %81 = vst [vmem:[#allocation2] sm:$0x1] %v80_v0 }
  0x48   :  { %82 = vsyncpa [#allocation5], 0 }
  0x49   :  { %83 = vsyncpa [#allocation7], 0 }
  0x4a   :  { %84 = vsyncpa [#allocation10], 0  ;;  %s102_s7 = sshll.u32 %s10103_s9, 4  ;;  %s103_s7 = int_to_ptr.vmem [resolvable:$true] %s102_s7 }
  0x4b   :  { %85 = vsyncpa [#allocation4], 0  ;;  %s92_s10 = sshll.u32 %s10098_s5, 4  ;;  %s9958_s11 = scalar_lea.vmem %s103_s7, 16  ;;  %s93_s10 = int_to_ptr.vmem [resolvable:$true] %s92_s10 }
  0x4c   :  { %p9959_p0 = scmp.ne.s32.totalorder %s103_s7, %s9958_s11  ;;  %p9963_p1 = scmp.lt.s32.totalorder %s103_s7, %s103_s7 }
  0x4d   :  { %p9964_p2 = scmp.lt.s32.totalorder %s9958_s11, %s9958_s11 }
  0x4f   :  { %p9965_p3 = por %p9964_p2, %p9963_p1 }
  0x51   :  { %p9966_p4 = pnand %p9965_p3, %p9959_p0 }
  0x53   :  { %9969 = shalt.err (!%p9966_p4)
}
  0x54   :  { %s10073_s0 = smov [#allocation6]   ;;  %s9970_s8 = scalar_lea.vmem %s93_s10, 16 }
  0x55   :  { %105 = dma.vmem_to_smem %s103_s7, 16, %s10073_s0, [#allocation7]  }
  0x56   :  { %p9971_p5 = scmp.ne.s32.totalorder %s93_s10, %s9970_s8  ;;  %p9975_p6 = scmp.lt.s32.totalorder %s93_s10, %s93_s10 }
  0x57   :  { %p9976_p7 = scmp.lt.s32.totalorder %s9970_s8, %s9970_s8 }
  0x59   :  { %p9977_p8 = por %p9976_p7, %p9975_p6 }
  0x5b   :  { %p9978_p9 = pnand %p9977_p8, %p9971_p5 }
  0x5d   :  { %9981 = shalt.err (!%p9978_p9)
}
  0x5e   :  { %s10074_s9 = smov [#allocation3]   ;;  %s112_s5 = sshll.u32 %s10108_s13, 4  ;;  %s113_s5 = int_to_ptr.vmem [resolvable:$true] %s112_s5 }
  0x5f   :  { %95 = dma.vmem_to_smem %s93_s10, 16, %s10074_s9, [#allocation5]  }
  0x60   :  { %s122_s15 = sshll.u32 %s10113_s17, 4  ;;  %s9982_s16 = scalar_lea.vmem %s113_s5, 16  ;;  %s123_s15 = int_to_ptr.vmem [resolvable:$true] %s122_s15 }
  0x61   :  { %p9983_p10 = scmp.ne.s32.totalorder %s113_s5, %s9982_s16  ;;  %p9987_p11 = scmp.lt.s32.totalorder %s113_s5, %s113_s5 }
  0x62   :  { %p9988_p12 = scmp.lt.s32.totalorder %s9982_s16, %s9982_s16 }
  0x64   :  { %p9989_p13 = por %p9988_p12, %p9987_p11 }
  0x66   :  { %p9990_p0 = pnand %p9989_p13, %p9983_p10 }
  0x68   :  { %9993 = shalt.err (!%p9990_p0)
}
  0x69   :  { %s10075_s18 = smov [#allocation8]   ;;  %s9994_s22 = scalar_lea.vmem %s123_s15, 16 }
  0x6a   :  { %115 = dma.vmem_to_smem %s113_s5, 16, %s10075_s18, [#allocation7]  }
  0x6b   :  { %p9995_p1 = scmp.ne.s32.totalorder %s123_s15, %s9994_s22  ;;  %p9999_p2 = scmp.lt.s32.totalorder %s123_s15, %s123_s15 }
  0x6c   :  { %p10000_p3 = scmp.lt.s32.totalorder %s9994_s22, %s9994_s22 }
  0x6e   :  { %p10001_p4 = por %p10000_p3, %p9999_p2 }
  0x70   :  { %p10002_p5 = pnand %p10001_p4, %p9995_p1 }
  0x72   :  { %10005 = shalt.err (!%p10002_p5)
}
  0x73   :  { %s10076_s13 = smov [#allocation9]  }
  0x74   :  { %125 = dma.vmem_to_smem %s123_s15, 16, %s10076_s13, [#allocation10]  }
  0x75   :  { %10028 = dma.done.wait [#allocation5], 16  }
  0x76   :  { %10029 = vsyncadd [#allocation5], 4294967280 }
  0x77   :  { %10030 = dma.done.wait [#allocation7], 32  }
  0x78   :  { %10031 = vsyncadd [#allocation7], 4294967264 }
  0x79   :  { %10032 = dma.done.wait [#allocation10], 16  }
  0x7a   :  { %10033 = vsyncadd [#allocation10], 4294967280 }
  0x7b   :  { %204 = sfence }
  0x7c   :  { %v10288_v1 = vld [vmem:[%s10153_s24] sm:$0xff]   ;;  %v10077_v2 = vmov 0.0   ;;  %v10294_v3 = vld [vmem:[%s10153_s24 + $0x8] sm:$0xff]   ;;  %vm10078_vm0 = vmmov 0   ;;  %v10302_v4 = vld [vmem:[%s10153_s24 + $0x10] sm:$0xff]   ;;  %vm239_vm1 = vcmask 392192   ;;  %v443_v37 = vlaneseq }
  0x7d   :  { %8917 = vmatprep.subr.bf16.mxu0 %v10077_v2  ;;  %8927 = vmatprep.subr.bf16.mxu1 %v10077_v2  ;;  %v213_v5 = vld [vmem:[%s10118_s21] sm:$0x1]  ;;  %v10318_v8 = vld [vmem:[%s10173_s20 + $0x8] sm:$0xff]   ;;  %vm296_vm2 = vcmask 261120   ;;  %s10079_s17 = smov 64   ;;  %s10080_s21 = smov 96  }
  0x7e   :  { %8918 = vmatpush3.bf16.msra.mxu0 %v10288_v1  ;;  %8923 = vmatprep.mubr.msk.bf16.mxu0 %vm10078_vm0, %v10077_v2  ;;  %v10306_v6 = vld [vmem:[%s10173_s20] sm:$0xff]   ;;  %v220_v7 = vpack.c.bf16 %v213_v5, %v213_v5  ;;  %vm362_vm3 = vcmask 1040384   ;;  %vm346_vm4 = vcmask 253952   ;;  %vm358_vm5 = vcmask 7168   ;;  %s8081_s23 = sld [smem:[#allocation3 + $0x1]]  ;;  %s2106_s26 = sld [smem:[#allocation6]] }
  0x7f   :  { %8919 = vmatprep.subr.bf16.mxu0 %v10077_v2  ;;  %8931 = vmatprep.mubr.msk.bf16.mxu1 %vm10078_vm0, %v10077_v2  ;;  %v10323_v9 = vld [vmem:[%s10158_s30] sm:$0x1]  ;;  %s10081_s30 = smov 32   ;;  %v10356_v39 = vshrl.u32 %v443_v37, 7  ;;  %vm687_vm6 = vcmask 9216   ;;  %s8082_s1 = sld [smem:[#allocation3 + $0x2]] }
  0x80   :  { %8928 = vmatpush3.bf16.msra.mxu1 %v10306_v6  ;;  %v10330_v16 = vld [vmem:[%s10178_s27] sm:$0x1]  ;;  %s8093_s28 = sld [smem:[#allocation6 + $0x1]]  ;;  %s8094_s2 = sld [smem:[#allocation6 + $0x2]]  ;;  %vm705_vm13 = vcmask 1041408   ;;  %vm1130_vm14 = vcmask 1042432  }
  0x81   :  { %8929 = vmatprep.subr.bf16.mxu1 %v10077_v2  ;;  %v512_v35 = vld [vmem:[%s10123_s25] sm:$0x3]  ;;  %v10363_v42 = vsub.s32 0, %v10356_v39  ;;  %s1971_s25 = sld [smem:[#allocation3]]  ;;  %s8083_s7 = sld [smem:[#allocation3 + $0x3]] }
  0x82   :  { %8920 = vmatpush3.bf16.msra.mxu0 %v10294_v3  ;;  %v513_v36 = vpack.c.bf16 %v512_v35, %v512_v35  ;;  %s8084_s10 = sld [smem:[#allocation3 + $0x4]]  ;;  %s8095_s11 = sld [smem:[#allocation6 + $0x3]] }
  0x83   :  { %8921 = vmatprep.subr.bf16.mxu0 %v10077_v2  ;;  %v10369_v43 = vrot.slane %v10323_v9, %v10363_v42  ;;  %v10380_v54 = vrot.slane %v10330_v16, %v10363_v42  ;;  %s8096_s0 = sld [smem:[#allocation6 + $0x4]]  ;;  %s11559_s8 = sld [smem:[#allocation19_spill]] }
  0x84   :  { %8930 = vmatpush3.bf16.msra.mxu1 %v10318_v8  ;;  %s2016_s9 = sld [smem:[#allocation8]]  ;;  %s8089_s5 = sld [smem:[#allocation8 + $0x1]] }
  0x85   :  { %8935 = vmatprep.subr.mxu1 %v10077_v2  ;;  %s8090_s15 = sld [smem:[#allocation8 + $0x2]]  ;;  %s10660_s16 = sld [smem:[#allocation9]] }
  0x86   :  { %8922 = vmatpush3.bf16.msra.mxu0 %v10302_v4  ;;  %s10662_s18 = sld [smem:[#allocation9 + $0x1]]  ;;  %s10666_s22 = sld [smem:[#allocation6 + $0x8]] }
  0x87   :  { %8940 = vmatprep.subr.bf16.mxu0 %v10077_v2  ;;  %s10670_s13 = sld [smem:[#allocation9 + $0x2]] }
  0x89   :  { %8924 = vmatmul.mubr.msk.bf16.vlgmr.msra.gmra.mrb[0].mxu0 %vm239_vm1, %v220_v7  ;;  %v10395_v7 = vand.u32 127, %v443_v37 }
  0x8a   :  { %8944 = vmatprep.mubr.msk.bf16.mxu0 %vm10078_vm0, %v10077_v2 }
 0x15c   :  { %v277_v10 = vpop.f32.mrb[0].mxu0 }
 0x15d   :  { %v278_v11 = vadd.f32 %v277_v10, %v10323_v9  ;;  %v8925_v12 = vpop.f32.mrb[1].mxu0  ;;  %v1976_v9 = vstv %s8081_s23  ;;  %v2107_v10 = vstv %s2106_s26  ;;  %s8088_s23 = sld [smem:[#allocation3 + $0x8]] }
 0x15e   :  { %v280_v13 = vpop.f32.mrb[2].mxu0  ;;  %vm1977_vm8 = vcmp.eq.s32.totalorder %v10395_v7, %v1976_v9  ;;  %v1980_v12 = vstv %s8082_s1  ;;  %vm2108_vm9 = vcmp.eq.s32.totalorder %v10395_v7, %v2107_v10  ;;  %s11563_s26 = sld [smem:[#allocation20_spill]]  ;;  %s11564_s1 = sld [smem:[#allocation17_spill]] }
 0x15f   :  { %v283_v14 = vpack.c.bf16 %v278_v11, %v278_v11  ;;  %v8926_v15 = vpop.f32.mrb[3].mxu0  ;;  %v2111_v11 = vstv %s8093_s28  ;;  %v2115_v13 = vstv %s8094_s2  ;;  %vm1981_vm11 = vcmp.eq.s32.totalorder %v10395_v7, %v1980_v12  ;;  %s11565_s28 = sld [smem:[#allocation21_spill]]  ;;  %s10084_s2 = smov 80  }
 0x160   :  { %vm2112_vm10 = vcmp.eq.s32.totalorder %v10395_v7, %v2111_v11  ;;  %v1978_v15 = vsel %vm1977_vm8, 1.0, %v10077_v2  ;;  %vm2116_vm12 = vcmp.eq.s32.totalorder %v10395_v7, %v2115_v13  ;;  %vm871_vm8 = vcmask 1043456  }
 0x161   :  { %8932 = vmatmul.mubr.msk.bf16.vlgmr.msra.gmra.mrb[0].mxu1 %vm296_vm2, %v283_v14 }
 0x162   :  { %8937 = vmatprep.mubr.msk.f32.mxu1 %vm10078_vm0, %v10077_v2 }
 0x234   :  { %v334_v17 = vpop.f32.mrb[0].mxu1 }
 0x235   :  { %v335_v18 = vadd.f32 %v334_v17, %v10330_v16  ;;  %v8933_v19 = vpop.f32.mrb[1].mxu1  ;;  %v2109_v16 = vsel %vm2108_vm9, 1.0, %v10077_v2  ;;  %v2113_v17 = vsel %vm2112_vm10, 1.0, %v10077_v2  ;;  %vm701_vm9 = vcmask 15360  }
 0x236   :  { %v337_v20 = vpop.f32.mrb[2].mxu1  ;;  %vm867_vm10 = vcmask 195584  }
 0x237   :  { %356 = vrot.lane.b32.xlu1 %v335_v18, %s10079_s17  ;;  %342 = vrot.lane.b32.xlu0 %v335_v18, %s10080_s21  ;;  %v8934_v21 = vpop.f32.mrb[3].mxu1  ;;  %v340_v22 = vmul.f32 0.17677669, %v335_v18  ;;  %v1982_v18 = vsel %vm1981_vm11, 1.0, %v10077_v2  ;;  %v2117_v20 = vsel %vm2116_vm12, 1.0, %v10077_v2  ;;  %vm1112_vm11 = vcmask 18432  }
 0x238   :  { %v2142_v21 = vsel %vm362_vm3, %v2109_v16, %v2113_v17  ;;  %vm1126_vm12 = vcmask 23552  }
 0x23b   :  { %436 = vrot.lane.b32.xlu1 %v10306_v6, %s10081_s30 }
 0x23f   :  { %438 = vrot.lane.b32.xlu1 %v10318_v8, %s10081_s30 }
 0x2a9   :  { %v357_v23 = vpop.permute.xlu1 %356  ;;  %v343_v24 = vpop.permute.xlu0 %342 }
 0x2aa   :  { %v345_v25 = vmul.f32 %v343_v24, %v340_v22  ;;  %8936 = vmatpush3.msk.msra.mxu1 %vm362_vm3, %v357_v23  ;;  %v2143_v23 = vsel %vm705_vm13, %v2142_v21, %v2117_v20  ;;  %v1984_v24 = vstv %s8083_s7  ;;  %s10085_s7 = smov 112  }
 0x2ab   :  { %8948 = vmatprep.subr.bf16.mxu1 %v10077_v2  ;;  %vm1985_vm15 = vcmp.eq.s32.totalorder %v10395_v7, %v1984_v24 }
 0x2ac   :  { %v347_v26 = vsel %vm346_vm4, %v345_v25, 0.0  ;;  %v1988_v25 = vstv %s8084_s10  ;;  %s10086_s10 = smov 48  }
 0x2ad   :  { %348 = vadd.xlane.f32.xlu0 %v347_v26  ;;  %v437_v33 = vpop.permute.xlu1 %436  ;;  %v2119_v26 = vstv %s8095_s11  ;;  %s10087_s11 = smov 16  }
 0x2ae   :  { %8941 = vmatpush3.bf16.msra.mxu0 %v437_v33 }
 0x2af   :  { %8942 = vmatprep.subr.bf16.mxu0 %v10077_v2 }
 0x2b1   :  { %v439_v34 = vpop.permute.xlu1 %438 }
 0x2b2   :  { %8943 = vmatpush3.bf16.msra.mxu0 %v439_v34 }
 0x2b3   :  { %8958 = vmatprep.subr.bf16.mxu0 %v10077_v2 }
 0x33a   :  { %v349_v27 = vpop.xlane.xlu0 %348 }
 0x33b   :  { %v350_v28 = vsub.f32 %v349_v27, %v349_v27  ;;  %v2123_v27 = vstv %s8096_s0  ;;  %s11568_s0 = sld [smem:[#allocation22_spill]] }
 0x33d   :  { %v351_v29 = vmul.f32 1.442695, %v350_v28  ;;  %v1986_v28 = vsel %vm1985_vm15, 1.0, %v10077_v2  ;;  %vm822_vm15 = vcmask 254976  }
 0x33f   :  { %9822 = vpow2.f32 %v351_v29 }
 0x349   :  { %v9823_v30 = vpop.eup %9822 }
 0x34a   :  { %9824 = vrcp.f32 %v9823_v30 }
 0x354   :  { %v9825_v31 = vpop.eup %9824 }
 0x355   :  { %v355_v32 = vmul.f32 %v9825_v31, %v9823_v30 }
 0x357   :  { %8938 = vmatmul.mubr.msk.f32.vlgmr.msra.gmra.mrb[4].mxu1 %vm358_vm5, %v355_v32  ;;  %vm1989_vm5 = vcmp.eq.s32.totalorder %v10395_v7, %v1988_v25 }
 0x358   :  { %8949 = vmatpush3.bf16.msra.mxu1 %v10288_v1  ;;  %8954 = vmatprep.mubr.msk.bf16.mxu1 %vm10078_vm0, %v10077_v2  ;;  %v1990_v29 = vsel %vm1989_vm5, 1.0, %v10077_v2  ;;  %vm2011_vm5 = vcmask 1044480  }
 0x359   :  { %8950 = vmatprep.subr.bf16.mxu1 %v10077_v2 }
 0x35c   :  { %8951 = vmatpush3.bf16.msra.mxu1 %v10294_v3 }
 0x35d   :  { %8952 = vmatprep.subr.bf16.mxu1 %v10077_v2 }
 0x360   :  { %8953 = vmatpush3.bf16.msra.mxu1 %v10302_v4 }
 0x361   :  { %8971 = vmatprep.subr.mxu1 %v10077_v2 }
 0x363   :  { %8955 = vmatmul.mubr.msk.bf16.vlgmr.msra.gmra.mrb[8].mxu1 %vm239_vm1, %v513_v36 }
 0x364   :  { %8973 = vmatprep.mubr.msk.f32.mxu1 %vm10078_vm0, %v10077_v2 }
 0x42a   :  { %v431_v38 = vpop.f32.mrb[4].mxu1 }
 0x42b   :  { %v435_v40 = vpack.c.bf16 %v431_v38, %v431_v38  ;;  %v8939_v41 = vpop.f32.mrb[5].mxu1 }
 0x42d   :  { %8945 = vmatmul.mubr.msk.bf16.vlgmr.msra.gmra.mrb[4].mxu0 %vm296_vm2, %v435_v40  ;;  %v9626_v40 = vld [vmem:[%s10163_s6] sm:$0xff]  }
 0x42e   :  { %8959 = vmatpush3.bf16.msra.mxu0 %v10306_v6  ;;  %8962 = vmatprep.mubr.msk.bf16.mxu0 %vm10078_vm0, %v10077_v2 }
 0x42f   :  { %8960 = vmatprep.subr.bf16.mxu0 %v10077_v2 }
 0x432   :  { %8961 = vmatpush3.bf16.msra.mxu0 %v10318_v8  ;;  %v1972_v8 = vstv %s1971_s25  ;;  %s11560_s25 = sld [smem:[#allocation18_spill]] }
 0x433   :  { %8966 = vmatprep.subr.mxu0 %v10077_v2  ;;  %vm1973_vm7 = vcmp.eq.s32.totalorder %v10395_v7, %v1972_v8 }
 0x434   :  { %v1974_v14 = vsel %vm1973_vm7, 1.0, %v10077_v2  ;;  %vm2124_vm7 = vcmp.eq.s32.totalorder %v10395_v7, %v2123_v27 }
 0x435   :  { %v2007_v19 = vsel %vm362_vm3, %v1974_v14, %v1978_v15  ;;  %v2125_v32 = vsel %vm2124_vm7, 1.0, %v10077_v2  ;;  %v915_v15 = vld [vmem:[%s10133_s3] sm:$0x7]  ;;  %s8097_s3 = sld [smem:[#allocation6 + $0x5]] }
 0x436   :  { %v557_v44 = vpop.f32.mrb[8].mxu1  ;;  %v2008_v22 = vsel %vm705_vm13, %v2007_v19, %v1982_v18  ;;  %v916_v16 = vpack.c.bf16 %v915_v15, %v915_v15 }
 0x437   :  { %v558_v45 = vadd.f32 %v557_v44, %v10369_v43  ;;  %v8956_v46 = vpop.f32.mrb[9].mxu1  ;;  %v2009_v30 = vsel %vm1130_vm14, %v2008_v22, %v1986_v28  ;;  %v9627_v44 = vld [vmem:[%s10163_s6 + $0x8] ss:$0 sps:$4 sm:$0xff]   ;;  %s8099_s6 = sld [smem:[#allocation6 + $0x7]] }
 0x438   :  { %v560_v47 = vpop.f32.mrb[10].mxu1  ;;  %v873_v46 = vsel %vm871_vm8, %v9627_v44, 0 }
 0x439   :  { %v563_v48 = vpack.c.bf16 %v558_v45, %v558_v45  ;;  %v8957_v49 = vpop.f32.mrb[11].mxu1  ;;  %v846_v45 = vld [vmem:[%s10128_s29] sm:$0x7]  ;;  %s11558_s29 = sld [smem:[#allocation16_spill]] }
 0x43a   :  { %v850_v47 = vpack.c.bf16 %v846_v45, %v846_v45  ;;  %v9629_v49 = vld [vmem:[%s10173_s20 + $0x38] sm:$0xff]  }
 0x43b   :  { %8963 = vmatmul.mubr.msk.bf16.vlgmr.msra.gmra.mrb[8].mxu0 %vm296_vm2, %v563_v48  ;;  %v10443_v48 = vld [vmem:[%s10173_s20 + $0x30] sm:$0xff]  }
 0x43c   :  { %8968 = vmatprep.mubr.msk.f32.mxu0 %vm10078_vm0, %v10077_v2 }
 0x500   :  { %v10376_v50 = vpop.f32.mrb[4].mxu0 }
 0x501   :  { %v8946_v51 = vpop.f32.mrb[5].mxu0 }
 0x502   :  { %v490_v52 = vpop.f32.mrb[6].mxu0 }
 0x503   :  { %v8947_v53 = vpop.f32.mrb[7].mxu0 }
 0x50e   :  { %v602_v55 = vpop.f32.mrb[8].mxu0 }
 0x50f   :  { %v603_v56 = vadd.f32 %v602_v55, %v10380_v54  ;;  %v8964_v57 = vpop.f32.mrb[9].mxu0  ;;  %v10451_v55 = vld [vmem:[%s10153_s24] sm:$0xff]  }
 0x510   :  { %v605_v58 = vpop.f32.mrb[10].mxu0 }
 0x511   :  { %610 = vrot.lane.b32.xlu1 %v603_v56, %s10080_s21  ;;  %v8965_v59 = vpop.f32.mrb[11].mxu0  ;;  %v608_v61 = vmul.f32 0.17677669, %v603_v56  ;;  %v10459_v58 = vld [vmem:[%s10153_s24 + $0x8] sm:$0xff]  }
 0x583   :  { %v611_v60 = vpop.permute.xlu1 %610 }
 0x584   :  { %8967 = vmatpush3.xpose.msk.msra.mxu0 %vm296_vm2, %v611_v60 }
 0x585   :  { %8976 = vmatprep.subr.bf16.mxu0 %v10077_v2 }
 0x587   :  { %8969 = vmatmul.mubr.msk.f32.vlgmr.msra.gmra.mrb[12].mxu0 %vm296_vm2, %v608_v61 }
 0x588   :  { %8977 = vmatpush3.bf16.msra.mxu0 %v437_v33  ;;  %8980 = vmatprep.mubr.msk.bf16.mxu0 %vm10078_vm0, %v10077_v2  ;;  %v10423_v33 = vsel %vm871_vm8, %v2009_v30, %v1990_v29 }
 0x589   :  { %8978 = vmatprep.subr.bf16.mxu0 %v10077_v2 }
 0x58c   :  { %8979 = vmatpush3.bf16.msra.mxu0 %v439_v34 }
 0x58d   :  { %8992 = vmatprep.subr.bf16.mxu0 %v10077_v2 }
 0x65a   :  { %v683_v62 = vpop.f32.mrb[12].mxu0 }
 0x65b   :  { %v8970_v63 = vpop.f32.mrb[13].mxu0  ;;  %v688_v0 = vsel %vm687_vm6, %v683_v62, -inf }
 0x65c   :  { %689 = vmax.xlane.f32.xlu1 %v688_v0  ;;  %v10464_v0 = vld [vmem:[%s10153_s24 + $0x10] sm:$0xff]   ;;  %s8098_s24 = sld [smem:[#allocation6 + $0x6]] }
 0x6e9   :  { %v690_v1 = vpop.xlane.xlu1 %689 }
 0x6ea   :  { %v691_v3 = vsub.f32 %v683_v62, %v690_v1 }
 0x6ec   :  { %v692_v4 = vmul.f32 1.442695, %v691_v3 }
 0x6ee   :  { %9826 = vpow2.f32 %v692_v4 }
 0x6f8   :  { %v10391_v5 = vpop.eup %9826 }
 0x6f9   :  { %v694_v6 = vsel %vm687_vm6, %v10391_v5, 0.0  ;;  %vm2120_vm6 = vcmp.eq.s32.totalorder %v10395_v7, %v2119_v26 }
 0x6fa   :  { %695 = vadd.xlane.f32.xlu0 %v694_v6  ;;  %v2121_v31 = vsel %vm2120_vm6, 1.0, %v10077_v2  ;;  %v10474_v6 = vld [vmem:[%s10178_s27 + $0x3] ss:$0 sm:$0xff] }
 0x6fb   :  { %v2144_v34 = vsel %vm1130_vm14, %v2143_v23, %v2121_v31 }
 0x6fc   :  { %v10427_v35 = vsel %vm871_vm8, %v2144_v34, %v2125_v32  ;;  %vm1964_vm8 = vcmask 1045504  }
 0x710   :  { %699 = vrot.lane.b32.xlu0 %v603_v56, %s10079_s17  ;;  %v8030_v56 = vld [vmem:[%s10168_s12] ss:$0 sm:$0xff]  ;;  %s8085_s12 = sld [smem:[#allocation3 + $0x5]] }
 0x787   :  { %v696_v36 = vpop.xlane.xlu0 %695 }
 0x788   :  { %9828 = vrcp.f32 %v696_v36  ;;  %v9630_v36 = vld [vmem:[%s10173_s20 + $0x20] sm:$0xff]  }
 0x78b   :  { %v700_v37 = vpop.permute.xlu0 %699 }
 0x78c   :  { %8972 = vmatpush3.msk.msra.mxu1 %vm705_vm13, %v700_v37 }
 0x78d   :  { %8984 = vmatprep.subr.bf16.mxu1 %v10077_v2 }
 0x792   :  { %v9829_v38 = vpop.eup %9828 }
 0x793   :  { %v698_v41 = vmul.f32 %v9829_v38, %v10391_v5 }
 0x795   :  { %8974 = vmatmul.mubr.msk.f32.vlgmr.msra.gmra.mrb[6].mxu1 %vm701_vm9, %v698_v41  ;;  %vm2014_vm9 = vcmask 1046528  }
 0x796   :  { %8985 = vmatpush3.bf16.msra.mxu1 %v9626_v40  ;;  %8988 = vmatprep.mubr.msk.bf16.mxu1 %vm10078_vm0, %v10077_v2  ;;  %v9631_v40 = vld [vmem:[%s10173_s20 + $0x28] sm:$0xff]  }
 0x797   :  { %8986 = vmatprep.subr.bf16.mxu1 %v10077_v2 }
 0x79a   :  { %8987 = vmatpush3.bf16.msra.mxu1 %v873_v46 }
 0x79b   :  { %9002 = vmatprep.subr.bf16.mxu1 %v10077_v2 }
 0x79d   :  { %8989 = vmatmul.mubr.msk.bf16.vlgmr.msra.gmra.mrb[12].mxu1 %vm867_vm10, %v850_v47  ;;  %v10512_v47 = vld [vmem:[%s10178_s27 + $0x2] ss:$0 sm:$0xff] }
 0x79e   :  { %9006 = vmatprep.mubr.msk.bf16.mxu1 %vm10078_vm0, %v10077_v2  ;;  %9003 = vmatpush3.bf16.msra.mxu1 %v10443_v48 }
 0x79f   :  { %9004 = vmatprep.subr.bf16.mxu1 %v10077_v2 }
 0x7a2   :  { %9005 = vmatpush3.bf16.msra.mxu1 %v9629_v49 }
 0x7a3   :  { %9010 = vmatprep.subr.mxu1 %v10077_v2 }
 0x868   :  { %v774_v51 = vpop.f32.mrb[6].mxu1 }
 0x869   :  { %v778_v52 = vpack.c.bf16 %v774_v51, %v774_v51  ;;  %v8975_v53 = vpop.f32.mrb[7].mxu1 }
 0x86b   :  { %8981 = vmatmul.mubr.msk.bf16.vlgmr.msra.gmra.mrb[16].mxu0 %vm296_vm2, %v778_v52 }
 0x86c   :  { %8993 = vmatpush3.bf16.msra.mxu0 %v10451_v55  ;;  %8998 = vmatprep.mubr.msk.bf16.mxu0 %vm10078_vm0, %v10077_v2 }
 0x86d   :  { %8994 = vmatprep.subr.bf16.mxu0 %v10077_v2 }
 0x870   :  { %v909_v57 = vpop.f32.mrb[12].mxu1  ;;  %8995 = vmatpush3.bf16.msra.mxu0 %v10459_v58 }
 0x871   :  { %v910_v59 = vadd.f32 %v8030_v56, %v909_v57  ;;  %v8990_v60 = vpop.f32.mrb[13].mxu1  ;;  %8996 = vmatprep.subr.bf16.mxu0 %v10077_v2 }
 0x872   :  { %v912_v61 = vpop.f32.mrb[14].mxu1 }
 0x873   :  { %v971_v62 = vpack.c.bf16 %v910_v59, %v910_v59  ;;  %v8991_v63 = vpop.f32.mrb[15].mxu1 }
 0x874   :  { %8997 = vmatpush3.bf16.msra.mxu0 %v10464_v0 }
 0x875   :  { %9007 = vmatmul.mubr.msk.bf16.vlgmr.msra.gmra.mrb[16].mxu1 %vm296_vm2, %v971_v62  ;;  %9015 = vmatprep.subr.mxu0 %v10077_v2 }
 0x876   :  { %9012 = vmatprep.mubr.msk.f32.mxu1 %vm10078_vm0, %v10077_v2 }
 0x877   :  { %8999 = vmatmul.mubr.msk.bf16.vlgmr.msra.gmra.mrb[20].mxu0 %vm239_vm1, %v916_v16 }
 0x878   :  { %9017 = vmatprep.mubr.msk.f32.mxu0 %vm10078_vm0, %v10077_v2 }
 0x93e   :  { %v10471_v1 = vpop.f32.mrb[16].mxu0 }
 0x93f   :  { %v8982_v3 = vpop.f32.mrb[17].mxu0 }
 0x940   :  { %v819_v4 = vpop.f32.mrb[18].mxu0 }
 0x941   :  { %v8983_v5 = vpop.f32.mrb[19].mxu0 }
 0x948   :  { %v1027_v8 = vpop.f32.mrb[16].mxu1 }
 0x949   :  { %v1028_v9 = vadd.f32 %v10474_v6, %v1027_v8  ;;  %v9008_v10 = vpop.f32.mrb[17].mxu1 }
 0x94a   :  { %v1030_v11 = vpop.f32.mrb[18].mxu1  ;;  %v954_v26 = vpop.f32.mrb[20].mxu0 }
 0x94b   :  { %1035 = vrot.lane.b32.xlu1 %v1028_v9, %s10080_s21  ;;  %v9009_v12 = vpop.f32.mrb[19].mxu1  ;;  %v1033_v14 = vmul.f32 0.17677669, %v1028_v9  ;;  %v9000_v27 = vpop.f32.mrb[21].mxu0  ;;  %v955_v38 = vadd.f32 %v954_v26, %v10369_v43 }
 0x94c   :  { %v957_v28 = vpop.f32.mrb[22].mxu0 }
 0x94d   :  { %v9001_v29 = vpop.f32.mrb[23].mxu0  ;;  %v1287_v41 = vpack.c.bf16 %v955_v38, %v955_v38 }
 0x9bd   :  { %v1036_v13 = vpop.permute.xlu1 %1035 }
 0x9be   :  { %9011 = vmatpush3.xpose.msk.msra.mxu1 %vm296_vm2, %v1036_v13 }
 0x9bf   :  { %9020 = vmatprep.subr.bf16.mxu1 %v10077_v2 }
 0x9c1   :  { %9013 = vmatmul.mubr.msk.f32.vlgmr.msra.gmra.mrb[20].mxu1 %vm296_vm2, %v1033_v14 }
 0x9c2   :  { %9024 = vmatprep.mubr.msk.bf16.mxu1 %vm10078_vm0, %v10077_v2 }
 0xa94   :  { %v1108_v17 = vpop.f32.mrb[20].mxu1 }
 0xa95   :  { %v9014_v18 = vpop.f32.mrb[21].mxu1  ;;  %v1113_v19 = vsel %vm1112_vm11, %v1108_v17, -inf }
 0xa96   :  { %1114 = vmax.xlane.f32.xlu0 %v1113_v19  ;;  %v1594_v18 = vld [vmem:[%s11558_s29] sm:$0x7]  ;;  %s11569_s29 = sld [smem:[#allocation24_spill]] }
 0xa97   :  { %v1604_v19 = vpack.c.bf16 %v1594_v18, %v1594_v18 }
 0xaac   :  { %1124 = vrot.lane.b32.xlu0 %v1028_v9, %s10079_s17 }
 0xab0   :  { %1206 = vrot.lane.b32.xlu0 %v9629_v49, %s10081_s30 }
 0xb23   :  { %v1115_v20 = vpop.xlane.xlu0 %1114 }
 0xb24   :  { %v1116_v21 = vsub.f32 %v1108_v17, %v1115_v20  ;;  %v9632_v20 = vld [vmem:[%s10173_s20 + $0x10] sm:$0xff]  }
 0xb26   :  { %v1117_v22 = vmul.f32 1.442695, %v1116_v21 }
 0xb27   :  { %v1125_v23 = vpop.permute.xlu0 %1124 }
 0xb28   :  { %9830 = vpow2.f32 %v1117_v22  ;;  %9016 = vmatpush3.msk.msra.mxu0 %vm1130_vm14, %v1125_v23 }
 0xb29   :  { %9028 = vmatprep.subr.bf16.mxu0 %v10077_v2 }
 0xb2b   :  { %v1207_v32 = vpop.permute.xlu0 %1206 }
 0xb32   :  { %v9831_v24 = vpop.eup %9830 }
 0xb33   :  { %v1119_v25 = vsel %vm1112_vm11, %v9831_v24, 0.0 }
 0xb34   :  { %1120 = vadd.xlane.f32.xlu1 %v1119_v25 }
 0xb45   :  { %1204 = vrot.lane.b32.xlu1 %v10443_v48, %s10081_s30 }
 0xbc1   :  { %v1121_v30 = vpop.xlane.xlu1 %1120 }
 0xbc2   :  { %9832 = vrcp.f32 %v1121_v30 }
 0xbc5   :  { %v1205_v31 = vpop.permute.xlu1 %1204 }
 0xbc6   :  { %9021 = vmatpush3.bf16.msra.mxu1 %v1205_v31 }
 0xbc7   :  { %9022 = vmatprep.subr.bf16.mxu1 %v10077_v2 }
 0xbca   :  { %9023 = vmatpush3.bf16.msra.mxu1 %v1207_v32  ;;  %v8072_v32 = vld [vmem:[%s10178_s27 + $0x1] ss:$0 sm:$0xff]  ;;  %s8087_s27 = sld [smem:[#allocation3 + $0x7]] }
 0xbcb   :  { %9036 = vmatprep.subr.mxu1 %v10077_v2 }
 0xbcc   :  { %v9833_v34 = vpop.eup %9832 }
 0xbcd   :  { %v1123_v37 = vmul.f32 %v9833_v34, %v9831_v24 }
 0xbcf   :  { %9018 = vmatmul.mubr.msk.f32.vlgmr.msra.gmra.mrb[14].mxu0 %vm1126_vm12, %v1123_v37 }
 0xbd0   :  { %9029 = vmatpush3.bf16.msra.mxu0 %v9630_v36  ;;  %9032 = vmatprep.mubr.msk.bf16.mxu0 %vm10078_vm0, %v10077_v2 }
 0xbd1   :  { %9030 = vmatprep.subr.bf16.mxu0 %v10077_v2 }
 0xbd4   :  { %9031 = vmatpush3.bf16.msra.mxu0 %v9631_v40 }
 0xbd5   :  { %9041 = vmatprep.subr.mxu0 %v10077_v2 }
 0xbd7   :  { %9033 = vmatmul.mubr.msk.bf16.vlgmr.msra.gmra.mrb[24].mxu0 %vm296_vm2, %v1287_v41 }
 0xbd8   :  { %9043 = vmatprep.mubr.msk.f32.mxu0 %vm10078_vm0, %v10077_v2 }
 0xca2   :  { %v1199_v44 = vpop.f32.mrb[14].mxu0 }
 0xca3   :  { %v1203_v45 = vpack.c.bf16 %v1199_v44, %v1199_v44  ;;  %v9019_v46 = vpop.f32.mrb[15].mxu0 }
 0xca5   :  { %9025 = vmatmul.mubr.msk.bf16.vlgmr.msra.gmra.mrb[24].mxu1 %vm296_vm2, %v1203_v45 }
 0xca6   :  { %9038 = vmatprep.mubr.msk.f32.mxu1 %vm10078_vm0, %v10077_v2 }
 0xcaa   :  { %v1343_v48 = vpop.f32.mrb[24].mxu0 }
 0xcab   :  { %v1344_v49 = vadd.f32 %v10512_v47, %v1343_v48  ;;  %v9034_v51 = vpop.f32.mrb[25].mxu0 }
 0xcac   :  { %v1346_v52 = vpop.f32.mrb[26].mxu0 }
 0xcad   :  { %1351 = vrot.lane.b32.xlu0 %v1344_v49, %s10080_s21  ;;  %v9035_v53 = vpop.f32.mrb[27].mxu0  ;;  %v1349_v57 = vmul.f32 0.17677669, %v1344_v49 }
 0xd1f   :  { %v1352_v56 = vpop.permute.xlu0 %1351 }
 0xd20   :  { %9037 = vmatpush3.xpose.msk.msra.mxu1 %vm296_vm2, %v1352_v56 }
 0xd21   :  { %9046 = vmatprep.subr.bf16.mxu1 %v10077_v2 }
 0xd23   :  { %9039 = vmatmul.mubr.msk.f32.vlgmr.msra.gmra.mrb[22].mxu1 %vm296_vm2, %v1349_v57 }
 0xd24   :  { %9050 = vmatprep.mubr.msk.bf16.mxu1 %vm10078_vm0, %v10077_v2 }
 0xd78   :  { %v10521_v59 = vpop.f32.mrb[24].mxu1 }
 0xd79   :  { %v9026_v60 = vpop.f32.mrb[25].mxu1 }
 0xd7a   :  { %v1253_v61 = vpop.f32.mrb[26].mxu1 }
 0xd7b   :  { %v9027_v62 = vpop.f32.mrb[27].mxu1 }
 0xdf6   :  { %v1424_v63 = vpop.f32.mrb[22].mxu1 }
 0xdf7   :  { %v9040_v3 = vpop.f32.mrb[23].mxu1  ;;  %v1428_v4 = vsel %vm1112_vm11, %v1424_v63, -inf }
 0xdf8   :  { %1429 = vmax.xlane.f32.xlu0 %v1428_v4 }
 0xe0e   :  { %1439 = vrot.lane.b32.xlu0 %v1344_v49, %s10079_s17 }
 0xe12   :  { %1519 = vrot.lane.b32.xlu0 %v9631_v40, %s10081_s30 }
 0xe85   :  { %v1430_v5 = vpop.xlane.xlu0 %1429 }
 0xe86   :  { %v1431_v8 = vsub.f32 %v1424_v63, %v1430_v5 }
 0xe88   :  { %v1432_v9 = vmul.f32 1.442695, %v1431_v8 }
 0xe89   :  { %v1440_v10 = vpop.permute.xlu0 %1439 }
 0xe8a   :  { %9834 = vpow2.f32 %v1432_v9  ;;  %9042 = vmatpush3.msk.msra.mxu0 %vm1130_vm14, %v1440_v10 }
 0xe8b   :  { %9054 = vmatprep.subr.bf16.mxu0 %v10077_v2 }
 0xe8d   :  { %v1520_v15 = vpop.permute.xlu0 %1519 }
 0xe94   :  { %v9835_v11 = vpop.eup %9834 }
 0xe95   :  { %v1434_v12 = vsel %vm1112_vm11, %v9835_v11, 0.0 }
 0xe96   :  { %1435 = vadd.xlane.f32.xlu1 %v1434_v12 }
 0xea7   :  { %1517 = vrot.lane.b32.xlu1 %v9630_v36, %s10081_s30 }
 0xf23   :  { %v1436_v13 = vpop.xlane.xlu1 %1435 }
 0xf24   :  { %9836 = vrcp.f32 %v1436_v13 }
 0xf27   :  { %v1518_v14 = vpop.permute.xlu1 %1517 }
 0xf28   :  { %9047 = vmatpush3.bf16.msra.mxu1 %v1518_v14 }
 0xf29   :  { %9048 = vmatprep.subr.bf16.mxu1 %v10077_v2 }
 0xf2c   :  { %9049 = vmatpush3.bf16.msra.mxu1 %v1520_v15 }
 0xf2d   :  { %9064 = vmatprep.subr.bf16.mxu1 %v10077_v2 }
 0xf2e   :  { %v9837_v16 = vpop.eup %9836 }
 0xf2f   :  { %v1438_v17 = vmul.f32 %v9837_v16, %v9835_v11 }
 0xf31   :  { %9044 = vmatmul.mubr.msk.f32.vlgmr.msra.gmra.mrb[28].mxu0 %vm1126_vm12, %v1438_v17 }
 0xf32   :  { %9055 = vmatpush3.bf16.msra.mxu0 %v10451_v55  ;;  %9060 = vmatprep.mubr.msk.bf16.mxu0 %vm10078_vm0, %v10077_v2 }
 0xf33   :  { %9056 = vmatprep.subr.bf16.mxu0 %v10077_v2 }
 0xf36   :  { %9057 = vmatpush3.bf16.msra.mxu0 %v10459_v58  ;;  %v9633_v58 = vld [vmem:[%s10173_s20 + $0x18] sm:$0xff]   ;;  %s8086_s20 = sld [smem:[#allocation3 + $0x6]] }
 0xf37   :  { %9058 = vmatprep.subr.bf16.mxu0 %v10077_v2 }
 0xf3a   :  { %9059 = vmatpush3.bf16.msra.mxu0 %v10464_v0 }
 0xf3b   :  { %9072 = vmatprep.subr.mxu0 %v10077_v2 }
 0xf3d   :  { %9061 = vmatmul.mubr.msk.bf16.vlgmr.msra.gmra.mrb[32].mxu0 %vm239_vm1, %v1604_v19  ;;  %vm1256_vm1 = vcmask 256000  }
 0xf3e   :  { %9074 = vmatprep.mubr.msk.f32.mxu0 %vm10078_vm0, %v10077_v2 }
0x1004   :  { %v1512_v55 = vpop.f32.mrb[28].mxu0 }
0x1005   :  { %v1516_v21 = vpack.c.bf16 %v1512_v55, %v1512_v55  ;;  %v9045_v22 = vpop.f32.mrb[29].mxu0 }
0x1007   :  { %9051 = vmatmul.mubr.msk.bf16.vlgmr.msra.gmra.mrb[28].mxu1 %vm296_vm2, %v1516_v21 }
0x1008   :  { %9065 = vmatpush3.bf16.msra.mxu1 %v9632_v20  ;;  %9068 = vmatprep.mubr.msk.bf16.mxu1 %vm10078_vm0, %v10077_v2 }
0x1009   :  { %9066 = vmatprep.subr.bf16.mxu1 %v10077_v2 }
0x100c   :  { %9067 = vmatpush3.bf16.msra.mxu1 %v9633_v58 }
0x100d   :  { %9077 = vmatprep.subr.mxu1 %v10077_v2 }
0x1010   :  { %v1642_v0 = vpop.f32.mrb[32].mxu0 }
0x1011   :  { %v1643_v23 = vadd.f32 %v1642_v0, %v10369_v43  ;;  %v9062_v24 = vpop.f32.mrb[33].mxu0 }
0x1012   :  { %v1645_v25 = vpop.f32.mrb[34].mxu0 }
0x1013   :  { %v1648_v26 = vpack.c.bf16 %v1643_v23, %v1643_v23  ;;  %v9063_v27 = vpop.f32.mrb[35].mxu0 }
0x1015   :  { %9069 = vmatmul.mubr.msk.bf16.vlgmr.msra.gmra.mrb[32].mxu1 %vm296_vm2, %v1648_v26 }
0x1016   :  { %9079 = vmatprep.mubr.msk.f32.mxu1 %vm10078_vm0, %v10077_v2 }
0x10da   :  { %v1563_v28 = vpop.f32.mrb[28].mxu1 }
0x10db   :  { %v9052_v29 = vpop.f32.mrb[29].mxu1 }
0x10dc   :  { %v1566_v30 = vpop.f32.mrb[30].mxu1 }
0x10dd   :  { %v9053_v31 = vpop.f32.mrb[31].mxu1 }
0x10e8   :  { %v1704_v34 = vpop.f32.mrb[32].mxu1 }
0x10e9   :  { %v1705_v36 = vadd.f32 %v8072_v32, %v1704_v34  ;;  %v9070_v37 = vpop.f32.mrb[33].mxu1 }
0x10ea   :  { %v1707_v38 = vpop.f32.mrb[34].mxu1 }
0x10eb   :  { %1712 = vrot.lane.b32.xlu1 %v1705_v36, %s10080_s21  ;;  %v9071_v43 = vpop.f32.mrb[35].mxu1  ;;  %v1710_v41 = vmul.f32 0.17677669, %v1705_v36 }
0x115d   :  { %v1713_v40 = vpop.permute.xlu1 %1712 }
0x115e   :  { %9073 = vmatpush3.xpose.msk.msra.mxu0 %vm296_vm2, %v1713_v40 }
0x115f   :  { %9082 = vmatprep.subr.bf16.mxu0 %v10077_v2 }
0x1161   :  { %9075 = vmatmul.mubr.msk.f32.vlgmr.msra.gmra.mrb[30].mxu0 %vm296_vm2, %v1710_v41 }
0x1162   :  { %9086 = vmatprep.mubr.msk.bf16.mxu0 %vm10078_vm0, %v10077_v2 }
0x1234   :  { %v1785_v44 = vpop.f32.mrb[30].mxu0 }
0x1235   :  { %v9076_v45 = vpop.f32.mrb[31].mxu0  ;;  %v1789_v46 = vsel %vm1112_vm11, %v1785_v44, -inf }
0x1236   :  { %1790 = vmax.xlane.f32.xlu0 %v1789_v46  ;;  %v10082_v46 = vmov 0.0|0.0  }
0x124c   :  { %1800 = vrot.lane.b32.xlu0 %v1705_v36, %s10079_s17 }
0x1250   :  { %1880 = vrot.lane.b32.xlu0 %v9633_v58, %s10081_s30 }
0x1254   :  { %1523 = vrot.lane.b32.xlu0 %v10512_v47, %s10081_s30 }
0x1258   :  { %1884 = vrot.lane.b32.xlu0 %v8072_v32, %s10081_s30 }
0x12c3   :  { %v1791_v48 = vpop.xlane.xlu0 %1790 }
0x12c4   :  { %v1792_v49 = vsub.f32 %v1785_v44, %v1791_v48  ;;  %v2127_v48 = vstv %s8097_s3  ;;  %s11570_s3 = sld [smem:[#allocation26_spill]] }
0x12c5   :  { %vm2128_vm6 = vcmp.eq.s32.totalorder %v10395_v7, %v2127_v48 }
0x12c6   :  { %v1793_v51 = vmul.f32 1.442695, %v1792_v49  ;;  %v2131_v49 = vstv %s8098_s24  ;;  %s11571_s24 = sld [smem:[#allocation23_spill]] }
0x12c7   :  { %v1801_v52 = vpop.permute.xlu0 %1800  ;;  %vm2132_vm7 = vcmp.eq.s32.totalorder %v10395_v7, %v2131_v49  ;;  %v8070_v49 = vld [vmem:[%s11559_s8 + $0x6] sm:$0x3] }
0x12c8   :  { %9838 = vpow2.f32 %v1793_v51  ;;  %9078 = vmatpush3.msk.msra.mxu1 %vm1130_vm14, %v1801_v52  ;;  %v2129_v51 = vsel %vm2128_vm6, 1.0, %v10077_v2  ;;  %v2133_v52 = vsel %vm2132_vm7, 1.0, %v10077_v2 }
0x12c9   :  { %9389 = vmatprep.subr.bf16.mxu1 %v10082_v46 }
0x12cb   :  { %v1881_v53 = vpop.permute.xlu0 %1880 }
0x12cf   :  { %v1524_v56 = vpop.permute.xlu0 %1523 }
0x12d0   :  { %v1564_v57 = vadd.f32 %v1563_v28, %v1524_v56  ;;  %v2146_v56 = vsel %vm2011_vm5, %v10427_v35, %v2129_v51 }
0x12d2   :  { %v9839_v60 = vpop.eup %9838  ;;  %v1569_v61 = vsel %vm1256_vm1, %v1564_v57, 0.0 }
0x12d3   :  { %1570 = vadd.xlane.f32.xlu0 %v1569_v61  ;;  %v1795_v62 = vsel %vm1112_vm11, %v9839_v60, 0.0  ;;  %v1885_v12 = vpop.permute.xlu0 %1884 }
0x12d4   :  { %1796 = vadd.xlane.f32.xlu1 %v1795_v62  ;;  %v1992_v62 = vstv %s8085_s12  ;;  %s11573_s12 = sld [smem:[#allocation27_spill]] }
0x12e5   :  { %1878 = vrot.lane.b32.xlu1 %v9632_v20, %s10081_s30 }
0x12e9   :  { %1210 = vrot.lane.b32.xlu1 %v10474_v6, %s10081_s30 }
0x12ed   :  { %447 = vrot.lane.b32.xlu1 %v10380_v54, %s10081_s30 }
0x1360   :  { %v1571_v13 = vpop.xlane.xlu0 %1570 }
0x1361   :  { %v1797_v47 = vpop.xlane.xlu1 %1796  ;;  %v1572_v0 = vmul.f32 0.03125, %v1571_v13 }
0x1362   :  { %9840 = vrcp.f32 %v1797_v47  ;;  %v1996_v47 = vstv %s8086_s20  ;;  %s11574_s20 = sld [smem:[#allocation28_spill]] }
0x1363   :  { %v10601_v24 = vsub.f32 %v1564_v57, %v1572_v0  ;;  %vm1997_vm6 = vcmp.eq.s32.totalorder %v10395_v7, %v1996_v47 }
0x1364   :  { %v1998_v35 = vsel %vm1997_vm6, 1.0, %v10077_v2 }
0x1365   :  { %v1879_v63 = vpop.permute.xlu1 %1878  ;;  %v1574_v34 = vmul.f32 %v10601_v24, %v10601_v24 }
0x1366   :  { %9083 = vmatpush3.bf16.msra.mxu0 %v1879_v63 }
0x1367   :  { %9084 = vmatprep.subr.bf16.mxu0 %v10077_v2  ;;  %v1575_v36 = vsel %vm1256_vm1, %v1574_v34, 0.0 }
0x1369   :  { %v1211_v3 = vpop.permute.xlu1 %1210 }
0x136a   :  { %v1251_v4 = vadd.f32 %v10521_v59, %v1211_v3  ;;  %9085 = vmatpush3.bf16.msra.mxu0 %v1881_v53  ;;  %v2135_v53 = vstv %s8099_s6  ;;  %v2000_v3 = vstv %s8087_s27  ;;  %s11572_s6 = sld [smem:[#allocation25_spill]]  ;;  %s11575_s27 = sld [smem:[#allocation29_spill]] }
0x136b   :  { %9114 = vmatprep.subr.bf16.mxu0 %v10077_v2  ;;  %vm2136_vm10 = vcmp.eq.s32.totalorder %v10395_v7, %v2135_v53  ;;  %vm2001_vm7 = vcmp.eq.s32.totalorder %v10395_v7, %v2000_v3 }
0x136c   :  { %v9841_v5 = vpop.eup %9840  ;;  %v1257_v8 = vsel %vm1256_vm1, %v1251_v4, 0.0  ;;  %v2137_v57 = vsel %vm2136_vm10, 1.0, %v10077_v2 }
0x136d   :  { %1258 = vadd.xlane.f32.xlu1 %v1257_v8  ;;  %v448_v6 = vpop.permute.xlu1 %447  ;;  %v1799_v9 = vmul.f32 %v9841_v5, %v9839_v60  ;;  %v2147_v60 = vsel %vm1964_vm8, %v2146_v56, %v2133_v52  ;;  %v2002_v5 = vsel %vm2001_vm7, 1.0, %v10077_v2  ;;  %v1946_v56 = vrot.slane %v8070_v49, %v10363_v42 }
0x136e   :  { %v488_v54 = vadd.f32 %v10376_v50, %v448_v6  ;;  %v817_v10 = vadd.f32 %v10471_v1, %v448_v6  ;;  %v10628_v61 = vsel %vm2014_vm9, %v2147_v60, %v2137_v57  ;;  %v2017_v60 = vstv %s2016_s9  ;;  %s11577_s9 = sld [smem:[#allocation35_spill]] }
0x136f   :  { %9080 = vmatmul.mubr.msk.f32.vlgmr.msra.gmra.mrb[36].mxu1 %vm1126_vm12, %v1799_v9 }
0x1370   :  { %v493_v11 = vsel %vm346_vm4, %v488_v54, 0.0  ;;  %v823_v59 = vsel %vm822_vm15, %v817_v10, 0.0  ;;  %9094 = vmatprep.mubr.msk.f32.mxu1 %vm10078_vm0, %v10077_v2 }
0x1371   :  { %494 = vadd.xlane.f32.xlu1 %v493_v11  ;;  %824 = vadd.xlane.f32.xlu0 %v823_v59 }
0x13fa   :  { %v1259_v14 = vpop.xlane.xlu1 %1258 }
0x13fb   :  { %v1260_v15 = vmul.f32 0.03125, %v1259_v14 }
0x13fd   :  { %v10588_v16 = vsub.f32 %v1251_v4, %v1260_v15 }
0x13fe   :  { %v825_v50 = vpop.xlane.xlu0 %824  ;;  %v495_v23 = vpop.xlane.xlu1 %494 }
0x13ff   :  { %v826_v17 = vmul.f32 0.03125, %v825_v50  ;;  %v1262_v1 = vmul.f32 %v10588_v16, %v10588_v16  ;;  %v497_v25 = vmul.f32 0.03125, %v495_v23 }
0x1401   :  { %v10592_v18 = vsub.f32 %v817_v10, %v826_v17  ;;  %v1263_v19 = vsel %vm1256_vm1, %v1262_v1, 0.0  ;;  %v10603_v30 = vsub.f32 %v488_v54, %v497_v25 }
0x1402   :  { %1264 = vadd.xlane.f32.xlu1 %v1263_v19  ;;  %v8036_v19 = vld [vmem:[%s11559_s8 + $0x4] sm:$0x3] }
0x1403   :  { %v828_v55 = vmul.f32 %v10592_v18, %v10592_v18  ;;  %v499_v37 = vmul.f32 %v10603_v30, %v10603_v30 }
0x1405   :  { %v829_v20 = vsel %vm822_vm15, %v828_v55, 0.0  ;;  %v500_v38 = vsel %vm346_vm4, %v499_v37, 0.0  ;;  %vm1993_vm15 = vcmp.eq.s32.totalorder %v10395_v7, %v1992_v62  ;;  %v2021_v62 = vstv %s8089_s5  ;;  %s11578_s5 = sld [smem:[#allocation31_spill]] }
0x1406   :  { %830 = vadd.xlane.f32.xlu1 %v829_v20  ;;  %v1994_v63 = vsel %vm1993_vm15, 1.0, %v10077_v2  ;;  %v8035_v20 = vld [vmem:[%s11559_s8 + $0x2] sm:$0x3]  ;;  %vm10083_vm15 = vmmov 1  }
0x1407   :  { %v2012_v4 = vsel %vm2011_vm5, %v10423_v33, %v1994_v63  ;;  %v1273_v23 = vrot.slane %v8035_v20, %v10363_v42  ;;  %vm2018_vm5 = vcmp.eq.s32.totalorder %v10395_v7, %v2017_v60  ;;  %vm10680_vm6 = vmpackc.low %vm362_vm3, %vm10083_vm15 }
0x1408   :  { %v2013_v8 = vsel %vm1964_vm8, %v2012_v4, %v1998_v35  ;;  %v2025_v4 = vstv %s8090_s15  ;;  %s11579_s15 = sld [smem:[#allocation33_spill]] }
0x1409   :  { %v10640_v6 = vsel %vm2014_vm9, %v2013_v8, %v2002_v5  ;;  %vm2022_vm9 = vcmp.eq.s32.totalorder %v10395_v7, %v2021_v62  ;;  %vm2026_vm10 = vcmp.eq.s32.totalorder %v10395_v7, %v2025_v4 }
0x1442   :  { %v1873_v21 = vpop.f32.mrb[36].mxu1 }
0x1443   :  { %v1877_v22 = vpack.c.bf16 %v1873_v21, %v1873_v21  ;;  %v9081_v58 = vpop.f32.mrb[37].mxu1  ;;  %v1585_v21 = vrot.slane %v8036_v19, %v10363_v42 }
0x1444   :  { %v10647_v58 = vsub.s32 1, %v10356_v39 }
0x1445   :  { %9087 = vmatmul.mubr.msk.bf16.vlgmr.msra.gmra.mrb[36].mxu0 %vm296_vm2, %v1877_v22 }
0x1446   :  { %9118 = vmatprep.mubr.msk.bf16.mxu0 %vm10078_vm0, %v10077_v2  ;;  %v1278_v34 = vrot.slane %v8035_v20, %v10647_v58  ;;  %v1951_v63 = vrot.slane %v8070_v49, %v10647_v58  ;;  %v10741_v49 = vld [vmem:[%s11565_s28] ss:$0 sm:$0xff] }
0x148f   :  { %v1265_v9 = vpop.xlane.xlu1 %1264 }
0x1490   :  { %v1266_v11 = vmul.f32 0.03125, %v1265_v9  ;;  %v2019_v9 = vsel %vm2018_vm5, 1.0, %v10077_v2 }
0x1492   :  { %v1267_v13 = vadd.f32 1e-05, %v1266_v11 }
0x1493   :  { %v831_v59 = vpop.xlane.xlu1 %830 }
0x1494   :  { %v832_v14 = vmul.f32 0.03125, %v831_v59  ;;  %v2232_v59 = vstv %s10660_s16  ;;  %s11580_s16 = sld [smem:[#allocation32_spill]] }
0x1495   :  { %vm2233_vm7 = vcmp.eq.s32.totalorder %v10395_v7, %v2232_v59 }
0x1496   :  { %v833_v50 = vadd.f32 1e-05, %v832_v14  ;;  %v2234_v20 = vsel %vm2233_vm7, 1.0, %v10077_v2 }
0x1518   :  { %v1924_v26 = vpop.f32.mrb[36].mxu0 }
0x1519   :  { %v1925_v27 = vadd.f32 %v1924_v26, %v1885_v12  ;;  %v9088_v28 = vpop.f32.mrb[37].mxu0 }
0x151a   :  { %v1927_v29 = vpop.f32.mrb[38].mxu0  ;;  %v219_v28 = vld [vmem:[%s11559_s8] sm:$0x3]  ;;  %s11576_s8 = sld [smem:[#allocation30_spill]] }
0x151b   :  { %v9089_v31 = vpop.f32.mrb[39].mxu0  ;;  %v1930_v32 = vsel %vm1256_vm1, %v1925_v27, 0.0  ;;  %v1590_v29 = vrot.slane %v8036_v19, %v10647_v58  ;;  %v839_v37 = vrot.slane %v219_v28, %v10363_v42  ;;  %v509_v51 = vrot.slane %v219_v28, 1 }
0x151c   :  { %1931 = vadd.xlane.f32.xlu0 %v1930_v32  ;;  %v2240_v19 = vstv %s10670_s13 }
0x151d   :  { %vm2241_vm15 = vcmp.eq.s32.totalorder %v10395_v7, %v2240_v19 }
0x1520   :  { %1576 = vadd.xlane.f32.xlu0 %v1575_v36 }
0x1524   :  { %501 = vadd.xlane.f32.xlu0 %v500_v38 }
0x15a9   :  { %v1932_v43 = vpop.xlane.xlu0 %1931 }
0x15aa   :  { %v1933_v40 = vmul.f32 0.03125, %v1932_v43 }
0x15ac   :  { %v10612_v41 = vsub.f32 %v1925_v27, %v1933_v40 }
0x15ad   :  { %v1577_v54 = vpop.xlane.xlu0 %1576 }
0x15ae   :  { %v1935_v44 = vmul.f32 %v10612_v41, %v10612_v41  ;;  %v1578_v10 = vmul.f32 0.03125, %v1577_v54  ;;  %v2023_v54 = vsel %vm2022_vm9, 1.0, %v10077_v2  ;;  %vm2030_vm9 = vcmask 72704  }
0x15b0   :  { %v1936_v45 = vsel %vm1256_vm1, %v1935_v44, 0.0  ;;  %v1579_v12 = vadd.f32 1e-05, %v1578_v10  ;;  %v844_v44 = vrot.slane %v219_v28, %v10647_v58 }
0x15b1   :  { %1937 = vadd.xlane.f32.xlu1 %v1936_v45  ;;  %v502_v15 = vpop.xlane.xlu0 %501 }
0x15b2   :  { %9842 = vrsqrt.f32 %v1579_v12  ;;  %v503_v33 = vmul.f32 0.03125, %v502_v15  ;;  %v2236_v12 = vstv %s10662_s18  ;;  %v2027_v15 = vsel %vm2026_vm10, 1.0, %v10077_v2  ;;  %s11581_s18 = sld [smem:[#allocation34_spill]] }
0x15b3   :  { %9844 = vrsqrt.f32 %v1267_v13  ;;  %vm2237_vm5 = vcmp.eq.s32.totalorder %v10395_v7, %v2236_v12 }
0x15b4   :  { %v504_v17 = vadd.f32 1e-05, %v503_v33  ;;  %9846 = vrsqrt.f32 %v833_v50  ;;  %v2028_v33 = vsel %vm362_vm3, %v2019_v9, %v2023_v54 }
0x15b6   :  { %9848 = vrsqrt.f32 %v504_v17  ;;  %v1966_v17 = vld [vmem:[%s11560_s25] sm:$0xff] }
0x15bc   :  { %v9843_v1 = vpop.eup %9842 }
0x15bd   :  { %v9845_v55 = vpop.eup %9844  ;;  %v1581_v22 = vmul.f32 %v9843_v1, %v10601_v24  ;;  %v2139_v1 = vstv %s10666_s22 }
0x15be   :  { %v1269_v25 = vmul.f32 %v9845_v55, %v10588_v16  ;;  %v9847_v27 = vpop.eup %9846  ;;  %v2029_v55 = vsel %vm705_vm13, %v2028_v33, %v2027_v15  ;;  %vm2140_vm10 = vcmp.eq.s32.totalorder %v10395_v7, %v2139_v1 }
0x15bf   :  { %v1586_v31 = vmul.f32 %v1585_v21, %v1581_v22  ;;  %v835_v38 = vmul.f32 %v9847_v27, %v10592_v18  ;;  %v2238_v21 = vsel %vm2237_vm5, 1.0, %v10077_v2  ;;  %v2141_v22 = vsel %vm2140_vm10, 1.0, %v10077_v2  ;;  %v10721_v27 = vld [vmem:[%s11563_s26] sm:$0xff]  }
0x15c0   :  { %v9849_v36 = vpop.eup %9848  ;;  %v1274_v24 = vmul.f32 %v1273_v23, %v1269_v25  ;;  %v2243_v23 = vsel %vm362_vm3, %v2234_v20, %v2238_v21  ;;  %v2004_v25 = vstv %s8088_s23  ;;  %9115 = vmatpush3.bf16.msra.mxu0 %v10721_v27  ;;  %vm2572_vm5 = vcmask 65536  }
0x15c1   :  { %v1591_v43 = vadd.f32 %v1590_v29, %v1586_v31  ;;  %v506_v16 = vmul.f32 %v9849_v36, %v10603_v30  ;;  %v840_v45 = vmul.f32 %v839_v37, %v835_v38  ;;  %vm2005_vm7 = vcmp.eq.s32.totalorder %v10395_v7, %v2004_v25  ;;  %9116 = vmatprep.subr.bf16.mxu0 %v10077_v2  ;;  %v10726_v7 = vld [vmem:[%s11563_s26 + $0x8] sm:$0xff]   ;;  %v1967_v29 = vld [vmem:[%s11564_s1] sm:$0xff] }
0x15c2   :  { %v1279_v40 = vadd.f32 %v1278_v34, %v1274_v24  ;;  %v1968_v37 = vld [vmem:[%s11564_s1 + $0x8] sm:$0x1] }
0x15c3   :  { %v507_v52 = vmul.f32 %v506_v16, %v219_v28  ;;  %v845_v53 = vadd.f32 %v844_v44, %v840_v45 }
0x15c4   :  { %v1592_v48 = vadd.f32 %v1591_v43, %v1279_v40  ;;  %9117 = vmatpush3.bf16.msra.mxu0 %v10726_v7 }
0x15c5   :  { %v511_v30 = vadd.f32 %v509_v51, %v507_v52  ;;  %v1954_v3 = vrot.slane %v845_v53, 7 }
0x15c6   :  { %v1593_v18 = vmul.f32 0.5, %v1592_v48 }
0x15c8   :  { %v1957_v5 = vrot.slane %v1593_v18, 5 }
0x163e   :  { %v1938_v0 = vpop.xlane.xlu1 %1937 }
0x163f   :  { %v1939_v26 = vmul.f32 0.03125, %v1938_v0  ;;  %v2242_v0 = vsel %vm2241_vm15, 1.0, %v10077_v2 }
0x1641   :  { %v1940_v32 = vadd.f32 1e-05, %v1939_v26  ;;  %v2006_v26 = vsel %vm2005_vm7, 1.0, %v10077_v2 }
0x1643   :  { %9850 = vrsqrt.f32 %v1940_v32 }
0x164d   :  { %v9851_v57 = vpop.eup %9850 }
0x164e   :  { %v1942_v47 = vmul.f32 %v9851_v57, %v10612_v41  ;;  %v1962_v41 = vsel %vm362_vm3, %v511_v30, %v1954_v3  ;;  %vm2483_vm3 = vcmask 130048  }
0x164f   :  { %v1963_v11 = vsel %vm1130_vm14, %v1962_v41, %v1957_v5 }
0x1650   :  { %v1947_v35 = vmul.f32 %v1946_v56, %v1942_v47 }
0x1652   :  { %v1952_v8 = vadd.f32 %v1951_v63, %v1947_v35 }
0x1654   :  { %v1960_v10 = vrot.slane %v1952_v8, 2 }
0x1656   :  { %v1965_v14 = vsel %vm1964_vm8, %v1963_v11, %v1960_v10  ;;  %vm2149_vm8 = vcmask 64512  }
0x1657   :  { %v9390_v50 = vpack.c.bf16 %v1960_v10, %v1965_v14 }
0x1659   :  { %9392 = vmatpush3.bf16.msk.msra.mxu1 %vm10680_vm6, %v9390_v50 }
0x165a   :  { %9097 = vmatprep.subr.mxu1 %v1966_v17 }
0x165c   :  { %9095 = vmatmul.mubr.msk.f32.vlgmr.msra.gmra.mrb[38].mxu1 %vm2030_vm9, %v2029_v55 }
0x165d   :  { %9098 = vmatpush3.msra.mxu1 %v1966_v17  ;;  %9099 = vmatprep.mubr.msk.f32.mxu1 %vm2149_vm8, %v10628_v61  ;;  %v2244_v61 = vsel %vm705_vm13, %v2243_v23, %v2242_v0  ;;  %vm10756_vm13 = vmpackc.low %vm2483_vm3, %vm2483_vm3 }
0x165e   :  { %9102 = vmatprep.subr.mxu1 %v10077_v2 }
0x1660   :  { %9100 = vmatmul.mubr.msk.f32.vlgmr.msra.gmra.mrb[40].mxu1 %vm2149_vm8, %v2141_v22 }
0x1661   :  { %9103 = vmatpush3.msra.mxu1 %v1966_v17  ;;  %9104 = vmatprep.mubr.msk.f32.mxu1 %vm10078_vm0, %v10077_v2 }
0x1662   :  { %9395 = vmatprep.subr.msk.bf16.mxu1 %vm10680_vm6, %v9390_v50 }
0x1664   :  { %9105 = vmatmul.mubr.msk.f32.vlgmr.msra.gmra.mrb[42].mxu1 %vm2149_vm8, %v2244_v61 }
0x1665   :  { %9398 = vmatpush3.bf16.msk.msra.mxu1 %vm10680_vm6, %v9390_v50  ;;  %9111 = vmatprep.mubr.msk.f32.mxu1 %vm2030_vm9, %v10640_v6 }
0x1668   :  { %9112 = vmatmul.mubr.msk.f32.vlgmr.msra.gmra.mrb[40].mxu1 %vm2030_vm9, %v2006_v26 }
0x172f   :  { %v2102_v28 = vpop.f32.mrb[38].mxu1 }
0x1730   :  { %v2403_v31 = vmul.f32 2.0, %v2102_v28  ;;  %v9096_v6 = vpop.f32.mrb[39].mxu1 }
0x1732   :  { %v2404_v32 = vadd.f32 %v2403_v31, %v1967_v29 }
0x1737   :  { %v2314_v34 = vpop.f32.mrb[42].mxu1 }
0x1738   :  { %v10730_v36 = vadd.f32 %v2404_v32, %v2314_v34  ;;  %v9106_v24 = vpop.f32.mrb[43].mxu1 }
0x173b   :  { %v9113_v38 = vpop.f32.mrb[40].mxu1 }
0x173c   :  { %v2400_v43 = vmul.f32 2.0, %v9113_v38  ;;  %v2390_v16 = vpop.f32.mrb[41].mxu1 }
0x173d   :  { %v2399_v40 = vmul.f32 2.0, %v2390_v16 }
0x173e   :  { %v10733_v44 = vadd.f32 %v2400_v43, %v1968_v37 }
0x173f   :  { %v10735_v45 = vadd.f32 %v2399_v40, %v1967_v29 }
0x1741   :  { %v2412_v48 = vpack.c.bf16 %v10733_v44, %v10735_v45 }
0x1743   :  { %9119 = vmatmul.mubr.msk.bf16.vlgmr.msra.gmra.mrb[40].mxu0 %vm296_vm2, %v2412_v48 }
0x1816   :  { %v2468_v51 = vpop.f32.mrb[40].mxu0 }
0x1817   :  { %v2469_v52 = vadd.f32 %v10741_v49, %v2468_v51  ;;  %v9120_v53 = vpop.f32.mrb[41].mxu0 }
0x1818   :  { %v2471_v56 = vpop.f32.mrb[42].mxu0 }
0x1819   :  { %v2472_v57 = vadd.f32 %v10741_v49, %v2471_v56  ;;  %v9121_v18 = vpop.f32.mrb[43].mxu0  ;;  %v2475_v60 = vmul.f32 0.25, %v2469_v52 }
0x181b   :  { %9126 = vmatprep.mubr.msk.f32.mxu0 %vm2483_vm3, %v2475_v60  ;;  %v10746_v62 = vpack.i.bf16 %v2472_v57, %v2469_v52  ;;  %v2476_v30 = vmul.f32 0.25, %v2472_v57 }
0x181d   :  { %9542 = vrot.lane.b32.xlu0 %v10746_v62, %s10080_s21 }
0x1821   :  { %9552 = vrot.lane.b32.xlu0 %v10746_v62, %s10084_s2 }
0x1825   :  { %2680 = vrot.lane.b32.xlu0 %v2475_v60, %s10085_s7 }
0x1829   :  { %2682 = vrot.lane.b32.xlu0 %v2476_v30, %s10085_s7 }
0x188f   :  { %v9543_v47 = vpop.permute.xlu0 %9542 }
0x1890   :  { %v9545_v63 = vunpack.i.h.bf16 %v9543_v47  ;;  %v9544_v3 = vunpack.i.l.bf16 %v9543_v47 }
0x1892   :  { %v9399_v4 = vpack.c.bf16 %v9545_v63, %v9544_v3 }
0x1893   :  { %v9553_v55 = vpop.permute.xlu0 %9552 }
0x1894   :  { %9401 = vmatprep.subr.msk.bf16.mxu0 %vm10756_vm13, %v9399_v4  ;;  %v9555_v21 = vunpack.i.h.bf16 %v9553_v55  ;;  %v9554_v22 = vunpack.i.l.bf16 %v9553_v55 }
0x1895   :  { %9404 = vmatpush3.bf16.xpose.msk.msra.mxu0 %vm10756_vm13, %v9399_v4 }
0x1896   :  { %v9411_v61 = vpack.c.bf16 %v9555_v21, %v9554_v22 }
0x1897   :  { %v2681_v6 = vpop.permute.xlu0 %2680 }
0x189b   :  { %v2683_v32 = vpop.permute.xlu0 %2682 }
0x189c   :  { %9127 = vmatmul.mubr.msk.f32.vlgmr.msra.gmra.mrb[44].mxu0 %vm2483_vm3, %v2476_v30 }
0x196f   :  { %v9128_v5 = vpop.f32.mrb[44].mxu0 }
0x1970   :  { %v2560_v8 = vpop.f32.mrb[45].mxu0  ;;  %v2573_v9 = vsel %vm2572_vm5, %v9128_v5, -inf }
0x1971   :  { %v2569_v41 = vsel %vm2030_vm9, %v2560_v8, -inf }
0x1972   :  { %2570 = vmax.xlane.f32.xlu1 %v2569_v41 }
0x1976   :  { %2574 = vmax.xlane.f32.xlu1 %v2573_v9 }
0x19ff   :  { %v2571_v54 = vpop.xlane.xlu1 %2570 }
0x1a00   :  { %v2576_v10 = vsub.f32 %v2560_v8, %v2571_v54 }
0x1a02   :  { %v2578_v12 = vmul.f32 1.442695, %v2576_v10 }
0x1a03   :  { %v2575_v11 = vpop.xlane.xlu1 %2574 }
0x1a04   :  { %v2577_v59 = vsub.f32 %v9128_v5, %v2575_v11 }
0x1a06   :  { %v2580_v14 = vmul.f32 1.442695, %v2577_v59 }
0x1a08   :  { %9852 = vpow2.f32 %v2580_v14 }
0x1a09   :  { %9854 = vpow2.f32 %v2578_v12 }
0x1a12   :  { %v9853_v15 = vpop.eup %9852 }
0x1a13   :  { %v2585_v33 = vsel %vm2572_vm5, %v9853_v15, 0.0  ;;  %v9855_v50 = vpop.eup %9854 }
0x1a14   :  { %2586 = vadd.xlane.f32.xlu1 %v2585_v33  ;;  %v2582_v17 = vsel %vm2030_vm9, %v9855_v50, 0.0 }
0x1a18   :  { %2583 = vadd.xlane.f32.xlu1 %v2582_v17 }
0x1a29   :  { %9547 = vrot.lane.b32.xlu1 %v10746_v62, %s10079_s17 }
0x1aa1   :  { %v2587_v1 = vpop.xlane.xlu1 %2586 }
0x1aa2   :  { %9856 = vrcp.f32 %v2587_v1 }
0x1aa5   :  { %v2584_v19 = vpop.xlane.xlu1 %2583 }
0x1aa6   :  { %9858 = vrcp.f32 %v2584_v19 }
0x1aa9   :  { %v9548_v20 = vpop.permute.xlu1 %9547 }
0x1aaa   :  { %v9550_v0 = vunpack.i.h.bf16 %v9548_v20  ;;  %v9549_v23 = vunpack.i.l.bf16 %v9548_v20 }
0x1aac   :  { %v9405_v25 = vpack.c.bf16 %v9550_v0, %v9549_v23  ;;  %v9857_v26 = vpop.eup %9856 }
0x1aad   :  { %v2591_v31 = vmul.f32 %v9857_v26, %v9853_v15 }
0x1aae   :  { %9407 = vmatprep.subr.msk.bf16.mxu1 %vm10680_vm6, %v9405_v25 }
0x1aaf   :  { %9410 = vmatpush3.bf16.msk.msra.mxu1 %vm10680_vm6, %v9405_v25 }
0x1ab0   :  { %v9859_v28 = vpop.eup %9858  ;;  %9413 = vmatprep.subr.msk.bf16.mxu1 %vm10756_vm13, %v9411_v61 }
0x1ab1   :  { %v2590_v29 = vmul.f32 %v9859_v28, %v9855_v50 }
0x1ab3   :  { %9133 = vmatprep.mubr.msk.f32.mxu1 %vm2030_vm9, %v2590_v29 }
0x1ab4   :  { %9134 = vmatmul.mubr.msk.f32.vlgmr.msra.gmra.mrb[44].mxu1 %vm2030_vm9, %v2591_v31 }
0x1ab5   :  { %9140 = vmatprep.mubr.msk.f32.mxu1 %vm2483_vm3, %v2681_v6 }
0x1ab8   :  { %9416 = vmatpush3.bf16.xpose.msk.msra.mxu1 %vm10756_vm13, %v9411_v61 }
0x1abf   :  { %9141 = vmatmul.mubr.msk.f32.vlgmr.msra.gmra.mrb[46].mxu1 %vm2483_vm3, %v2683_v32 }
0x1b87   :  { %v9135_v34 = vpop.f32.mrb[44].mxu1 }
0x1b88   :  { %v2671_v24 = vpop.f32.mrb[45].mxu1 }
0x1b92   :  { %v9142_v37 = vpop.f32.mrb[46].mxu1 }
0x1b93   :  { %v2762_v38 = vpop.f32.mrb[47].mxu1  ;;  %v2774_v43 = vsel %vm2572_vm5, %v9142_v37, -inf }
0x1b94   :  { %2775 = vmax.xlane.f32.xlu1 %v2774_v43  ;;  %v2771_v16 = vsel %vm2030_vm9, %v2762_v38, -inf  ;;  %v9636_v43 = vld [vmem:[%s11568_s0] ss:$16 sps:$4 sm:$0xff]  }
0x1b95   :  { %2772 = vmax.xlane.f32.xlu0 %v2771_v16  ;;  %v9639_v16 = vld [vmem:[%s11568_s0 + $0x8] ss:$16 sps:$4 sm:$0xff]  }
0x1ba5   :  { %9557 = vrot.lane.b32.xlu1 %v10746_v62, %s10086_s10 }
0x1c21   :  { %v2776_v40 = vpop.xlane.xlu1 %2775 }
0x1c22   :  { %v2778_v48 = vsub.f32 %v9142_v37, %v2776_v40  ;;  %v2773_v51 = vpop.xlane.xlu0 %2772  ;;  %v9638_v37 = vld [vmem:[%s11568_s0 + $0x4] ss:$16 sps:$4 sm:$0xff]   ;;  %v9642_v40 = vld [vmem:[%s11568_s0 + $0x20] ss:$16 sps:$4 sm:$0xff]  }
0x1c23   :  { %v2777_v52 = vsub.f32 %v2762_v38, %v2773_v51  ;;  %v9641_v38 = vld [vmem:[%s11568_s0 + $0xc] ss:$16 sps:$4 sm:$0xff]   ;;  %3059 = vmatprep.subr.bf16.mxu1 %v9638_v37  ;;  %v9645_v51 = vld [vmem:[%s11568_s0 + $0x28] ss:$16 sps:$4 sm:$0xff]  }
0x1c24   :  { %v2781_v53 = vmul.f32 1.442695, %v2778_v48  ;;  %3060 = vmatpush1.bf16.msra.mxu1 %v9636_v43  ;;  %v9644_v48 = vld [vmem:[%s11568_s0 + $0x24] ss:$16 sps:$4 sm:$0xff]   ;;  %v9677_v37 = vld [vmem:[%s11569_s29 + $0xf8] sm:$0xff]  }
0x1c25   :  { %v2779_v56 = vmul.f32 1.442695, %v2777_v52  ;;  %v9558_v57 = vpop.permute.xlu1 %9557  ;;  %v9647_v52 = vld [vmem:[%s11568_s0 + $0x2c] ss:$16 sps:$4 sm:$0xff]   ;;  %3061 = vmatprep.subr.bf16.mxu1 %v9644_v48  ;;  %v10878_v48 = vsub.s32 3, %v10356_v39 }
0x1c26   :  { %v9560_v18 = vunpack.i.h.bf16 %v9558_v57  ;;  %v9559_v60 = vunpack.i.l.bf16 %v9558_v57  ;;  %v9649_v57 = vld [vmem:[%s11569_s29 + $0xc0] sm:$0xff]   ;;  %v9679_v43 = vld [vmem:[%s11569_s29 + $0xb8] sm:$0xff]  }
0x1c27   :  { %9860 = vpow2.f32 %v2779_v56  ;;  %v9648_v56 = vld [vmem:[%s11569_s29 + $0x40] sm:$0xff]  }
0x1c28   :  { %v9417_v30 = vpack.c.bf16 %v9560_v18, %v9559_v60  ;;  %9862 = vpow2.f32 %v2781_v53  ;;  %v10088_v53 = vmov 0   ;;  %3062 = vmatpush1.bf16.msra.mxu1 %v9642_v40  ;;  %v2994_v40 = vld [vmem:[%s11571_s24] sm:$0xf] }
0x1c29   :  { %3091 = vmatprep.mubr.bf16.mxu1 %v10088_v53  ;;  %8644 = vmatprep.subr.bf16.mxu1 %v9648_v56  ;;  %v3003_v56 = vrot.slane %v2994_v40, %v10647_v58 }
0x1c2a   :  { %9419 = vmatprep.subr.msk.bf16.mxu0 %vm10680_vm6, %v9417_v30 }
0x1c2b   :  { %9422 = vmatpush3.bf16.msk.msra.mxu0 %vm10680_vm6, %v9417_v30 }
0x1c2c   :  { %9150 = vmatprep.subr.bf16.mxu0 %v10077_v2 }
0x1c31   :  { %v9861_v62 = vpop.eup %9860 }
0x1c32   :  { %v2783_v47 = vsel %vm2030_vm9, %v9861_v62, 0.0  ;;  %v9863_v63 = vpop.eup %9862 }
0x1c33   :  { %2784 = vadd.xlane.f32.xlu0 %v2783_v47  ;;  %v2786_v3 = vsel %vm2572_vm5, %v9863_v63, 0.0 }
0x1c37   :  { %2787 = vadd.xlane.f32.xlu0 %v2786_v3  ;;  %v10828_v3 = vld [vmem:[%s11570_s3] sm:$0xf] }
0x1c4d   :  { %2892 = vrot.lane.b32.xlu0 %v10721_v27, %s10081_s30 }
0x1c51   :  { %2898 = vrot.lane.b32.xlu0 %v10741_v49, %s10081_s30 }
0x1cc0   :  { %v2785_v4 = vpop.xlane.xlu0 %2784 }
0x1cc1   :  { %9864 = vrcp.f32 %v2785_v4  ;;  %v2976_v4 = vrot.slane %v10828_v3, %v10363_v42 }
0x1cc4   :  { %v2788_v5 = vpop.xlane.xlu0 %2787 }
0x1cc5   :  { %9866 = vrcp.f32 %v2788_v5 }
0x1cc8   :  { %v2893_v10 = vpop.permute.xlu0 %2892 }
0x1ccb   :  { %v9865_v8 = vpop.eup %9864 }
0x1ccc   :  { %v2791_v41 = vmul.f32 %v9865_v8, %v9861_v62  ;;  %v2899_v1 = vpop.permute.xlu0 %2898 }
0x1cce   :  { %9147 = vmatprep.mubr.msk.f32.mxu0 %vm2030_vm9, %v2791_v41 }
0x1ccf   :  { %v9867_v9 = vpop.eup %9866 }
0x1cd0   :  { %v2792_v54 = vmul.f32 %v9867_v9, %v9863_v63 }
0x1cd2   :  { %9148 = vmatmul.mubr.msk.f32.vlgmr.msra.gmra.mrb[46].mxu0 %vm2030_vm9, %v2792_v54 }
0x1cd3   :  { %9154 = vmatprep.mubr.msk.bf16.mxu0 %vm10078_vm0, %v10077_v2  ;;  %9151 = vmatpush3.bf16.msra.mxu0 %v2893_v10  ;;  %v2982_v10 = vrot.slane %v10828_v3, %v10647_v58 }
0x1cd4   :  { %9152 = vmatprep.subr.bf16.mxu0 %v10077_v2 }
0x1da5   :  { %v9149_v27 = vpop.f32.mrb[46].mxu0 }
0x1da6   :  { %v2872_v49 = vpop.f32.mrb[47].mxu0 }
0x1da7   :  { %v9561_v11 = vpack.i.bf16 %v9149_v27, %v2872_v49 }
0x1da9   :  { %9562 = vrot.lane.b32.xlu1 %v9561_v11, %s10087_s11 }
0x1dad   :  { %2894 = vrot.lane.b32.xlu1 %v10726_v7, %s10081_s30 }
0x1e1b   :  { %v9563_v59 = vpop.permute.xlu1 %9562 }
0x1e1c   :  { %v9565_v12 = vunpack.i.h.bf16 %v9563_v59  ;;  %v9564_v14 = vunpack.i.l.bf16 %v9563_v59  ;;  %v9650_v59 = vld [vmem:[%s11569_s29] sm:$0xff]  }
0x1e1e   :  { %v2890_v15 = vsel %vm2483_vm3, %v9135_v34, %v9565_v12  ;;  %v2889_v33 = vsel %vm2483_vm3, %v2671_v24, %v9564_v14  ;;  %v9651_v12 = vld [vmem:[%s11569_s29 + $0x80] sm:$0xff]  }
0x1e1f   :  { %v2891_v50 = vpack.c.bf16 %v2890_v15, %v2889_v33  ;;  %v2895_v17 = vpop.permute.xlu1 %2894  ;;  %v9652_v15 = vld [vmem:[%s11569_s29 + $0x48] sm:$0xff]  }
0x1e20   :  { %9153 = vmatpush3.bf16.msra.mxu0 %v2895_v17  ;;  %v9653_v33 = vld [vmem:[%s11569_s29 + $0xc8] sm:$0xff]  }
0x1e21   :  { %3102 = vmatprep.subr.bf16.mxu0 %v9641_v38  ;;  %v9655_v17 = vld [vmem:[%s11569_s29 + $0x88] sm:$0xff]   ;;  %v9678_v38 = vld [vmem:[%s11569_s29 + $0x38] sm:$0xff]  }
0x1e23   :  { %9155 = vmatmul.mubr.msk.bf16.vlgmr.msra.gmra.mrb[48].mxu0 %vm296_vm2, %v2891_v50  ;;  %v9654_v50 = vld [vmem:[%s11569_s29 + $0x8] sm:$0xff]  }
0x1e24   :  { %3103 = vmatpush1.bf16.msra.mxu0 %v9639_v16  ;;  %3134 = vmatprep.mubr.bf16.mxu0 %v10088_v53  ;;  %v10874_v16 = vsub.s32 2, %v10356_v39 }
0x1e25   :  { %3104 = vmatprep.subr.bf16.mxu0 %v9647_v52 }
0x1e26   :  { %v3007_v52 = vrot.slane %v2994_v40, %v10874_v16 }
0x1e28   :  { %3105 = vmatpush1.bf16.msra.mxu0 %v9645_v51  ;;  %v2999_v51 = vrot.slane %v2994_v40, %v10363_v42 }
0x1e29   :  { %8666 = vmatprep.subr.bf16.mxu0 %v9649_v57  ;;  %v3011_v57 = vrot.slane %v2994_v40, %v10878_v48 }
0x1ef6   :  { %v2938_v19 = vpop.f32.mrb[48].mxu0 }
0x1ef7   :  { %v2939_v55 = vadd.f32 %v2938_v19, %v2899_v1  ;;  %v9156_v20 = vpop.f32.mrb[49].mxu0  ;;  %v9657_v19 = vld [vmem:[%s11569_s29 + $0xd0] sm:$0xff]  }
0x1ef8   :  { %v2941_v21 = vpop.f32.mrb[50].mxu0  ;;  %v9659_v20 = vld [vmem:[%s11569_s29 + $0x90] sm:$0xff]  }
0x1ef9   :  { %v2942_v22 = vadd.f32 %v2941_v21, %v2899_v1  ;;  %v9157_v0 = vpop.f32.mrb[51].mxu0  ;;  %v2945_v7 = vadd.f32 %v2939_v55, %v10735_v45  ;;  %v9656_v1 = vld [vmem:[%s11569_s29 + $0x50] sm:$0xff]   ;;  %v9660_v21 = vld [vmem:[%s11569_s29 + $0x58] sm:$0xff]  }
0x1efa   :  { %v9658_v55 = vld [vmem:[%s11569_s29 + $0x10] sm:$0xff]   ;;  %v9662_v0 = vld [vmem:[%s11569_s29 + $0x18] sm:$0xff]  }
0x1efb   :  { %v2947_v23 = vsel %vm296_vm2, %v2945_v7, 0.0  ;;  %v2946_v25 = vadd.f32 %v2942_v22, %v10733_v44  ;;  %v9661_v22 = vld [vmem:[%s11569_s29 + $0xd8] sm:$0xff]  }
0x1efc   :  { %2948 = vadd.xlane.f32.xlu1 %v2947_v23  ;;  %v9664_v23 = vld [vmem:[%s11569_s29 + $0x60] sm:$0xff]  }
0x1efd   :  { %v2950_v61 = vsel %vm346_vm4, %v2946_v25, 0.0 }
0x1efe   :  { %2951 = vadd.xlane.f32.xlu0 %v2950_v61  ;;  %v9666_v61 = vld [vmem:[%s11569_s29 + $0x20] sm:$0xff]  }
0x1f89   :  { %v2949_v26 = vpop.xlane.xlu1 %2948 }
0x1f8a   :  { %v2953_v28 = vmul.f32 0.03125, %v2949_v26  ;;  %v9667_v26 = vld [vmem:[%s11569_s29 + $0xa0] sm:$0xff]  }
0x1f8b   :  { %v2952_v29 = vpop.xlane.xlu0 %2951 }
0x1f8c   :  { %v2955_v31 = vsub.f32 %v2945_v7, %v2953_v28  ;;  %v2954_v6 = vmul.f32 0.03125, %v2952_v29  ;;  %v9663_v7 = vld [vmem:[%s11569_s29 + $0x98] sm:$0xff]   ;;  %v9668_v28 = vld [vmem:[%s11569_s29 + $0x68] sm:$0xff]  }
0x1f8d   :  { %v9669_v29 = vld [vmem:[%s11569_s29 + $0xe8] sm:$0xff]  }
0x1f8e   :  { %v2956_v32 = vsub.f32 %v2946_v25, %v2954_v6  ;;  %v2957_v45 = vmul.f32 %v2955_v31, %v2955_v31  ;;  %v9665_v25 = vld [vmem:[%s11569_s29 + $0xe0] sm:$0xff]   ;;  %v9671_v6 = vld [vmem:[%s11569_s29 + $0xa8] sm:$0xff]  }
0x1f90   :  { %v2959_v44 = vsel %vm296_vm2, %v2957_v45, 0.0  ;;  %v2958_v34 = vmul.f32 %v2956_v32, %v2956_v32  ;;  %v9673_v45 = vld [vmem:[%s11569_s29 + $0xf0] sm:$0xff]  }
0x1f91   :  { %2960 = vadd.xlane.f32.xlu0 %v2959_v44  ;;  %v9674_v44 = vld [vmem:[%s11569_s29 + $0x30] sm:$0xff]  }
0x1f92   :  { %v2962_v24 = vsel %vm346_vm4, %v2958_v34, 0.0  ;;  %v9675_v34 = vld [vmem:[%s11569_s29 + $0xb0] sm:$0xff]  }
0x1f93   :  { %2963 = vadd.xlane.f32.xlu1 %v2962_v24  ;;  %v9676_v24 = vld [vmem:[%s11569_s29 + $0x78] sm:$0xff]  }
0x201e   :  { %v2961_v18 = vpop.xlane.xlu0 %2960 }
0x201f   :  { %v2965_v60 = vmul.f32 0.03125, %v2961_v18 }
0x2020   :  { %v2964_v30 = vpop.xlane.xlu1 %2963 }
0x2021   :  { %v2967_v62 = vadd.f32 1e-05, %v2965_v60  ;;  %v2966_v47 = vmul.f32 0.03125, %v2964_v30 }
0x2023   :  { %9868 = vrsqrt.f32 %v2967_v62  ;;  %v2968_v63 = vadd.f32 1e-05, %v2966_v47 }
0x2025   :  { %9870 = vrsqrt.f32 %v2968_v63 }
0x202d   :  { %v9869_v5 = vpop.eup %9868 }
0x202e   :  { %v2971_v8 = vmul.f32 %v9869_v5, %v2955_v31  ;;  %v9670_v31 = vld [vmem:[%s11569_s29 + $0x28] sm:$0xff]  }
0x202f   :  { %v9871_v41 = vpop.eup %9870 }
0x2030   :  { %v2977_v9 = vmul.f32 %v2976_v4, %v2971_v8  ;;  %v2972_v54 = vmul.f32 %v9871_v41, %v2956_v32  ;;  %v9672_v32 = vld [vmem:[%s11569_s29 + $0x70] sm:$0xff]  }
0x2032   :  { %v2978_v27 = vmul.f32 %v2976_v4, %v2972_v54  ;;  %v10834_v49 = vadd.f32 %v2982_v10, %v2977_v9 }
0x2034   :  { %v10836_v11 = vadd.f32 %v2982_v10, %v2978_v27 }
0x2036   :  { %v2993_v14 = vpack.c.bf16 %v10836_v11, %v10834_v49 }
0x2038   :  { %8136 = vmatmul.mubr.msk.bf16.vlgmr.msra.gmra.mrb[48].mxu1 %vm296_vm2, %v2993_v14  ;;  %8137 = vmatmul.mubr.msk.bf16.vlgmr.msra.gmra.mrb[52].mxu0 %vm296_vm2, %v2993_v14 }
0x2039   :  { %8645 = vmatpush3.bf16.msra.mxu1 %v9650_v59  ;;  %8667 = vmatpush3.bf16.msra.mxu0 %v9651_v12 }
0x203a   :  { %8646 = vmatprep.subr.bf16.mxu1 %v9652_v15  ;;  %8668 = vmatprep.subr.bf16.mxu0 %v9653_v33 }
0x203d   :  { %8647 = vmatpush3.bf16.msra.mxu1 %v9654_v50  ;;  %8669 = vmatpush3.bf16.msra.mxu0 %v9655_v17 }
0x203e   :  { %8648 = vmatprep.subr.bf16.mxu1 %v9656_v1  ;;  %8670 = vmatprep.subr.bf16.mxu0 %v9657_v19 }
0x2041   :  { %8649 = vmatpush3.bf16.msra.mxu1 %v9658_v55  ;;  %8671 = vmatpush3.bf16.msra.mxu0 %v9659_v20 }
0x2042   :  { %8650 = vmatprep.subr.bf16.mxu1 %v9660_v21  ;;  %8672 = vmatprep.subr.bf16.mxu0 %v9661_v22 }
0x2045   :  { %8651 = vmatpush3.bf16.msra.mxu1 %v9662_v0  ;;  %8673 = vmatpush3.bf16.msra.mxu0 %v9663_v7 }
0x2046   :  { %8652 = vmatprep.subr.bf16.mxu1 %v9664_v23  ;;  %8674 = vmatprep.subr.bf16.mxu0 %v9665_v25  ;;  %v8138_v25 = vld [vmem:[%s11572_s6] ss:$0 sm:$0xff] }
0x2049   :  { %8653 = vmatpush3.bf16.msra.mxu1 %v9666_v61  ;;  %8675 = vmatpush3.bf16.msra.mxu0 %v9667_v26 }
0x204a   :  { %8654 = vmatprep.subr.bf16.mxu1 %v9668_v28  ;;  %8676 = vmatprep.subr.bf16.mxu0 %v9669_v29 }
0x204d   :  { %8655 = vmatpush3.bf16.msra.mxu1 %v9670_v31  ;;  %8677 = vmatpush3.bf16.msra.mxu0 %v9671_v6 }
0x204e   :  { %8656 = vmatprep.subr.bf16.mxu1 %v9672_v32  ;;  %8678 = vmatprep.subr.bf16.mxu0 %v9673_v45 }
0x2051   :  { %8657 = vmatpush3.bf16.msra.mxu1 %v9674_v44  ;;  %8679 = vmatpush3.bf16.msra.mxu0 %v9675_v34 }
0x2052   :  { %8658 = vmatprep.subr.bf16.mxu1 %v9676_v24  ;;  %8680 = vmatprep.subr.bf16.mxu0 %v9677_v37 }
0x2055   :  { %8659 = vmatpush3.bf16.msra.mxu1 %v9678_v38  ;;  %8681 = vmatpush3.bf16.msra.mxu0 %v9679_v43 }
0x2056   :  { %9158 = vmatprep.subr.bf16.mxu1 %v10077_v2 }
0x210b   :  { %v3093_v18 = vpop.f32.mrb[48].mxu1  ;;  %v3136_v60 = vpop.f32.mrb[52].mxu0 }
0x210c   :  { %v3094_v30 = vadd.f32 %v3093_v18, %v2999_v51  ;;  %v3137_v62 = vadd.f32 %v3136_v60, %v3007_v52  ;;  %v3095_v47 = vpop.f32.mrb[49].mxu1  ;;  %v3138_v63 = vpop.f32.mrb[53].mxu0 }
0x210d   :  { %v3096_v4 = vadd.f32 %v3095_v47, %v3003_v56  ;;  %v3139_v5 = vadd.f32 %v3138_v63, %v3011_v57  ;;  %v3097_v8 = vpop.f32.mrb[50].mxu1  ;;  %v3140_v41 = vpop.f32.mrb[54].mxu0 }
0x210e   :  { %v3098_v9 = vadd.f32 %v3097_v8, %v2999_v51  ;;  %v3141_v54 = vadd.f32 %v3140_v41, %v3007_v52  ;;  %v3099_v10 = vpop.f32.mrb[51].mxu1  ;;  %v3142_v27 = vpop.f32.mrb[55].mxu0  ;;  %v3145_v14 = vmax.f32 %v3094_v30, 0.0  ;;  %v3147_v15 = vmax.f32 %v3137_v62, 0.0  ;;  %v10898_v8 = vld [vmem:[%s11563_s26 + $0x18] sm:$0xff]  }
0x210f   :  { %v3100_v59 = vadd.f32 %v3099_v10, %v3003_v56  ;;  %v3143_v12 = vadd.f32 %v3142_v27, %v3011_v57  ;;  %v3146_v17 = vmax.f32 %v3096_v4, 0.0  ;;  %v3148_v1 = vmax.f32 %v3139_v5, 0.0 }
0x2110   :  { %v3149_v33 = vmax.f32 %v3098_v9, 0.0  ;;  %v3151_v50 = vmax.f32 %v3141_v54, 0.0 }
0x2111   :  { %v3150_v19 = vmax.f32 %v3100_v59, 0.0  ;;  %v3152_v55 = vmax.f32 %v3143_v12, 0.0  ;;  %v3533_v12 = vrot.slane %v10828_v3, %v10874_v16 }
0x2112   :  { %v3217_v20 = vpack.c.bf16 %v3149_v33, %v3145_v14  ;;  %v3219_v21 = vpack.c.bf16 %v3151_v50, %v3147_v15 }
0x2113   :  { %v3218_v22 = vpack.c.bf16 %v3150_v19, %v3146_v17  ;;  %v3220_v0 = vpack.c.bf16 %v3152_v55, %v3148_v1  ;;  %v3539_v1 = vrot.slane %v10828_v3, %v10878_v48 }
0x2115   :  { %3452 = vmatprep.mubr.bf16.mxu1 %v3218_v22  ;;  %3493 = vmatprep.mubr.bf16.mxu0 %v3220_v0  ;;  %v10914_v22 = vld [vmem:[%s11565_s28 + $0x1] ss:$0 sm:$0xff] }
0x2116   :  { %3453 = vmatmul.mubr.bf16.vlgmr.msra.gmra.mrb[52].mxu1 %v3217_v20  ;;  %3494 = vmatmul.mubr.bf16.vlgmr.msra.gmra.mrb[56].mxu0 %v3219_v21 }
0x2117   :  { %9162 = vmatprep.mubr.msk.bf16.mxu1 %vm10078_vm0, %v10077_v2 }
0x21e9   :  { %v8660_v7 = vpop.f32.mrb[52].mxu1  ;;  %v8682_v23 = vpop.f32.mrb[56].mxu0 }
0x21ea   :  { %v8661_v61 = vpop.f32.mrb[53].mxu1  ;;  %v8683_v26 = vpop.f32.mrb[57].mxu0 }
0x21eb   :  { %v8662_v28 = vadd.f32 %v8661_v61, %v8660_v7  ;;  %v8684_v29 = vadd.f32 %v8683_v26, %v8682_v23  ;;  %v8663_v31 = vpop.f32.mrb[54].mxu1  ;;  %v8685_v6 = vpop.f32.mrb[58].mxu0 }
0x21ec   :  { %v8664_v32 = vpop.f32.mrb[55].mxu1  ;;  %v8686_v45 = vpop.f32.mrb[59].mxu0 }
0x21ed   :  { %v3455_v44 = vadd.f32 %v8662_v28, %v8138_v25  ;;  %v8665_v34 = vadd.f32 %v8664_v32, %v8663_v31  ;;  %v8687_v24 = vadd.f32 %v8686_v45, %v8685_v6 }
0x21ef   :  { %v3496_v37 = vadd.f32 %v8684_v29, %v3455_v44  ;;  %v3458_v38 = vadd.f32 %v8665_v34, %v8138_v25 }
0x21f1   :  { %v3499_v43 = vadd.f32 %v8687_v24, %v3458_v38  ;;  %v3502_v40 = vadd.f32 %v3496_v37, %v10834_v49 }
0x21f3   :  { %v3504_v51 = vsel %vm296_vm2, %v3502_v40, 0.0  ;;  %v3503_v52 = vadd.f32 %v3499_v43, %v10836_v11  ;;  %v10894_v11 = vld [vmem:[%s11563_s26 + $0x10] sm:$0xff]  }
0x21f4   :  { %3505 = vadd.xlane.f32.xlu0 %v3504_v51  ;;  %9159 = vmatpush3.bf16.msra.mxu1 %v10894_v11 }
0x21f5   :  { %v3507_v56 = vsel %vm346_vm4, %v3503_v52, 0.0  ;;  %9160 = vmatprep.subr.bf16.mxu1 %v10077_v2 }
0x21f6   :  { %3508 = vadd.xlane.f32.xlu1 %v3507_v56 }
0x21f8   :  { %9161 = vmatpush3.bf16.msra.mxu1 %v10898_v8 }
0x2281   :  { %v3506_v57 = vpop.xlane.xlu0 %3505 }
0x2282   :  { %v3510_v18 = vmul.f32 0.03125, %v3506_v57 }
0x2283   :  { %v3509_v60 = vpop.xlane.xlu1 %3508 }
0x2284   :  { %v3512_v30 = vsub.f32 %v3502_v40, %v3510_v18  ;;  %v3511_v62 = vmul.f32 0.03125, %v3509_v60 }
0x2286   :  { %v3513_v47 = vsub.f32 %v3503_v52, %v3511_v62  ;;  %v3514_v63 = vmul.f32 %v3512_v30, %v3512_v30 }
0x2288   :  { %v3516_v4 = vsel %vm296_vm2, %v3514_v63, 0.0  ;;  %v3515_v49 = vmul.f32 %v3513_v47, %v3513_v47 }
0x2289   :  { %3517 = vadd.xlane.f32.xlu0 %v3516_v4 }
0x228a   :  { %v3519_v5 = vsel %vm346_vm4, %v3515_v49, 0.0 }
0x228b   :  { %3520 = vadd.xlane.f32.xlu1 %v3519_v5 }
0x2316   :  { %v3518_v41 = vpop.xlane.xlu0 %3517 }
0x2317   :  { %v3522_v9 = vmul.f32 0.03125, %v3518_v41 }
0x2318   :  { %v3521_v54 = vpop.xlane.xlu1 %3520 }
0x2319   :  { %v3524_v10 = vadd.f32 1e-05, %v3522_v9  ;;  %v3523_v27 = vmul.f32 0.03125, %v3521_v54 }
0x231b   :  { %9872 = vrsqrt.f32 %v3524_v10  ;;  %v3525_v59 = vadd.f32 1e-05, %v3523_v27 }
0x231d   :  { %9874 = vrsqrt.f32 %v3525_v59 }
0x2325   :  { %v9873_v14 = vpop.eup %9872 }
0x2326   :  { %v3528_v15 = vmul.f32 %v9873_v14, %v3512_v30 }
0x2327   :  { %v9875_v33 = vpop.eup %9874 }
0x2328   :  { %v3534_v50 = vmul.f32 %v3533_v12, %v3528_v15  ;;  %v3529_v17 = vmul.f32 %v9875_v33, %v3513_v47 }
0x232a   :  { %v3535_v19 = vmul.f32 %v3533_v12, %v3529_v17  ;;  %v10906_v55 = vadd.f32 %v3539_v1, %v3534_v50 }
0x232c   :  { %v10908_v20 = vadd.f32 %v3539_v1, %v3535_v19 }
0x232e   :  { %v3551_v21 = vpack.c.bf16 %v10908_v20, %v10906_v55 }
0x2330   :  { %9163 = vmatmul.mubr.msk.bf16.vlgmr.msra.gmra.mrb[56].mxu1 %vm296_vm2, %v3551_v21 }
0x2403   :  { %v3607_v0 = vpop.f32.mrb[56].mxu1 }
0x2404   :  { %v3608_v7 = vadd.f32 %v10914_v22, %v3607_v0  ;;  %v9164_v23 = vpop.f32.mrb[57].mxu1 }
0x2405   :  { %v3610_v25 = vpop.f32.mrb[58].mxu1 }
0x2406   :  { %v3611_v61 = vadd.f32 %v10914_v22, %v3610_v25  ;;  %v9165_v3 = vpop.f32.mrb[59].mxu1  ;;  %v3614_v26 = vmul.f32 0.25, %v3608_v7 }
0x2408   :  { %9170 = vmatprep.mubr.msk.f32.mxu0 %vm2483_vm3, %v3614_v26  ;;  %v10919_v28 = vpack.i.bf16 %v3611_v61, %v3608_v7  ;;  %v3615_v29 = vmul.f32 0.25, %v3611_v61 }
0x240a   :  { %9572 = vrot.lane.b32.xlu1 %v10919_v28, %s10084_s2  ;;  %9567 = vrot.lane.b32.xlu0 %v10919_v28, %s10080_s21 }
0x240e   :  { %3817 = vrot.lane.b32.xlu1 %v3614_v26, %s10085_s7  ;;  %3819 = vrot.lane.b32.xlu0 %v3615_v29, %s10085_s7 }
0x247c   :  { %v9573_v31 = vpop.permute.xlu1 %9572  ;;  %v9568_v6 = vpop.permute.xlu0 %9567 }
0x247d   :  { %v9575_v32 = vunpack.i.h.bf16 %v9573_v31  ;;  %v9574_v45 = vunpack.i.l.bf16 %v9573_v31  ;;  %v9570_v44 = vunpack.i.h.bf16 %v9568_v6  ;;  %v9569_v34 = vunpack.i.l.bf16 %v9568_v6 }
0x247f   :  { %v9423_v24 = vpack.c.bf16 %v9570_v44, %v9569_v34  ;;  %v9435_v37 = vpack.c.bf16 %v9575_v32, %v9574_v45 }
0x2480   :  { %v3818_v38 = vpop.permute.xlu1 %3817  ;;  %v3820_v43 = vpop.permute.xlu0 %3819 }
0x2481   :  { %9425 = vmatprep.subr.msk.bf16.mxu0 %vm10756_vm13, %v9423_v24 }
0x2482   :  { %9428 = vmatpush3.bf16.xpose.msk.msra.mxu0 %vm10756_vm13, %v9423_v24 }
0x2483   :  { %9437 = vmatprep.subr.msk.bf16.mxu0 %vm10756_vm13, %v9435_v37 }
0x2489   :  { %9171 = vmatmul.mubr.msk.f32.vlgmr.msra.gmra.mrb[60].mxu0 %vm2483_vm3, %v3615_v29 }
0x248a   :  { %9440 = vmatpush3.bf16.xpose.msk.msra.mxu0 %vm10756_vm13, %v9435_v37  ;;  %9184 = vmatprep.mubr.msk.f32.mxu0 %vm2483_vm3, %v3818_v38 }
0x2491   :  { %9185 = vmatmul.mubr.msk.f32.vlgmr.msra.gmra.mrb[62].mxu0 %vm2483_vm3, %v3820_v43 }
0x2492   :  { %4230 = vmatprep.mubr.bf16.mxu0 %v10088_v53 }
0x255c   :  { %v9172_v40 = vpop.f32.mrb[60].mxu0 }
0x255d   :  { %v3698_v51 = vpop.f32.mrb[61].mxu0  ;;  %v3710_v52 = vsel %vm2572_vm5, %v9172_v40, -inf }
0x255e   :  { %3711 = vmax.xlane.f32.xlu0 %v3710_v52  ;;  %v3707_v56 = vsel %vm2030_vm9, %v3698_v51, -inf }
0x255f   :  { %3708 = vmax.xlane.f32.xlu1 %v3707_v56 }
0x2564   :  { %v9186_v57 = vpop.f32.mrb[62].mxu0 }
0x2565   :  { %v3899_v18 = vpop.f32.mrb[63].mxu0  ;;  %v3911_v60 = vsel %vm2572_vm5, %v9186_v57, -inf }
0x2566   :  { %3912 = vmax.xlane.f32.xlu1 %v3911_v60  ;;  %v3908_v30 = vsel %vm2030_vm9, %v3899_v18, -inf }
0x2567   :  { %3909 = vmax.xlane.f32.xlu0 %v3908_v30 }
0x25eb   :  { %v3712_v62 = vpop.xlane.xlu0 %3711 }
0x25ec   :  { %v3714_v47 = vsub.f32 %v9172_v40, %v3712_v62  ;;  %v3709_v63 = vpop.xlane.xlu1 %3708 }
0x25ed   :  { %v3713_v4 = vsub.f32 %v3698_v51, %v3709_v63 }
0x25ee   :  { %v3717_v49 = vmul.f32 1.442695, %v3714_v47 }
0x25ef   :  { %v3715_v5 = vmul.f32 1.442695, %v3713_v4 }
0x25f0   :  { %9876 = vpow2.f32 %v3717_v49 }
0x25f1   :  { %9878 = vpow2.f32 %v3715_v5 }
0x25f3   :  { %v3913_v41 = vpop.xlane.xlu1 %3912 }
0x25f4   :  { %v3915_v9 = vsub.f32 %v9186_v57, %v3913_v41  ;;  %v3910_v54 = vpop.xlane.xlu0 %3909 }
0x25f5   :  { %v3914_v10 = vsub.f32 %v3899_v18, %v3910_v54 }
0x25f6   :  { %v3918_v27 = vmul.f32 1.442695, %v3915_v9 }
0x25f7   :  { %v3916_v59 = vmul.f32 1.442695, %v3914_v10 }
0x25f8   :  { %9880 = vpow2.f32 %v3918_v27 }
0x25f9   :  { %9882 = vpow2.f32 %v3916_v59 }
0x25fa   :  { %v9877_v12 = vpop.eup %9876 }
0x25fb   :  { %v9879_v14 = vpop.eup %9878  ;;  %v3722_v15 = vsel %vm2572_vm5, %v9877_v12, 0.0 }
0x25fc   :  { %3723 = vadd.xlane.f32.xlu1 %v3722_v15  ;;  %v3719_v33 = vsel %vm2030_vm9, %v9879_v14, 0.0 }
0x25fd   :  { %3720 = vadd.xlane.f32.xlu0 %v3719_v33 }
0x2602   :  { %v9881_v50 = vpop.eup %9880 }
0x2603   :  { %v9883_v17 = vpop.eup %9882  ;;  %v3923_v1 = vsel %vm2572_vm5, %v9881_v50, 0.0 }
0x2604   :  { %3924 = vadd.xlane.f32.xlu1 %v3923_v1  ;;  %v3920_v19 = vsel %vm2030_vm9, %v9883_v17, 0.0 }
0x2605   :  { %3921 = vadd.xlane.f32.xlu0 %v3920_v19 }
0x2615   :  { %9582 = vrot.lane.b32.xlu1 %v10919_v28, %s10086_s10 }
0x2619   :  { %4029 = vrot.lane.b32.xlu1 %v10894_v11, %s10081_s30 }
0x261b   :  { %9577 = vrot.lane.b32.xlu0 %v10919_v28, %s10079_s17 }
0x261d   :  { %4031 = vrot.lane.b32.xlu1 %v10898_v8, %s10081_s30 }
0x2689   :  { %v3724_v0 = vpop.xlane.xlu1 %3723 }
0x268a   :  { %v3721_v21 = vpop.xlane.xlu0 %3720 }
0x268b   :  { %9884 = vrcp.f32 %v3721_v21 }
0x268c   :  { %9886 = vrcp.f32 %v3724_v0  ;;  %v9684_v0 = vld [vmem:[%s11568_s0 + $0x44] ss:$16 sps:$4 sm:$0xff]  }
0x268d   :  { %4198 = vmatprep.subr.bf16.mxu0 %v9684_v0  ;;  %v9721_v0 = vld [vmem:[%s11569_s29 + $0x1b0] sm:$0xff]  }
0x2691   :  { %v3925_v7 = vpop.xlane.xlu1 %3924 }
0x2692   :  { %v3922_v23 = vpop.xlane.xlu0 %3921 }
0x2693   :  { %9888 = vrcp.f32 %v3922_v23  ;;  %v9682_v23 = vld [vmem:[%s11568_s0 + $0x40] ss:$16 sps:$4 sm:$0xff]  }
0x2694   :  { %9890 = vrcp.f32 %v3925_v7  ;;  %v9687_v7 = vld [vmem:[%s11568_s0 + $0x4c] ss:$16 sps:$4 sm:$0xff]   ;;  %4199 = vmatpush1.bf16.msra.mxu0 %v9682_v23 }
0x2695   :  { %v9885_v25 = vpop.eup %9884  ;;  %v9583_v61 = vpop.permute.xlu1 %9582  ;;  %v9723_v23 = vld [vmem:[%s11569_s29 + $0x1f8] sm:$0xff]  }
0x2696   :  { %v9578_v3 = vpop.permute.xlu0 %9577  ;;  %v3727_v26 = vmul.f32 %v9885_v25, %v9879_v14  ;;  %v9585_v29 = vunpack.i.h.bf16 %v9583_v61  ;;  %v9584_v11 = vunpack.i.l.bf16 %v9583_v61  ;;  %v9887_v8 = vpop.eup %9886  ;;  %v9685_v25 = vld [vmem:[%s11568_s0 + $0x48] ss:$16 sps:$4 sm:$0xff]   ;;  %v9688_v61 = vld [vmem:[%s11568_s0 + $0x60] ss:$16 sps:$4 sm:$0xff]  }
0x2697   :  { %v9580_v31 = vunpack.i.h.bf16 %v9578_v3  ;;  %v9579_v6 = vunpack.i.l.bf16 %v9578_v3  ;;  %v3728_v44 = vmul.f32 %v9887_v8, %v9877_v12  ;;  %v9690_v3 = vld [vmem:[%s11568_s0 + $0x64] ss:$16 sps:$4 sm:$0xff]  }
0x2698   :  { %9177 = vmatprep.mubr.msk.f32.mxu1 %vm2030_vm9, %v3727_v26  ;;  %v9441_v32 = vpack.c.bf16 %v9585_v29, %v9584_v11  ;;  %v9691_v26 = vld [vmem:[%s11568_s0 + $0x68] ss:$16 sps:$4 sm:$0xff]   ;;  %v9693_v29 = vld [vmem:[%s11568_s0 + $0x6c] ss:$16 sps:$4 sm:$0xff]   ;;  %4200 = vmatprep.subr.bf16.mxu0 %v9690_v3  ;;  %v9694_v11 = vld [vmem:[%s11569_s29 + $0x140] sm:$0xff]  }
0x2699   :  { %v9429_v28 = vpack.c.bf16 %v9580_v31, %v9579_v6  ;;  %v4030_v38 = vpop.permute.xlu1 %4029  ;;  %4201 = vmatpush1.bf16.msra.mxu0 %v9688_v61  ;;  %v9695_v31 = vld [vmem:[%s11569_s29 + $0x1c0] sm:$0xff]   ;;  %v9725_v61 = vld [vmem:[%s11569_s29 + $0x1b8] sm:$0xff]  }
0x269a   :  { %8710 = vmatprep.subr.bf16.mxu0 %v9694_v11  ;;  %v8204_v3 = vld [vmem:[%s11571_s24 + $0x4] sm:$0xf] }
0x269b   :  { %9431 = vmatprep.subr.msk.bf16.mxu1 %vm10680_vm6, %v9429_v28  ;;  %v4142_v11 = vrot.slane %v8204_v3, %v10647_v58 }
0x269c   :  { %9434 = vmatpush3.bf16.msk.msra.mxu1 %vm10680_vm6, %v9429_v28 }
0x269d   :  { %v9889_v45 = vpop.eup %9888  ;;  %9443 = vmatprep.subr.msk.bf16.mxu1 %vm10680_vm6, %v9441_v32  ;;  %v4032_v43 = vpop.permute.xlu1 %4031 }
0x269e   :  { %v9891_v34 = vpop.eup %9890  ;;  %v3928_v24 = vmul.f32 %v9889_v45, %v9883_v17 }
0x269f   :  { %9178 = vmatmul.mubr.msk.f32.vlgmr.msra.gmra.mrb[60].mxu1 %vm2030_vm9, %v3728_v44  ;;  %v3929_v37 = vmul.f32 %v9891_v34, %v9881_v50  ;;  %v10995_v34 = vld [vmem:[%s11570_s3 + $0x4] sm:$0xf] }
0x26a0   :  { %9446 = vmatpush3.bf16.msk.msra.mxu1 %vm10680_vm6, %v9441_v32  ;;  %9191 = vmatprep.mubr.msk.f32.mxu1 %vm2030_vm9, %v3928_v24  ;;  %v4113_v24 = vrot.slane %v10995_v34, %v10363_v42 }
0x26a1   :  { %9194 = vmatprep.subr.bf16.mxu1 %v10077_v2 }
0x26a3   :  { %9192 = vmatmul.mubr.msk.f32.vlgmr.msra.gmra.mrb[62].mxu1 %vm2030_vm9, %v3929_v37 }
0x26a4   :  { %9198 = vmatprep.mubr.msk.bf16.mxu1 %vm10078_vm0, %v10077_v2  ;;  %9195 = vmatpush3.bf16.msra.mxu1 %v4030_v38 }
0x26a5   :  { %9196 = vmatprep.subr.bf16.mxu1 %v10077_v2 }
0x26a8   :  { %9197 = vmatpush3.bf16.msra.mxu1 %v4032_v43 }
0x26a9   :  { %4241 = vmatprep.subr.bf16.mxu1 %v9687_v7  ;;  %v9722_v7 = vld [vmem:[%s11569_s29 + $0x178] sm:$0xff]  }
0x2772   :  { %v9179_v40 = vpop.f32.mrb[60].mxu1 }
0x2773   :  { %v3808_v51 = vpop.f32.mrb[61].mxu1 }
0x2776   :  { %v9193_v52 = vpop.f32.mrb[62].mxu1 }
0x2777   :  { %v4009_v56 = vpop.f32.mrb[63].mxu1 }
0x2778   :  { %v9586_v57 = vpack.i.bf16 %v9193_v52, %v4009_v56  ;;  %v4119_v52 = vrot.slane %v10995_v34, %v10647_v58 }
0x277a   :  { %9587 = vrot.lane.b32.xlu0 %v9586_v57, %s10087_s11 }
0x277e   :  { %4035 = vrot.lane.b32.xlu0 %v10914_v22, %s10081_s30 }
0x27ec   :  { %v9588_v18 = vpop.permute.xlu0 %9587 }
0x27ed   :  { %v9590_v60 = vunpack.i.h.bf16 %v9588_v18  ;;  %v9589_v30 = vunpack.i.l.bf16 %v9588_v18 }
0x27ef   :  { %v4027_v62 = vsel %vm2483_vm3, %v9179_v40, %v9590_v60  ;;  %v4026_v47 = vsel %vm2483_vm3, %v3808_v51, %v9589_v30  ;;  %v9696_v60 = vld [vmem:[%s11569_s29 + $0x100] sm:$0xff]  }
0x27f0   :  { %v4028_v63 = vpack.c.bf16 %v4027_v62, %v4026_v47  ;;  %v4036_v4 = vpop.permute.xlu0 %4035  ;;  %v9697_v30 = vld [vmem:[%s11569_s29 + $0x180] sm:$0xff]   ;;  %v9698_v47 = vld [vmem:[%s11569_s29 + $0x148] sm:$0xff]  }
0x27f2   :  { %9199 = vmatmul.mubr.msk.bf16.vlgmr.msra.gmra.mrb[64].mxu1 %vm296_vm2, %v4028_v63  ;;  %v9699_v63 = vld [vmem:[%s11569_s29 + $0x1c8] sm:$0xff]  }
0x27f3   :  { %4273 = vmatprep.mubr.bf16.mxu1 %v10088_v53  ;;  %4242 = vmatpush1.bf16.msra.mxu1 %v9685_v25  ;;  %v9724_v25 = vld [vmem:[%s11569_s29 + $0x138] sm:$0xff]  }
0x27f4   :  { %4243 = vmatprep.subr.bf16.mxu1 %v9693_v29  ;;  %v4146_v29 = vrot.slane %v8204_v3, %v10874_v16 }
0x27f7   :  { %4244 = vmatpush1.bf16.msra.mxu1 %v9691_v26  ;;  %v4138_v26 = vrot.slane %v8204_v3, %v10363_v42 }
0x27f8   :  { %8732 = vmatprep.subr.bf16.mxu1 %v9695_v31  ;;  %v4150_v31 = vrot.slane %v8204_v3, %v10878_v48 }
0x28c5   :  { %v4075_v49 = vpop.f32.mrb[64].mxu1 }
0x28c6   :  { %v4076_v5 = vadd.f32 %v4075_v49, %v4036_v4  ;;  %v9200_v41 = vpop.f32.mrb[65].mxu1  ;;  %v9701_v49 = vld [vmem:[%s11569_s29 + $0x188] sm:$0xff]  }
0x28c7   :  { %v4078_v9 = vpop.f32.mrb[66].mxu1  ;;  %v9703_v41 = vld [vmem:[%s11569_s29 + $0x1d0] sm:$0xff]  }
0x28c8   :  { %v4079_v54 = vadd.f32 %v4078_v9, %v4036_v4  ;;  %v9201_v10 = vpop.f32.mrb[67].mxu1  ;;  %v4082_v22 = vadd.f32 %v4076_v5, %v10906_v55  ;;  %v9700_v4 = vld [vmem:[%s11569_s29 + $0x108] sm:$0xff]   ;;  %v9702_v5 = vld [vmem:[%s11569_s29 + $0x150] sm:$0xff]  }
0x28c9   :  { %v9704_v9 = vld [vmem:[%s11569_s29 + $0x110] sm:$0xff]   ;;  %v9706_v10 = vld [vmem:[%s11569_s29 + $0x158] sm:$0xff]  }
0x28ca   :  { %v4084_v27 = vsel %vm296_vm2, %v4082_v22, 0.0  ;;  %v4083_v59 = vadd.f32 %v4079_v54, %v10908_v20  ;;  %v9705_v54 = vld [vmem:[%s11569_s29 + $0x190] sm:$0xff]  }
0x28cb   :  { %4085 = vadd.xlane.f32.xlu1 %v4084_v27  ;;  %v9708_v27 = vld [vmem:[%s11569_s29 + $0x118] sm:$0xff]  }
0x28cc   :  { %v4087_v12 = vsel %vm346_vm4, %v4083_v59, 0.0 }
0x28cd   :  { %4088 = vadd.xlane.f32.xlu0 %v4087_v12  ;;  %v9710_v12 = vld [vmem:[%s11569_s29 + $0x160] sm:$0xff]  }
0x2958   :  { %v4086_v14 = vpop.xlane.xlu1 %4085 }
0x2959   :  { %v4090_v15 = vmul.f32 0.03125, %v4086_v14  ;;  %v9711_v14 = vld [vmem:[%s11569_s29 + $0x1e0] sm:$0xff]  }
0x295a   :  { %v4089_v33 = vpop.xlane.xlu0 %4088 }
0x295b   :  { %v4092_v50 = vsub.f32 %v4082_v22, %v4090_v15  ;;  %v4091_v17 = vmul.f32 0.03125, %v4089_v33  ;;  %v9707_v22 = vld [vmem:[%s11569_s29 + $0x1d8] sm:$0xff]   ;;  %v9712_v15 = vld [vmem:[%s11569_s29 + $0x120] sm:$0xff]  }
0x295c   :  { %v9713_v33 = vld [vmem:[%s11569_s29 + $0x1a0] sm:$0xff]  }
0x295d   :  { %v4093_v1 = vsub.f32 %v4083_v59, %v4091_v17  ;;  %v4094_v55 = vmul.f32 %v4092_v50, %v4092_v50  ;;  %v9709_v59 = vld [vmem:[%s11569_s29 + $0x198] sm:$0xff]   ;;  %v9715_v17 = vld [vmem:[%s11569_s29 + $0x1e8] sm:$0xff]  }
0x295f   :  { %v4096_v20 = vsel %vm296_vm2, %v4094_v55, 0.0  ;;  %v4095_v19 = vmul.f32 %v4093_v1, %v4093_v1  ;;  %v9717_v55 = vld [vmem:[%s11569_s29 + $0x1a8] sm:$0xff]  }
0x2960   :  { %4097 = vadd.xlane.f32.xlu0 %v4096_v20  ;;  %v9718_v20 = vld [vmem:[%s11569_s29 + $0x170] sm:$0xff]  }
0x2961   :  { %v4099_v21 = vsel %vm346_vm4, %v4095_v19, 0.0  ;;  %v9719_v19 = vld [vmem:[%s11569_s29 + $0x1f0] sm:$0xff]  }
0x2962   :  { %4100 = vadd.xlane.f32.xlu1 %v4099_v21  ;;  %v9720_v21 = vld [vmem:[%s11569_s29 + $0x130] sm:$0xff]  }
0x29ed   :  { %v4098_v6 = vpop.xlane.xlu0 %4097 }
0x29ee   :  { %v4102_v28 = vmul.f32 0.03125, %v4098_v6 }
0x29ef   :  { %v4101_v8 = vpop.xlane.xlu1 %4100 }
0x29f0   :  { %v4104_v32 = vadd.f32 1e-05, %v4102_v28  ;;  %v4103_v45 = vmul.f32 0.03125, %v4101_v8 }
0x29f2   :  { %9892 = vrsqrt.f32 %v4104_v32  ;;  %v4105_v44 = vadd.f32 1e-05, %v4103_v45 }
0x29f4   :  { %9894 = vrsqrt.f32 %v4105_v44 }
0x29fc   :  { %v9893_v37 = vpop.eup %9892 }
0x29fd   :  { %v4108_v38 = vmul.f32 %v9893_v37, %v4092_v50  ;;  %v9714_v50 = vld [vmem:[%s11569_s29 + $0x168] sm:$0xff]  }
0x29fe   :  { %v9895_v43 = vpop.eup %9894 }
0x29ff   :  { %v4114_v40 = vmul.f32 %v4113_v24, %v4108_v38  ;;  %v4109_v51 = vmul.f32 %v9895_v43, %v4093_v1  ;;  %v9716_v1 = vld [vmem:[%s11569_s29 + $0x128] sm:$0xff]  }
0x2a01   :  { %v4115_v56 = vmul.f32 %v4113_v24, %v4109_v51  ;;  %v11001_v57 = vadd.f32 %v4119_v52, %v4114_v40 }
0x2a03   :  { %v11003_v18 = vadd.f32 %v4119_v52, %v4115_v56 }
0x2a05   :  { %v4131_v62 = vpack.c.bf16 %v11003_v18, %v11001_v57 }
0x2a07   :  { %8213 = vmatmul.mubr.msk.bf16.vlgmr.msra.gmra.mrb[64].mxu0 %vm296_vm2, %v4131_v62  ;;  %8214 = vmatmul.mubr.msk.bf16.vlgmr.msra.gmra.mrb[68].mxu1 %vm296_vm2, %v4131_v62 }
0x2a08   :  { %8711 = vmatpush3.bf16.msra.mxu0 %v9696_v60  ;;  %8733 = vmatpush3.bf16.msra.mxu1 %v9697_v30 }
0x2a09   :  { %8712 = vmatprep.subr.bf16.mxu0 %v9698_v47  ;;  %8734 = vmatprep.subr.bf16.mxu1 %v9699_v63 }
0x2a0c   :  { %8713 = vmatpush3.bf16.msra.mxu0 %v9700_v4  ;;  %8735 = vmatpush3.bf16.msra.mxu1 %v9701_v49 }
0x2a0d   :  { %8714 = vmatprep.subr.bf16.mxu0 %v9702_v5  ;;  %8736 = vmatprep.subr.bf16.mxu1 %v9703_v41 }
0x2a10   :  { %8715 = vmatpush3.bf16.msra.mxu0 %v9704_v9  ;;  %8737 = vmatpush3.bf16.msra.mxu1 %v9705_v54 }
0x2a11   :  { %8716 = vmatprep.subr.bf16.mxu0 %v9706_v10  ;;  %8738 = vmatprep.subr.bf16.mxu1 %v9707_v22 }
0x2a14   :  { %8717 = vmatpush3.bf16.msra.mxu0 %v9708_v27  ;;  %8739 = vmatpush3.bf16.msra.mxu1 %v9709_v59  ;;  %v9726_v59 = vld [vmem:[%s11573_s12] sm:$0xff]  }
0x2a15   :  { %8718 = vmatprep.subr.bf16.mxu0 %v9710_v12  ;;  %8740 = vmatprep.subr.bf16.mxu1 %v9711_v14  ;;  %v11048_v12 = vld [vmem:[%s11573_s12 + $0x8] sm:$0xff]   ;;  %v4728_v14 = vpack.c.bf16 %v10730_v36, %v10730_v36 }
0x2a18   :  { %8719 = vmatpush3.bf16.msra.mxu0 %v9712_v15  ;;  %8741 = vmatpush3.bf16.msra.mxu1 %v9713_v33 }
0x2a19   :  { %8720 = vmatprep.subr.bf16.mxu0 %v9714_v50  ;;  %8742 = vmatprep.subr.bf16.mxu1 %v9715_v17  ;;  %v8280_v50 = vld [vmem:[%s11572_s6 + $0x1] ss:$0 sm:$0xff] }
0x2a1c   :  { %8721 = vmatpush3.bf16.msra.mxu0 %v9716_v1  ;;  %8743 = vmatpush3.bf16.msra.mxu1 %v9717_v55 }
0x2a1d   :  { %8722 = vmatprep.subr.bf16.mxu0 %v9718_v20  ;;  %8744 = vmatprep.subr.bf16.mxu1 %v9719_v19 }
0x2a20   :  { %8723 = vmatpush3.bf16.msra.mxu0 %v9720_v21  ;;  %8745 = vmatpush3.bf16.msra.mxu1 %v9721_v0 }
0x2a21   :  { %8724 = vmatprep.subr.bf16.mxu0 %v9722_v7  ;;  %8746 = vmatprep.subr.bf16.mxu1 %v9723_v23 }
0x2a24   :  { %8725 = vmatpush3.bf16.msra.mxu0 %v9724_v25  ;;  %8747 = vmatpush3.bf16.msra.mxu1 %v9725_v61 }
0x2a25   :  { %9202 = vmatprep.subr.bf16.mxu0 %v10077_v2  ;;  %9210 = vmatprep.subr.mxu1 %v10077_v2 }
0x2ada   :  { %v4232_v6 = vpop.f32.mrb[64].mxu0  ;;  %v4275_v28 = vpop.f32.mrb[68].mxu1 }
0x2adb   :  { %v4233_v8 = vadd.f32 %v4232_v6, %v4138_v26  ;;  %v4276_v32 = vadd.f32 %v4275_v28, %v4146_v29  ;;  %v4234_v45 = vpop.f32.mrb[65].mxu0  ;;  %v4277_v44 = vpop.f32.mrb[69].mxu1 }
0x2adc   :  { %v4235_v24 = vadd.f32 %v4234_v45, %v4142_v11  ;;  %v4278_v37 = vadd.f32 %v4277_v44, %v4150_v31  ;;  %v4236_v38 = vpop.f32.mrb[66].mxu0  ;;  %v4279_v43 = vpop.f32.mrb[70].mxu1 }
0x2add   :  { %v4237_v40 = vadd.f32 %v4236_v38, %v4138_v26  ;;  %v4280_v51 = vadd.f32 %v4279_v43, %v4146_v29  ;;  %v4238_v52 = vpop.f32.mrb[67].mxu0  ;;  %v4281_v56 = vpop.f32.mrb[71].mxu1  ;;  %v4284_v62 = vmax.f32 %v4233_v8, 0.0  ;;  %v4286_v47 = vmax.f32 %v4276_v32, 0.0  ;;  %v11066_v29 = vld [vmem:[%s11574_s20] ss:$0 sm:$0xff] }
0x2ade   :  { %v4239_v60 = vadd.f32 %v4238_v52, %v4142_v11  ;;  %v4282_v30 = vadd.f32 %v4281_v56, %v4150_v31  ;;  %v4285_v49 = vmax.f32 %v4235_v24, 0.0  ;;  %v4287_v5 = vmax.f32 %v4278_v37, 0.0 }
0x2adf   :  { %v4288_v63 = vmax.f32 %v4237_v40, 0.0  ;;  %v4290_v4 = vmax.f32 %v4280_v51, 0.0 }
0x2ae0   :  { %v4289_v41 = vmax.f32 %v4239_v60, 0.0  ;;  %v4291_v9 = vmax.f32 %v4282_v30, 0.0 }
0x2ae1   :  { %v4357_v54 = vpack.c.bf16 %v4288_v63, %v4284_v62  ;;  %v4359_v10 = vpack.c.bf16 %v4290_v4, %v4286_v47 }
0x2ae2   :  { %v4358_v22 = vpack.c.bf16 %v4289_v41, %v4285_v49  ;;  %v4360_v27 = vpack.c.bf16 %v4291_v9, %v4287_v5 }
0x2ae4   :  { %4593 = vmatprep.mubr.bf16.mxu0 %v4358_v22  ;;  %4634 = vmatprep.mubr.bf16.mxu1 %v4360_v27 }
0x2ae5   :  { %4594 = vmatmul.mubr.bf16.vlgmr.msra.gmra.mrb[68].mxu0 %v4357_v54  ;;  %4635 = vmatmul.mubr.bf16.vlgmr.msra.gmra.mrb[72].mxu1 %v4359_v10 }
0x2ae6   :  { %9203 = vmatpush3.bf16.msra.mxu0 %v9726_v59  ;;  %9206 = vmatprep.mubr.msk.bf16.mxu0 %vm10078_vm0, %v10077_v2 }
0x2ae7   :  { %9204 = vmatprep.subr.bf16.mxu0 %v10077_v2  ;;  %9212 = vmatprep.mubr.msk.f32.mxu1 %vm10078_vm0, %v10077_v2 }
0x2aea   :  { %9205 = vmatpush3.bf16.msra.mxu0 %v11048_v12 }
0x2aeb   :  { %9215 = vmatprep.subr.mxu0 %v10077_v2 }
0x2aed   :  { %9207 = vmatmul.mubr.msk.bf16.vlgmr.msra.gmra.mrb[72].mxu0 %vm296_vm2, %v4728_v14 }
0x2aee   :  { %9217 = vmatprep.mubr.msk.f32.mxu0 %vm10078_vm0, %v10077_v2 }
0x2bb8   :  { %v8726_v15 = vpop.f32.mrb[68].mxu0  ;;  %v8748_v33 = vpop.f32.mrb[72].mxu1 }
0x2bb9   :  { %v8727_v17 = vpop.f32.mrb[69].mxu0  ;;  %v8749_v1 = vpop.f32.mrb[73].mxu1 }
0x2bba   :  { %v8728_v55 = vadd.f32 %v8727_v17, %v8726_v15  ;;  %v8750_v20 = vadd.f32 %v8749_v1, %v8748_v33  ;;  %v8729_v19 = vpop.f32.mrb[70].mxu0  ;;  %v8751_v21 = vpop.f32.mrb[74].mxu1 }
0x2bbb   :  { %v8730_v0 = vpop.f32.mrb[71].mxu0  ;;  %v8752_v7 = vpop.f32.mrb[75].mxu1 }
0x2bbc   :  { %v4596_v23 = vadd.f32 %v8728_v55, %v8280_v50  ;;  %v8731_v25 = vadd.f32 %v8730_v0, %v8729_v19  ;;  %v8753_v61 = vadd.f32 %v8752_v7, %v8751_v21 }
0x2bbe   :  { %v11063_v3 = vadd.f32 %v8750_v20, %v4596_v23  ;;  %v4599_v26 = vadd.f32 %v8731_v25, %v8280_v50 }
0x2bc0   :  { %v4640_v11 = vadd.f32 %v8753_v61, %v4599_v26  ;;  %v4784_v31 = vpop.f32.mrb[72].mxu0  ;;  %v4643_v23 = vadd.f32 %v11063_v3, %v11001_v57 }
0x2bc1   :  { %v4785_v6 = vadd.f32 %v11066_v29, %v4784_v31  ;;  %v9208_v28 = vpop.f32.mrb[73].mxu0 }
0x2bc2   :  { %v4787_v8 = vpop.f32.mrb[74].mxu0  ;;  %v4644_v10 = vadd.f32 %v4640_v11, %v11003_v18  ;;  %v4645_v25 = vsel %vm296_vm2, %v4643_v23, 0.0 }
0x2bc3   :  { %4959 = vrot.lane.b32.xlu1 %v4785_v6, %s10084_s2  ;;  %4792 = vrot.lane.b32.xlu0 %v4785_v6, %s10080_s21  ;;  %v9209_v32 = vpop.f32.mrb[75].mxu0  ;;  %v4790_v45 = vmul.f32 0.25, %v4785_v6 }
0x2bc4   :  { %v4648_v22 = vsel %vm346_vm4, %v4644_v10, 0.0 }
0x2bc7   :  { %4957 = vrot.lane.b32.xlu1 %v4790_v45, %s10085_s7 }
0x2c35   :  { %v4793_v44 = vpop.permute.xlu0 %4792  ;;  %v4960_v24 = vpop.permute.xlu1 %4959 }
0x2c36   :  { %9211 = vmatpush3.xpose.msk.msra.mxu1 %vm2483_vm3, %v4793_v44 }
0x2c37   :  { %9220 = vmatprep.subr.mxu1 %v10077_v2 }
0x2c39   :  { %9213 = vmatmul.mubr.msk.f32.vlgmr.msra.gmra.mrb[76].mxu1 %vm2483_vm3, %v4790_v45  ;;  %v4958_v37 = vpop.permute.xlu1 %4957 }
0x2c3a   :  { %9221 = vmatpush3.xpose.msk.msra.mxu1 %vm2483_vm3, %v4960_v24  ;;  %9222 = vmatprep.mubr.msk.f32.mxu1 %vm10078_vm0, %v10077_v2 }
0x2c3b   :  { %9230 = vmatprep.subr.bf16.mxu1 %v10077_v2 }
0x2c3d   :  { %9223 = vmatmul.mubr.msk.f32.vlgmr.msra.gmra.mrb[78].mxu1 %vm2483_vm3, %v4958_v37 }
0x2c3e   :  { %9234 = vmatprep.mubr.msk.bf16.mxu1 %vm10078_vm0, %v10077_v2 }
0x2d0c   :  { %v4865_v38 = vpop.f32.mrb[76].mxu1 }
0x2d0d   :  { %v9214_v43 = vpop.f32.mrb[77].mxu1  ;;  %v4869_v40 = vsel %vm1112_vm11, %v4865_v38, -inf }
0x2d0e   :  { %4870 = vmax.xlane.f32.xlu0 %v4869_v40 }
0x2d10   :  { %v5031_v51 = vpop.f32.mrb[78].mxu1 }
0x2d11   :  { %v9224_v52 = vpop.f32.mrb[79].mxu1  ;;  %v5035_v56 = vsel %vm1112_vm11, %v5031_v51, -inf }
0x2d12   :  { %5036 = vmax.xlane.f32.xlu1 %v5035_v56 }
0x2d23   :  { %4880 = vrot.lane.b32.xlu1 %v4785_v6, %s10079_s17 }
0x2d27   :  { %5129 = vrot.lane.b32.xlu1 %v9726_v59, %s10081_s30 }
0x2d9b   :  { %v4871_v60 = vpop.xlane.xlu0 %4870 }
0x2d9c   :  { %v4872_v30 = vsub.f32 %v4865_v38, %v4871_v60 }
0x2d9e   :  { %v4873_v62 = vmul.f32 1.442695, %v4872_v30  ;;  %v4674_v30 = vrot.slane %v10995_v34, %v10874_v16 }
0x2d9f   :  { %v5037_v47 = vpop.xlane.xlu1 %5036 }
0x2da0   :  { %9896 = vpow2.f32 %v4873_v62  ;;  %v5038_v63 = vsub.f32 %v5031_v51, %v5037_v47 }
0x2da2   :  { %v5039_v4 = vmul.f32 1.442695, %v5038_v63 }
0x2da3   :  { %v4881_v49 = vpop.permute.xlu1 %4880 }
0x2da4   :  { %9898 = vpow2.f32 %v5039_v4  ;;  %9216 = vmatpush3.msk.msra.mxu0 %vm1130_vm14, %v4881_v49  ;;  %v4680_v4 = vrot.slane %v10995_v34, %v10878_v48  ;;  %v11133_v34 = vld [vmem:[%s11575_s27 + $0x8] sm:$0xff]  }
0x2da5   :  { %9225 = vmatprep.subr.mxu0 %v10077_v2 }
0x2da7   :  { %v5130_v18 = vpop.permute.xlu1 %5129 }
0x2da8   :  { %9231 = vmatpush3.bf16.msra.mxu1 %v5130_v18 }
0x2da9   :  { %9232 = vmatprep.subr.bf16.mxu1 %v10077_v2 }
0x2daa   :  { %v9897_v5 = vpop.eup %9896 }
0x2dab   :  { %v4875_v41 = vsel %vm1112_vm11, %v9897_v5, 0.0 }
0x2dac   :  { %4876 = vadd.xlane.f32.xlu0 %v4875_v41 }
0x2dae   :  { %v9899_v9 = vpop.eup %9898 }
0x2daf   :  { %v5041_v54 = vsel %vm1112_vm11, %v9899_v9, 0.0 }
0x2db0   :  { %5042 = vadd.xlane.f32.xlu0 %v5041_v54 }
0x2dc6   :  { %5046 = vrot.lane.b32.xlu0 %v4785_v6, %s10086_s10 }
0x2dca   :  { %5131 = vrot.lane.b32.xlu0 %v11048_v12, %s10081_s30 }
0x2de9   :  { %4649 = vadd.xlane.f32.xlu0 %v4648_v22 }
0x2e39   :  { %v4877_v27 = vpop.xlane.xlu0 %4876 }
0x2e3a   :  { %9900 = vrcp.f32 %v4877_v27 }
0x2e3d   :  { %v5043_v59 = vpop.xlane.xlu0 %5042 }
0x2e3e   :  { %9902 = vrcp.f32 %v5043_v59 }
0x2e41   :  { %v5047_v33 = vpop.permute.xlu0 %5046 }
0x2e44   :  { %v9901_v14 = vpop.eup %9900 }
0x2e45   :  { %v4879_v15 = vmul.f32 %v9901_v14, %v9897_v5  ;;  %v5132_v17 = vpop.permute.xlu0 %5131  ;;  %v11126_v14 = vld [vmem:[%s11575_s27] sm:$0xff]  }
0x2e46   :  { %9233 = vmatpush3.bf16.msra.mxu1 %v5132_v17 }
0x2e47   :  { %9218 = vmatmul.mubr.msk.f32.vlgmr.msra.gmra.mrb[76].mxu0 %vm1126_vm12, %v4879_v15  ;;  %9246 = vmatprep.subr.bf16.mxu1 %v10077_v2 }
0x2e48   :  { %v9903_v50 = vpop.eup %9902  ;;  %9226 = vmatpush3.msk.msra.mxu0 %vm1130_vm14, %v5047_v33  ;;  %9227 = vmatprep.mubr.msk.f32.mxu0 %vm10078_vm0, %v10077_v2 }
0x2e49   :  { %v5045_v12 = vmul.f32 %v9903_v50, %v9899_v9  ;;  %9238 = vmatprep.subr.bf16.mxu0 %v10077_v2 }
0x2e4b   :  { %9228 = vmatmul.mubr.msk.f32.vlgmr.msra.gmra.mrb[78].mxu0 %vm1126_vm12, %v5045_v12 }
0x2e4c   :  { %9242 = vmatprep.mubr.msk.bf16.mxu0 %vm10078_vm0, %v10077_v2  ;;  %9239 = vmatpush3.bf16.msra.mxu0 %v11126_v14 }
0x2e4d   :  { %9240 = vmatprep.subr.bf16.mxu0 %v10077_v2 }
0x2e50   :  { %9241 = vmatpush3.bf16.msra.mxu0 %v11133_v34 }
0x2e51   :  { %9447 = vmatprep.subr.bf16.mxu0 %v10082_v46 }
0x2e76   :  { %v4650_v21 = vpop.xlane.xlu0 %4649 }
0x2e77   :  { %v4652_v0 = vmul.f32 0.03125, %v4650_v21 }
0x2e79   :  { %v4654_v7 = vsub.f32 %v4644_v10, %v4652_v0 }
0x2e7b   :  { %v4656_v61 = vmul.f32 %v4654_v7, %v4654_v7 }
0x2e7d   :  { %v4660_v26 = vsel %vm346_vm4, %v4656_v61, 0.0  ;;  %v11144_v61 = vld [vmem:[%s11576_s8] ss:$0 sm:$0xff] }
0x2f1a   :  { %v4953_v1 = vpop.f32.mrb[76].mxu0 }
0x2f1b   :  { %v9219_v55 = vpop.f32.mrb[77].mxu0 }
0x2f1e   :  { %v5119_v20 = vpop.f32.mrb[78].mxu0 }
0x2f1f   :  { %5124 = vrot.lane.b32.xlu1 %v5119_v20, %s10087_s11  ;;  %v9229_v19 = vpop.f32.mrb[79].mxu0 }
0x2f43   :  { %4646 = vadd.xlane.f32.xlu1 %v4645_v25 }
0x2f47   :  { %4661 = vadd.xlane.f32.xlu1 %v4660_v26 }
0x2f91   :  { %v5125_v11 = vpop.permute.xlu1 %5124 }
0x2f92   :  { %v5127_v31 = vsel %vm2483_vm3, %v4953_v1, %v5125_v11 }
0x2f93   :  { %v5128_v6 = vpack.c.bf16 %v5127_v31, %v5127_v31 }
0x2f95   :  { %9235 = vmatmul.mubr.msk.bf16.vlgmr.msra.gmra.mrb[80].mxu1 %vm296_vm2, %v5128_v6 }
0x2f96   :  { %9250 = vmatprep.mubr.msk.bf16.mxu1 %vm10078_vm0, %v10077_v2 }
0x2fd0   :  { %v4647_v28 = vpop.xlane.xlu1 %4646 }
0x2fd1   :  { %v4651_v8 = vmul.f32 0.03125, %v4647_v28 }
0x2fd3   :  { %v4653_v32 = vsub.f32 %v4643_v23, %v4651_v8 }
0x2fd4   :  { %v4662_v45 = vpop.xlane.xlu1 %4661 }
0x2fd5   :  { %v4655_v57 = vmul.f32 %v4653_v32, %v4653_v32  ;;  %v4664_v44 = vmul.f32 0.03125, %v4662_v45 }
0x2fd7   :  { %v4657_v3 = vsel %vm296_vm2, %v4655_v57, 0.0  ;;  %v4666_v24 = vadd.f32 1e-05, %v4664_v44  ;;  %v4683_v44 = vld [vmem:[%s10268_s14] sm:$0xf] }
0x2fd8   :  { %4658 = vadd.xlane.f32.xlu0 %v4657_v3 }
0x2fd9   :  { %9904 = vrsqrt.f32 %v4666_v24 }
0x2fe3   :  { %v9905_v60 = vpop.eup %9904 }
0x2fe4   :  { %v4670_v62 = vmul.f32 %v9905_v60, %v4654_v7 }
0x2fe6   :  { %v4676_v49 = vmul.f32 %v4674_v30, %v4670_v62 }
0x2fe8   :  { %v4682_v10 = vadd.f32 %v4680_v4, %v4676_v49 }
0x2fea   :  { %v4687_v27 = vsel %vm346_vm4, %v4682_v10, 0.0 }
0x2fee   :  { %5135 = vrot.lane.b32.xlu0 %v11066_v29, %s10081_s30 }
0x2ff2   :  { %5273 = vrot.lane.b32.xlu0 %v11126_v14, %s10080_s21 }
0x2ff6   :  { %5279 = vrot.lane.b32.xlu0 %v11144_v61, %s10080_s21 }
0x3065   :  { %v4659_v37 = vpop.xlane.xlu0 %4658 }
0x3066   :  { %v4663_v38 = vmul.f32 0.03125, %v4659_v37  ;;  %v4713_v37 = vrot.slane %v4683_v44, %v10363_v42 }
0x3068   :  { %v4665_v43 = vadd.f32 1e-05, %v4663_v38  ;;  %v5175_v40 = vpop.f32.mrb[80].mxu1 }
0x3069   :  { %v9236_v51 = vpop.f32.mrb[81].mxu1  ;;  %v5136_v5 = vpop.permute.xlu0 %5135 }
0x306a   :  { %9906 = vrsqrt.f32 %v4665_v43  ;;  %v5178_v52 = vpop.f32.mrb[82].mxu1  ;;  %v5176_v9 = vadd.f32 %v5175_v40, %v5136_v5  ;;  %v11152_v40 = vld [vmem:[%s11577_s9] sm:$0x3f] }
0x306b   :  { %v9237_v56 = vpop.f32.mrb[83].mxu1 }
0x306c   :  { %v5181_v22 = vadd.f32 %v5176_v9, %v10730_v36  ;;  %v4719_v56 = vrot.slane %v4683_v44, %v10647_v58 }
0x306d   :  { %v5274_v25 = vpop.permute.xlu0 %5273 }
0x306e   :  { %v5182_v59 = vsel %vm1256_vm1, %v5181_v22, 0.0  ;;  %9247 = vmatpush3.bf16.msra.mxu1 %v5274_v25 }
0x306f   :  { %9248 = vmatprep.subr.bf16.mxu1 %v10077_v2 }
0x3074   :  { %v9907_v47 = vpop.eup %9906 }
0x3075   :  { %v4669_v29 = vmul.f32 %v9907_v47, %v4653_v32 }
0x3077   :  { %v4675_v63 = vmul.f32 %v4674_v30, %v4669_v29  ;;  %v5198_v30 = vrot.slane %v11152_v40, %v10363_v42 }
0x3079   :  { %v4681_v41 = vadd.f32 %v4680_v4, %v4675_v63  ;;  %v5203_v4 = vrot.slane %v11152_v40, %v10647_v58 }
0x307b   :  { %v4684_v54 = vsel %vm296_vm2, %v4681_v41, 0.0 }
0x307c   :  { %4685 = vadd.xlane.f32.xlu1 %v4684_v54  ;;  %v5280_v54 = vpop.permute.xlu0 %5279 }
0x3080   :  { %4688 = vadd.xlane.f32.xlu1 %v4687_v27 }
0x3084   :  { %5183 = vadd.xlane.f32.xlu1 %v5182_v59 }
0x3109   :  { %v4686_v36 = vpop.xlane.xlu1 %4685 }
0x310a   :  { %v4690_v15 = vmul.f32 0.03125, %v4686_v36 }
0x310c   :  { %v4692_v33 = vsub.f32 %v4681_v41, %v4690_v15 }
0x310d   :  { %v4689_v50 = vpop.xlane.xlu1 %4688 }
0x310e   :  { %v4691_v12 = vmul.f32 0.03125, %v4689_v50  ;;  %v4694_v18 = vmul.f32 %v4692_v33, %v4692_v33 }
0x3110   :  { %v4693_v17 = vsub.f32 %v4682_v10, %v4691_v12  ;;  %v4696_v1 = vsel %vm296_vm2, %v4694_v18, 0.0 }
0x3111   :  { %4697 = vadd.xlane.f32.xlu1 %v4696_v1  ;;  %v5184_v55 = vpop.xlane.xlu1 %5183 }
0x3112   :  { %v5185_v20 = vmul.f32 0.03125, %v5184_v55  ;;  %v4695_v19 = vmul.f32 %v4693_v17, %v4693_v17 }
0x3114   :  { %v5186_v21 = vsub.f32 %v5181_v22, %v5185_v20  ;;  %v4699_v0 = vsel %vm346_vm4, %v4695_v19, 0.0  ;;  %vm5406_vm4 = vcmask 67584  }
0x3115   :  { %4700 = vadd.xlane.f32.xlu1 %v4699_v0 }
0x3116   :  { %v5187_v7 = vmul.f32 %v5186_v21, %v5186_v21 }
0x3118   :  { %v5188_v23 = vsel %vm1256_vm1, %v5187_v7, 0.0 }
0x3119   :  { %5189 = vadd.xlane.f32.xlu1 %v5188_v23 }
0x312a   :  { %5275 = vrot.lane.b32.xlu1 %v11133_v34, %s10080_s21 }
0x319e   :  { %v4698_v26 = vpop.xlane.xlu1 %4697 }
0x319f   :  { %v4702_v11 = vmul.f32 0.03125, %v4698_v26 }
0x31a1   :  { %v4704_v31 = vadd.f32 1e-05, %v4702_v11 }
0x31a2   :  { %v4701_v6 = vpop.xlane.xlu1 %4700 }
0x31a3   :  { %9908 = vrsqrt.f32 %v4704_v31  ;;  %v4703_v28 = vmul.f32 0.03125, %v4701_v6 }
0x31a5   :  { %v4705_v8 = vadd.f32 1e-05, %v4703_v28 }
0x31a6   :  { %v5190_v32 = vpop.xlane.xlu1 %5189 }
0x31a7   :  { %9910 = vrsqrt.f32 %v4705_v8  ;;  %v5191_v57 = vmul.f32 0.03125, %v5190_v32 }
0x31a9   :  { %v5192_v3 = vadd.f32 1e-05, %v5191_v57 }
0x31aa   :  { %v5276_v45 = vpop.permute.xlu1 %5275 }
0x31ab   :  { %9912 = vrsqrt.f32 %v5192_v3  ;;  %9249 = vmatpush3.bf16.msra.mxu1 %v5276_v45 }
0x31ac   :  { %9455 = vmatprep.subr.bf16.mxu1 %v10082_v46 }
0x31ad   :  { %v9909_v24 = vpop.eup %9908 }
0x31ae   :  { %v4708_v38 = vmul.f32 %v9909_v24, %v4692_v33 }
0x31b0   :  { %v4714_v51 = vmul.f32 %v4713_v37, %v4708_v38 }
0x31b1   :  { %v9911_v43 = vpop.eup %9910 }
0x31b2   :  { %v4709_v52 = vmul.f32 %v9911_v43, %v4693_v17  ;;  %v4720_v29 = vadd.f32 %v4719_v56, %v4714_v51 }
0x31b4   :  { %v4715_v60 = vmul.f32 %v4713_v37, %v4709_v52 }
0x31b5   :  { %v9913_v62 = vpop.eup %9912 }
0x31b6   :  { %v5194_v47 = vmul.f32 %v9913_v62, %v5186_v21  ;;  %v4721_v63 = vadd.f32 %v4719_v56, %v4715_v60 }
0x31b8   :  { %v5199_v49 = vmul.f32 %v5198_v30, %v5194_v47  ;;  %v11159_v5 = vpack.c.bf16 %v4721_v63, %v4720_v29 }
0x31ba   :  { %9251 = vmatmul.mubr.msk.bf16.vlgmr.msra.gmra.mrb[84].mxu1 %vm296_vm2, %v11159_v5  ;;  %v11163_v41 = vadd.f32 %v5203_v4, %v5199_v49 }
0x31bb   :  { %9272 = vmatprep.mubr.msk.f32.mxu1 %vm10078_vm0, %v10077_v2 }
0x31bc   :  { %v5210_v9 = vpack.c.bf16 %v11163_v41, %v11163_v41 }
0x31be   :  { %9243 = vmatmul.mubr.msk.bf16.vlgmr.msra.gmra.mrb[80].mxu0 %vm296_vm2, %v5210_v9 }
0x31bf   :  { %9258 = vmatprep.mubr.msk.f32.mxu0 %vm10078_vm0, %v10077_v2 }
0x328d   :  { %v5319_v10 = vpop.f32.mrb[84].mxu1 }
0x328e   :  { %v9252_v22 = vpop.f32.mrb[85].mxu1  ;;  %v5320_v59 = vadd.f32 %v5319_v10, %v5280_v54 }
0x328f   :  { %v5322_v27 = vpop.f32.mrb[86].mxu1 }
0x3290   :  { %v5323_v36 = vadd.f32 %v5322_v27, %v5280_v54  ;;  %v9253_v15 = vpop.f32.mrb[87].mxu1 }
0x3291   :  { %v5266_v33 = vpop.f32.mrb[80].mxu0 }
0x3292   :  { %v9448_v50 = vpack.c.bf16 %v5323_v36, %v5320_v59  ;;  %v5267_v12 = vadd.f32 %v11144_v61, %v5266_v33  ;;  %v9244_v18 = vpop.f32.mrb[81].mxu0  ;;  %v9591_v17 = vpack.i.bf16 %v5323_v36, %v5320_v59 }
0x3293   :  { %v5269_v1 = vpop.f32.mrb[82].mxu0 }
0x3294   :  { %v9245_v55 = vpop.f32.mrb[83].mxu0  ;;  %9592 = vrot.lane.b32.xlu0 %v9591_v17, %s10085_s7  ;;  %9450 = vmatpush3.bf16.xpose.msk.msra.mxu0 %vm10756_vm13, %v9448_v50  ;;  %v5326_v20 = vmul.f32 0.25, %v5267_v12 }
0x3295   :  { %9451 = vmatprep.subr.bf16.mxu0 %v10082_v46 }
0x3298   :  { %5498 = vrot.lane.b32.xlu0 %v5326_v20, %s10085_s7 }
0x329b   :  { %9259 = vmatmul.mubr.msk.f32.vlgmr.msra.gmra.mrb[84].mxu0 %vm2483_vm3, %v5326_v20 }
0x329c   :  { %9265 = vmatprep.mubr.msk.f32.mxu0 %vm10078_vm0, %v10077_v2 }
0x3306   :  { %v9593_v19 = vpop.permute.xlu0 %9592 }
0x3307   :  { %v9595_v21 = vunpack.i.h.bf16 %v9593_v19  ;;  %v9594_v0 = vunpack.i.l.bf16 %v9593_v19 }
0x3309   :  { %v9456_v7 = vpack.c.bf16 %v9595_v21, %v9594_v0 }
0x330a   :  { %v5499_v23 = vpop.permute.xlu0 %5498 }
0x330b   :  { %9458 = vmatpush3.bf16.xpose.msk.msra.mxu1 %vm10756_vm13, %v9456_v7 }
0x330c   :  { %9282 = vmatprep.subr.bf16.mxu1 %v10077_v2 }
0x3312   :  { %9273 = vmatmul.mubr.msk.f32.vlgmr.msra.gmra.mrb[88].mxu1 %vm2483_vm3, %v5499_v23 }
0x3313   :  { %9286 = vmatprep.mubr.msk.bf16.mxu1 %vm10078_vm0, %v10077_v2 }
0x336e   :  { %v5402_v25 = vpop.f32.mrb[84].mxu0 }
0x336f   :  { %v9260_v26 = vpop.f32.mrb[85].mxu0  ;;  %v5407_v11 = vsel %vm5406_vm4, %v5402_v25, -inf }
0x3370   :  { %5408 = vmax.xlane.f32.xlu0 %v5407_v11  ;;  %v9732_v26 = vld [vmem:[%s11578_s5 + $0x4] ss:$16 sps:$4 sm:$0xff]   ;;  %v9735_v11 = vld [vmem:[%s11578_s5 + $0xc] ss:$16 sps:$4 sm:$0xff]  }
0x33e5   :  { %v5576_v31 = vpop.f32.mrb[88].mxu1 }
0x33e6   :  { %v9274_v6 = vpop.f32.mrb[89].mxu1  ;;  %v5580_v28 = vsel %vm5406_vm4, %v5576_v31, -inf }
0x33e7   :  { %5581 = vmax.xlane.f32.xlu1 %v5580_v28  ;;  %v9736_v6 = vld [vmem:[%s11578_s5 + $0x20] ss:$16 sps:$4 sm:$0xff]   ;;  %v9738_v28 = vld [vmem:[%s11578_s5 + $0x24] ss:$16 sps:$4 sm:$0xff]  }
0x33f8   :  { %9602 = vrot.lane.b32.xlu1 %v9591_v17, %s10084_s2 }
0x33fc   :  { %5677 = vrot.lane.b32.xlu1 %v11126_v14, %s10081_s30 }
0x33fd   :  { %v5409_v8 = vpop.xlane.xlu0 %5408 }
0x33fe   :  { %v5410_v32 = vsub.f32 %v5402_v25, %v5409_v8  ;;  %v9739_v8 = vld [vmem:[%s11578_s5 + $0x28] ss:$16 sps:$4 sm:$0xff]  }
0x3400   :  { %v5411_v57 = vmul.f32 1.442695, %v5410_v32  ;;  %5679 = vrot.lane.b32.xlu1 %v11133_v34, %s10081_s30  ;;  %v9741_v32 = vld [vmem:[%s11578_s5 + $0x2c] ss:$16 sps:$4 sm:$0xff]  }
0x3402   :  { %9914 = vpow2.f32 %v5411_v57  ;;  %v9742_v57 = vld [vmem:[%s11579_s15 + $0x40] sm:$0xff]  }
0x340c   :  { %v9915_v3 = vpop.eup %9914 }
0x340d   :  { %v5413_v45 = vsel %vm5406_vm4, %v9915_v3, 0.0 }
0x340e   :  { %5414 = vadd.xlane.f32.xlu0 %v5413_v45 }
0x3474   :  { %v5582_v44 = vpop.xlane.xlu1 %5581 }
0x3475   :  { %v5583_v24 = vsub.f32 %v5576_v31, %v5582_v44  ;;  %v9733_v31 = vld [vmem:[%s11578_s5 + $0x8] ss:$16 sps:$4 sm:$0xff]  }
0x3477   :  { %v5584_v37 = vmul.f32 1.442695, %v5583_v24 }
0x3478   :  { %v9603_v34 = vpop.permute.xlu1 %9602 }
0x3479   :  { %9916 = vpow2.f32 %v5584_v37  ;;  %v9605_v62 = vunpack.i.h.bf16 %v9603_v34  ;;  %v9604_v47 = vunpack.i.l.bf16 %v9603_v34  ;;  %v5746_v37 = vrot.slane %v11152_v40, %v10874_v16 }
0x347b   :  { %v9460_v49 = vpack.c.bf16 %v9605_v62, %v9604_v47  ;;  %v9747_v62 = vld [vmem:[%s11579_s15 + $0xc8] sm:$0xff]  }
0x347c   :  { %v5678_v54 = vpop.permute.xlu1 %5677  ;;  %v9748_v47 = vld [vmem:[%s11579_s15 + $0x8] sm:$0xff]  }
0x347d   :  { %9283 = vmatpush3.bf16.msra.mxu1 %v5678_v54  ;;  %v9754_v54 = vld [vmem:[%s11579_s15 + $0x58] sm:$0xff]  }
0x347e   :  { %9284 = vmatprep.subr.bf16.mxu1 %v10077_v2 }
0x3480   :  { %v5680_v10 = vpop.permute.xlu1 %5679 }
0x3481   :  { %9285 = vmatpush3.bf16.msra.mxu1 %v5680_v10  ;;  %v9755_v10 = vld [vmem:[%s11579_s15 + $0xd8] sm:$0xff]  }
0x3482   :  { %5868 = vmatprep.subr.bf16.mxu1 %v9735_v11 }
0x3483   :  { %v9917_v38 = vpop.eup %9916 }
0x3484   :  { %v5586_v43 = vsel %vm5406_vm4, %v9917_v38, 0.0 }
0x3485   :  { %5587 = vadd.xlane.f32.xlu0 %v5586_v43 }
0x349b   :  { %9597 = vrot.lane.b32.xlu0 %v9591_v17, %s10080_s21  ;;  %v5415_v14 = vpop.xlane.xlu0 %5414 }
0x349c   :  { %9918 = vrcp.f32 %v5415_v14  ;;  %v5751_v14 = vrot.slane %v11152_v40, %v10878_v48 }
0x34a6   :  { %v9919_v30 = vpop.eup %9918 }
0x34a7   :  { %v5417_v63 = vmul.f32 %v9919_v30, %v9915_v3  ;;  %v9743_v3 = vld [vmem:[%s11579_s15 + $0xc0] sm:$0xff]   ;;  %v9746_v30 = vld [vmem:[%s11579_s15 + $0x48] sm:$0xff]  }
0x3512   :  { %v5588_v51 = vpop.xlane.xlu0 %5587 }
0x3513   :  { %9920 = vrcp.f32 %v5588_v51 }
0x3516   :  { %v9598_v52 = vpop.permute.xlu0 %9597 }
0x3517   :  { %v9600_v56 = vunpack.i.h.bf16 %v9598_v52  ;;  %v9599_v60 = vunpack.i.l.bf16 %v9598_v52  ;;  %v9744_v52 = vld [vmem:[%s11579_s15] sm:$0xff]  }
0x3519   :  { %v9452_v29 = vpack.c.bf16 %v9600_v56, %v9599_v60  ;;  %v9745_v56 = vld [vmem:[%s11579_s15 + $0x80] sm:$0xff]  }
0x351b   :  { %9454 = vmatpush3.bf16.msk.msra.mxu0 %vm10680_vm6, %v9452_v29  ;;  %v9749_v29 = vld [vmem:[%s11579_s15 + $0x88] sm:$0xff]  }
0x351c   :  { %9459 = vmatprep.subr.bf16.mxu0 %v10082_v46 }
0x351d   :  { %v9921_v4 = vpop.eup %9920 }
0x351e   :  { %9266 = vmatmul.mubr.msk.f32.vlgmr.msra.gmra.mrb[86].mxu0 %vm2030_vm9, %v5417_v63  ;;  %v5590_v9 = vmul.f32 %v9921_v4, %v9917_v38  ;;  %v9750_v63 = vld [vmem:[%s11579_s15 + $0x50] sm:$0xff]  }
0x351f   :  { %9462 = vmatpush3.bf16.msk.msra.mxu0 %vm10680_vm6, %v9460_v49  ;;  %9279 = vmatprep.mubr.msk.f32.mxu0 %vm10078_vm0, %v10077_v2  ;;  %v9751_v4 = vld [vmem:[%s11579_s15 + $0xd0] sm:$0xff]  }
0x3520   :  { %5827 = vmatprep.subr.bf16.mxu0 %v9732_v26  ;;  %v9752_v49 = vld [vmem:[%s11579_s15 + $0x10] sm:$0xff]  }
0x3522   :  { %9280 = vmatmul.mubr.msk.f32.vlgmr.msra.gmra.mrb[88].mxu0 %vm2030_vm9, %v5590_v9  ;;  %v9753_v9 = vld [vmem:[%s11579_s15 + $0x90] sm:$0xff]  }
0x3523   :  { %5859 = vmatprep.mubr.bf16.mxu0 %v10088_v53 }
0x35f1   :  { %v5494_v22 = vpop.f32.mrb[86].mxu0 }
0x35f2   :  { %v9267_v27 = vpop.f32.mrb[87].mxu0 }
0x35f3   :  { %v9757_v27 = vld [vmem:[%s11579_s15 + $0x98] sm:$0xff]  }
0x35f5   :  { %v5667_v59 = vpop.f32.mrb[88].mxu0 }
0x35f6   :  { %5672 = vrot.lane.b32.xlu0 %v5667_v59, %s10087_s11  ;;  %v9281_v36 = vpop.f32.mrb[89].mxu0  ;;  %v9758_v59 = vld [vmem:[%s11579_s15 + $0x60] sm:$0xff]  }
0x35f7   :  { %v9759_v36 = vld [vmem:[%s11579_s15 + $0xe0] sm:$0xff]  }
0x35fa   :  { %5683 = vrot.lane.b32.xlu0 %v11144_v61, %s10081_s30 }
0x3668   :  { %v5673_v15 = vpop.permute.xlu0 %5672 }
0x3669   :  { %v5675_v33 = vsel %vm2483_vm3, %v5494_v22, %v5673_v15  ;;  %v9756_v22 = vld [vmem:[%s11579_s15 + $0x18] sm:$0xff]   ;;  %v9760_v15 = vld [vmem:[%s11579_s15 + $0x20] sm:$0xff]  }
0x366a   :  { %v5676_v50 = vpack.c.bf16 %v5675_v33, %v5675_v33  ;;  %v9761_v33 = vld [vmem:[%s11579_s15 + $0xa0] sm:$0xff]  }
0x366c   :  { %9287 = vmatmul.mubr.msk.bf16.vlgmr.msra.gmra.mrb[92].mxu1 %vm296_vm2, %v5676_v50  ;;  %v5684_v12 = vpop.permute.xlu0 %5683  ;;  %v9762_v50 = vld [vmem:[%s11579_s15 + $0x68] sm:$0xff]  }
0x366d   :  { %5900 = vmatprep.mubr.bf16.mxu1 %v10088_v53  ;;  %5869 = vmatpush1.bf16.msra.mxu1 %v9733_v31 }
0x366e   :  { %5870 = vmatprep.subr.bf16.mxu1 %v9741_v32 }
0x3671   :  { %5871 = vmatpush1.bf16.msra.mxu1 %v9739_v8 }
0x3672   :  { %8811 = vmatprep.subr.bf16.mxu1 %v9743_v3 }
0x373f   :  { %v5723_v18 = vpop.f32.mrb[92].mxu1 }
0x3740   :  { %v5724_v17 = vadd.f32 %v5723_v18, %v5684_v12  ;;  %v9288_v1 = vpop.f32.mrb[93].mxu1  ;;  %v9763_v12 = vld [vmem:[%s11579_s15 + $0xe8] sm:$0xff]  }
0x3741   :  { %v5726_v55 = vpop.f32.mrb[94].mxu1  ;;  %v9764_v18 = vld [vmem:[%s11579_s15 + $0x28] sm:$0xff]   ;;  %v9766_v1 = vld [vmem:[%s11579_s15 + $0x70] sm:$0xff]  }
0x3742   :  { %v5729_v20 = vadd.f32 %v5724_v17, %v11163_v41  ;;  %v9289_v61 = vpop.f32.mrb[95].mxu1  ;;  %v9730_v41 = vld [vmem:[%s11578_s5] ss:$16 sps:$4 sm:$0xff]   ;;  %v9765_v17 = vld [vmem:[%s11579_s15 + $0xa8] sm:$0xff]  }
0x3743   :  { %5828 = vmatpush1.bf16.msra.mxu0 %v9730_v41  ;;  %v9767_v55 = vld [vmem:[%s11579_s15 + $0xf0] sm:$0xff]  }
0x3744   :  { %v5730_v19 = vsel %vm1256_vm1, %v5729_v20, 0.0  ;;  %5829 = vmatprep.subr.bf16.mxu0 %v9738_v28  ;;  %v9769_v61 = vld [vmem:[%s11579_s15 + $0xb0] sm:$0xff]  }
0x3745   :  { %5731 = vadd.xlane.f32.xlu1 %v5730_v19  ;;  %v9770_v19 = vld [vmem:[%s11579_s15 + $0x78] sm:$0xff]  }
0x3747   :  { %5830 = vmatpush1.bf16.msra.mxu0 %v9736_v6 }
0x3748   :  { %8789 = vmatprep.subr.bf16.mxu0 %v9742_v57 }
0x37d2   :  { %v5732_v21 = vpop.xlane.xlu1 %5731 }
0x37d3   :  { %v5733_v0 = vmul.f32 0.03125, %v5732_v21  ;;  %v9771_v21 = vld [vmem:[%s11579_s15 + $0xf8] sm:$0xff]  }
0x37d5   :  { %v5734_v7 = vsub.f32 %v5729_v20, %v5733_v0  ;;  %v9768_v20 = vld [vmem:[%s11579_s15 + $0x30] sm:$0xff]   ;;  %v9772_v0 = vld [vmem:[%s11579_s15 + $0x38] sm:$0xff]  }
0x37d7   :  { %v5735_v23 = vmul.f32 %v5734_v7, %v5734_v7 }
0x37d9   :  { %v5736_v25 = vsel %vm1256_vm1, %v5735_v23, 0.0  ;;  %v5762_v23 = vld [vmem:[%s11580_s16] sm:$0xf] }
0x37da   :  { %5737 = vadd.xlane.f32.xlu0 %v5736_v25  ;;  %v5767_v25 = vrot.slane %v5762_v23, %v10363_v42  ;;  %v5775_v26 = vrot.slane %v5762_v23, %v10874_v16  ;;  %v5771_v11 = vrot.slane %v5762_v23, %v10647_v58  ;;  %v5779_v41 = vrot.slane %v5762_v23, %v10878_v48 }
0x3867   :  { %v5738_v45 = vpop.xlane.xlu0 %5737 }
0x3868   :  { %v5739_v44 = vmul.f32 0.03125, %v5738_v45 }
0x386a   :  { %v5740_v24 = vadd.f32 1e-05, %v5739_v44 }
0x386c   :  { %9922 = vrsqrt.f32 %v5740_v24 }
0x3876   :  { %v9923_v38 = vpop.eup %9922 }
0x3877   :  { %v5742_v43 = vmul.f32 %v9923_v38, %v5734_v7  ;;  %v9773_v7 = vld [vmem:[%s11579_s15 + $0xb8] sm:$0xff]  }
0x3879   :  { %v5747_v51 = vmul.f32 %v5746_v37, %v5742_v43 }
0x387b   :  { %v11231_v34 = vadd.f32 %v5751_v14, %v5747_v51 }
0x387d   :  { %v5761_v60 = vpack.c.bf16 %v11231_v34, %v11231_v34 }
0x387f   :  { %8350 = vmatmul.mubr.msk.bf16.vlgmr.msra.gmra.mrb[92].mxu0 %vm296_vm2, %v5761_v60  ;;  %8351 = vmatmul.mubr.msk.bf16.vlgmr.msra.gmra.mrb[96].mxu1 %vm296_vm2, %v5761_v60 }
0x3880   :  { %8790 = vmatpush3.bf16.msra.mxu0 %v9744_v52  ;;  %8812 = vmatpush3.bf16.msra.mxu1 %v9745_v56 }
0x3881   :  { %8791 = vmatprep.subr.bf16.mxu0 %v9746_v30  ;;  %8813 = vmatprep.subr.bf16.mxu1 %v9747_v62 }
0x3884   :  { %8792 = vmatpush3.bf16.msra.mxu0 %v9748_v47  ;;  %8814 = vmatpush3.bf16.msra.mxu1 %v9749_v29 }
0x3885   :  { %8793 = vmatprep.subr.bf16.mxu0 %v9750_v63  ;;  %8815 = vmatprep.subr.bf16.mxu1 %v9751_v4  ;;  %v8352_v63 = vld [vmem:[%s11581_s18] ss:$0 sm:$0xff] }
0x3888   :  { %8794 = vmatpush3.bf16.msra.mxu0 %v9752_v49  ;;  %8816 = vmatpush3.bf16.msra.mxu1 %v9753_v9 }
0x3889   :  { %8795 = vmatprep.subr.bf16.mxu0 %v9754_v54  ;;  %8817 = vmatprep.subr.bf16.mxu1 %v9755_v10 }
0x388c   :  { %8796 = vmatpush3.bf16.msra.mxu0 %v9756_v22  ;;  %8818 = vmatpush3.bf16.msra.mxu1 %v9757_v27 }
0x388d   :  { %8797 = vmatprep.subr.bf16.mxu0 %v9758_v59  ;;  %8819 = vmatprep.subr.bf16.mxu1 %v9759_v36 }
0x3890   :  { %8798 = vmatpush3.bf16.msra.mxu0 %v9760_v15  ;;  %8820 = vmatpush3.bf16.msra.mxu1 %v9761_v33 }
0x3891   :  { %8799 = vmatprep.subr.bf16.mxu0 %v9762_v50  ;;  %8821 = vmatprep.subr.bf16.mxu1 %v9763_v12 }
0x3894   :  { %8800 = vmatpush3.bf16.msra.mxu0 %v9764_v18  ;;  %8822 = vmatpush3.bf16.msra.mxu1 %v9765_v17 }
0x3895   :  { %8801 = vmatprep.subr.bf16.mxu0 %v9766_v1  ;;  %8823 = vmatprep.subr.bf16.mxu1 %v9767_v55 }
0x3898   :  { %8802 = vmatpush3.bf16.msra.mxu0 %v9768_v20  ;;  %8824 = vmatpush3.bf16.msra.mxu1 %v9769_v61  ;;  %v9774_v20 = vld [vmem:[%s11573_s12 + $0x10] sm:$0xff]   ;;  %v11284_v61 = vld [vmem:[%s11573_s12 + $0x18] sm:$0xff]  }
0x3899   :  { %8803 = vmatprep.subr.bf16.mxu0 %v9770_v19  ;;  %8825 = vmatprep.subr.bf16.mxu1 %v9771_v21 }
0x389c   :  { %8804 = vmatpush3.bf16.msra.mxu0 %v9772_v0  ;;  %8826 = vmatpush3.bf16.msra.mxu1 %v9773_v7  ;;  %v6276_v0 = vsub.s32 4, %v10356_v39  ;;  %v6281_v7 = vsub.s32 5, %v10356_v39 }
0x389d   :  { %9290 = vmatprep.subr.bf16.mxu0 %v10077_v2  ;;  %9298 = vmatprep.subr.mxu1 %v10077_v2 }
0x389e   :  { %v6277_v23 = vrot.slane %v11152_v40, %v6276_v0 }
0x3952   :  { %v5861_v31 = vpop.f32.mrb[92].mxu0  ;;  %v5902_v6 = vpop.f32.mrb[96].mxu1 }
0x3953   :  { %v5862_v28 = vadd.f32 %v5861_v31, %v5767_v25  ;;  %v5903_v8 = vadd.f32 %v5902_v6, %v5775_v26  ;;  %v5863_v32 = vpop.f32.mrb[93].mxu0  ;;  %v5904_v57 = vpop.f32.mrb[97].mxu1 }
0x3954   :  { %v5864_v3 = vadd.f32 %v5863_v32, %v5771_v11  ;;  %v5905_v45 = vadd.f32 %v5904_v57, %v5779_v41  ;;  %v5865_v44 = vpop.f32.mrb[94].mxu0  ;;  %v5906_v24 = vpop.f32.mrb[98].mxu1  ;;  %v6282_v11 = vrot.slane %v11152_v40, %v6281_v7 }
0x3955   :  { %v5909_v37 = vmax.f32 %v5862_v28, 0.0  ;;  %v5911_v38 = vmax.f32 %v5903_v8, 0.0  ;;  %v5866_v43 = vpop.f32.mrb[95].mxu0  ;;  %v5907_v14 = vpop.f32.mrb[99].mxu1  ;;  %v11305_v28 = vld [vmem:[%s11574_s20 + $0x1] ss:$0 sm:$0xff] }
0x3956   :  { %v5910_v51 = vmax.f32 %v5864_v3, 0.0  ;;  %v5912_v52 = vmax.f32 %v5905_v45, 0.0 }
0x3957   :  { %v5977_v30 = vpack.c.bf16 %v5909_v37, %v5909_v37  ;;  %v5979_v62 = vpack.c.bf16 %v5911_v38, %v5911_v38 }
0x3958   :  { %v5978_v56 = vpack.c.bf16 %v5910_v51, %v5910_v51  ;;  %v5980_v60 = vpack.c.bf16 %v5912_v52, %v5912_v52 }
0x395a   :  { %6212 = vmatprep.mubr.bf16.mxu0 %v5978_v56  ;;  %6252 = vmatprep.mubr.bf16.mxu1 %v5980_v60 }
0x395b   :  { %6213 = vmatmul.mubr.bf16.vlgmr.msra.gmra.mrb[96].mxu0 %v5977_v30  ;;  %6253 = vmatmul.mubr.bf16.vlgmr.msra.gmra.mrb[100].mxu1 %v5979_v62 }
0x395c   :  { %9294 = vmatprep.mubr.msk.bf16.mxu0 %vm10078_vm0, %v10077_v2  ;;  %9300 = vmatprep.mubr.msk.f32.mxu1 %vm10078_vm0, %v10077_v2 }
0x395d   :  { %9291 = vmatpush3.bf16.msra.mxu0 %v9774_v20 }
0x395e   :  { %9292 = vmatprep.subr.bf16.mxu0 %v10077_v2 }
0x3961   :  { %9293 = vmatpush3.bf16.msra.mxu0 %v11284_v61 }
0x3962   :  { %9303 = vmatprep.subr.mxu0 %v10077_v2 }
0x3a2e   :  { %v8805_v47 = vpop.f32.mrb[96].mxu0  ;;  %v8827_v29 = vpop.f32.mrb[100].mxu1 }
0x3a2f   :  { %v8806_v4 = vpop.f32.mrb[97].mxu0  ;;  %v8828_v49 = vpop.f32.mrb[101].mxu1 }
0x3a30   :  { %v8807_v9 = vadd.f32 %v8806_v4, %v8805_v47  ;;  %v8829_v54 = vadd.f32 %v8828_v49, %v8827_v29  ;;  %v8808_v10 = vpop.f32.mrb[98].mxu0  ;;  %v8830_v22 = vpop.f32.mrb[102].mxu1 }
0x3a31   :  { %v8809_v27 = vpop.f32.mrb[99].mxu0  ;;  %v8831_v59 = vpop.f32.mrb[103].mxu1 }
0x3a32   :  { %v6215_v36 = vadd.f32 %v8807_v9, %v8352_v63 }
0x3a34   :  { %v6255_v15 = vadd.f32 %v8829_v54, %v6215_v36 }
0x3a36   :  { %v6260_v33 = vadd.f32 %v6255_v15, %v11231_v34 }
0x3a38   :  { %v6261_v50 = vsel %vm1256_vm1, %v6260_v33, 0.0 }
0x3a39   :  { %6262 = vadd.xlane.f32.xlu0 %v6261_v50 }
0x3ac6   :  { %v6263_v12 = vpop.xlane.xlu0 %6262 }
0x3ac7   :  { %v6264_v18 = vmul.f32 0.03125, %v6263_v12 }
0x3ac9   :  { %v6265_v17 = vsub.f32 %v6260_v33, %v6264_v18 }
0x3acb   :  { %v6266_v1 = vmul.f32 %v6265_v17, %v6265_v17 }
0x3acd   :  { %v6267_v55 = vsel %vm1256_vm1, %v6266_v1, 0.0 }
0x3ace   :  { %6268 = vadd.xlane.f32.xlu1 %v6267_v55 }
0x3b5b   :  { %v6269_v34 = vpop.xlane.xlu1 %6268 }
0x3b5c   :  { %v6270_v19 = vmul.f32 0.03125, %v6269_v34 }
0x3b5e   :  { %v6271_v21 = vadd.f32 1e-05, %v6270_v19 }
0x3b60   :  { %9924 = vrsqrt.f32 %v6271_v21 }
0x3b6a   :  { %v9925_v25 = vpop.eup %9924 }
0x3b6b   :  { %v6273_v26 = vmul.f32 %v9925_v25, %v6265_v17 }
0x3b6d   :  { %v6278_v41 = vmul.f32 %v6277_v23, %v6273_v26 }
0x3b6f   :  { %v11297_v31 = vadd.f32 %v6282_v11, %v6278_v41 }
0x3b71   :  { %v6293_v6 = vpack.c.bf16 %v11297_v31, %v11297_v31 }
0x3b73   :  { %9295 = vmatmul.mubr.msk.bf16.vlgmr.msra.gmra.mrb[100].mxu0 %vm296_vm2, %v6293_v6 }
0x3b74   :  { %9305 = vmatprep.mubr.msk.f32.mxu0 %vm10078_vm0, %v10077_v2 }
0x3c46   :  { %v6349_v8 = vpop.f32.mrb[100].mxu0 }
0x3c47   :  { %v6350_v32 = vadd.f32 %v11305_v28, %v6349_v8  ;;  %v9296_v57 = vpop.f32.mrb[101].mxu0  ;;  %v11352_v8 = vld [vmem:[%s11575_s27 + $0x10] sm:$0xff]  }
0x3c48   :  { %v6352_v3 = vpop.f32.mrb[102].mxu0 }
0x3c49   :  { %6524 = vrot.lane.b32.xlu1 %v6350_v32, %s10084_s2  ;;  %6357 = vrot.lane.b32.xlu0 %v6350_v32, %s10080_s21  ;;  %v9297_v40 = vpop.f32.mrb[103].mxu0  ;;  %v6355_v45 = vmul.f32 0.25, %v6350_v32 }
0x3c4d   :  { %6522 = vrot.lane.b32.xlu1 %v6355_v45, %s10085_s7 }
0x3cbb   :  { %v6358_v44 = vpop.permute.xlu0 %6357  ;;  %v6525_v24 = vpop.permute.xlu1 %6524 }
0x3cbc   :  { %9299 = vmatpush3.xpose.msk.msra.mxu1 %vm2483_vm3, %v6358_v44 }
0x3cbd   :  { %9308 = vmatprep.subr.mxu1 %v10077_v2 }
0x3cbf   :  { %9301 = vmatmul.mubr.msk.f32.vlgmr.msra.gmra.mrb[90].mxu1 %vm2483_vm3, %v6355_v45  ;;  %v6523_v37 = vpop.permute.xlu1 %6522 }
0x3cc0   :  { %9309 = vmatpush3.xpose.msk.msra.mxu1 %vm2483_vm3, %v6525_v24  ;;  %9310 = vmatprep.mubr.msk.f32.mxu1 %vm10078_vm0, %v10077_v2  ;;  %v11368_v24 = vld [vmem:[%s11576_s8 + $0x1] ss:$0 sm:$0xff] }
0x3cc1   :  { %9318 = vmatprep.subr.bf16.mxu1 %v10077_v2 }
0x3cc3   :  { %9311 = vmatmul.mubr.msk.f32.vlgmr.msra.gmra.mrb[104].mxu1 %vm2483_vm3, %v6523_v37 }
0x3cc4   :  { %9322 = vmatprep.mubr.msk.bf16.mxu1 %vm10078_vm0, %v10077_v2 }
0x3d92   :  { %v6430_v38 = vpop.f32.mrb[90].mxu1 }
0x3d93   :  { %v9302_v43 = vpop.f32.mrb[91].mxu1  ;;  %v6434_v14 = vsel %vm1112_vm11, %v6430_v38, -inf }
0x3d94   :  { %6435 = vmax.xlane.f32.xlu0 %v6434_v14 }
0x3d96   :  { %v6596_v51 = vpop.f32.mrb[104].mxu1 }
0x3d97   :  { %v9312_v52 = vpop.f32.mrb[105].mxu1  ;;  %v6600_v56 = vsel %vm1112_vm11, %v6596_v51, -inf }
0x3d98   :  { %6601 = vmax.xlane.f32.xlu1 %v6600_v56 }
0x3da9   :  { %6445 = vrot.lane.b32.xlu1 %v6350_v32, %s10079_s17 }
0x3dad   :  { %6694 = vrot.lane.b32.xlu1 %v9774_v20, %s10081_s30 }
0x3e21   :  { %v6436_v60 = vpop.xlane.xlu0 %6435 }
0x3e22   :  { %v6437_v30 = vsub.f32 %v6430_v38, %v6436_v60 }
0x3e24   :  { %v6438_v62 = vmul.f32 1.442695, %v6437_v30 }
0x3e25   :  { %v6602_v47 = vpop.xlane.xlu1 %6601 }
0x3e26   :  { %9926 = vpow2.f32 %v6438_v62  ;;  %v6603_v29 = vsub.f32 %v6596_v51, %v6602_v47  ;;  %v11378_v51 = vld [vmem:[%s11577_s9 + $0x8] sm:$0x3f] }
0x3e27   :  { %v6763_v52 = vrot.slane %v11378_v51, %v10363_v42  ;;  %v6768_v30 = vrot.slane %v11378_v51, %v10647_v58 }
0x3e28   :  { %v6604_v63 = vmul.f32 1.442695, %v6603_v29 }
0x3e29   :  { %v6446_v4 = vpop.permute.xlu1 %6445 }
0x3e2a   :  { %9928 = vpow2.f32 %v6604_v63  ;;  %9304 = vmatpush3.msk.msra.mxu0 %vm1130_vm14, %v6446_v4 }
0x3e2b   :  { %9313 = vmatprep.subr.mxu0 %v10077_v2 }
0x3e2d   :  { %v6695_v12 = vpop.permute.xlu1 %6694 }
0x3e2e   :  { %9319 = vmatpush3.bf16.msra.mxu1 %v6695_v12 }
0x3e2f   :  { %9320 = vmatprep.subr.bf16.mxu1 %v10077_v2 }
0x3e30   :  { %v9927_v49 = vpop.eup %9926 }
0x3e31   :  { %v6440_v9 = vsel %vm1112_vm11, %v9927_v49, 0.0 }
0x3e32   :  { %6441 = vadd.xlane.f32.xlu0 %v6440_v9 }
0x3e34   :  { %v9929_v54 = vpop.eup %9928 }
0x3e35   :  { %v6606_v10 = vsel %vm1112_vm11, %v9929_v54, 0.0 }
0x3e36   :  { %6607 = vadd.xlane.f32.xlu0 %v6606_v10 }
0x3e4c   :  { %6611 = vrot.lane.b32.xlu0 %v6350_v32, %s10086_s10  ;;  %v11359_v32 = vld [vmem:[%s11575_s27 + $0x18] sm:$0xff]  }
0x3e50   :  { %6696 = vrot.lane.b32.xlu0 %v11284_v61, %s10081_s30 }
0x3ebf   :  { %v6442_v22 = vpop.xlane.xlu0 %6441 }
0x3ec0   :  { %9930 = vrcp.f32 %v6442_v22 }
0x3ec3   :  { %v6608_v27 = vpop.xlane.xlu0 %6607 }
0x3ec4   :  { %9932 = vrcp.f32 %v6608_v27 }
0x3ec7   :  { %v6612_v15 = vpop.permute.xlu0 %6611 }
0x3eca   :  { %v9931_v59 = vpop.eup %9930 }
0x3ecb   :  { %v6444_v36 = vmul.f32 %v9931_v59, %v9927_v49  ;;  %v6697_v18 = vpop.permute.xlu0 %6696 }
0x3ecc   :  { %9321 = vmatpush3.bf16.msra.mxu1 %v6697_v18 }
0x3ecd   :  { %9306 = vmatmul.mubr.msk.f32.vlgmr.msra.gmra.mrb[90].mxu0 %vm1126_vm12, %v6444_v36  ;;  %9334 = vmatprep.subr.bf16.mxu1 %v10077_v2 }
0x3ece   :  { %v9933_v33 = vpop.eup %9932  ;;  %9314 = vmatpush3.msk.msra.mxu0 %vm1130_vm14, %v6612_v15  ;;  %9315 = vmatprep.mubr.msk.f32.mxu0 %vm10078_vm0, %v10077_v2 }
0x3ecf   :  { %v6610_v50 = vmul.f32 %v9933_v33, %v9929_v54  ;;  %9326 = vmatprep.subr.bf16.mxu0 %v10077_v2 }
0x3ed1   :  { %9316 = vmatmul.mubr.msk.f32.vlgmr.msra.gmra.mrb[104].mxu0 %vm1126_vm12, %v6610_v50 }
0x3ed2   :  { %9330 = vmatprep.mubr.msk.bf16.mxu0 %vm10078_vm0, %v10077_v2  ;;  %9327 = vmatpush3.bf16.msra.mxu0 %v11352_v8 }
0x3ed3   :  { %9328 = vmatprep.subr.bf16.mxu0 %v10077_v2 }
0x3ed6   :  { %9329 = vmatpush3.bf16.msra.mxu0 %v11359_v32 }
0x3ed7   :  { %9463 = vmatprep.subr.bf16.mxu0 %v10082_v46 }
0x3fa0   :  { %v6518_v17 = vpop.f32.mrb[90].mxu0 }
0x3fa1   :  { %v9307_v1 = vpop.f32.mrb[91].mxu0 }
0x3fa4   :  { %v6684_v55 = vpop.f32.mrb[104].mxu0 }
0x3fa5   :  { %6689 = vrot.lane.b32.xlu1 %v6684_v55, %s10087_s11  ;;  %v9317_v20 = vpop.f32.mrb[105].mxu0 }
0x3fa9   :  { %6700 = vrot.lane.b32.xlu1 %v11305_v28, %s10081_s30 }
0x4017   :  { %v6690_v61 = vpop.permute.xlu1 %6689 }
0x4018   :  { %v6692_v34 = vsel %vm2483_vm3, %v6518_v17, %v6690_v61 }
0x4019   :  { %v6693_v19 = vpack.c.bf16 %v6692_v34, %v6692_v34 }
0x401b   :  { %9323 = vmatmul.mubr.msk.bf16.vlgmr.msra.gmra.mrb[108].mxu1 %vm296_vm2, %v6693_v19  ;;  %v6701_v21 = vpop.permute.xlu1 %6700 }
0x401c   :  { %9338 = vmatprep.mubr.msk.bf16.mxu1 %vm10078_vm0, %v10077_v2 }
0x40ee   :  { %v6740_v23 = vpop.f32.mrb[108].mxu1 }
0x40ef   :  { %v6741_v25 = vadd.f32 %v6740_v23, %v6701_v21  ;;  %v9324_v26 = vpop.f32.mrb[109].mxu1 }
0x40f0   :  { %v6743_v11 = vpop.f32.mrb[110].mxu1 }
0x40f1   :  { %v6746_v41 = vadd.f32 %v6741_v25, %v11297_v31  ;;  %v9325_v6 = vpop.f32.mrb[111].mxu1 }
0x40f3   :  { %v6747_v28 = vsel %vm1256_vm1, %v6746_v41, 0.0 }
0x40f4   :  { %6748 = vadd.xlane.f32.xlu0 %v6747_v28 }
0x410a   :  { %6839 = vrot.lane.b32.xlu0 %v11352_v8, %s10080_s21 }
0x410e   :  { %6845 = vrot.lane.b32.xlu0 %v11368_v24, %s10080_s21 }
0x4181   :  { %v6749_v31 = vpop.xlane.xlu0 %6748 }
0x4182   :  { %v6750_v57 = vmul.f32 0.03125, %v6749_v31 }
0x4184   :  { %v6751_v3 = vsub.f32 %v6746_v41, %v6750_v57 }
0x4185   :  { %v6840_v44 = vpop.permute.xlu0 %6839 }
0x4186   :  { %v6752_v40 = vmul.f32 %v6751_v3, %v6751_v3  ;;  %9335 = vmatpush3.bf16.msra.mxu1 %v6840_v44 }
0x4187   :  { %9336 = vmatprep.subr.bf16.mxu1 %v10077_v2 }
0x4188   :  { %v6753_v45 = vsel %vm1256_vm1, %v6752_v40, 0.0 }
0x4189   :  { %6754 = vadd.xlane.f32.xlu1 %v6753_v45  ;;  %v6846_v63 = vpop.permute.xlu0 %6845 }
0x419a   :  { %6841 = vrot.lane.b32.xlu1 %v11359_v32, %s10080_s21 }
0x4216   :  { %v6755_v37 = vpop.xlane.xlu1 %6754 }
0x4217   :  { %v6756_v38 = vmul.f32 0.03125, %v6755_v37 }
0x4219   :  { %v6757_v43 = vadd.f32 1e-05, %v6756_v38 }
0x421a   :  { %v6842_v14 = vpop.permute.xlu1 %6841 }
0x421b   :  { %9934 = vrsqrt.f32 %v6757_v43  ;;  %9337 = vmatpush3.bf16.msra.mxu1 %v6842_v14 }
0x421c   :  { %9471 = vmatprep.subr.bf16.mxu1 %v10082_v46 }
0x421e   :  { %9339 = vmatmul.mubr.msk.bf16.vlgmr.msra.gmra.mrb[112].mxu1 %vm296_vm2, %v11159_v5 }
0x421f   :  { %9360 = vmatprep.mubr.msk.f32.mxu1 %vm10078_vm0, %v10077_v2 }
0x4225   :  { %v9935_v56 = vpop.eup %9934 }
0x4226   :  { %v6759_v60 = vmul.f32 %v9935_v56, %v6751_v3 }
0x4228   :  { %v6764_v62 = vmul.f32 %v6763_v52, %v6759_v60 }
0x422a   :  { %v11384_v47 = vadd.f32 %v6768_v30, %v6764_v62 }
0x422c   :  { %v6777_v29 = vpack.c.bf16 %v11384_v47, %v11384_v47 }
0x422e   :  { %9331 = vmatmul.mubr.msk.bf16.vlgmr.msra.gmra.mrb[108].mxu0 %vm296_vm2, %v6777_v29 }
0x422f   :  { %9346 = vmatprep.mubr.msk.f32.mxu0 %vm10078_vm0, %v10077_v2 }
0x42f1   :  { %v6882_v5 = vpop.f32.mrb[112].mxu1 }
0x42f2   :  { %v9340_v4 = vpop.f32.mrb[113].mxu1  ;;  %v6883_v9 = vadd.f32 %v6882_v5, %v6846_v63 }
0x42f3   :  { %v6885_v49 = vpop.f32.mrb[114].mxu1 }
0x42f4   :  { %v6886_v54 = vadd.f32 %v6885_v49, %v6846_v63  ;;  %v9341_v10 = vpop.f32.mrb[115].mxu1 }
0x42f6   :  { %v9464_v22 = vpack.c.bf16 %v6886_v54, %v6883_v9  ;;  %v9606_v27 = vpack.i.bf16 %v6886_v54, %v6883_v9 }
0x42f8   :  { %9607 = vrot.lane.b32.xlu1 %v9606_v27, %s10085_s7  ;;  %9466 = vmatpush3.bf16.xpose.msk.msra.mxu0 %vm10756_vm13, %v9464_v22 }
0x42f9   :  { %9467 = vmatprep.subr.bf16.mxu0 %v10082_v46 }
0x4301   :  { %v6833_v59 = vpop.f32.mrb[108].mxu0 }
0x4302   :  { %v6834_v36 = vadd.f32 %v11368_v24, %v6833_v59  ;;  %v9332_v15 = vpop.f32.mrb[109].mxu0 }
0x4303   :  { %v6836_v33 = vpop.f32.mrb[110].mxu0 }
0x4304   :  { %v6889_v50 = vmul.f32 0.25, %v6834_v36  ;;  %v9333_v12 = vpop.f32.mrb[111].mxu0 }
0x4306   :  { %7060 = vrot.lane.b32.xlu0 %v6889_v50, %s10085_s7  ;;  %9347 = vmatmul.mubr.msk.f32.vlgmr.msra.gmra.mrb[106].mxu0 %vm2483_vm3, %v6889_v50 }
0x4307   :  { %9353 = vmatprep.mubr.msk.f32.mxu0 %vm10078_vm0, %v10077_v2 }
0x436a   :  { %v9608_v18 = vpop.permute.xlu1 %9607 }
0x436b   :  { %v9610_v17 = vunpack.i.h.bf16 %v9608_v18  ;;  %v9609_v1 = vunpack.i.l.bf16 %v9608_v18 }
0x436d   :  { %v9472_v55 = vpack.c.bf16 %v9610_v17, %v9609_v1 }
0x436f   :  { %9474 = vmatpush3.bf16.xpose.msk.msra.mxu1 %vm10756_vm13, %v9472_v55 }
0x4370   :  { %9370 = vmatprep.subr.bf16.mxu1 %v10077_v2 }
0x4378   :  { %v7061_v20 = vpop.permute.xlu0 %7060 }
0x4379   :  { %9361 = vmatmul.mubr.msk.f32.vlgmr.msra.gmra.mrb[106].mxu1 %vm2483_vm3, %v7061_v20  ;;  %v9780_v20 = vld [vmem:[%s11578_s5 + $0x44] ss:$16 sps:$4 sm:$0xff]  }
0x437a   :  { %9374 = vmatprep.mubr.msk.bf16.mxu1 %vm10078_vm0, %v10077_v2 }
0x43d9   :  { %v6965_v61 = vpop.f32.mrb[106].mxu0 }
0x43da   :  { %v9348_v34 = vpop.f32.mrb[107].mxu0  ;;  %v6969_v19 = vsel %vm5406_vm4, %v6965_v61, -inf }
0x43db   :  { %6970 = vmax.xlane.f32.xlu1 %v6969_v19  ;;  %v9781_v34 = vld [vmem:[%s11578_s5 + $0x48] ss:$16 sps:$4 sm:$0xff]   ;;  %v9784_v19 = vld [vmem:[%s11578_s5 + $0x60] ss:$16 sps:$4 sm:$0xff]  }
0x444c   :  { %v7138_v21 = vpop.f32.mrb[106].mxu1 }
0x444d   :  { %v9362_v23 = vpop.f32.mrb[107].mxu1  ;;  %v7142_v25 = vsel %vm5406_vm4, %v7138_v21, -inf }
0x444e   :  { %7143 = vmax.xlane.f32.xlu0 %v7142_v25  ;;  %v9787_v23 = vld [vmem:[%s11578_s5 + $0x68] ss:$16 sps:$4 sm:$0xff]   ;;  %v9789_v25 = vld [vmem:[%s11578_s5 + $0x6c] ss:$16 sps:$4 sm:$0xff]  }
0x4468   :  { %v6971_v35 = vpop.xlane.xlu1 %6970 }
0x4469   :  { %v6972_v26 = vsub.f32 %v6965_v61, %v6971_v35  ;;  %v9783_v61 = vld [vmem:[%s11578_s5 + $0x4c] ss:$16 sps:$4 sm:$0xff]   ;;  %v9790_v35 = vld [vmem:[%s11579_s15 + $0x140] sm:$0xff]  }
0x446b   :  { %v6973_v11 = vmul.f32 1.442695, %v6972_v26  ;;  %v9791_v26 = vld [vmem:[%s11579_s15 + $0x1c0] sm:$0xff]  }
0x446d   :  { %9936 = vpow2.f32 %v6973_v11 }
0x4477   :  { %v9937_v41 = vpop.eup %9936 }
0x4478   :  { %v6975_v6 = vsel %vm5406_vm4, %v9937_v41, 0.0 }
0x4479   :  { %6976 = vadd.xlane.f32.xlu0 %v6975_v6 }
0x448f   :  { %9612 = vrot.lane.b32.xlu0 %v9606_v27, %s10080_s21 }
0x44db   :  { %v7144_v28 = vpop.xlane.xlu0 %7143 }
0x44dc   :  { %v7145_v31 = vsub.f32 %v7138_v21, %v7144_v28  ;;  %v9786_v21 = vld [vmem:[%s11578_s5 + $0x64] ss:$16 sps:$4 sm:$0xff]   ;;  %v7308_v28 = vrot.slane %v11378_v51, %v10874_v16 }
0x44de   :  { %v7146_v57 = vmul.f32 1.442695, %v7145_v31 }
0x44e0   :  { %9938 = vpow2.f32 %v7146_v57 }
0x44ea   :  { %v9939_v3 = vpop.eup %9938 }
0x44eb   :  { %v7148_v40 = vsel %vm5406_vm4, %v9939_v3, 0.0 }
0x44ec   :  { %7149 = vadd.xlane.f32.xlu1 %v7148_v40 }
0x44fd   :  { %9617 = vrot.lane.b32.xlu1 %v9606_v27, %s10084_s2 }
0x4501   :  { %7239 = vrot.lane.b32.xlu1 %v11352_v8, %s10081_s30 }
0x4505   :  { %7241 = vrot.lane.b32.xlu1 %v11359_v32, %s10081_s30 }
0x4506   :  { %v6977_v45 = vpop.xlane.xlu0 %6976 }
0x4507   :  { %9940 = vrcp.f32 %v6977_v45 }
0x450a   :  { %v9613_v44 = vpop.permute.xlu0 %9612 }
0x450b   :  { %v9615_v37 = vunpack.i.h.bf16 %v9613_v44  ;;  %v9614_v38 = vunpack.i.l.bf16 %v9613_v44  ;;  %v9792_v44 = vld [vmem:[%s11579_s15 + $0x100] sm:$0xff]  }
0x450d   :  { %v9468_v43 = vpack.c.bf16 %v9615_v37, %v9614_v38  ;;  %v9793_v37 = vld [vmem:[%s11579_s15 + $0x180] sm:$0xff]  }
0x450f   :  { %9470 = vmatpush3.bf16.msk.msra.mxu0 %vm10680_vm6, %v9468_v43  ;;  %v9794_v43 = vld [vmem:[%s11579_s15 + $0x148] sm:$0xff]  }
0x4510   :  { %9475 = vmatprep.subr.bf16.mxu0 %v10082_v46 }
0x4511   :  { %v9941_v14 = vpop.eup %9940 }
0x4512   :  { %v6979_v52 = vmul.f32 %v9941_v14, %v9937_v41  ;;  %v9795_v14 = vld [vmem:[%s11579_s15 + $0x1c8] sm:$0xff]  }
0x4514   :  { %9354 = vmatmul.mubr.msk.f32.vlgmr.msra.gmra.mrb[112].mxu0 %vm2030_vm9, %v6979_v52  ;;  %v9796_v52 = vld [vmem:[%s11579_s15 + $0x108] sm:$0xff]  }
0x4515   :  { %9367 = vmatprep.mubr.msk.f32.mxu0 %vm10078_vm0, %v10077_v2 }
0x4579   :  { %v7150_v8 = vpop.xlane.xlu1 %7149 }
0x457a   :  { %9942 = vrcp.f32 %v7150_v8  ;;  %v9797_v8 = vld [vmem:[%s11579_s15 + $0x188] sm:$0xff]  }
0x457d   :  { %v9618_v32 = vpop.permute.xlu1 %9617 }
0x457e   :  { %v9620_v56 = vunpack.i.h.bf16 %v9618_v32  ;;  %v9619_v60 = vunpack.i.l.bf16 %v9618_v32  ;;  %v9798_v32 = vld [vmem:[%s11579_s15 + $0x150] sm:$0xff]  }
0x4580   :  { %v9476_v30 = vpack.c.bf16 %v9620_v56, %v9619_v60  ;;  %v9799_v56 = vld [vmem:[%s11579_s15 + $0x1d0] sm:$0xff]  }
0x4581   :  { %v7240_v5 = vpop.permute.xlu1 %7239  ;;  %v9800_v60 = vld [vmem:[%s11579_s15 + $0x110] sm:$0xff]  }
0x4582   :  { %9478 = vmatpush3.bf16.msk.msra.mxu0 %vm10680_vm6, %v9476_v30  ;;  %9371 = vmatpush3.bf16.msra.mxu1 %v7240_v5  ;;  %v9801_v30 = vld [vmem:[%s11579_s15 + $0x190] sm:$0xff]   ;;  %v9804_v5 = vld [vmem:[%s11579_s15 + $0x118] sm:$0xff]  }
0x4583   :  { %9372 = vmatprep.subr.bf16.mxu1 %v10077_v2  ;;  %7391 = vmatprep.subr.bf16.mxu0 %v9780_v20 }
0x4584   :  { %v9943_v62 = vpop.eup %9942 }
0x4585   :  { %v7152_v29 = vmul.f32 %v9943_v62, %v9939_v3  ;;  %v7242_v63 = vpop.permute.xlu1 %7241  ;;  %v7313_v3 = vrot.slane %v11378_v51, %v10878_v48  ;;  %v9802_v62 = vld [vmem:[%s11579_s15 + $0x158] sm:$0xff]  }
0x4586   :  { %9373 = vmatpush3.bf16.msra.mxu1 %v7242_v63  ;;  %v9805_v63 = vld [vmem:[%s11579_s15 + $0x198] sm:$0xff]  }
0x4587   :  { %9368 = vmatmul.mubr.msk.f32.vlgmr.msra.gmra.mrb[114].mxu0 %vm2030_vm9, %v7152_v29  ;;  %7432 = vmatprep.subr.bf16.mxu1 %v9783_v61  ;;  %v9803_v29 = vld [vmem:[%s11579_s15 + $0x1d8] sm:$0xff]  }
0x4588   :  { %7423 = vmatprep.mubr.bf16.mxu0 %v10088_v53 }
0x45e7   :  { %v7056_v4 = vpop.f32.mrb[112].mxu0 }
0x45e8   :  { %v9355_v49 = vpop.f32.mrb[113].mxu0 }
0x45e9   :  { %v9807_v49 = vld [vmem:[%s11579_s15 + $0x1e0] sm:$0xff]  }
0x465a   :  { %v7229_v9 = vpop.f32.mrb[114].mxu0 }
0x465b   :  { %7234 = vrot.lane.b32.xlu0 %v7229_v9, %s10087_s11  ;;  %v9369_v54 = vpop.f32.mrb[115].mxu0  ;;  %v9808_v9 = vld [vmem:[%s11579_s15 + $0x120] sm:$0xff]  }
0x465c   :  { %v9809_v54 = vld [vmem:[%s11579_s15 + $0x1a0] sm:$0xff]  }
0x465f   :  { %7245 = vrot.lane.b32.xlu0 %v11368_v24, %s10081_s30 }
0x46cd   :  { %v7235_v13 = vpop.permute.xlu0 %7234 }
0x46ce   :  { %v7237_v10 = vsel %vm2483_vm3, %v7056_v4, %v7235_v13  ;;  %v9806_v4 = vld [vmem:[%s11579_s15 + $0x160] sm:$0xff]   ;;  %v9810_v13 = vld [vmem:[%s11579_s15 + $0x168] sm:$0xff]  }
0x46cf   :  { %v7238_v22 = vpack.c.bf16 %v7237_v10, %v7237_v10  ;;  %v9811_v10 = vld [vmem:[%s11579_s15 + $0x1e8] sm:$0xff]  }
0x46d1   :  { %9375 = vmatmul.mubr.msk.bf16.vlgmr.msra.gmra.mrb[116].mxu1 %vm296_vm2, %v7238_v22  ;;  %v7246_v27 = vpop.permute.xlu0 %7245  ;;  %v9812_v22 = vld [vmem:[%s11579_s15 + $0x128] sm:$0xff]  }
0x46d2   :  { %7464 = vmatprep.mubr.bf16.mxu1 %v10088_v53  ;;  %7433 = vmatpush1.bf16.msra.mxu1 %v9781_v34 }
0x46d3   :  { %7434 = vmatprep.subr.bf16.mxu1 %v9789_v25 }
0x46d6   :  { %7435 = vmatpush1.bf16.msra.mxu1 %v9787_v23 }
0x46d7   :  { %8890 = vmatprep.subr.bf16.mxu1 %v9791_v26 }
0x47a4   :  { %v7285_v59 = vpop.f32.mrb[116].mxu1 }
0x47a5   :  { %v7286_v36 = vadd.f32 %v7285_v59, %v7246_v27  ;;  %v9376_v15 = vpop.f32.mrb[117].mxu1  ;;  %v9813_v27 = vld [vmem:[%s11579_s15 + $0x1a8] sm:$0xff]   ;;  %v9814_v59 = vld [vmem:[%s11579_s15 + $0x170] sm:$0xff]  }
0x47a6   :  { %v7288_v33 = vpop.f32.mrb[118].mxu1  ;;  %v9816_v15 = vld [vmem:[%s11579_s15 + $0x130] sm:$0xff]  }
0x47a7   :  { %v7291_v50 = vadd.f32 %v7286_v36, %v11384_v47  ;;  %v9377_v24 = vpop.f32.mrb[119].mxu1  ;;  %v9778_v47 = vld [vmem:[%s11578_s5 + $0x40] ss:$16 sps:$4 sm:$0xff]  }
0x47a8   :  { %7392 = vmatpush1.bf16.msra.mxu0 %v9778_v47  ;;  %v9815_v36 = vld [vmem:[%s11579_s15 + $0x1f0] sm:$0xff]   ;;  %v9819_v24 = vld [vmem:[%s11579_s15 + $0x1f8] sm:$0xff]  }
0x47a9   :  { %v7292_v12 = vsel %vm1256_vm1, %v7291_v50, 0.0  ;;  %7393 = vmatprep.subr.bf16.mxu0 %v9786_v21  ;;  %v9817_v33 = vld [vmem:[%s11579_s15 + $0x1b0] sm:$0xff]  }
0x47aa   :  { %7293 = vadd.xlane.f32.xlu1 %v7292_v12  ;;  %v9820_v12 = vld [vmem:[%s11579_s15 + $0x138] sm:$0xff]  }
0x47ac   :  { %7394 = vmatpush1.bf16.msra.mxu0 %v9784_v19 }
0x47ad   :  { %8868 = vmatprep.subr.bf16.mxu0 %v9790_v35 }
0x4837   :  { %v7294_v18 = vpop.xlane.xlu1 %7293 }
0x4838   :  { %v7295_v53 = vmul.f32 0.03125, %v7294_v18  ;;  %v9821_v18 = vld [vmem:[%s11579_s15 + $0x1b8] sm:$0xff]  }
0x483a   :  { %v7296_v17 = vsub.f32 %v7291_v50, %v7295_v53  ;;  %v9818_v50 = vld [vmem:[%s11579_s15 + $0x178] sm:$0xff]   ;;  %v8433_v53 = vld [vmem:[%s11580_s16 + $0x4] sm:$0xf] }
0x483b   :  { %v7343_v20 = vrot.slane %v8433_v53, %v10878_v48 }
0x483c   :  { %v7297_v1 = vmul.f32 %v7296_v17, %v7296_v17 }
0x483e   :  { %v7298_v55 = vsel %vm1256_vm1, %v7297_v1, 0.0  ;;  %v7339_v1 = vrot.slane %v8433_v53, %v10874_v16 }
0x483f   :  { %7299 = vadd.xlane.f32.xlu0 %v7298_v55  ;;  %v7335_v55 = vrot.slane %v8433_v53, %v10647_v58 }
0x48cc   :  { %v7300_v11 = vpop.xlane.xlu0 %7299 }
0x48cd   :  { %v7301_v41 = vmul.f32 0.03125, %v7300_v11 }
0x48cf   :  { %v7302_v6 = vadd.f32 1e-05, %v7301_v41 }
0x48d1   :  { %9944 = vrsqrt.f32 %v7302_v6 }
0x48db   :  { %v9945_v31 = vpop.eup %9944 }
0x48dc   :  { %v7304_v57 = vmul.f32 %v9945_v31, %v7296_v17  ;;  %v7331_v17 = vrot.slane %v8433_v53, %v10363_v42 }
0x48de   :  { %v7309_v40 = vmul.f32 %v7308_v28, %v7304_v57 }
0x48e0   :  { %v11450_v45 = vadd.f32 %v7313_v3, %v7309_v40 }
0x48e2   :  { %v7324_v38 = vpack.c.bf16 %v11450_v45, %v11450_v45 }
0x48e4   :  { %8442 = vmatmul.mubr.msk.bf16.vlgmr.msra.gmra.mrb[116].mxu0 %vm296_vm2, %v7324_v38  ;;  %8443 = vmatmul.mubr.msk.bf16.vlgmr.msra.gmra.mrb[120].mxu1 %vm296_vm2, %v7324_v38 }
0x48e5   :  { %8869 = vmatpush3.bf16.msra.mxu0 %v9792_v44  ;;  %8891 = vmatpush3.bf16.msra.mxu1 %v9793_v37 }
0x48e6   :  { %8870 = vmatprep.subr.bf16.mxu0 %v9794_v43  ;;  %8892 = vmatprep.subr.bf16.mxu1 %v9795_v14  ;;  %v8509_v43 = vld [vmem:[%s11581_s18 + $0x1] ss:$0 sm:$0xff] }
0x48e9   :  { %8871 = vmatpush3.bf16.msra.mxu0 %v9796_v52  ;;  %8893 = vmatpush3.bf16.msra.mxu1 %v9797_v8 }
0x48ea   :  { %8872 = vmatprep.subr.bf16.mxu0 %v9798_v32  ;;  %8894 = vmatprep.subr.bf16.mxu1 %v9799_v56 }
0x48ed   :  { %8873 = vmatpush3.bf16.msra.mxu0 %v9800_v60  ;;  %8895 = vmatpush3.bf16.msra.mxu1 %v9801_v30 }
0x48ee   :  { %8874 = vmatprep.subr.bf16.mxu0 %v9802_v62  ;;  %8896 = vmatprep.subr.bf16.mxu1 %v9803_v29 }
0x48f1   :  { %8875 = vmatpush3.bf16.msra.mxu0 %v9804_v5  ;;  %8897 = vmatpush3.bf16.msra.mxu1 %v9805_v63 }
0x48f2   :  { %8876 = vmatprep.subr.bf16.mxu0 %v9806_v4  ;;  %8898 = vmatprep.subr.bf16.mxu1 %v9807_v49 }
0x48f5   :  { %8877 = vmatpush3.bf16.msra.mxu0 %v9808_v9  ;;  %8899 = vmatpush3.bf16.msra.mxu1 %v9809_v54 }
0x48f6   :  { %8878 = vmatprep.subr.bf16.mxu0 %v9810_v13  ;;  %8900 = vmatprep.subr.bf16.mxu1 %v9811_v10 }
0x48f9   :  { %8879 = vmatpush3.bf16.msra.mxu0 %v9812_v22  ;;  %8901 = vmatpush3.bf16.msra.mxu1 %v9813_v27 }
0x48fa   :  { %8880 = vmatprep.subr.bf16.mxu0 %v9814_v59  ;;  %8902 = vmatprep.subr.bf16.mxu1 %v9815_v36 }
0x48fd   :  { %8881 = vmatpush3.bf16.msra.mxu0 %v9816_v15  ;;  %8903 = vmatpush3.bf16.msra.mxu1 %v9817_v33  ;;  %v7848_v15 = vrot.slane %v11378_v51, %v6281_v7  ;;  %v7875_v7 = vld [vmem:[%s10273_s19 + $0x10] sm:$0xff] }
0x48fe   :  { %8882 = vmatprep.subr.bf16.mxu0 %v9818_v50  ;;  %8904 = vmatprep.subr.bf16.mxu1 %v9819_v24 }
0x4901   :  { %8883 = vmatpush3.bf16.msra.mxu0 %v9820_v12  ;;  %8905 = vmatpush3.bf16.msra.mxu1 %v9821_v18 }
0x4902   :  { %9479 = vmatprep.subr.bf16.mxu0 %v10082_v46 }
0x49b7   :  { %v7425_v61 = vpop.f32.mrb[116].mxu0  ;;  %v7466_v47 = vpop.f32.mrb[120].mxu1 }
0x49b8   :  { %v7426_v34 = vadd.f32 %v7425_v61, %v7331_v17  ;;  %v7467_v19 = vadd.f32 %v7466_v47, %v7339_v1  ;;  %v7427_v21 = vpop.f32.mrb[117].mxu0  ;;  %v7468_v23 = vpop.f32.mrb[121].mxu1  ;;  %v7873_v1 = vld [vmem:[%s10273_s19] sm:$0xff] }
0x49b9   :  { %v7428_v25 = vadd.f32 %v7427_v21, %v7335_v55  ;;  %v7469_v35 = vadd.f32 %v7468_v23, %v7343_v20  ;;  %v7429_v26 = vpop.f32.mrb[118].mxu0  ;;  %v7470_v11 = vpop.f32.mrb[122].mxu1  ;;  %v7874_v55 = vld [vmem:[%s10273_s19 + $0x8] sm:$0xff] }
0x49ba   :  { %v7473_v41 = vmax.f32 %v7426_v34, 0.0  ;;  %v7475_v6 = vmax.f32 %v7467_v19, 0.0  ;;  %v7430_v42 = vpop.f32.mrb[119].mxu0  ;;  %v7471_v28 = vpop.f32.mrb[123].mxu1  ;;  %v9480_v39 = vpack.c.bf16 %v7874_v55, %v7873_v1  ;;  %v9957_v19 = vld [vmem:[%s10268_s14] sm:$0xf] }
0x49bb   :  { %v7474_v31 = vmax.f32 %v7428_v25, 0.0  ;;  %v7476_v57 = vmax.f32 %v7469_v35, 0.0  ;;  %v7866_v21 = vrot.slane %v9957_v19, %v10874_v16  ;;  %v7871_v35 = vrot.slane %v9957_v19, %v10878_v48  ;;  %s10089_s14 = smov [#allocation11]  }
0x49bc   :  { %v7542_v40 = vpack.c.bf16 %v7473_v41, %v7473_v41  ;;  %v7544_v44 = vpack.c.bf16 %v7475_v6, %v7475_v6 }
0x49bd   :  { %v7543_v58 = vpack.c.bf16 %v7474_v31, %v7474_v31  ;;  %v7545_v3 = vpack.c.bf16 %v7476_v57, %v7476_v57 }
0x49bf   :  { %7778 = vmatprep.mubr.bf16.mxu0 %v7543_v58  ;;  %7818 = vmatprep.mubr.bf16.mxu1 %v7545_v3 }
0x49c0   :  { %7779 = vmatmul.mubr.bf16.vlgmr.msra.gmra.mrb[120].mxu0 %v7542_v40  ;;  %7819 = vmatmul.mubr.bf16.vlgmr.msra.gmra.mrb[124].mxu1 %v7544_v44 }
0x49c1   :  { %9386 = vmatprep.mubr.msk.f32.mxu0 %vm10078_vm0, %v10077_v2  ;;  %9481 = vmatpush3.bf16.msra.mxu0 %v9480_v39  ;;  %vm7957_vm0 = vcmask 0  }
0x49c2   :  { %9482 = vmatprep.subr.bf16.mxu0 %v10082_v46  ;;  %v7877_v46 = vld [vmem:[#allocation2] sm:$0x1] }
0x4a93   :  { %v8884_v37 = vpop.f32.mrb[120].mxu0  ;;  %v8906_v38 = vpop.f32.mrb[124].mxu1 }
0x4a94   :  { %v8885_v14 = vpop.f32.mrb[121].mxu0  ;;  %v8907_v52 = vpop.f32.mrb[125].mxu1 }
0x4a95   :  { %v8886_v8 = vadd.f32 %v8885_v14, %v8884_v37  ;;  %v8908_v32 = vadd.f32 %v8907_v52, %v8906_v38  ;;  %v8887_v56 = vpop.f32.mrb[122].mxu0  ;;  %v8909_v60 = vpop.f32.mrb[126].mxu1 }
0x4a96   :  { %v8888_v30 = vpop.f32.mrb[123].mxu0  ;;  %v8910_v62 = vpop.f32.mrb[127].mxu1 }
0x4a97   :  { %v7781_v29 = vadd.f32 %v8886_v8, %v8509_v43 }
0x4a99   :  { %v7821_v5 = vadd.f32 %v8908_v32, %v7781_v29 }
0x4a9b   :  { %v7826_v63 = vadd.f32 %v7821_v5, %v11450_v45  ;;  %v7843_v45 = vrot.slane %v11378_v51, %v6276_v0  ;;  %v7876_v51 = vld [vmem:[%s10273_s19 + $0x18] sm:$0xff]  ;;  %s7965_s19 = sshll.u32 %s10089_s14, 4  ;;  %s7966_s19 = int_to_ptr.vmem [resolvable:$true] %s7965_s19 }
0x4a9c   :  { %v9483_v20 = vpack.c.bf16 %v7876_v51, %v7875_v7  ;;  %s10006_s17 = scalar_lea.vmem %s7966_s19, 16  ;;  %s10010_s21 = scalar_lea.vmem %s7966_s19, 32 }
0x4a9d   :  { %v7827_v4 = vsel %vm1256_vm1, %v7826_v63, 0.0  ;;  %p10007_p6 = scmp.ne.s32.totalorder %s7966_s19, %s10006_s17  ;;  %p10011_p7 = scmp.lt.s32.totalorder %s7966_s19, %s7966_s19 }
0x4a9e   :  { %7828 = vadd.xlane.f32.xlu0 %v7827_v4  ;;  %9484 = vmatpush3.bf16.msra.mxu0 %v9483_v20  ;;  %p10012_p8 = scmp.lt.s32.totalorder %s10010_s21, %s10006_s17 }
0x4aa0   :  { %p10013_p9 = por %p10012_p8, %p10011_p7 }
0x4aa2   :  { %p10014_p10 = pnand %p10013_p9, %p10007_p6 }
0x4b2b   :  { %v7829_v49 = vpop.xlane.xlu0 %7828 }
0x4b2c   :  { %v7830_v2 = vmul.f32 0.03125, %v7829_v49 }
0x4b2e   :  { %v7831_v9 = vsub.f32 %v7826_v63, %v7830_v2 }
0x4b30   :  { %v7832_v54 = vmul.f32 %v7831_v9, %v7831_v9 }
0x4b32   :  { %v7833_v13 = vsel %vm1256_vm1, %v7832_v54, 0.0 }
0x4b33   :  { %7834 = vadd.xlane.f32.xlu1 %v7833_v13 }
0x4bc0   :  { %v7835_v10 = vpop.xlane.xlu1 %7834 }
0x4bc1   :  { %v7836_v22 = vmul.f32 0.03125, %v7835_v10 }
0x4bc3   :  { %v7837_v27 = vadd.f32 1e-05, %v7836_v22 }
0x4bc5   :  { %9946 = vrsqrt.f32 %v7837_v27 }
0x4bcf   :  { %v9947_v59 = vpop.eup %9946 }
0x4bd0   :  { %v7839_v36 = vmul.f32 %v9947_v59, %v7831_v9 }
0x4bd2   :  { %v7844_v33 = vmul.f32 %v7843_v45, %v7839_v36 }
0x4bd4   :  { %v7849_v50 = vadd.f32 %v7848_v15, %v7844_v33 }
0x4bd6   :  { %v7850_v24 = vsel %vm1256_vm1, %v7849_v50, 0.0 }
0x4bd7   :  { %7851 = vadd.xlane.f32.xlu0 %v7850_v24 }
0x4c64   :  { %v7852_v12 = vpop.xlane.xlu0 %7851 }
0x4c65   :  { %v7853_v18 = vmul.f32 0.03125, %v7852_v12 }
0x4c67   :  { %v7854_v53 = vsub.f32 %v7849_v50, %v7853_v18 }
0x4c69   :  { %v7855_v17 = vmul.f32 %v7854_v53, %v7854_v53 }
0x4c6b   :  { %v7856_v0 = vsel %vm1256_vm1, %v7855_v17, 0.0 }
0x4c6c   :  { %7857 = vadd.xlane.f32.xlu1 %v7856_v0 }
0x4cf9   :  { %v7858_v61 = vpop.xlane.xlu1 %7857 }
0x4cfa   :  { %v7859_v47 = vmul.f32 0.03125, %v7858_v61 }
0x4cfc   :  { %v7860_v34 = vadd.f32 1e-05, %v7859_v47 }
0x4cfe   :  { %9948 = vrsqrt.f32 %v7860_v34 }
0x4d08   :  { %v9949_v23 = vpop.eup %9948 }
0x4d09   :  { %v7862_v25 = vmul.f32 %v9949_v23, %v7854_v53 }
0x4d0b   :  { %v7867_v26 = vmul.f32 %v7866_v21, %v7862_v25 }
0x4d0d   :  { %v7872_v11 = vadd.f32 %v7871_v35, %v7867_v26 }
0x4d0f   :  { %9387 = vmatmul.mubr.msk.f32.vlgmr.msra.gmra.mrb[124].mxu0 %vm296_vm2, %v7872_v11 }
0x4de2   :  { %v7947_v41 = vpop.f32.mrb[124].mxu0 }
0x4de3   :  { %v7948_v6 = vadd.f32 %v7947_v41, %v7877_v46  ;;  %v9388_v42 = vpop.f32.mrb[125].mxu0 }
0x4de5   :  { %v7951_v28 = vsub.f32 0.0, %v7948_v6 }
0x4de7   :  { %v7952_v31 = vmul.f32 1.442695, %v7951_v28 }
0x4de9   :  { %9950 = vpow2.f32 %v7952_v31 }
0x4df3   :  { %v9951_v57 = vpop.eup %9950 }
0x4df4   :  { %v7954_v58 = vadd.f32 1.0, %v9951_v57 }
0x4df6   :  { %9952 = vrcp.f32 %v7954_v58 }
0x4e00   :  { %v9953_v16 = vpop.eup %9952 }
0x4e01   :  { %7958 = vst.msk [vmem:[#allocation11] sm:$0x1] %vm7957_vm0, %v9953_v16 }
0x4e02   :  { %10017 = shalt.err (!%p10014_p10)
}
0x4e03   :  { %s10018_s30 = scalar_lea.hbm %s10281_s4, 16 }
0x4e04   :  { %p10019_p11 = scmp.ne.s32.totalorder %s10281_s4, %s10018_s30  ;;  %p10022_p12 = scmp.lt.u32.totalorder %s10018_s30, %s10281_s4 }
0x4e06   :  { %p10024_p13 = pnand %p10022_p12, %p10019_p11 }
0x4e08   :  { %10027 = shalt.err (!%p10024_p13)
}
0x4e09   :  { %7968 = dma.vmem_to_hbm [thread:$0]  %s7966_s19, 16, %s10281_s4, [#allocation4]  }
0x4e0a   :  { %10034 = dma.done.wait [#allocation4], 16  }
0x4e0b   :  { %10035 = vsyncadd [#allocation4], 4294967280 }
0x4e0c   :  { %7972 = vsyncpa [#allocation4], 1 }
0x4e0d   :  { %7973 = vsyncpa [#allocation5], 1 }
0x4e0e   :  { %7974 = vsyncpa [#allocation7], 1 }
0x4e0f   :  { %7975 = vsyncpa [#allocation10], 1 }

</bundles_post_ra>
